<compile_context>
chip_gen: v6e
topology: v6e:2x2x1
jax: 0.10.0
libtpu: 0.0.40
codegen_flags: <defaults>
</compile_context>

<pallas_src>
import functools

import jax
import jax.numpy as jnp
import numpy as np
from jax import lax
from jax.experimental import pallas as pl
from jax.experimental.pallas import tpu as pltpu


def _round_up(x, m):
    return (x + m - 1) // m * m


def _pick_batch_tile(n, per_elem_bytes, budget_bytes=8 << 20):
    """Largest divisor of n whose double-buffered tile fits the VMEM budget
    (conservative for v7x's 32 MiB scoped / 64 MiB physical VMEM), preferring
    an even grid length so v7x's two TensorCores split steps evenly."""
    divs = [d for d in range(1, n + 1) if n % d == 0]
    ok = [d for d in divs if 2 * d * per_elem_bytes <= budget_bytes] or [1]
    best = max(ok)
    if best < n and (n // best) % 2 == 1:
        even = [d for d in ok if (n // d) % 2 == 0]
        if even:
            best = max(even)
    return best


def _conv_bias_relu_kernel(x_ref, w_ref, b_ref, o_ref, *, KH, KW, Ho, Wo):
    # x_ref: (B_sub, Hp, Wp, Cin)   padded NHWC input tile (bf16)
    # w_ref: (KH*KW, Cin, Cout)     per-tap weights (bf16)
    # b_ref: (1, Cout)              bias (f32)
    # o_ref: (B_sub*Ho*Wo, Cout)    output tile (f32) — no channel padding
    Bs = x_ref.shape[0]
    Cin = x_ref.shape[-1]
    Cout = o_ref.shape[-1]
    rows = Bs * Ho * Wo

    # f32 accumulator initialized from the bias (epilogue stays f32 on v5e too).
    acc = jnp.broadcast_to(b_ref[...], (rows, Cout))
    # In-kernel im2col: 9 static tap slices -> 9 tiny MXU dots (MXU has slack).
    for kh in range(KH):
        for kw in range(KW):
            patch = x_ref[:, kh:kh + Ho, kw:kw + Wo, :].reshape(rows, Cin)
            acc = acc + jnp.dot(patch, w_ref[kh * KW + kw],
                                preferred_element_type=jnp.float32)
    o_ref[...] = jnp.maximum(acc, 0.0).astype(o_ref.dtype)


@functools.partial(jax.jit, static_argnames=("padding",))
def rpc_forward(x_nchw, w_oihw, b, *, padding=1):
    """Semantics of RemoteBaseCPURPC.forward -> underlying(x) with
    underlying = Conv2d(Cin, Cout, KHxKW, padding=padding, stride=1) + ReLU.
    Input/output are NCHW (PyTorch convention)."""
    N, Cin, H, W = x_nchw.shape
    Cout, _, KH, KW = w_oihw.shape
    Ho = H + 2 * padding - KH + 1            # stride=1, dilation=1
    Wo = W + 2 * padding - KW + 1
    Hp, Wp = H + 2 * padding, W + 2 * padding

    # ---- tiny layout plumbing (fused by XLA; all FLOPs live in the kernel) --
    x_nhwc = jnp.transpose(x_nchw, (0, 2, 3, 1)).astype(jnp.bfloat16)
    x_pad = jnp.pad(x_nhwc,
                    ((0, 0), (padding, padding), (padding, padding), (0, 0)))
    # OIHW -> (KH*KW, Cin, Cout) per-tap matrices, bf16 inputs / f32 accum.
    w_taps = jnp.transpose(w_oihw, (2, 3, 1, 0)).reshape(KH * KW, Cin, Cout)
    w_taps = w_taps.astype(jnp.bfloat16)
    b_row = b.astype(jnp.float32).reshape(1, Cout)

    # Batch tile selection (VMEM-padded footprint estimate per batch element).
    in_bytes = Hp * _round_up(Wp, 8) * 128 * 2                 # bf16 x tile
    out_bytes = Ho * Wo * max(_round_up(Cout, 128), 128) * 4   # f32 out tile
    B_sub = _pick_batch_tile(N, in_bytes + out_bytes)
    if (B_sub * Ho * Wo) % 8 != 0:
        B_sub = N   # full-row block always satisfies the (8,128) block rule
    rows_tile = B_sub * Ho * Wo

    kernel = functools.partial(_conv_bias_relu_kernel,
                               KH=KH, KW=KW, Ho=Ho, Wo=Wo)
    out = pl.pallas_call(
        kernel,
        out_shape=jax.ShapeDtypeStruct((N * Ho * Wo, Cout), jnp.float32),
        grid_spec=pltpu.PrefetchScalarGridSpec(
            num_scalar_prefetch=0,
            grid=(N // B_sub,),
            in_specs=[
                pl.BlockSpec((B_sub, Hp, Wp, Cin), lambda i: (i, 0, 0, 0)),
                pl.BlockSpec((KH * KW, Cin, Cout), lambda i: (0, 0, 0)),
                pl.BlockSpec((1, Cout), lambda i: (0, 0)),
            ],
            out_specs=pl.BlockSpec((rows_tile, Cout), lambda i: (i, 0)),
        ),
        compiler_params=pltpu.CompilerParams(
            dimension_semantics=("parallel",)),
    )(x_pad, w_taps, b_row)

    # NCHW only at the true module boundary (forward returns the tensor to CPU
    # in the RPC spec); this touches just the real Cout channels (16 KiB here).
    out = out.reshape(N, Ho, Wo, Cout)
    return jnp.transpose(out, (0, 3, 1, 2))


def _reference(x, w, b, *, padding=1):
    out = lax.conv_general_dilated(
        x, w, window_strides=(1, 1),
        padding=((padding, padding), (padding, padding)),
        dimension_numbers=("NCHW", "OIHW", "NCHW"),
        preferred_element_type=jnp.float32)
    return jnp.maximum(out + b.reshape(1, -1, 1, 1), 0.0)


if __name__ == "__main__":
    # Small MNIST-like shapes: batch=2, in-channels=4, spatial=16x16,
    # conv 4->8 channels, 3x3, padding=1.
    key = jax.random.PRNGKey(0)
    kx, kw, kb = jax.random.split(key, 3)

    N, Cin, H, W = 2, 4, 16, 16
    Cout, KH, KW = 8, 3, 3

    x = jax.random.normal(kx, (N, Cin, H, W), dtype=jnp.float32)
    fan_in = Cin * KH * KW
    bound = 1.0 / np.sqrt(fan_in)
    w = jax.random.uniform(kw, (Cout, Cin, KH, KW), jnp.float32, -bound, bound)
    b = jax.random.uniform(kb, (Cout,), jnp.float32, -bound, bound)

    out = jax.block_until_ready(rpc_forward(x, w, b, padding=1))
    assert out.shape == (N, Cout, H, W), out.shape

    # (1) bit-comparable reference: same bf16-input / f32-accumulate contraction.
    ref_bf16 = _reference(x.astype(jnp.bfloat16), w.astype(jnp.bfloat16), b,
                          padding=1)
    assert np.allclose(np.asarray(out), np.asarray(ref_bf16),
                       atol=1e-3, rtol=1e-3)

    # (2) accuracy sanity check vs the f32 conv (bf16 input rounding only).
    ref_f32 = _reference(x, w, b, padding=1)
    assert np.allclose(np.asarray(out), np.asarray(ref_f32),
                       atol=5e-2, rtol=5e-2)

    print("KERNEL_OK")
</pallas_src>

<mosaic_0001>
module attributes {stable_mosaic.version = 11 : i64} {
  func.func @_conv_bias_relu_kernel(%arg0: i32, %arg1: memref<2x18x18x4xbf16, #tpu.memory_space<vmem>>, %arg2: memref<9x4x8xbf16, #tpu.memory_space<vmem>>, %arg3: memref<1x8xf32, #tpu.memory_space<vmem>>, %arg4: memref<512x8xf32, #tpu.memory_space<vmem>>) attributes {dimension_semantics = [#tpu.dimension_semantics<parallel>], iteration_bounds = array<i64: 1>, scalar_prefetch = 0 : i64, scratch_operands = 0 : i64, tpu.core_type = #tpu.core_type<tc>, window_params = [{transform_indices = @transform_0, window_bounds = array<i64: 2, 18, 18, 4>}, {pipeline_mode = #tpu.pipeline_mode<synchronous>, transform_indices = @transform_1, window_bounds = array<i64: 9, 4, 8>}, {pipeline_mode = #tpu.pipeline_mode<synchronous>, transform_indices = @transform_2, window_bounds = array<i64: 1, 8>}, {transform_indices = @transform_3, window_bounds = array<i64: 512, 8>}]} {
    %c0 = arith.constant 0 : index
    %c0_0 = arith.constant 0 : index
    %0 = vector.load %arg3[%c0, %c0_0] : memref<1x8xf32, #tpu.memory_space<vmem>>, vector<1x8xf32>
    %1 = vector.shape_cast %0 : vector<1x8xf32> to vector<1x8xf32>
    %2 = vector.broadcast %1 : vector<1x8xf32> to vector<512x8xf32>
    %c0_1 = arith.constant 0 : index
    %c0_2 = arith.constant 0 : index
    %c0_3 = arith.constant 0 : index
    %c0_4 = arith.constant 0 : index
    %3 = vector.load %arg1[%c0_1, %c0_2, %c0_3, %c0_4] : memref<2x18x18x4xbf16, #tpu.memory_space<vmem>>, vector<2x16x16x4xbf16>
    %4 = vector.shape_cast %3 : vector<2x16x16x4xbf16> to vector<512x4xbf16>
    %c0_5 = arith.constant 0 : index
    %c0_6 = arith.constant 0 : index
    %c0_7 = arith.constant 0 : index
    %5 = vector.load %arg2[%c0_5, %c0_6, %c0_7] : memref<9x4x8xbf16, #tpu.memory_space<vmem>>, vector<1x4x8xbf16>
    %6 = vector.shape_cast %5 : vector<1x4x8xbf16> to vector<4x8xbf16>
    %cst = arith.constant dense<0.000000e+00> : vector<512x8xf32>
    %7 = tpu.matmul %4, %6, %cst {dimension_numbers = #tpu.dot_dimension_numbers<[1], [0], [0], [1], [0, 0, 1, 1], [], []>} : vector<512x4xbf16>, vector<4x8xbf16>, vector<512x8xf32> -> vector<512x8xf32>
    %8 = arith.addf %2, %7 : vector<512x8xf32>
    %c0_8 = arith.constant 0 : index
    %c0_9 = arith.constant 0 : index
    %c1 = arith.constant 1 : index
    %c0_10 = arith.constant 0 : index
    %9 = vector.load %arg1[%c0_8, %c0_9, %c1, %c0_10] : memref<2x18x18x4xbf16, #tpu.memory_space<vmem>>, vector<2x16x16x4xbf16>
    %10 = vector.shape_cast %9 : vector<2x16x16x4xbf16> to vector<512x4xbf16>
    %c1_11 = arith.constant 1 : index
    %c0_12 = arith.constant 0 : index
    %c0_13 = arith.constant 0 : index
    %11 = vector.load %arg2[%c1_11, %c0_12, %c0_13] : memref<9x4x8xbf16, #tpu.memory_space<vmem>>, vector<1x4x8xbf16>
    %12 = vector.shape_cast %11 : vector<1x4x8xbf16> to vector<4x8xbf16>
    %cst_14 = arith.constant dense<0.000000e+00> : vector<512x8xf32>
    %13 = tpu.matmul %10, %12, %cst_14 {dimension_numbers = #tpu.dot_dimension_numbers<[1], [0], [0], [1], [0, 0, 1, 1], [], []>} : vector<512x4xbf16>, vector<4x8xbf16>, vector<512x8xf32> -> vector<512x8xf32>
    %14 = arith.addf %8, %13 : vector<512x8xf32>
    %c0_15 = arith.constant 0 : index
    %c0_16 = arith.constant 0 : index
    %c2 = arith.constant 2 : index
    %c0_17 = arith.constant 0 : index
    %15 = vector.load %arg1[%c0_15, %c0_16, %c2, %c0_17] : memref<2x18x18x4xbf16, #tpu.memory_space<vmem>>, vector<2x16x16x4xbf16>
    %16 = vector.shape_cast %15 : vector<2x16x16x4xbf16> to vector<512x4xbf16>
    %c2_18 = arith.constant 2 : index
    %c0_19 = arith.constant 0 : index
    %c0_20 = arith.constant 0 : index
    %17 = vector.load %arg2[%c2_18, %c0_19, %c0_20] : memref<9x4x8xbf16, #tpu.memory_space<vmem>>, vector<1x4x8xbf16>
    %18 = vector.shape_cast %17 : vector<1x4x8xbf16> to vector<4x8xbf16>
    %cst_21 = arith.constant dense<0.000000e+00> : vector<512x8xf32>
    %19 = tpu.matmul %16, %18, %cst_21 {dimension_numbers = #tpu.dot_dimension_numbers<[1], [0], [0], [1], [0, 0, 1, 1], [], []>} : vector<512x4xbf16>, vector<4x8xbf16>, vector<512x8xf32> -> vector<512x8xf32>
    %20 = arith.addf %14, %19 : vector<512x8xf32>
    %c0_22 = arith.constant 0 : index
    %c1_23 = arith.constant 1 : index
    %c0_24 = arith.constant 0 : index
    %c0_25 = arith.constant 0 : index
    %21 = vector.load %arg1[%c0_22, %c1_23, %c0_24, %c0_25] : memref<2x18x18x4xbf16, #tpu.memory_space<vmem>>, vector<2x16x16x4xbf16>
    %22 = vector.shape_cast %21 : vector<2x16x16x4xbf16> to vector<512x4xbf16>
    %c3 = arith.constant 3 : index
    %c0_26 = arith.constant 0 : index
    %c0_27 = arith.constant 0 : index
    %23 = vector.load %arg2[%c3, %c0_26, %c0_27] : memref<9x4x8xbf16, #tpu.memory_space<vmem>>, vector<1x4x8xbf16>
    %24 = vector.shape_cast %23 : vector<1x4x8xbf16> to vector<4x8xbf16>
    %cst_28 = arith.constant dense<0.000000e+00> : vector<512x8xf32>
    %25 = tpu.matmul %22, %24, %cst_28 {dimension_numbers = #tpu.dot_dimension_numbers<[1], [0], [0], [1], [0, 0, 1, 1], [], []>} : vector<512x4xbf16>, vector<4x8xbf16>, vector<512x8xf32> -> vector<512x8xf32>
    %26 = arith.addf %20, %25 : vector<512x8xf32>
    %c0_29 = arith.constant 0 : index
    %c1_30 = arith.constant 1 : index
    %c1_31 = arith.constant 1 : index
    %c0_32 = arith.constant 0 : index
    %27 = vector.load %arg1[%c0_29, %c1_30, %c1_31, %c0_32] : memref<2x18x18x4xbf16, #tpu.memory_space<vmem>>, vector<2x16x16x4xbf16>
    %28 = vector.shape_cast %27 : vector<2x16x16x4xbf16> to vector<512x4xbf16>
    %c4 = arith.constant 4 : index
    %c0_33 = arith.constant 0 : index
    %c0_34 = arith.constant 0 : index
    %29 = vector.load %arg2[%c4, %c0_33, %c0_34] : memref<9x4x8xbf16, #tpu.memory_space<vmem>>, vector<1x4x8xbf16>
    %30 = vector.shape_cast %29 : vector<1x4x8xbf16> to vector<4x8xbf16>
    %cst_35 = arith.constant dense<0.000000e+00> : vector<512x8xf32>
    %31 = tpu.matmul %28, %30, %cst_35 {dimension_numbers = #tpu.dot_dimension_numbers<[1], [0], [0], [1], [0, 0, 1, 1], [], []>} : vector<512x4xbf16>, vector<4x8xbf16>, vector<512x8xf32> -> vector<512x8xf32>
    %32 = arith.addf %26, %31 : vector<512x8xf32>
    %c0_36 = arith.constant 0 : index
    %c1_37 = arith.constant 1 : index
    %c2_38 = arith.constant 2 : index
    %c0_39 = arith.constant 0 : index
    %33 = vector.load %arg1[%c0_36, %c1_37, %c2_38, %c0_39] : memref<2x18x18x4xbf16, #tpu.memory_space<vmem>>, vector<2x16x16x4xbf16>
    %34 = vector.shape_cast %33 : vector<2x16x16x4xbf16> to vector<512x4xbf16>
    %c5 = arith.constant 5 : index
    %c0_40 = arith.constant 0 : index
    %c0_41 = arith.constant 0 : index
    %35 = vector.load %arg2[%c5, %c0_40, %c0_41] : memref<9x4x8xbf16, #tpu.memory_space<vmem>>, vector<1x4x8xbf16>
    %36 = vector.shape_cast %35 : vector<1x4x8xbf16> to vector<4x8xbf16>
    %cst_42 = arith.constant dense<0.000000e+00> : vector<512x8xf32>
    %37 = tpu.matmul %34, %36, %cst_42 {dimension_numbers = #tpu.dot_dimension_numbers<[1], [0], [0], [1], [0, 0, 1, 1], [], []>} : vector<512x4xbf16>, vector<4x8xbf16>, vector<512x8xf32> -> vector<512x8xf32>
    %38 = arith.addf %32, %37 : vector<512x8xf32>
    %c0_43 = arith.constant 0 : index
    %c2_44 = arith.constant 2 : index
    %c0_45 = arith.constant 0 : index
    %c0_46 = arith.constant 0 : index
    %39 = vector.load %arg1[%c0_43, %c2_44, %c0_45, %c0_46] : memref<2x18x18x4xbf16, #tpu.memory_space<vmem>>, vector<2x16x16x4xbf16>
    %40 = vector.shape_cast %39 : vector<2x16x16x4xbf16> to vector<512x4xbf16>
    %c6 = arith.constant 6 : index
    %c0_47 = arith.constant 0 : index
    %c0_48 = arith.constant 0 : index
    %41 = vector.load %arg2[%c6, %c0_47, %c0_48] : memref<9x4x8xbf16, #tpu.memory_space<vmem>>, vector<1x4x8xbf16>
    %42 = vector.shape_cast %41 : vector<1x4x8xbf16> to vector<4x8xbf16>
    %cst_49 = arith.constant dense<0.000000e+00> : vector<512x8xf32>
    %43 = tpu.matmul %40, %42, %cst_49 {dimension_numbers = #tpu.dot_dimension_numbers<[1], [0], [0], [1], [0, 0, 1, 1], [], []>} : vector<512x4xbf16>, vector<4x8xbf16>, vector<512x8xf32> -> vector<512x8xf32>
    %44 = arith.addf %38, %43 : vector<512x8xf32>
    %c0_50 = arith.constant 0 : index
    %c2_51 = arith.constant 2 : index
    %c1_52 = arith.constant 1 : index
    %c0_53 = arith.constant 0 : index
    %45 = vector.load %arg1[%c0_50, %c2_51, %c1_52, %c0_53] : memref<2x18x18x4xbf16, #tpu.memory_space<vmem>>, vector<2x16x16x4xbf16>
    %46 = vector.shape_cast %45 : vector<2x16x16x4xbf16> to vector<512x4xbf16>
    %c7 = arith.constant 7 : index
    %c0_54 = arith.constant 0 : index
    %c0_55 = arith.constant 0 : index
    %47 = vector.load %arg2[%c7, %c0_54, %c0_55] : memref<9x4x8xbf16, #tpu.memory_space<vmem>>, vector<1x4x8xbf16>
    %48 = vector.shape_cast %47 : vector<1x4x8xbf16> to vector<4x8xbf16>
    %cst_56 = arith.constant dense<0.000000e+00> : vector<512x8xf32>
    %49 = tpu.matmul %46, %48, %cst_56 {dimension_numbers = #tpu.dot_dimension_numbers<[1], [0], [0], [1], [0, 0, 1, 1], [], []>} : vector<512x4xbf16>, vector<4x8xbf16>, vector<512x8xf32> -> vector<512x8xf32>
    %50 = arith.addf %44, %49 : vector<512x8xf32>
    %c0_57 = arith.constant 0 : index
    %c2_58 = arith.constant 2 : index
    %c2_59 = arith.constant 2 : index
    %c0_60 = arith.constant 0 : index
    %51 = vector.load %arg1[%c0_57, %c2_58, %c2_59, %c0_60] : memref<2x18x18x4xbf16, #tpu.memory_space<vmem>>, vector<2x16x16x4xbf16>
    %52 = vector.shape_cast %51 : vector<2x16x16x4xbf16> to vector<512x4xbf16>
    %c8 = arith.constant 8 : index
    %c0_61 = arith.constant 0 : index
    %c0_62 = arith.constant 0 : index
    %53 = vector.load %arg2[%c8, %c0_61, %c0_62] : memref<9x4x8xbf16, #tpu.memory_space<vmem>>, vector<1x4x8xbf16>
    %54 = vector.shape_cast %53 : vector<1x4x8xbf16> to vector<4x8xbf16>
    %cst_63 = arith.constant dense<0.000000e+00> : vector<512x8xf32>
    %55 = tpu.matmul %52, %54, %cst_63 {dimension_numbers = #tpu.dot_dimension_numbers<[1], [0], [0], [1], [0, 0, 1, 1], [], []>} : vector<512x4xbf16>, vector<4x8xbf16>, vector<512x8xf32> -> vector<512x8xf32>
    %56 = arith.addf %50, %55 : vector<512x8xf32>
    %cst_64 = arith.constant 0.000000e+00 : f32
    %57 = vector.broadcast %cst_64 : f32 to vector<512x8xf32>
    %58 = arith.maximumf %56, %57 : vector<512x8xf32>
    %c0_65 = arith.constant 0 : index
    %c0_66 = arith.constant 0 : index
    %59 = vector.load %arg4[%c0_65, %c0_66] : memref<512x8xf32, #tpu.memory_space<vmem>>, vector<512x8xf32>
    tpu.vector_store %arg4[%c0_65, %c0_66], %58 {strides = array<i32>} : memref<512x8xf32, #tpu.memory_space<vmem>>, vector<512x8xf32>,
    return
  }
  func.func @transform_0(%arg0: i32) -> (i32, i32, i32, i32) {
    %c0_i32 = arith.constant 0 : i32
    %c0_i32_0 = arith.constant 0 : i32
    %c0_i32_1 = arith.constant 0 : i32
    %c0_i32_2 = arith.constant 0 : i32
    return %arg0, %c0_i32, %c0_i32_0, %c0_i32_1 : i32, i32, i32, i32
  }
  func.func @transform_1(%arg0: i32) -> (i32, i32, i32) {
    %c0_i32 = arith.constant 0 : i32
    %c0_i32_0 = arith.constant 0 : i32
    %c0_i32_1 = arith.constant 0 : i32
    %c0_i32_2 = arith.constant 0 : i32
    return %c0_i32, %c0_i32_0, %c0_i32_1 : i32, i32, i32
  }
  func.func @transform_2(%arg0: i32) -> (i32, i32) {
    %c0_i32 = arith.constant 0 : i32
    %c0_i32_0 = arith.constant 0 : i32
    %c0_i32_1 = arith.constant 0 : i32
    return %c0_i32, %c0_i32_0 : i32, i32
  }
  func.func @transform_3(%arg0: i32) -> (i32, i32) {
    %c0_i32 = arith.constant 0 : i32
    %c0_i32_0 = arith.constant 0 : i32
    return %arg0, %c0_i32 : i32, i32
  }
}

</mosaic_0001>

<bundles_post_ra>
// kernel: rpc_forward.1
= control target key start
LH: loop header
LB: loop body
LE: loop exit
PB: predicated region body
PF: predicated region fallthrough
CT: control target
= control target key end

     0   :  { %vm344_vm0 = vcmask 1041408   ;;  %vm247_vm1 = vcmask 31744   ;;  %vm797_vm2 = vsmask.f32 3328  ;;  %vm798_vm3 = vsmask.f32 7440  ;;  %s16688_s1 = inlined_call_operand.vmem [shape: bf16[9,4,8], index: 1, kind: input, shape index: {}]   ;;  %s16689_s0 = inlined_call_operand.vmem [shape: bf16[2,18,18,4], index: 0, kind: input, shape index: {}]   ;;  %s16690_s2 = inlined_call_operand.vmem [shape: f32[1,8], index: 2, kind: input, shape index: {}]   ;;  %s16691_s3 = inlined_call_operand.vmem [shape: f32[512,8], index: 3, kind: output, shape index: {}]  }
   0x1   :  { %v86_v0 = vld [vmem:[%s16688_s1] sm:$0x3]  ;;  %v11115_v3 = vld [vmem:[%s16689_s0 + $0xd8] sm:$0xff]   ;;  %v11116_v4 = vld [vmem:[%s16689_s0 + $0xc] sm:$0xff]   ;;  %vm2246_vm4 = vcmask 1042432   ;;  %vm2247_vm5 = vcmask 1046532  }
   0x2   :  { %11104 = vmatprep.subr.msk.bf16.mxu0 %vm344_vm0, %v86_v0  ;;  %11105 = vmatprep.subr.msk.bf16.mxu1 %vm344_vm0, %v86_v0  ;;  %v346_v1 = vsel %vm344_vm0, %v86_v0, 0  ;;  %v11114_v2 = vld [vmem:[%s16689_s0] sm:$0xff]   ;;  %v11118_v10 = vld [vmem:[%s16689_s0 + $0x18] sm:$0xff]   ;;  %v11119_v11 = vld [vmem:[%s16689_s0 + $0xf0] sm:$0xff]   ;;  %v16700_v43 = vmov 0  ;;  %vm9077_vm8 = vcmask 64512  }
   0x3   :  { %10509 = vmatpush3.bf16.msra.mxu0 %v346_v1  ;;  %11103 = vmatpush3.bf16.msra.mxu1 %v346_v1  ;;  %v11117_v5 = vld [vmem:[%s16689_s0 + $0xe4] sm:$0xff]   ;;  %v9211_v6 = vld [vmem:[%s16688_s1 + $0x2] sm:$0x3]  ;;  %v11122_v14 = vld [vmem:[%s16689_s0 + $0x30] sm:$0xff]  }
   0x4   :  { %10510 = vmatprep.mubr.msk.bf16.mxu0 %vm247_vm1, %v11114_v2  ;;  %10542 = vmatprep.mubr.msk.bf16.mxu1 %vm247_vm1, %v11115_v3  ;;  %v9308_v7 = vld [vmem:[%s16688_s1 + $0x4] sm:$0x3]  ;;  %v1763_v8 = vsel %vm344_vm0, %v9211_v6, 0  ;;  %v11121_v13 = vld [vmem:[%s16689_s0 + $0xfc] sm:$0xff]   ;;  %v11123_v15 = vld [vmem:[%s16689_s0 + $0x108] sm:$0xff]  }
   0x5   :  { %11106 = vmatprep.subr.msk.bf16.mxu1 %vm344_vm0, %v9211_v6  ;;  %v2668_v9 = vsel %vm344_vm0, %v9308_v7, 0  ;;  %11107 = vmatprep.subr.msk.bf16.mxu0 %vm344_vm0, %v9308_v7  ;;  %v11120_v12 = vld [vmem:[%s16689_s0 + $0x24] sm:$0xff]   ;;  %v11124_v16 = vld [vmem:[%s16689_s0 + $0x3c] sm:$0xff]   ;;  %v11125_v17 = vld [vmem:[%s16689_s0 + $0x114] sm:$0xff]  }
   0x6   :  { %10511 = vmatmul.mubr.msk.bf16.vlgmr.msra.gmra.mxu0 %vm247_vm1, %v11116_v4  ;;  %10543 = vmatmul.mubr.msk.bf16.vlgmr.msra.gmra.mxu1 %vm247_vm1, %v11117_v5  ;;  %v11126_v18 = vld [vmem:[%s16689_s0 + $0x48] sm:$0xff]   ;;  %v11127_v19 = vld [vmem:[%s16689_s0 + $0x120] sm:$0xff]   ;;  %v11128_v20 = vld [vmem:[%s16689_s0 + $0x54] sm:$0xff]  }
   0x7   :  { %10575 = vmatpush3.bf16.msra.mxu1 %v1763_v8  ;;  %10641 = vmatpush3.bf16.msra.mxu0 %v2668_v9  ;;  %v11129_v21 = vld [vmem:[%s16689_s0 + $0x12c] sm:$0xff]   ;;  %v11130_v22 = vld [vmem:[%s16689_s0 + $0x60] sm:$0xff]   ;;  %v11131_v23 = vld [vmem:[%s16689_s0 + $0x138] sm:$0xff]  }
   0x8   :  { %10514 = vmatprep.mubr.msk.bf16.mxu0 %vm247_vm1, %v11118_v10  ;;  %10546 = vmatprep.mubr.msk.bf16.mxu1 %vm247_vm1, %v11119_v11  ;;  %v11132_v24 = vld [vmem:[%s16689_s0 + $0x6c] sm:$0xff]   ;;  %v11133_v25 = vld [vmem:[%s16689_s0 + $0x144] sm:$0xff]   ;;  %v11134_v26 = vld [vmem:[%s16689_s0 + $0x78] sm:$0xff]  }
   0x9   :  { %v701_v27 = vld [vmem:[%s16689_s0] sm:$0xf]  ;;  %v702_v28 = vld [vmem:[%s16689_s0 + $0x4] sm:$0xf]  ;;  %v703_v29 = vld [vmem:[%s16689_s0 + $0x8] sm:$0x1] }
   0xa   :  { %v801_v30 = vshrl.u32 %v701_v27, 16  ;;  %v804_v31 = vshll.u32 %v701_v27, 16  ;;  %v810_v32 = vshll.u32 %v702_v28, 16  ;;  %v814_v33 = vshrl.u32 %v702_v28, 16  ;;  %v11135_v34 = vld [vmem:[%s16689_s0 + $0x150] sm:$0xff]   ;;  %vm11408_vm6 = vmor %vm2246_vm4, %vm2247_vm5  ;;  %v11136_v3 = vld [vmem:[%s16689_s0 + $0x84] sm:$0xff]  }
   0xb   :  { %v820_v35 = vshll.u32 %v703_v29, 16  ;;  %v2118_v36 = vld [vmem:[%s16689_s0] sm:$0xe]  ;;  %v2251_v37 = vrot.slane %v702_v28, 5  ;;  %v2254_v38 = vrot.slane %v703_v29, 5  ;;  %v16701_v43 = vsel %vm11408_vm6, 4294967295, %v16700_v43  ;;  %vm11430_vm7 = vmor %vm797_vm2, %vm798_vm3 }
   0xc   :  { %v803_v39 = vrot.slane %v801_v30, 4  ;;  %v806_v40 = vrot.slane %v804_v31, 5  ;;  %v812_v41 = vrot.slane %v810_v32, 5  ;;  %v816_v42 = vrot.slane %v814_v33, 4  ;;  %16702 = vst [vmem:[#allocation2_spill] sm:$0xff] %v16701_v43  ;;  %v11137_v8 = vld [vmem:[%s16689_s0 + $0x15c] sm:$0xff]  }
   0xd   :  { %v704_v44 = vld [vmem:[%s16689_s0 + $0xc] sm:$0xf]  ;;  %v822_v45 = vrot.slane %v820_v35, 5  ;;  %v9276_v46 = vrot.slane %v2118_v36, 9  ;;  %v2253_v47 = vrot.slane %v2251_v37, 4  ;;  %v11138_v9 = vld [vmem:[%s16689_s0 + $0x90] sm:$0xff]  }
   0xe   :  { %10515 = vmatmul.mubr.msk.bf16.gmra.mxu0 %vm247_vm1, %v11120_v12  ;;  %10547 = vmatmul.mubr.msk.bf16.gmra.mxu1 %vm247_vm1, %v11121_v13  ;;  %v705_v48 = vld [vmem:[%s16689_s0 + $0x10] sm:$0xf]  ;;  %v825_v49 = vshrl.u32 %v704_v44, 16  ;;  %v807_v50 = vor.u32 %v806_v40, %v803_v39  ;;  %v817_v51 = vor.u32 %v816_v42, %v812_v41  ;;  %v706_v52 = vld [vmem:[%s16689_s0 + $0x14] sm:$0x1]  ;;  %v828_v53 = vshll.u32 %v704_v44, 16 }
   0xf   :  { %10518 = vmatprep.mubr.msk.bf16.mxu0 %vm247_vm1, %v11122_v14  ;;  %10550 = vmatprep.mubr.msk.bf16.mxu1 %vm247_vm1, %v11123_v15  ;;  %v834_v54 = vshll.u32 %v705_v48, 16  ;;  %v2119_v55 = vld [vmem:[%s16689_s0 + $0xc] sm:$0xe]  ;;  %v11436_v57 = vsel %vm11408_vm6, %v9276_v46, %v2251_v37  ;;  %v11440_v58 = vsel %vm11408_vm6, %v2253_v47, %v2254_v38  ;;  %v838_v60 = vshrl.u32 %v705_v48, 16  ;;  %v9437_v61 = vld [vmem:[%s16688_s1 + $0x6] sm:$0x3] }
  0x10   :  { %v827_v59 = vrot.slane %v825_v49, 4  ;;  %v9598_v62 = vld [vmem:[%s16688_s1 + $0x8] sm:$0x3]  ;;  %v808_v63 = vrot.slane %v807_v50, 4  ;;  %v818_v0 = vrot.slane %v817_v51, 4  ;;  %v9309_v1 = vcombine.low %v11436_v57, %v11440_v58  ;;  %11108 = vmatprep.subr.msk.bf16.mxu1 %vm344_vm0, %v9437_v61  ;;  %v11140_v46 = vld [vmem:[%s16689_s0 + $0x9c] sm:$0xff]  }
  0x11   :  { %v830_v2 = vrot.slane %v828_v53, 5  ;;  %11109 = vmatprep.subr.msk.bf16.mxu0 %vm344_vm0, %v9598_v62  ;;  %v836_v4 = vrot.slane %v834_v54, 5  ;;  %v840_v5 = vrot.slane %v838_v60, 4  ;;  %v844_v6 = vshll.u32 %v706_v52, 16  ;;  %v707_v14 = vld [vmem:[%s16689_s0 + $0x18] sm:$0xf] }
  0x12   :  { %v9277_v7 = vrot.slane %v2119_v55, 9  ;;  %v813_v10 = vsel %vm11430_vm7, %v808_v63, %v812_v41  ;;  %v823_v11 = vsel %vm11430_vm7, %v818_v0, %v822_v45  ;;  %v2258_v13 = vrot.slane %v705_v48, 5  ;;  %v11139_v15 = vld [vmem:[%s16689_s0 + $0x168] sm:$0xff]   ;;  %v709_v27 = vld [vmem:[%s16689_s0 + $0x20] sm:$0x1]  ;;  %v11141_v47 = vld [vmem:[%s16689_s0 + $0x174] sm:$0xff]  }
  0x13   :  { %v831_v12 = vor.u32 %v830_v2, %v827_v59  ;;  %v849_v28 = vshrl.u32 %v707_v14, 16  ;;  %v852_v29 = vshll.u32 %v707_v14, 16  ;;  %v710_v39 = vld [vmem:[%s16689_s0 + $0x24] sm:$0xf]  ;;  %v868_v44 = vshll.u32 %v709_v27, 16 }
  0x14   :  { %v711_v45 = vld [vmem:[%s16689_s0 + $0x28] sm:$0xf]  ;;  %v2268_v51 = vrot.slane %v709_v27, 5  ;;  %v712_v55 = vld [vmem:[%s16689_s0 + $0x2c] sm:$0x1]  ;;  %v873_v59 = vshrl.u32 %v710_v39, 16 }
  0x15   :  { %v851_v37 = vrot.slane %v849_v28, 4  ;;  %v854_v38 = vrot.slane %v852_v29, 5  ;;  %v870_v54 = vrot.slane %v868_v44, 5  ;;  %v876_v60 = vshll.u32 %v710_v39, 16  ;;  %v715_v29 = vld [vmem:[%s16689_s0 + $0x38] sm:$0x1] }
  0x16   :  { %10519 = vmatmul.mubr.msk.bf16.gmra.mxu0 %vm247_vm1, %v11124_v16  ;;  %10551 = vmatmul.mubr.msk.bf16.gmra.mxu1 %vm247_vm1, %v11125_v17  ;;  %v11471_v16 = vcombine.low %v813_v10, %v823_v11  ;;  %v841_v17 = vor.u32 %v840_v5, %v836_v4  ;;  %v882_v2 = vshll.u32 %v711_v45, 16  ;;  %v892_v11 = vshll.u32 %v712_v55, 16  ;;  %v11145_v39 = vld [vmem:[%s16689_s0 + $0x18c] sm:$0xff]  }
  0x17   :  { %10522 = vmatprep.mubr.msk.bf16.mxu0 %vm247_vm1, %v11126_v18  ;;  %10554 = vmatprep.mubr.msk.bf16.mxu1 %vm247_vm1, %v11127_v19  ;;  %v846_v18 = vrot.slane %v844_v6, 5  ;;  %v2261_v19 = vrot.slane %v706_v52, 5  ;;  %v855_v48 = vor.u32 %v854_v38, %v851_v37  ;;  %v11142_v52 = vld [vmem:[%s16689_s0 + $0xa8] sm:$0xff]   ;;  %v878_v5 = vrot.slane %v876_v60, 5  ;;  %v2122_v38 = vld [vmem:[%s16689_s0 + $0x30] sm:$0xe] }
  0x18   :  { %v886_v6 = vshrl.u32 %v711_v45, 16  ;;  %v884_v10 = vrot.slane %v882_v2, 5  ;;  %v2275_v28 = vrot.slane %v712_v55, 5  ;;  %v717_v55 = vld [vmem:[%s16689_s0 + $0x40] sm:$0xf]  ;;  %v2282_v2 = vrot.slane %v715_v29, 5 }
  0x19   :  { %v930_v57 = vshll.u32 %v717_v55, 16 }
  0x1e   :  { %10523 = vmatmul.mubr.msk.bf16.gmra.mxu0 %vm247_vm1, %v11128_v20  ;;  %10555 = vmatmul.mubr.msk.bf16.gmra.mxu1 %vm247_vm1, %v11129_v21  ;;  %v708_v20 = vld [vmem:[%s16689_s0 + $0x1c] sm:$0xf]  ;;  %v832_v21 = vrot.slane %v831_v12, 4  ;;  %v713_v12 = vld [vmem:[%s16689_s0 + $0x30] sm:$0xf] }
  0x1f   :  { %10526 = vmatprep.mubr.msk.bf16.mxu0 %vm247_vm1, %v11130_v22  ;;  %10558 = vmatprep.mubr.msk.bf16.mxu1 %vm247_vm1, %v11131_v23  ;;  %v11478_v22 = vsel %vm11408_vm6, %v9277_v7, %v2258_v13  ;;  %v2260_v23 = vrot.slane %v2258_v13, 4  ;;  %v858_v32 = vshll.u32 %v708_v20, 16  ;;  %v862_v33 = vshrl.u32 %v708_v20, 16  ;;  %v2121_v7 = vld [vmem:[%s16689_s0 + $0x24] sm:$0xe] }
  0x20   :  { %v837_v30 = vsel %vm11430_vm7, %v832_v21, %v836_v4  ;;  %v2265_v50 = vrot.slane %v708_v20, 5  ;;  %v875_v4 = vrot.slane %v873_v59, 4  ;;  %v894_v20 = vrot.slane %v892_v11, 5 }
  0x21   :  { %v11496_v31 = vsel %vm11408_vm6, %v2260_v23, %v2261_v19  ;;  %v860_v41 = vrot.slane %v858_v32, 5  ;;  %v864_v42 = vrot.slane %v862_v33, 4  ;;  %v9279_v21 = vrot.slane %v2121_v7, 9  ;;  %v11144_v32 = vld [vmem:[%s16689_s0 + $0xb4] sm:$0xff]  }
  0x22   :  { %v9310_v36 = vcombine.low %v11478_v22, %v11496_v31  ;;  %v2267_v0 = vrot.slane %v2265_v50, 4  ;;  %v2272_v23 = vrot.slane %v711_v45, 5  ;;  %v934_v11 = vshrl.u32 %v717_v55, 16 }
  0x23   :  { %v865_v53 = vor.u32 %v864_v42, %v860_v41 }
  0x24   :  { %v11566_v33 = vsel %vm11408_vm6, %v9279_v21, %v2272_v23 }
  0x26   :  { %10527 = vmatmul.mubr.msk.bf16.gmra.mxu0 %vm247_vm1, %v11132_v24  ;;  %10559 = vmatmul.mubr.msk.bf16.gmra.mxu1 %vm247_vm1, %v11133_v25  ;;  %v11481_v24 = vsel %vm344_vm0, %v9437_v61, 0  ;;  %v842_v25 = vrot.slane %v841_v17, 4  ;;  %v11143_v61 = vld [vmem:[%s16689_s0 + $0x180] sm:$0xff]   ;;  %v888_v17 = vrot.slane %v886_v6, 4 }
  0x27   :  { %10530 = vmatprep.mubr.msk.bf16.mxu0 %vm247_vm1, %v11134_v26  ;;  %10562 = vmatprep.mubr.msk.bf16.mxu1 %vm247_vm1, %v11135_v34  ;;  %v11485_v26 = vsel %vm344_vm0, %v9598_v62, 0  ;;  %v2120_v34 = vld [vmem:[%s16689_s0 + $0x18] sm:$0xe]  ;;  %v856_v62 = vrot.slane %v855_v48, 4 }
  0x28   :  { %v847_v35 = vsel %vm11430_vm7, %v842_v25, %v846_v18  ;;  %v9278_v49 = vrot.slane %v2120_v34, 9  ;;  %v714_v18 = vld [vmem:[%s16689_s0 + $0x34] sm:$0xf]  ;;  %v889_v27 = vor.u32 %v888_v17, %v884_v10  ;;  %v2274_v34 = vrot.slane %v2272_v23, 4 }
  0x29   :  { %v11509_v40 = vcombine.low %v837_v30, %v847_v35  ;;  %v897_v30 = vshrl.u32 %v713_v12, 16  ;;  %v900_v35 = vshll.u32 %v713_v12, 16  ;;  %v906_v37 = vshll.u32 %v714_v18, 16  ;;  %v2123_v12 = vld [vmem:[%s16689_s0 + $0x3c] sm:$0xe] }
  0x2a   :  { %v11531_v63 = vsel %vm11408_vm6, %v9278_v49, %v2265_v50  ;;  %v890_v42 = vrot.slane %v889_v27, 4  ;;  %v910_v45 = vshrl.u32 %v714_v18, 16  ;;  %v916_v49 = vshll.u32 %v715_v29, 16  ;;  %v716_v50 = vld [vmem:[%s16689_s0 + $0x3c] sm:$0xf] }
  0x2b   :  { %v899_v44 = vrot.slane %v897_v30, 4  ;;  %v908_v48 = vrot.slane %v906_v37, 5  ;;  %v720_v27 = vld [vmem:[%s16689_s0 + $0x4c] sm:$0xf]  ;;  %v9281_v30 = vrot.slane %v2123_v12, 9 }
  0x2e   :  { %10531 = vmatmul.mubr.msk.bf16.gmra.mxu0 %vm247_vm1, %v11136_v3  ;;  %10563 = vmatmul.mubr.msk.bf16.gmra.mxu1 %vm247_vm1, %v11137_v8  ;;  %v866_v3 = vrot.slane %v865_v53, 4  ;;  %v861_v8 = vsel %vm11430_vm7, %v856_v62, %v860_v41  ;;  %v912_v53 = vrot.slane %v910_v45, 4  ;;  %v2279_v62 = vrot.slane %v714_v18, 5  ;;  %v719_v18 = vld [vmem:[%s16689_s0 + $0x48] sm:$0xf] }
  0x2f   :  { %10534 = vmatprep.mubr.msk.bf16.mxu0 %vm247_vm1, %v11138_v9  ;;  %10566 = vmatprep.mubr.msk.bf16.mxu1 %vm247_vm1, %v11139_v15  ;;  %v11541_v9 = vsel %vm11408_vm6, %v2267_v0, %v2268_v51  ;;  %v879_v15 = vor.u32 %v878_v5, %v875_v4  ;;  %v895_v51 = vsel %vm11430_vm7, %v890_v42, %v894_v20  ;;  %v921_v4 = vshrl.u32 %v716_v50, 16 }
  0x30   :  { %v871_v13 = vsel %vm11430_vm7, %v866_v3, %v870_v54  ;;  %v9311_v14 = vcombine.low %v11531_v63, %v11541_v9  ;;  %v9280_v54 = vrot.slane %v2122_v38, 9  ;;  %v913_v0 = vor.u32 %v912_v53, %v908_v48  ;;  %v718_v3 = vld [vmem:[%s16689_s0 + $0x44] sm:$0x1]  ;;  %v721_v38 = vld [vmem:[%s16689_s0 + $0x50] sm:$0x1] }
  0x31   :  { %v11556_v19 = vcombine.low %v861_v8, %v871_v13  ;;  %v880_v25 = vrot.slane %v879_v15, 4  ;;  %v924_v5 = vshll.u32 %v716_v50, 16  ;;  %v2281_v8 = vrot.slane %v2279_v62, 4 }
  0x32   :  { %v11605_v7 = vsel %vm11408_vm6, %v9280_v54, %v2279_v62  ;;  %v914_v58 = vrot.slane %v913_v0, 4  ;;  %v932_v15 = vrot.slane %v930_v57, 5  ;;  %v940_v17 = vshll.u32 %v718_v3, 16 }
  0x33   :  { %v885_v41 = vsel %vm11430_vm7, %v880_v25, %v884_v10  ;;  %v926_v10 = vrot.slane %v924_v5, 5  ;;  %v936_v25 = vrot.slane %v934_v11, 4  ;;  %v2289_v37 = vrot.slane %v718_v3, 5  ;;  %v2125_v11 = vld [vmem:[%s16689_s0 + $0x54] sm:$0xe] }
  0x34   :  { %v11591_v59 = vcombine.low %v885_v41, %v895_v51  ;;  %v942_v29 = vrot.slane %v940_v17, 5  ;;  %v954_v45 = vshll.u32 %v720_v27, 16  ;;  %v2293_v0 = vrot.slane %v720_v27, 5 }
  0x35   :  { %v2296_v9 = vrot.slane %v721_v38, 5 }
  0x36   :  { %10535 = vmatmul.mubr.msk.bf16.gmra.mxu0 %vm247_vm1, %v11140_v46  ;;  %10567 = vmatmul.mubr.msk.bf16.gmra.mxu1 %vm247_vm1, %v11141_v47  ;;  %v11578_v46 = vsel %vm11408_vm6, %v2274_v34, %v2275_v28  ;;  %v902_v47 = vrot.slane %v900_v35, 5  ;;  %v937_v35 = vor.u32 %v936_v25, %v932_v15  ;;  %v956_v51 = vrot.slane %v954_v45, 5 }
  0x37   :  { %10538 = vmatprep.mubr.msk.bf16.mxu0 %vm247_vm1, %v11142_v52  ;;  %10570 = vmatprep.mubr.msk.bf16.mxu1 %vm247_vm1, %v11143_v61  ;;  %v9312_v52 = vcombine.low %v11566_v33, %v11578_v46  ;;  %v918_v61 = vrot.slane %v916_v49, 5 }
  0x38   :  { %v903_v60 = vor.u32 %v902_v47, %v899_v44  ;;  %v948_v44 = vshll.u32 %v719_v18, 16  ;;  %v2124_v47 = vld [vmem:[%s16689_s0 + $0x48] sm:$0xe]  ;;  %v938_v31 = vrot.slane %v937_v35, 4 }
  0x39   :  { %v919_v20 = vsel %vm11430_vm7, %v914_v58, %v918_v61  ;;  %v9282_v54 = vrot.slane %v2124_v47, 9 }
  0x3a   :  { %v904_v6 = vrot.slane %v903_v60, 4  ;;  %v950_v50 = vrot.slane %v948_v44, 5 }
  0x3b   :  { %v2294_v5 = vsel %vm11408_vm6, %v9282_v54, %v2293_v0 }
  0x3c   :  { %v909_v13 = vsel %vm11430_vm7, %v904_v6, %v908_v48  ;;  %v958_v48 = vshrl.u32 %v720_v27, 16  ;;  %v2295_v6 = vrot.slane %v2293_v0, 4  ;;  %v9283_v27 = vrot.slane %v2125_v11, 9 }
  0x3d   :  { %v11626_v28 = vcombine.low %v909_v13, %v919_v20 }
  0x3e   :  { %10539 = vmatmul.mubr.msk.bf16.gmra.mxu0 %vm247_vm1, %v11144_v32  ;;  %10571 = vmatmul.mubr.msk.bf16.gmra.mxu1 %vm247_vm1, %v11145_v39  ;;  %v2286_v32 = vrot.slane %v717_v55, 5  ;;  %v945_v39 = vshrl.u32 %v719_v18, 16  ;;  %v960_v53 = vrot.slane %v958_v48, 4  ;;  %v723_v55 = vld [vmem:[%s16689_s0 + $0x58] sm:$0xf]  ;;  %v2297_v13 = vsel %vm11408_vm6, %v2295_v6, %v2296_v9 }
  0x3f   :  { %10642 = vmatprep.mubr.msk.bf16.mxu0 %vm247_vm1, %v9309_v1  ;;  %10576 = vmatprep.mubr.msk.bf16.mxu1 %vm247_vm1, %v11471_v16  ;;  %v923_v1 = vrot.slane %v921_v4, 4  ;;  %v11614_v16 = vsel %vm11408_vm6, %v2281_v8, %v2282_v2  ;;  %v978_v8 = vshll.u32 %v723_v55, 16  ;;  %v725_v18 = vld [vmem:[%s16689_s0 + $0x60] sm:$0xf]  ;;  %v9315_v46 = vcombine.low %v2294_v5, %v2297_v13  ;;  %v728_v48 = vld [vmem:[%s16689_s0 + $0x6c] sm:$0xf] }
  0x40   :  { %v9313_v21 = vcombine.low %v11605_v7, %v11614_v16  ;;  %v11637_v41 = vsel %vm11408_vm6, %v9281_v30, %v2286_v32  ;;  %v2288_v42 = vrot.slane %v2286_v32, 4  ;;  %v961_v63 = vor.u32 %v960_v53, %v956_v51  ;;  %v727_v30 = vld [vmem:[%s16689_s0 + $0x68] sm:$0x1]  ;;  %v2127_v6 = vld [vmem:[%s16689_s0 + $0x6c] sm:$0xe] }
  0x41   :  { %v927_v23 = vor.u32 %v926_v10, %v923_v1  ;;  %v982_v10 = vshrl.u32 %v723_v55, 16  ;;  %v993_v32 = vshrl.u32 %v725_v18, 16  ;;  %v2310_v0 = vrot.slane %v727_v30, 5 }
  0x42   :  { %v11652_v49 = vsel %vm11408_vm6, %v2288_v42, %v2289_v37  ;;  %v962_v57 = vrot.slane %v961_v63, 4  ;;  %v996_v37 = vshll.u32 %v725_v18, 16  ;;  %v730_v63 = vld [vmem:[%s16689_s0 + $0x74] sm:$0x1]  ;;  %v1017_v9 = vshrl.u32 %v728_v48, 16 }
  0x43   :  { %v928_v34 = vrot.slane %v927_v23, 4  ;;  %v984_v20 = vrot.slane %v982_v10, 4  ;;  %v726_v23 = vld [vmem:[%s16689_s0 + $0x64] sm:$0xf]  ;;  %v995_v44 = vrot.slane %v993_v32, 4 }
  0x44   :  { %v1006_v45 = vshrl.u32 %v726_v23, 16  ;;  %v731_v10 = vld [vmem:[%s16689_s0 + $0x78] sm:$0xf] }
  0x45   :  { %v933_v22 = vsel %vm11430_vm7, %v928_v34, %v932_v15  ;;  %v980_v15 = vrot.slane %v978_v8, 5 }
  0x46   :  { %10643 = vmatmul.mubr.msk.bf16.vlgmr.msra.gmra.mxu0 %vm247_vm1, %v9310_v36  ;;  %10577 = vmatmul.mubr.msk.bf16.vlgmr.msra.gmra.mxu1 %vm247_vm1, %v11509_v40  ;;  %v947_v36 = vrot.slane %v945_v39, 4  ;;  %v964_v40 = vshll.u32 %v721_v38, 16  ;;  %v1002_v38 = vshll.u32 %v726_v23, 16 }
  0x47   :  { %10773 = vmatpush3.bf16.msra.mxu0 %v11485_v26  ;;  %10707 = vmatpush3.bf16.msra.mxu1 %v11481_v24  ;;  %v722_v26 = vld [vmem:[%s16689_s0 + $0x54] sm:$0xf]  ;;  %v943_v24 = vsel %vm11430_vm7, %v938_v31, %v942_v29  ;;  %v2300_v29 = vrot.slane %v723_v55, 5  ;;  %v985_v16 = vor.u32 %v984_v20, %v980_v15 }
  0x48   :  { %10580 = vmatprep.mubr.msk.bf16.mxu1 %vm247_vm1, %v11556_v19  ;;  %10646 = vmatprep.mubr.msk.bf16.mxu0 %vm247_vm1, %v9311_v14  ;;  %v9314_v19 = vcombine.low %v11637_v41, %v11652_v49  ;;  %v11668_v60 = vcombine.low %v933_v22, %v943_v24  ;;  %v951_v61 = vor.u32 %v950_v50, %v947_v36  ;;  %v966_v62 = vrot.slane %v964_v40, 5  ;;  %v724_v14 = vld [vmem:[%s16689_s0 + $0x5c] sm:$0x1]  ;;  %v729_v24 = vld [vmem:[%s16689_s0 + $0x70] sm:$0xf] }
  0x49   :  { %v969_v2 = vshrl.u32 %v722_v26, 16  ;;  %v972_v3 = vshll.u32 %v722_v26, 16  ;;  %v988_v17 = vshll.u32 %v724_v14, 16  ;;  %v2301_v34 = vsel %vm11408_vm6, %v9283_v27, %v2300_v29 }
  0x4a   :  { %v952_v4 = vrot.slane %v951_v61, 4  ;;  %v967_v33 = vsel %vm11430_vm7, %v962_v57, %v966_v62  ;;  %v2302_v35 = vrot.slane %v2300_v29, 4  ;;  %v986_v42 = vrot.slane %v985_v16, 4 }
  0x4b   :  { %v971_v58 = vrot.slane %v969_v2, 4  ;;  %v974_v1 = vrot.slane %v972_v3, 5  ;;  %v998_v22 = vrot.slane %v996_v37, 5  ;;  %v1004_v31 = vrot.slane %v1002_v38, 5 }
  0x4c   :  { %v957_v12 = vsel %vm11430_vm7, %v952_v4, %v956_v51  ;;  %v1012_v36 = vshll.u32 %v727_v30, 16  ;;  %v1008_v40 = vrot.slane %v1006_v45, 4  ;;  %v2307_v61 = vrot.slane %v726_v23, 5  ;;  %v2128_v30 = vld [vmem:[%s16689_s0 + $0x78] sm:$0xe] }
  0x4d   :  { %v9218_v25 = vcombine.low %v957_v12, %v967_v33  ;;  %v999_v54 = vor.u32 %v998_v22, %v995_v44  ;;  %v1026_v2 = vshll.u32 %v729_v24, 16  ;;  %v1030_v5 = vshrl.u32 %v729_v24, 16  ;;  %v734_v44 = vld [vmem:[%s16689_s0 + $0x84] sm:$0xf] }
  0x4e   :  { %10647 = vmatmul.mubr.msk.bf16.gmra.mxu0 %vm247_vm1, %v9312_v52  ;;  %10581 = vmatmul.mubr.msk.bf16.gmra.mxu1 %vm247_vm1, %v11591_v59  ;;  %v975_v52 = vor.u32 %v974_v1, %v971_v58  ;;  %v990_v59 = vrot.slane %v988_v17, 5  ;;  %v1014_v55 = vrot.slane %v1012_v36, 5  ;;  %v1009_v62 = vor.u32 %v1008_v40, %v1004_v31  ;;  %v732_v17 = vld [vmem:[%s16689_s0 + $0x7c] sm:$0xf]  ;;  %v735_v36 = vld [vmem:[%s16689_s0 + $0x88] sm:$0xf] }
  0x4f   :  { %10650 = vmatprep.mubr.msk.bf16.mxu0 %vm247_vm1, %v9313_v21  ;;  %10584 = vmatprep.mubr.msk.bf16.mxu1 %vm247_vm1, %v11626_v28  ;;  %v2303_v21 = vrot.slane %v724_v14, 5  ;;  %v2126_v28 = vld [vmem:[%s16689_s0 + $0x60] sm:$0xe]  ;;  %v1020_v14 = vshll.u32 %v728_v48, 16  ;;  %v1000_v41 = vrot.slane %v999_v54, 4  ;;  %v1028_v58 = vrot.slane %v1026_v2, 5 }
  0x50   :  { %v976_v7 = vrot.slane %v975_v52, 4  ;;  %v991_v50 = vsel %vm11430_vm7, %v986_v42, %v990_v59  ;;  %v9284_v26 = vrot.slane %v2126_v28, 9  ;;  %v1010_v3 = vrot.slane %v1009_v62, 4  ;;  %v733_v59 = vld [vmem:[%s16689_s0 + $0x80] sm:$0x1] }
  0x51   :  { %v2304_v47 = vsel %vm11408_vm6, %v2302_v35, %v2303_v21  ;;  %v1022_v4 = vrot.slane %v1020_v14, 5  ;;  %v1005_v8 = vsel %vm11430_vm7, %v1000_v41, %v1004_v31  ;;  %v1036_v1 = vshll.u32 %v730_v63, 16 }
  0x52   :  { %v981_v39 = vsel %vm11430_vm7, %v976_v7, %v980_v15  ;;  %v9316_v51 = vcombine.low %v2301_v34, %v2304_v47  ;;  %v2308_v49 = vsel %vm11408_vm6, %v9284_v26, %v2307_v61  ;;  %v1015_v11 = vsel %vm11430_vm7, %v1010_v3, %v1014_v55 }
  0x53   :  { %v9219_v53 = vcombine.low %v981_v39, %v991_v50  ;;  %v1032_v15 = vrot.slane %v1030_v5, 4  ;;  %v9220_v18 = vcombine.low %v1005_v8, %v1015_v11  ;;  %v1038_v33 = vrot.slane %v1036_v1, 5  ;;  %v737_v5 = vld [vmem:[%s16689_s0 + $0x90] sm:$0xf]  ;;  %v738_v1 = vld [vmem:[%s16689_s0 + $0x94] sm:$0xf] }
  0x54   :  { %v2314_v52 = vrot.slane %v729_v24, 5  ;;  %v1041_v27 = vshrl.u32 %v731_v10, 16  ;;  %v1044_v16 = vshll.u32 %v731_v10, 16  ;;  %v1050_v21 = vshll.u32 %v732_v17, 16 }
  0x55   :  { %v1033_v23 = vor.u32 %v1032_v15, %v1028_v58  ;;  %v1054_v37 = vshrl.u32 %v732_v17, 16  ;;  %v1060_v42 = vshll.u32 %v733_v59, 16  ;;  %v9286_v31 = vrot.slane %v2128_v30, 9 }
  0x56   :  { %10651 = vmatmul.mubr.msk.bf16.gmra.mxu0 %vm247_vm1, %v9314_v19  ;;  %10585 = vmatmul.mubr.msk.bf16.gmra.mxu1 %vm247_vm1, %v11668_v60  ;;  %v2309_v19 = vrot.slane %v2307_v61, 4  ;;  %v1019_v60 = vrot.slane %v1017_v9, 4  ;;  %v2316_v7 = vrot.slane %v2314_v52, 4  ;;  %v1043_v35 = vrot.slane %v1041_v27, 4 }
  0x57   :  { %10654 = vmatprep.mubr.msk.bf16.mxu0 %vm247_vm1, %v9315_v46  ;;  %10588 = vmatprep.mubr.msk.bf16.mxu1 %vm247_vm1, %v9218_v25  ;;  %v9285_v46 = vrot.slane %v2127_v6, 9  ;;  %v2317_v25 = vrot.slane %v730_v63, 5  ;;  %v1034_v34 = vrot.slane %v1033_v23, 4  ;;  %v1046_v28 = vrot.slane %v1044_v16, 5 }
  0x58   :  { %v2311_v57 = vsel %vm11408_vm6, %v2309_v19, %v2310_v0  ;;  %v1023_v13 = vor.u32 %v1022_v4, %v1019_v60  ;;  %v1052_v39 = vrot.slane %v1050_v21, 5  ;;  %v1056_v22 = vrot.slane %v1054_v37, 4  ;;  %v2129_v19 = vld [vmem:[%s16689_s0 + $0x84] sm:$0xe] }
  0x59   :  { %v9317_v12 = vcombine.low %v2308_v49, %v2311_v57  ;;  %v2315_v29 = vsel %vm11408_vm6, %v9285_v46, %v2314_v52  ;;  %v2318_v38 = vsel %vm11408_vm6, %v2316_v7, %v2317_v25  ;;  %v1039_v45 = vsel %vm11430_vm7, %v1034_v34, %v1038_v33  ;;  %v739_v33 = vld [vmem:[%s16689_s0 + $0x98] sm:$0x1] }
  0x5a   :  { %v1024_v20 = vrot.slane %v1023_v13, 4  ;;  %v9318_v47 = vcombine.low %v2315_v29, %v2318_v38  ;;  %v1047_v50 = vor.u32 %v1046_v28, %v1043_v35  ;;  %v2321_v40 = vrot.slane %v732_v17, 5  ;;  %v740_v35 = vld [vmem:[%s16689_s0 + $0x9c] sm:$0xf] }
  0x5b   :  { %v1057_v26 = vor.u32 %v1056_v22, %v1052_v39  ;;  %v2324_v24 = vrot.slane %v733_v59, 5  ;;  %v1065_v54 = vshrl.u32 %v734_v44, 16  ;;  %v1068_v55 = vshll.u32 %v734_v44, 16  ;;  %v2130_v59 = vld [vmem:[%s16689_s0 + $0x90] sm:$0xe] }
  0x5c   :  { %v1029_v32 = vsel %vm11430_vm7, %v1024_v20, %v1028_v58  ;;  %v1048_v61 = vrot.slane %v1047_v50, 4  ;;  %v2322_v62 = vsel %vm11408_vm6, %v9286_v31, %v2321_v40  ;;  %v2323_v0 = vrot.slane %v2321_v40, 4 }
  0x5d   :  { %v9221_v48 = vcombine.low %v1029_v32, %v1039_v45  ;;  %v1074_v63 = vshll.u32 %v735_v36, 16  ;;  %v1058_v9 = vrot.slane %v1057_v26, 4  ;;  %v1067_v14 = vrot.slane %v1065_v54, 4 }
  0x5e   :  { %10655 = vmatmul.mubr.msk.bf16.gmra.mxu0 %vm247_vm1, %v9316_v51  ;;  %10589 = vmatmul.mubr.msk.bf16.gmra.mxu1 %vm247_vm1, %v9219_v53  ;;  %v1062_v51 = vrot.slane %v1060_v42, 5  ;;  %v736_v53 = vld [vmem:[%s16689_s0 + $0x8c] sm:$0x1]  ;;  %v1070_v41 = vrot.slane %v1068_v55, 5  ;;  %v1078_v49 = vshrl.u32 %v735_v36, 16  ;;  %v1053_v2 = vsel %vm11430_vm7, %v1048_v61, %v1052_v39 }
  0x5f   :  { %10658 = vmatprep.mubr.msk.bf16.mxu0 %vm247_vm1, %v9317_v12  ;;  %10592 = vmatprep.mubr.msk.bf16.mxu1 %vm247_vm1, %v9220_v18  ;;  %v2325_v3 = vsel %vm11408_vm6, %v2323_v0, %v2324_v24  ;;  %v1076_v60 = vrot.slane %v1074_v63, 5  ;;  %v1084_v4 = vshll.u32 %v736_v53, 16  ;;  %v9287_v12 = vrot.slane %v2129_v19, 9  ;;  %v741_v42 = vld [vmem:[%s16689_s0 + $0xa0] sm:$0xf] }
  0x60   :  { %v1063_v6 = vsel %vm11430_vm7, %v1058_v9, %v1062_v51  ;;  %v9319_v8 = vcombine.low %v2322_v62, %v2325_v3  ;;  %v1071_v57 = vor.u32 %v1070_v41, %v1067_v14  ;;  %v1080_v58 = vrot.slane %v1078_v49, 4  ;;  %v2131_v0 = vld [vmem:[%s16689_s0 + $0x9c] sm:$0xe]  ;;  %v743_v49 = vld [vmem:[%s16689_s0 + $0xa8] sm:$0xf] }
  0x61   :  { %v9222_v10 = vcombine.low %v1053_v2, %v1063_v6  ;;  %v1086_v11 = vrot.slane %v1084_v4, 5  ;;  %v2328_v13 = vrot.slane %v735_v36, 5  ;;  %v2331_v18 = vrot.slane %v736_v53, 5  ;;  %v744_v4 = vld [vmem:[%s16689_s0 + $0xac] sm:$0xf] }
  0x62   :  { %v1072_v15 = vrot.slane %v1071_v57, 4  ;;  %v1081_v17 = vor.u32 %v1080_v58, %v1076_v60  ;;  %v1089_v46 = vshrl.u32 %v737_v5, 16  ;;  %v1092_v23 = vshll.u32 %v737_v5, 16 }
  0x63   :  { %v2329_v52 = vsel %vm11408_vm6, %v9287_v12, %v2328_v13  ;;  %v2330_v20 = vrot.slane %v2328_v13, 4  ;;  %v1098_v25 = vshll.u32 %v738_v1, 16  ;;  %v1102_v16 = vshrl.u32 %v738_v1, 16 }
  0x64   :  { %v1077_v27 = vsel %vm11430_vm7, %v1072_v15, %v1076_v60  ;;  %v1082_v29 = vrot.slane %v1081_v17, 4  ;;  %v1091_v7 = vrot.slane %v1089_v46, 4  ;;  %v1094_v30 = vrot.slane %v1092_v23, 5 }
  0x65   :  { %v2332_v21 = vsel %vm11408_vm6, %v2330_v20, %v2331_v18  ;;  %v1100_v32 = vrot.slane %v1098_v25, 5  ;;  %v1108_v34 = vshll.u32 %v739_v33, 16  ;;  %v1104_v28 = vrot.slane %v1102_v16, 4 }
  0x66   :  { %10659 = vmatmul.mubr.msk.bf16.gmra.mxu0 %vm247_vm1, %v9318_v47  ;;  %10593 = vmatmul.mubr.msk.bf16.gmra.mxu1 %vm247_vm1, %v9221_v48  ;;  %v1087_v37 = vsel %vm11430_vm7, %v1082_v29, %v1086_v11  ;;  %v9320_v38 = vcombine.low %v2329_v52, %v2332_v21  ;;  %v9288_v39 = vrot.slane %v2130_v59, 9  ;;  %v1095_v45 = vor.u32 %v1094_v30, %v1091_v7  ;;  %v742_v48 = vld [vmem:[%s16689_s0 + $0xa4] sm:$0x1]  ;;  %v745_v11 = vld [vmem:[%s16689_s0 + $0xb0] sm:$0x1] }
  0x67   :  { %10662 = vmatprep.mubr.msk.bf16.mxu0 %vm247_vm1, %v9319_v8  ;;  %10596 = vmatprep.mubr.msk.bf16.mxu1 %vm247_vm1, %v9222_v10  ;;  %v9223_v44 = vcombine.low %v1077_v27, %v1087_v37  ;;  %v1110_v47 = vrot.slane %v1108_v34, 5  ;;  %v2335_v22 = vrot.slane %v738_v1, 5  ;;  %v1105_v31 = vor.u32 %v1104_v28, %v1100_v32  ;;  %v746_v7 = vld [vmem:[%s16689_s0 + $0xb4] sm:$0xf]  ;;  %v747_v34 = vld [vmem:[%s16689_s0 + $0xb8] sm:$0xf] }
  0x68   :  { %v2338_v36 = vrot.slane %v739_v33, 5  ;;  %v1113_v50 = vshrl.u32 %v740_v35, 16  ;;  %v1116_v51 = vshll.u32 %v740_v35, 16  ;;  %v1096_v40 = vrot.slane %v1095_v45, 4  ;;  %v2132_v33 = vld [vmem:[%s16689_s0 + $0xa8] sm:$0xe] }
  0x69   :  { %v2336_v26 = vsel %vm11408_vm6, %v9288_v39, %v2335_v22  ;;  %v2337_v24 = vrot.slane %v2335_v22, 4  ;;  %v1122_v53 = vshll.u32 %v741_v42, 16  ;;  %v1106_v54 = vrot.slane %v1105_v31, 4 }
  0x6a   :  { %v1115_v55 = vrot.slane %v1113_v50, 4  ;;  %v1118_v61 = vrot.slane %v1116_v51, 5  ;;  %v1126_v62 = vshrl.u32 %v741_v42, 16  ;;  %v1101_v63 = vsel %vm11430_vm7, %v1096_v40, %v1100_v32 }
  0x6b   :  { %v2339_v9 = vsel %vm11408_vm6, %v2337_v24, %v2338_v36  ;;  %v1124_v14 = vrot.slane %v1122_v53, 5  ;;  %v1132_v41 = vshll.u32 %v742_v48, 16  ;;  %v1111_v19 = vsel %vm11430_vm7, %v1106_v54, %v1110_v47  ;;  %v2133_v24 = vld [vmem:[%s16689_s0 + $0xb4] sm:$0xe] }
  0x6c   :  { %v9321_v2 = vcombine.low %v2336_v26, %v2339_v9  ;;  %v1119_v3 = vor.u32 %v1118_v61, %v1115_v55  ;;  %v1128_v60 = vrot.slane %v1126_v62, 4  ;;  %v9224_v5 = vcombine.low %v1101_v63, %v1111_v19  ;;  %v749_v62 = vld [vmem:[%s16689_s0 + $0xd8] sm:$0xf] }
  0x6d   :  { %v1134_v6 = vrot.slane %v1132_v41, 5  ;;  %v9289_v8 = vrot.slane %v2131_v0, 9  ;;  %v2342_v57 = vrot.slane %v741_v42, 5  ;;  %v2345_v10 = vrot.slane %v742_v48, 5  ;;  %v750_v41 = vld [vmem:[%s16689_s0 + $0xdc] sm:$0xf] }
  0x6e   :  { %10663 = vmatmul.mubr.msk.bf16.gmra.mxu0 %vm247_vm1, %v9320_v38  ;;  %10597 = vmatmul.mubr.msk.bf16.gmra.mxu1 %vm247_vm1, %v9223_v44  ;;  %v1120_v58 = vrot.slane %v1119_v3, 4  ;;  %v1129_v1 = vor.u32 %v1128_v60, %v1124_v14  ;;  %v1137_v12 = vshrl.u32 %v743_v49, 16  ;;  %v1140_v17 = vshll.u32 %v743_v49, 16  ;;  %v748_v44 = vld [vmem:[%s16689_s0 + $0xbc] sm:$0x1] }
  0x6f   :  { %10666 = vmatprep.mubr.msk.bf16.mxu0 %vm247_vm1, %v9321_v2  ;;  %10600 = vmatprep.mubr.msk.bf16.mxu1 %vm247_vm1, %v9224_v5  ;;  %v2343_v13 = vsel %vm11408_vm6, %v9289_v8, %v2342_v57  ;;  %v2344_v15 = vrot.slane %v2342_v57, 4  ;;  %v1146_v18 = vshll.u32 %v744_v4, 16  ;;  %v1150_v23 = vshrl.u32 %v744_v4, 16  ;;  %v751_v60 = vld [vmem:[%s16689_s0 + $0xe0] sm:$0x1] }
  0x70   :  { %v1125_v46 = vsel %vm11430_vm7, %v1120_v58, %v1124_v14  ;;  %v1130_v52 = vrot.slane %v1129_v1, 4  ;;  %v1139_v20 = vrot.slane %v1137_v12, 4  ;;  %v1142_v59 = vrot.slane %v1140_v17, 5  ;;  %v2134_v57 = vld [vmem:[%s16689_s0 + $0xd8] sm:$0xe] }
  0x71   :  { %v2346_v25 = vsel %vm11408_vm6, %v2344_v15, %v2345_v10  ;;  %v1148_v27 = vrot.slane %v1146_v18, 5  ;;  %v1156_v29 = vshll.u32 %v745_v11, 16  ;;  %v1152_v30 = vrot.slane %v1150_v23, 4  ;;  %v752_v12 = vld [vmem:[%s16689_s0 + $0xe4] sm:$0xf] }
  0x72   :  { %v1135_v16 = vsel %vm11430_vm7, %v1130_v52, %v1134_v6  ;;  %v9322_v21 = vcombine.low %v2343_v13, %v2346_v25  ;;  %v9290_v32 = vrot.slane %v2132_v33, 9  ;;  %v1143_v37 = vor.u32 %v1142_v59, %v1139_v20 }
  0x73   :  { %v9225_v35 = vcombine.low %v1125_v46, %v1135_v16  ;;  %v1158_v38 = vrot.slane %v1156_v29, 5  ;;  %v2349_v28 = vrot.slane %v744_v4, 5  ;;  %v1153_v39 = vor.u32 %v1152_v30, %v1148_v27  ;;  %v753_v29 = vld [vmem:[%s16689_s0 + $0xe8] sm:$0xf] }
  0x74   :  { %v2352_v42 = vrot.slane %v745_v11, 5  ;;  %v1161_v45 = vshrl.u32 %v746_v7, 16  ;;  %v1164_v47 = vshll.u32 %v746_v7, 16  ;;  %v1144_v22 = vrot.slane %v1143_v37, 4 }
  0x75   :  { %v2350_v31 = vsel %vm11408_vm6, %v9290_v32, %v2349_v28  ;;  %v2351_v36 = vrot.slane %v2349_v28, 4  ;;  %v1170_v48 = vshll.u32 %v747_v34, 16  ;;  %v1154_v50 = vrot.slane %v1153_v39, 4  ;;  %v754_v32 = vld [vmem:[%s16689_s0 + $0xec] sm:$0x1] }
  0x76   :  { %10667 = vmatmul.mubr.msk.bf16.gmra.mxu0 %vm247_vm1, %v9322_v21  ;;  %10601 = vmatmul.mubr.msk.bf16.gmra.mxu1 %vm247_vm1, %v9225_v35  ;;  %v1163_v51 = vrot.slane %v1161_v45, 4  ;;  %v1166_v40 = vrot.slane %v1164_v47, 5  ;;  %v1174_v26 = vshrl.u32 %v747_v34, 16  ;;  %v1149_v53 = vsel %vm11430_vm7, %v1144_v22, %v1148_v27 }
  0x77   :  { %v2353_v54 = vsel %vm11408_vm6, %v2351_v36, %v2352_v42  ;;  %v1172_v55 = vrot.slane %v1170_v48, 5  ;;  %v1180_v61 = vshll.u32 %v748_v44, 16  ;;  %v1159_v0 = vsel %vm11430_vm7, %v1154_v50, %v1158_v38  ;;  %v2135_v36 = vld [vmem:[%s16689_s0 + $0xe4] sm:$0xe] }
  0x78   :  { %v9323_v63 = vcombine.low %v2350_v31, %v2353_v54  ;;  %v1167_v9 = vor.u32 %v1166_v40, %v1163_v51  ;;  %v1176_v14 = vrot.slane %v1174_v26, 4  ;;  %v9226_v49 = vcombine.low %v1149_v53, %v1159_v0  ;;  %v755_v26 = vld [vmem:[%s16689_s0 + $0xf0] sm:$0xf]  ;;  %v9727_v0 = vld [vmem:[%s16688_s1 + $0xa] sm:$0x3] }
  0x79   :  { %v1182_v19 = vrot.slane %v1180_v61, 5  ;;  %v9291_v2 = vrot.slane %v2133_v24, 9  ;;  %v2356_v3 = vrot.slane %v747_v34, 5  ;;  %v2359_v6 = vrot.slane %v748_v44, 5  ;;  %v756_v24 = vld [vmem:[%s16689_s0 + $0xf4] sm:$0xf]  ;;  %11110 = vmatprep.subr.msk.bf16.mxu1 %vm344_vm0, %v9727_v0 }
  0x7a   :  { %10670 = vmatprep.mubr.msk.bf16.mxu0 %vm247_vm1, %v9323_v63  ;;  %v1168_v4 = vrot.slane %v1167_v9, 4  ;;  %v1177_v5 = vor.u32 %v1176_v14, %v1172_v55  ;;  %v1185_v8 = vshrl.u32 %v749_v62, 16  ;;  %10604 = vmatprep.mubr.msk.bf16.mxu1 %vm247_vm1, %v9226_v49  ;;  %v1188_v10 = vshll.u32 %v749_v62, 16  ;;  %v757_v62 = vld [vmem:[%s16689_s0 + $0xf8] sm:$0x1] }
  0x7b   :  { %v2357_v58 = vsel %vm11408_vm6, %v9291_v2, %v2356_v3  ;;  %v2358_v1 = vrot.slane %v2356_v3, 4  ;;  %v1194_v11 = vshll.u32 %v750_v41, 16  ;;  %v1198_v18 = vshrl.u32 %v750_v41, 16  ;;  %v9856_v63 = vld [vmem:[%s16688_s1 + $0xc] sm:$0x3] }
  0x7c   :  { %v1173_v13 = vsel %vm11430_vm7, %v1168_v4, %v1172_v55  ;;  %v1178_v15 = vrot.slane %v1177_v5, 4  ;;  %v1187_v17 = vrot.slane %v1185_v8, 4  ;;  %v1190_v46 = vrot.slane %v1188_v10, 5  ;;  %11111 = vmatprep.subr.msk.bf16.mxu0 %vm344_vm0, %v9856_v63 }
  0x7d   :  { %v2360_v33 = vsel %vm11408_vm6, %v2358_v1, %v2359_v6  ;;  %v1196_v52 = vrot.slane %v1194_v11, 5  ;;  %v1204_v20 = vshll.u32 %v751_v60, 16  ;;  %v1200_v59 = vrot.slane %v1198_v18, 4 }
  0x7e   :  { %v1183_v23 = vsel %vm11430_vm7, %v1178_v15, %v1182_v19  ;;  %v9324_v25 = vcombine.low %v2357_v58, %v2360_v33  ;;  %v9292_v27 = vrot.slane %v2134_v57, 9  ;;  %v1191_v16 = vor.u32 %v1190_v46, %v1187_v17  ;;  %v2136_v57 = vld [vmem:[%s16689_s0 + $0xf0] sm:$0xe]  ;;  %v759_v33 = vld [vmem:[%s16689_s0 + $0x100] sm:$0xf] }
  0x7f   :  { %v9227_v7 = vcombine.low %v1173_v13, %v1183_v23  ;;  %v1206_v21 = vrot.slane %v1204_v20, 5  ;;  %v2363_v30 = vrot.slane %v750_v41, 5  ;;  %v1201_v34 = vor.u32 %v1200_v59, %v1196_v52 }
  0x80   :  { %10671 = vmatmul.mubr.msk.bf16.gmra.mxu0 %vm247_vm1, %v9324_v25  ;;  %v2366_v35 = vrot.slane %v751_v60, 5  ;;  %v1209_v37 = vshrl.u32 %v752_v12, 16  ;;  %v1212_v38 = vshll.u32 %v752_v12, 16  ;;  %v1192_v28 = vrot.slane %v1191_v16, 4  ;;  %v758_v12 = vld [vmem:[%s16689_s0 + $0xfc] sm:$0xf] }
  0x81   :  { %10605 = vmatmul.mubr.msk.bf16.gmra.mxu1 %vm247_vm1, %v9227_v7  ;;  %v2364_v39 = vsel %vm11408_vm6, %v9292_v27, %v2363_v30  ;;  %v2365_v42 = vrot.slane %v2363_v30, 4  ;;  %v1218_v44 = vshll.u32 %v753_v29, 16  ;;  %v1202_v45 = vrot.slane %v1201_v34, 4  ;;  %v760_v7 = vld [vmem:[%s16689_s0 + $0x104] sm:$0x1] }
  0x82   :  { %v1211_v47 = vrot.slane %v1209_v37, 4  ;;  %v1214_v22 = vrot.slane %v1212_v38, 5  ;;  %v1222_v31 = vshrl.u32 %v753_v29, 16  ;;  %v1197_v48 = vsel %vm11430_vm7, %v1192_v28, %v1196_v52  ;;  %v2137_v34 = vld [vmem:[%s16689_s0 + $0xfc] sm:$0xe] }
  0x83   :  { %v2367_v50 = vsel %vm11408_vm6, %v2365_v42, %v2366_v35  ;;  %v1220_v51 = vrot.slane %v1218_v44, 5  ;;  %v1228_v40 = vshll.u32 %v754_v32, 16  ;;  %v1207_v53 = vsel %vm11430_vm7, %v1202_v45, %v1206_v21 }
  0x84   :  { %v9325_v54 = vcombine.low %v2364_v39, %v2367_v50  ;;  %v1215_v55 = vor.u32 %v1214_v22, %v1211_v47  ;;  %v1224_v61 = vrot.slane %v1222_v31, 4  ;;  %v9228_v9 = vcombine.low %v1197_v48, %v1207_v53  ;;  %v761_v48 = vld [vmem:[%s16689_s0 + $0x108] sm:$0xf] }
  0x85   :  { %v1230_v14 = vrot.slane %v1228_v40, 5  ;;  %v9293_v41 = vrot.slane %v2135_v36, 9  ;;  %v2370_v49 = vrot.slane %v753_v29, 5  ;;  %v2373_v3 = vrot.slane %v754_v32, 5 }
  0x86   :  { %10674 = vmatprep.mubr.msk.bf16.mxu0 %vm247_vm1, %v9325_v54  ;;  %v1216_v19 = vrot.slane %v1215_v55, 4  ;;  %v1225_v2 = vor.u32 %v1224_v61, %v1220_v51  ;;  %v1233_v60 = vshrl.u32 %v755_v26, 16  ;;  %10608 = vmatprep.mubr.msk.bf16.mxu1 %vm247_vm1, %v9228_v9  ;;  %v1236_v6 = vshll.u32 %v755_v26, 16  ;;  %v763_v9 = vld [vmem:[%s16689_s0 + $0x110] sm:$0x1] }
  0x87   :  { %v2371_v4 = vsel %vm11408_vm6, %v9293_v41, %v2370_v49  ;;  %v2372_v5 = vrot.slane %v2370_v49, 4  ;;  %v1242_v8 = vshll.u32 %v756_v24, 16  ;;  %v1246_v11 = vshrl.u32 %v756_v24, 16 }
  0x88   :  { %v1221_v58 = vsel %vm11430_vm7, %v1216_v19, %v1220_v51  ;;  %v1226_v1 = vrot.slane %v1225_v2, 4  ;;  %v1235_v10 = vrot.slane %v1233_v60, 4  ;;  %v1238_v15 = vrot.slane %v1236_v6, 5 }
  0x89   :  { %v2374_v13 = vsel %vm11408_vm6, %v2372_v5, %v2373_v3  ;;  %v1244_v17 = vrot.slane %v1242_v8, 5  ;;  %v1252_v18 = vshll.u32 %v757_v62, 16  ;;  %v1248_v20 = vrot.slane %v1246_v11, 4  ;;  %v2138_v3 = vld [vmem:[%s16689_s0 + $0x108] sm:$0xe] }
  0x8a   :  { %v1231_v46 = vsel %vm11430_vm7, %v1226_v1, %v1230_v14  ;;  %v9326_v52 = vcombine.low %v2371_v4, %v2374_v13  ;;  %v9294_v23 = vrot.slane %v2136_v57, 9  ;;  %v1239_v59 = vor.u32 %v1238_v15, %v1235_v10  ;;  %v764_v8 = vld [vmem:[%s16689_s0 + $0x114] sm:$0xf] }
  0x8b   :  { %v9229_v25 = vcombine.low %v1221_v58, %v1231_v46  ;;  %v1254_v27 = vrot.slane %v1252_v18, 5  ;;  %v2377_v29 = vrot.slane %v756_v24, 5  ;;  %v1249_v16 = vor.u32 %v1248_v20, %v1244_v17  ;;  %v762_v24 = vld [vmem:[%s16689_s0 + $0x10c] sm:$0xf]  ;;  %v766_v20 = vld [vmem:[%s16689_s0 + $0x11c] sm:$0x1] }
  0x8c   :  { %10675 = vmatmul.mubr.msk.bf16.gmra.mxu0 %vm247_vm1, %v9326_v52  ;;  %v2380_v21 = vrot.slane %v757_v62, 5  ;;  %v1257_v30 = vshrl.u32 %v758_v12, 16  ;;  %v1260_v32 = vshll.u32 %v758_v12, 16  ;;  %v1240_v35 = vrot.slane %v1239_v59, 4 }
  0x8d   :  { %10609 = vmatmul.mubr.msk.bf16.gmra.mxu1 %vm247_vm1, %v9229_v25  ;;  %v2378_v37 = vsel %vm11408_vm6, %v9294_v23, %v2377_v29  ;;  %v2379_v38 = vrot.slane %v2377_v29, 4  ;;  %v1266_v28 = vshll.u32 %v759_v33, 16  ;;  %v1250_v39 = vrot.slane %v1249_v16, 4 }
  0x8e   :  { %v1259_v42 = vrot.slane %v1257_v30, 4  ;;  %v1262_v44 = vrot.slane %v1260_v32, 5  ;;  %v1270_v45 = vshrl.u32 %v759_v33, 16  ;;  %v1245_v47 = vsel %vm11430_vm7, %v1240_v35, %v1244_v17  ;;  %v765_v17 = vld [vmem:[%s16689_s0 + $0x118] sm:$0xf] }
  0x8f   :  { %v2381_v22 = vsel %vm11408_vm6, %v2379_v38, %v2380_v21  ;;  %v1268_v31 = vrot.slane %v1266_v28, 5  ;;  %v1276_v36 = vshll.u32 %v760_v7, 16  ;;  %v1255_v50 = vsel %vm11430_vm7, %v1250_v39, %v1254_v27 }
  0x90   :  { %v9327_v51 = vcombine.low %v2378_v37, %v2381_v22  ;;  %v1263_v40 = vor.u32 %v1262_v44, %v1259_v42  ;;  %v1272_v26 = vrot.slane %v1270_v45, 4  ;;  %v9230_v53 = vcombine.low %v1245_v47, %v1255_v50  ;;  %v2139_v37 = vld [vmem:[%s16689_s0 + $0x114] sm:$0xe]  ;;  %v767_v44 = vld [vmem:[%s16689_s0 + $0x120] sm:$0xf] }
  0x91   :  { %v1278_v54 = vrot.slane %v1276_v36, 5  ;;  %v9295_v55 = vrot.slane %v2137_v34, 9  ;;  %v2384_v61 = vrot.slane %v759_v33, 5  ;;  %v2387_v63 = vrot.slane %v760_v7, 5  ;;  %v768_v45 = vld [vmem:[%s16689_s0 + $0x124] sm:$0xf] }
  0x92   :  { %10678 = vmatprep.mubr.msk.bf16.mxu0 %vm247_vm1, %v9327_v51  ;;  %v1264_v62 = vrot.slane %v1263_v40, 4  ;;  %v1273_v0 = vor.u32 %v1272_v26, %v1268_v31  ;;  %v1281_v14 = vshrl.u32 %v761_v48, 16  ;;  %10612 = vmatprep.mubr.msk.bf16.mxu1 %vm247_vm1, %v9230_v53  ;;  %v1284_v19 = vshll.u32 %v761_v48, 16  ;;  %v769_v26 = vld [vmem:[%s16689_s0 + $0x128] sm:$0x1] }
  0x93   :  { %v2385_v41 = vsel %vm11408_vm6, %v9295_v55, %v2384_v61  ;;  %v2386_v49 = vrot.slane %v2384_v61, 4  ;;  %v1290_v2 = vshll.u32 %v762_v24, 16  ;;  %v1294_v6 = vshrl.u32 %v762_v24, 16  ;;  %v2140_v61 = vld [vmem:[%s16689_s0 + $0x120] sm:$0xe] }
  0x94   :  { %v1269_v60 = vsel %vm11430_vm7, %v1264_v62, %v1268_v31  ;;  %v1274_v4 = vrot.slane %v1273_v0, 4  ;;  %v1283_v5 = vrot.slane %v1281_v14, 4  ;;  %v1286_v58 = vrot.slane %v1284_v19, 5  ;;  %v770_v14 = vld [vmem:[%s16689_s0 + $0x12c] sm:$0xf] }
  0x95   :  { %v2388_v57 = vsel %vm11408_vm6, %v2386_v49, %v2387_v63  ;;  %v1292_v1 = vrot.slane %v1290_v2, 5  ;;  %v1300_v10 = vshll.u32 %v763_v9, 16  ;;  %v1296_v13 = vrot.slane %v1294_v6, 4 }
  0x96   :  { %v1279_v11 = vsel %vm11430_vm7, %v1274_v4, %v1278_v54  ;;  %v9328_v12 = vcombine.low %v2385_v41, %v2388_v57  ;;  %v9296_v15 = vrot.slane %v2138_v3, 9  ;;  %v1287_v33 = vor.u32 %v1286_v58, %v1283_v5 }
  0x97   :  { %v9231_v18 = vcombine.low %v1269_v60, %v1279_v11  ;;  %v1302_v46 = vrot.slane %v1300_v10, 5  ;;  %v2391_v52 = vrot.slane %v762_v24, 5  ;;  %v1297_v23 = vor.u32 %v1296_v13, %v1292_v1 }
  0x98   :  { %10679 = vmatmul.mubr.msk.bf16.gmra.mxu0 %vm247_vm1, %v9328_v12  ;;  %v2394_v25 = vrot.slane %v763_v9, 5  ;;  %v1305_v59 = vshrl.u32 %v764_v8, 16  ;;  %v1308_v27 = vshll.u32 %v764_v8, 16  ;;  %v1288_v29 = vrot.slane %v1287_v33, 4 }
  0x99   :  { %10613 = vmatmul.mubr.msk.bf16.gmra.mxu1 %vm247_vm1, %v9231_v18  ;;  %v2392_v7 = vsel %vm11408_vm6, %v9296_v15, %v2391_v52  ;;  %v2393_v16 = vrot.slane %v2391_v52, 4  ;;  %v1314_v21 = vshll.u32 %v765_v17, 16  ;;  %v1298_v30 = vrot.slane %v1297_v23, 4  ;;  %v772_v15 = vld [vmem:[%s16689_s0 + $0x134] sm:$0x1] }
  0x9a   :  { %v1307_v32 = vrot.slane %v1305_v59, 4  ;;  %v1310_v34 = vrot.slane %v1308_v27, 5  ;;  %v1318_v35 = vshrl.u32 %v765_v17, 16  ;;  %v1293_v38 = vsel %vm11430_vm7, %v1288_v29, %v1292_v1  ;;  %v771_v1 = vld [vmem:[%s16689_s0 + $0x130] sm:$0xf] }
  0x9b   :  { %v2395_v28 = vsel %vm11408_vm6, %v2393_v16, %v2394_v25  ;;  %v1316_v39 = vrot.slane %v1314_v21, 5  ;;  %v1324_v42 = vshll.u32 %v766_v20, 16  ;;  %v1303_v47 = vsel %vm11430_vm7, %v1298_v30, %v1302_v46  ;;  %v2141_v16 = vld [vmem:[%s16689_s0 + $0x12c] sm:$0xe] }
  0x9c   :  { %v9329_v22 = vcombine.low %v2392_v7, %v2395_v28  ;;  %v1311_v31 = vor.u32 %v1310_v34, %v1307_v32  ;;  %v1320_v36 = vrot.slane %v1318_v35, 4  ;;  %v9232_v48 = vcombine.low %v1293_v38, %v1303_v47  ;;  %v773_v35 = vld [vmem:[%s16689_s0 + $0x138] sm:$0xf] }
  0x9d   :  { %v1326_v50 = vrot.slane %v1324_v42, 5  ;;  %v9297_v51 = vrot.slane %v2139_v37, 9  ;;  %v2398_v40 = vrot.slane %v765_v17, 5  ;;  %v2401_v54 = vrot.slane %v766_v20, 5  ;;  %v774_v42 = vld [vmem:[%s16689_s0 + $0x13c] sm:$0xf] }
  0x9e   :  { %10682 = vmatprep.mubr.msk.bf16.mxu0 %vm247_vm1, %v9329_v22  ;;  %v1312_v24 = vrot.slane %v1311_v31, 4  ;;  %v1321_v53 = vor.u32 %v1320_v36, %v1316_v39  ;;  %v1329_v55 = vshrl.u32 %v767_v44, 16  ;;  %10616 = vmatprep.mubr.msk.bf16.mxu1 %vm247_vm1, %v9232_v48  ;;  %v1332_v63 = vshll.u32 %v767_v44, 16  ;;  %v775_v31 = vld [vmem:[%s16689_s0 + $0x140] sm:$0x1] }
  0x9f   :  { %v2399_v62 = vsel %vm11408_vm6, %v9297_v51, %v2398_v40  ;;  %v2400_v0 = vrot.slane %v2398_v40, 4  ;;  %v1338_v9 = vshll.u32 %v768_v45, 16  ;;  %v1342_v2 = vshrl.u32 %v768_v45, 16  ;;  %v2142_v40 = vld [vmem:[%s16689_s0 + $0x138] sm:$0xe] }
  0xa0   :  { %v1317_v41 = vsel %vm11430_vm7, %v1312_v24, %v1316_v39  ;;  %v1322_v49 = vrot.slane %v1321_v53, 4  ;;  %v1331_v19 = vrot.slane %v1329_v55, 4  ;;  %v1334_v60 = vrot.slane %v1332_v63, 5 }
  0xa1   :  { %v2402_v3 = vsel %vm11408_vm6, %v2400_v0, %v2401_v54  ;;  %v1340_v4 = vrot.slane %v1338_v9, 5  ;;  %v1348_v5 = vshll.u32 %v769_v26, 16  ;;  %v1344_v57 = vrot.slane %v1342_v2, 4 }
  0xa2   :  { %v1327_v6 = vsel %vm11430_vm7, %v1322_v49, %v1326_v50  ;;  %v9330_v8 = vcombine.low %v2399_v62, %v2402_v3  ;;  %v9298_v58 = vrot.slane %v2140_v61, 9  ;;  %v1335_v11 = vor.u32 %v1334_v60, %v1331_v19  ;;  %v776_v49 = vld [vmem:[%s16689_s0 + $0x144] sm:$0xf] }
  0xa3   :  { %v9233_v10 = vcombine.low %v1317_v41, %v1327_v6  ;;  %v1350_v12 = vrot.slane %v1348_v5, 5  ;;  %v2405_v13 = vrot.slane %v768_v45, 5  ;;  %v1345_v17 = vor.u32 %v1344_v57, %v1340_v4 }
  0xa4   :  { %10683 = vmatmul.mubr.msk.bf16.gmra.mxu0 %vm247_vm1, %v9330_v8  ;;  %v2408_v18 = vrot.slane %v769_v26, 5  ;;  %v1353_v33 = vshrl.u32 %v770_v14, 16  ;;  %v1356_v46 = vshll.u32 %v770_v14, 16  ;;  %v1336_v52 = vrot.slane %v1335_v11, 4 }
  0xa5   :  { %10617 = vmatmul.mubr.msk.bf16.gmra.mxu1 %vm247_vm1, %v9233_v10  ;;  %v2406_v20 = vsel %vm11408_vm6, %v9298_v58, %v2405_v13  ;;  %v2407_v23 = vrot.slane %v2405_v13, 4  ;;  %v1362_v25 = vshll.u32 %v771_v1, 16  ;;  %v1346_v59 = vrot.slane %v1345_v17, 4  ;;  %v778_v10 = vld [vmem:[%s16689_s0 + $0x14c] sm:$0x1] }
  0xa6   :  { %v1355_v27 = vrot.slane %v1353_v33, 4  ;;  %v1358_v29 = vrot.slane %v1356_v46, 5  ;;  %v1366_v7 = vshrl.u32 %v771_v1, 16  ;;  %v1341_v21 = vsel %vm11430_vm7, %v1336_v52, %v1340_v4  ;;  %v777_v4 = vld [vmem:[%s16689_s0 + $0x148] sm:$0xf] }
  0xa7   :  { %v2409_v30 = vsel %vm11408_vm6, %v2407_v23, %v2408_v18  ;;  %v1364_v32 = vrot.slane %v1362_v25, 5  ;;  %v1372_v34 = vshll.u32 %v772_v15, 16  ;;  %v1351_v37 = vsel %vm11430_vm7, %v1346_v59, %v1350_v12  ;;  %v2143_v33 = vld [vmem:[%s16689_s0 + $0x144] sm:$0xe]  ;;  %v779_v25 = vld [vmem:[%s16689_s0 + $0x150] sm:$0xf] }
  0xa8   :  { %v9331_v38 = vcombine.low %v2406_v20, %v2409_v30  ;;  %v1359_v28 = vor.u32 %v1358_v29, %v1355_v27  ;;  %v1368_v39 = vrot.slane %v1366_v7, 4  ;;  %v9234_v44 = vcombine.low %v1341_v21, %v1351_v37 }
  0xa9   :  { %v1374_v45 = vrot.slane %v1372_v34, 5  ;;  %v9299_v47 = vrot.slane %v2141_v16, 9  ;;  %v2412_v22 = vrot.slane %v771_v1, 5  ;;  %v2415_v50 = vrot.slane %v772_v15, 5  ;;  %v780_v34 = vld [vmem:[%s16689_s0 + $0x154] sm:$0xf] }
  0xaa   :  { %10686 = vmatprep.mubr.msk.bf16.mxu0 %vm247_vm1, %v9331_v38  ;;  %v1360_v36 = vrot.slane %v1359_v28, 4  ;;  %v1369_v48 = vor.u32 %v1368_v39, %v1364_v32  ;;  %v1377_v51 = vshrl.u32 %v773_v35, 16  ;;  %10620 = vmatprep.mubr.msk.bf16.mxu1 %vm247_vm1, %v9234_v44  ;;  %v1380_v53 = vshll.u32 %v773_v35, 16  ;;  %v781_v35 = vld [vmem:[%s16689_s0 + $0x158] sm:$0x1] }
  0xab   :  { %v2413_v26 = vsel %vm11408_vm6, %v9299_v47, %v2412_v22  ;;  %v2414_v24 = vrot.slane %v2412_v22, 4  ;;  %v1386_v54 = vshll.u32 %v774_v42, 16  ;;  %v1390_v0 = vshrl.u32 %v774_v42, 16 }
  0xac   :  { %v1365_v55 = vsel %vm11430_vm7, %v1360_v36, %v1364_v32  ;;  %v1370_v61 = vrot.slane %v1369_v48, 4  ;;  %v1379_v62 = vrot.slane %v1377_v51, 4  ;;  %v1382_v9 = vrot.slane %v1380_v53, 5 }
  0xad   :  { %v2416_v63 = vsel %vm11408_vm6, %v2414_v24, %v2415_v50  ;;  %v1388_v14 = vrot.slane %v1386_v54, 5  ;;  %v1396_v41 = vshll.u32 %v775_v31, 16  ;;  %v1392_v3 = vrot.slane %v1390_v0, 4 }
  0xae   :  { %v1375_v19 = vsel %vm11430_vm7, %v1370_v61, %v1374_v45  ;;  %v9332_v2 = vcombine.low %v2413_v26, %v2416_v63  ;;  %v9300_v60 = vrot.slane %v2142_v40, 9  ;;  %v1383_v6 = vor.u32 %v1382_v9, %v1379_v62  ;;  %v782_v62 = vld [vmem:[%s16689_s0 + $0x15c] sm:$0xf] }
  0xaf   :  { %v9235_v5 = vcombine.low %v1365_v55, %v1375_v19  ;;  %v1398_v8 = vrot.slane %v1396_v41, 5  ;;  %v2419_v57 = vrot.slane %v774_v42, 5  ;;  %v1393_v58 = vor.u32 %v1392_v3, %v1388_v14  ;;  %v2144_v42 = vld [vmem:[%s16689_s0 + $0x150] sm:$0xe]  ;;  %v783_v41 = vld [vmem:[%s16689_s0 + $0x160] sm:$0xf] }
  0xb0   :  { %10687 = vmatmul.mubr.msk.bf16.gmra.mxu0 %vm247_vm1, %v9332_v2  ;;  %v2422_v1 = vrot.slane %v775_v31, 5  ;;  %v1401_v11 = vshrl.u32 %v776_v49, 16  ;;  %v1404_v12 = vshll.u32 %v776_v49, 16  ;;  %v1384_v13 = vrot.slane %v1383_v6, 4 }
  0xb1   :  { %10621 = vmatmul.mubr.msk.bf16.gmra.mxu1 %vm247_vm1, %v9235_v5  ;;  %v2420_v15 = vsel %vm11408_vm6, %v9300_v60, %v2419_v57  ;;  %v2421_v17 = vrot.slane %v2419_v57, 4  ;;  %v1410_v18 = vshll.u32 %v777_v4, 16  ;;  %v1394_v46 = vrot.slane %v1393_v58, 4  ;;  %v784_v5 = vld [vmem:[%s16689_s0 + $0x164] sm:$0x1] }
  0xb2   :  { %v1403_v52 = vrot.slane %v1401_v11, 4  ;;  %v1406_v20 = vrot.slane %v1404_v12, 5  ;;  %v1414_v23 = vshrl.u32 %v777_v4, 16  ;;  %v1389_v59 = vsel %vm11430_vm7, %v1384_v13, %v1388_v14  ;;  %v2145_v11 = vld [vmem:[%s16689_s0 + $0x15c] sm:$0xe] }
  0xb3   :  { %v2423_v27 = vsel %vm11408_vm6, %v2421_v17, %v2422_v1  ;;  %v1412_v29 = vrot.slane %v1410_v18, 5  ;;  %v1420_v7 = vshll.u32 %v778_v10, 16  ;;  %v1399_v16 = vsel %vm11430_vm7, %v1394_v46, %v1398_v8 }
  0xb4   :  { %v9333_v21 = vcombine.low %v2420_v15, %v2423_v27  ;;  %v1407_v30 = vor.u32 %v1406_v20, %v1403_v52  ;;  %v1416_v32 = vrot.slane %v1414_v23, 4  ;;  %v9236_v37 = vcombine.low %v1389_v59, %v1399_v16  ;;  %v785_v20 = vld [vmem:[%s16689_s0 + $0x168] sm:$0xf]  ;;  %v12161_v16 = vld [vmem:[%s16689_s0 + $0x170] sm:$0x1] }
  0xb5   :  { %v1422_v38 = vrot.slane %v1420_v7, 5  ;;  %v9301_v28 = vrot.slane %v2143_v33, 9  ;;  %v2426_v39 = vrot.slane %v777_v4, 5  ;;  %v2429_v47 = vrot.slane %v778_v10, 5  ;;  %v786_v7 = vld [vmem:[%s16689_s0 + $0x16c] sm:$0xf] }
  0xb6   :  { %10690 = vmatprep.mubr.msk.bf16.mxu0 %vm247_vm1, %v9333_v21  ;;  %v1408_v44 = vrot.slane %v1407_v30, 4  ;;  %v1417_v45 = vor.u32 %v1416_v32, %v1412_v29  ;;  %v1425_v22 = vshrl.u32 %v779_v25, 16  ;;  %10624 = vmatprep.mubr.msk.bf16.mxu1 %vm247_vm1, %v9236_v37  ;;  %v1428_v48 = vshll.u32 %v779_v25, 16 }
  0xb7   :  { %v2427_v31 = vsel %vm11408_vm6, %v9301_v28, %v2426_v39  ;;  %v2428_v36 = vrot.slane %v2426_v39, 4  ;;  %v1434_v50 = vshll.u32 %v780_v34, 16  ;;  %v1438_v24 = vshrl.u32 %v780_v34, 16 }
  0xb8   :  { %v1413_v51 = vsel %vm11430_vm7, %v1408_v44, %v1412_v29  ;;  %v1418_v40 = vrot.slane %v1417_v45, 4  ;;  %v1427_v26 = vrot.slane %v1425_v22, 4  ;;  %v1430_v54 = vrot.slane %v1428_v48, 5 }
  0xb9   :  { %v2430_v53 = vsel %vm11408_vm6, %v2428_v36, %v2429_v47  ;;  %v1436_v55 = vrot.slane %v1434_v50, 5  ;;  %v1444_v61 = vshll.u32 %v781_v35, 16  ;;  %v1440_v9 = vrot.slane %v1438_v24, 4  ;;  %v2146_v36 = vld [vmem:[%s16689_s0 + $0x168] sm:$0xe] }
  0xba   :  { %v1423_v0 = vsel %vm11430_vm7, %v1418_v40, %v1422_v38  ;;  %v9334_v63 = vcombine.low %v2427_v31, %v2430_v53  ;;  %v9302_v14 = vrot.slane %v2144_v42, 9  ;;  %v1431_v19 = vor.u32 %v1430_v54, %v1427_v26  ;;  %v788_v24 = vld [vmem:[%s16689_s0 + $0x174] sm:$0xf] }
  0xbb   :  { %v9237_v49 = vcombine.low %v1413_v51, %v1423_v0  ;;  %v1446_v2 = vrot.slane %v1444_v61, 5  ;;  %v2433_v3 = vrot.slane %v780_v34, 5  ;;  %v1441_v60 = vor.u32 %v1440_v9, %v1436_v55  ;;  %v789_v0 = vld [vmem:[%s16689_s0 + $0x178] sm:$0xf] }
  0xbc   :  { %10691 = vmatmul.mubr.msk.bf16.gmra.mxu0 %vm247_vm1, %v9334_v63  ;;  %v2436_v4 = vrot.slane %v781_v35, 5  ;;  %v1449_v6 = vshrl.u32 %v782_v62, 16  ;;  %v1452_v8 = vshll.u32 %v782_v62, 16  ;;  %v1432_v57 = vrot.slane %v1431_v19, 4 }
  0xbd   :  { %10625 = vmatmul.mubr.msk.bf16.gmra.mxu1 %vm247_vm1, %v9237_v49  ;;  %v2434_v58 = vsel %vm11408_vm6, %v9302_v14, %v2433_v3  ;;  %v2435_v1 = vrot.slane %v2433_v3, 4  ;;  %v1458_v10 = vshll.u32 %v783_v41, 16  ;;  %v1442_v12 = vrot.slane %v1441_v60, 4 }
  0xbe   :  { %v1451_v13 = vrot.slane %v1449_v6, 4  ;;  %v1454_v15 = vrot.slane %v1452_v8, 5  ;;  %v1462_v17 = vshrl.u32 %v783_v41, 16  ;;  %v1437_v18 = vsel %vm11430_vm7, %v1432_v57, %v1436_v55  ;;  %v790_v57 = vld [vmem:[%s16689_s0 + $0x17c] sm:$0x1] }
  0xbf   :  { %v2437_v33 = vsel %vm11408_vm6, %v2435_v1, %v2436_v4  ;;  %v1460_v46 = vrot.slane %v1458_v10, 5  ;;  %v1468_v52 = vshll.u32 %v784_v5, 16  ;;  %v1447_v25 = vsel %vm11430_vm7, %v1442_v12, %v1446_v2 }
  0xc0   :  { %v9335_v59 = vcombine.low %v2434_v58, %v2437_v33  ;;  %v1455_v27 = vor.u32 %v1454_v15, %v1451_v13  ;;  %v1464_v29 = vrot.slane %v1462_v17, 4  ;;  %v9238_v30 = vcombine.low %v1437_v18, %v1447_v25  ;;  %v2147_v17 = vld [vmem:[%s16689_s0 + $0x174] sm:$0xe] }
  0xc1   :  { %v1470_v32 = vrot.slane %v1468_v52, 5  ;;  %v9303_v34 = vrot.slane %v2145_v11, 9  ;;  %v2440_v35 = vrot.slane %v783_v41, 5  ;;  %v2443_v39 = vrot.slane %v784_v5, 5 }
  0xc2   :  { %10694 = vmatprep.mubr.msk.bf16.mxu0 %vm247_vm1, %v9335_v59  ;;  %v1456_v38 = vrot.slane %v1455_v27, 4  ;;  %v1465_v28 = vor.u32 %v1464_v29, %v1460_v46  ;;  %v1473_v42 = vshrl.u32 %v785_v20, 16  ;;  %10628 = vmatprep.mubr.msk.bf16.mxu1 %vm247_vm1, %v9238_v30  ;;  %v1476_v22 = vshll.u32 %v785_v20, 16 }
  0xc3   :  { %v2441_v45 = vsel %vm11408_vm6, %v9303_v34, %v2440_v35  ;;  %v2442_v47 = vrot.slane %v2440_v35, 4  ;;  %v1482_v31 = vshll.u32 %v786_v7, 16  ;;  %v1486_v26 = vshrl.u32 %v786_v7, 16 }
  0xc4   :  { %v1461_v50 = vsel %vm11430_vm7, %v1456_v38, %v1460_v46  ;;  %v1466_v51 = vrot.slane %v1465_v28, 4  ;;  %v1475_v40 = vrot.slane %v1473_v42, 4  ;;  %v1478_v55 = vrot.slane %v1476_v22, 5  ;;  %v792_v28 = vld [vmem:[%s16689_s0 + $0x184] sm:$0xf] }
  0xc5   :  { %v2444_v54 = vsel %vm11408_vm6, %v2442_v47, %v2443_v39  ;;  %v1484_v61 = vrot.slane %v1482_v31, 5  ;;  %v1492_v62 = vshll.u32 %v12161_v16, 16  ;;  %v1488_v41 = vrot.slane %v1486_v26, 4  ;;  %v12233_v39 = vld [vmem:[%s16689_s0 + $0x188] sm:$0x1] }
  0xc6   :  { %v12151_v23 = vpop.f32.mrf.mxu0  ;;  %v12163_v21 = vpop.f32.mrf.mxu1  ;;  %v1471_v9 = vsel %vm11430_vm7, %v1466_v51, %v1470_v32  ;;  %v9336_v14 = vcombine.low %v2441_v45, %v2444_v54  ;;  %v9304_v49 = vrot.slane %v2146_v36, 9  ;;  %v1479_v3 = vor.u32 %v1478_v55, %v1475_v40 }
  0xc7   :  { %v9239_v2 = vcombine.low %v1461_v50, %v1471_v9  ;;  %v1494_v60 = vrot.slane %v1492_v62, 5  ;;  %v2447_v4 = vrot.slane %v786_v7, 5  ;;  %v1489_v6 = vor.u32 %v1488_v41, %v1484_v61 }
  0xc8   :  { %v12165_v37 = vpop.f32.mrf.mxu0  ;;  %v12168_v44 = vpop.f32.mrf.mxu1  ;;  %10695 = vmatmul.mubr.msk.bf16.gmra.mxu0 %vm247_vm1, %v9336_v14  ;;  %v2450_v8 = vrot.slane %v12161_v16, 5  ;;  %v1497_v58 = vshrl.u32 %v788_v24, 16  ;;  %v1500_v1 = vshll.u32 %v788_v24, 16  ;;  %v1480_v11 = vrot.slane %v1479_v3, 4  ;;  %v791_v16 = vld [vmem:[%s16689_s0 + $0x180] sm:$0xf] }
  0xc9   :  { %10629 = vmatmul.mubr.msk.bf16.gmra.mxu1 %vm247_vm1, %v9239_v2  ;;  %v2448_v12 = vsel %vm11408_vm6, %v9304_v49, %v2447_v4  ;;  %v2449_v13 = vrot.slane %v2447_v4, 4  ;;  %v1506_v15 = vshll.u32 %v789_v0, 16  ;;  %v1490_v33 = vrot.slane %v1489_v6, 4 }
  0xca   :  { %v12176_v48 = vpop.f32.mrf.mxu0  ;;  %v12183_v53 = vpop.f32.mrf.mxu1  ;;  %v1499_v46 = vrot.slane %v1497_v58, 4  ;;  %v1502_v52 = vrot.slane %v1500_v1, 5  ;;  %v1510_v20 = vshrl.u32 %v789_v0, 16  ;;  %v1485_v59 = vsel %vm11430_vm7, %v1480_v11, %v1484_v61 }
  0xcb   :  { %v2451_v27 = vsel %vm11408_vm6, %v2449_v13, %v2450_v8  ;;  %v1508_v29 = vrot.slane %v1506_v15, 5  ;;  %v1516_v7 = vshll.u32 %v790_v57, 16  ;;  %v1495_v32 = vsel %vm11430_vm7, %v1490_v33, %v1494_v60  ;;  %v795_v15 = vld [vmem:[%s16689_s0 + $0x190] sm:$0xf] }
  0xcc   :  { %v12191_v63 = vpop.f32.mrf.mxu0  ;;  %v12195_v19 = vpop.f32.mrf.mxu1  ;;  %v9337_v34 = vcombine.low %v2448_v12, %v2451_v27  ;;  %v1503_v35 = vor.u32 %v1502_v52, %v1499_v46  ;;  %v1512_v38 = vrot.slane %v1510_v20, 4  ;;  %v9240_v45 = vcombine.low %v1485_v59, %v1495_v32 }
  0xcd   :  { %v1518_v47 = vrot.slane %v1516_v7, 5  ;;  %v9305_v22 = vrot.slane %v2147_v17, 9  ;;  %v2454_v31 = vrot.slane %v789_v0, 5  ;;  %v2457_v40 = vrot.slane %v790_v57, 5  ;;  %v2148_v0 = vld [vmem:[%s16689_s0 + $0x180] sm:$0xe] }
  0xce   :  { %v12197_v5 = vpop.f32.mrf.mxu0  ;;  %v12204_v10 = vpop.f32.mrf.mxu1  ;;  %10698 = vmatprep.mubr.msk.bf16.mxu0 %vm247_vm1, %v9337_v34  ;;  %v1504_v50 = vrot.slane %v1503_v35, 4  ;;  %v1513_v51 = vor.u32 %v1512_v38, %v1508_v29  ;;  %v1521_v26 = vshrl.u32 %v791_v16, 16  ;;  %10632 = vmatprep.mubr.msk.bf16.mxu1 %vm247_vm1, %v9240_v45  ;;  %v1524_v61 = vshll.u32 %v791_v16, 16  ;;  %v794_v57 = vld [vmem:[%s16689_s0 + $0x18c] sm:$0xf] }
  0xcf   :  { %v2455_v54 = vsel %vm11408_vm6, %v9305_v22, %v2454_v31  ;;  %v2456_v55 = vrot.slane %v2454_v31, 4  ;;  %v1530_v62 = vshll.u32 %v792_v28, 16  ;;  %v1534_v2 = vshrl.u32 %v792_v28, 16  ;;  %v796_v7 = vld [vmem:[%s16689_s0 + $0x194] sm:$0x1] }
  0xd0   :  { %v12212_v18 = vpop.f32.mrf.mxu0  ;;  %v12214_v25 = vpop.f32.mrf.mxu1  ;;  %v1509_v14 = vsel %vm11430_vm7, %v1504_v50, %v1508_v29  ;;  %v1514_v41 = vrot.slane %v1513_v51, 4  ;;  %v1523_v49 = vrot.slane %v1521_v26, 4  ;;  %v1526_v4 = vrot.slane %v1524_v61, 5  ;;  %v2149_v51 = vld [vmem:[%s16689_s0 + $0x18c] sm:$0xe] }
  0xd1   :  { %v2458_v60 = vsel %vm11408_vm6, %v2456_v55, %v2457_v40  ;;  %v1532_v6 = vrot.slane %v1530_v62, 5  ;;  %v1540_v8 = vshll.u32 %v12233_v39, 16  ;;  %v1536_v12 = vrot.slane %v1534_v2, 4  ;;  %v9502_v62 = vld [vmem:[%s16689_s0 + $0xc] sm:$0xf] }
  0xd2   :  { %v12223_v30 = vpop.f32.mrf.mxu0  ;;  %v12235_v42 = vpop.f32.mrf.mxu1  ;;  %v1519_v1 = vsel %vm11430_vm7, %v1514_v41, %v1518_v47  ;;  %v9338_v11 = vcombine.low %v2455_v54, %v2458_v60  ;;  %v9306_v13 = vrot.slane %v2148_v0, 9  ;;  %v1527_v46 = vor.u32 %v1526_v4, %v1523_v49  ;;  %v9503_v60 = vld [vmem:[%s16689_s0 + $0x10] sm:$0xf] }
  0xd3   :  { %v9241_v33 = vcombine.low %v1509_v14, %v1519_v1  ;;  %v1542_v52 = vrot.slane %v1540_v8, 5  ;;  %v2461_v20 = vrot.slane %v792_v28, 5  ;;  %v1537_v27 = vor.u32 %v1536_v12, %v1532_v6 }
  0xd4   :  { %v12237_v36 = vpop.f32.mrf.mxu0  ;;  %v12240_v24 = vpop.f32.mrf.mxu1  ;;  %10699 = vmatmul.mubr.msk.bf16.gmra.mxu0 %vm247_vm1, %v9338_v11  ;;  %v2464_v29 = vrot.slane %v12233_v39, 5  ;;  %v1545_v16 = vshrl.u32 %v794_v57, 16  ;;  %v1548_v32 = vshll.u32 %v794_v57, 16  ;;  %v1528_v35 = vrot.slane %v1527_v46, 4  ;;  %v9504_v11 = vld [vmem:[%s16689_s0 + $0x14] sm:$0x1] }
  0xd5   :  { %10633 = vmatmul.mubr.msk.bf16.gmra.mxu1 %vm247_vm1, %v9241_v33  ;;  %v2462_v38 = vsel %vm11408_vm6, %v9306_v13, %v2461_v20  ;;  %v2463_v28 = vrot.slane %v2461_v20, 4  ;;  %v1554_v45 = vshll.u32 %v795_v15, 16  ;;  %v1538_v22 = vrot.slane %v1537_v27, 4 }
  0xd6   :  { %v12248_v9 = vpop.f32.mrf.mxu0  ;;  %v12252_v3 = vpop.f32.mrf.mxu1  ;;  %v1547_v39 = vrot.slane %v1545_v16, 4  ;;  %v1550_v31 = vrot.slane %v1548_v32, 5  ;;  %v1558_v50 = vshrl.u32 %v795_v15, 16  ;;  %v1533_v26 = vsel %vm11430_vm7, %v1528_v35, %v1532_v6  ;;  %v9505_v32 = vld [vmem:[%s16689_s0 + $0x18] sm:$0xf] }
  0xd7   :  { %v2465_v54 = vsel %vm11408_vm6, %v2463_v28, %v2464_v29  ;;  %v1556_v55 = vrot.slane %v1554_v45, 5  ;;  %v1564_v61 = vshll.u32 %v796_v7, 16  ;;  %v1543_v14 = vsel %vm11430_vm7, %v1538_v22, %v1542_v52 }
  0xd8   :  { %v12260_v58 = vpop.f32.mrf.mxu0  ;;  %v12267_v17 = vpop.f32.mrf.mxu1  ;;  %v9339_v41 = vcombine.low %v2462_v38, %v2465_v54  ;;  %v1551_v49 = vor.u32 %v1550_v31, %v1547_v39  ;;  %v1560_v2 = vrot.slane %v1558_v50, 4  ;;  %v9242_v6 = vcombine.low %v1533_v26, %v1543_v14  ;;  %v12329_v26 = vld [vmem:[%s16689_s0 + $0x1c] sm:$0xf] }
  0xd9   :  { %v1566_v8 = vrot.slane %v1564_v61, 5  ;;  %v9307_v57 = vrot.slane %v2149_v51, 9  ;;  %v2468_v1 = vrot.slane %v795_v15, 5  ;;  %v2471_v46 = vrot.slane %v796_v7, 5  ;;  %16705 = vst [vmem:[#allocation3_spill] sm:$0xff] %v12329_v26 }
  0xda   :  { %v12269_v59 = vpop.f32.mrf.mxu0  ;;  %v12276_v34 = vpop.f32.mrf.mxu1  ;;  %10702 = vmatprep.mubr.msk.bf16.mxu0 %vm247_vm1, %v9339_v41  ;;  %v1552_v13 = vrot.slane %v1551_v49, 4  ;;  %v1561_v33 = vor.u32 %v1560_v2, %v1556_v55  ;;  %v3799_v52 = vshrl.u32 %v9502_v62, 16  ;;  %10636 = vmatprep.mubr.msk.bf16.mxu1 %vm247_vm1, %v9242_v6  ;;  %v3802_v29 = vshll.u32 %v9502_v62, 16  ;;  %v11146_v62 = vld [vmem:[%s16689_s0 + $0xc] sm:$0xff]   ;;  %v12341_v41 = vld [vmem:[%s16689_s0 + $0x20] sm:$0x1] }
  0xdb   :  { %v2469_v27 = vsel %vm11408_vm6, %v9307_v57, %v2468_v1  ;;  %v2470_v15 = vrot.slane %v2468_v1, 4  ;;  %v3808_v16 = vshll.u32 %v9503_v60, 16  ;;  %v3812_v45 = vshrl.u32 %v9503_v60, 16  ;;  %16706 = vst [vmem:[#allocation4_spill] sm:$0xff] %v12341_v41 }
  0xdc   :  { %v12281_v47 = vpop.f32.mrf.mxu0  ;;  %v12286_v40 = vpop.f32.mrf.mxu1  ;;  %v1557_v7 = vsel %vm11430_vm7, %v1552_v13, %v1556_v55  ;;  %v1562_v38 = vrot.slane %v1561_v33, 4  ;;  %v3801_v28 = vrot.slane %v3799_v52, 4  ;;  %v3804_v31 = vrot.slane %v3802_v29, 5  ;;  %v12355_v52 = vld [vmem:[%s16690_s2] ss:$0 sm:$0xff] }
  0xdd   :  { %v2472_v39 = vsel %vm11408_vm6, %v2470_v15, %v2471_v46  ;;  %v3810_v50 = vrot.slane %v3808_v16, 5  ;;  %v3818_v51 = vshll.u32 %v9504_v11, 16  ;;  %v3814_v14 = vrot.slane %v3812_v45, 4 }
  0xde   :  { %v12295_v0 = vpop.f32.mrf.mxu0  ;;  %v12302_v4 = vpop.f32.mrf.mxu1  ;;  %v1567_v55 = vsel %vm11430_vm7, %v1562_v38, %v1566_v8  ;;  %v9340_v61 = vcombine.low %v2469_v27, %v2472_v39  ;;  %v3805_v60 = vor.u32 %v3804_v31, %v3801_v28  ;;  %v3823_v1 = vshrl.u32 %v9505_v32, 16  ;;  %v9508_v28 = vld [vmem:[%s16689_s0 + $0x24] sm:$0xf] }
  0xdf   :  { %v9243_v2 = vcombine.low %v1557_v7, %v1567_v55  ;;  %v3820_v6 = vrot.slane %v3818_v51, 5  ;;  %v3815_v8 = vor.u32 %v3814_v14, %v3810_v50  ;;  %v3826_v11 = vshll.u32 %v9505_v32, 16  ;;  %v11147_v51 = vld [vmem:[%s16689_s0 + $0x18] sm:$0xff]  }
  0xe0   :  { %v12307_v12 = vpop.f32.mrf.mxu0  ;;  %v12310_v20 = vpop.f32.mrf.mxu1  ;;  %10703 = vmatmul.mubr.msk.bf16.gmra.mxu0 %vm247_vm1, %v9340_v61  ;;  %v3832_v13 = vshll.u32 %v12329_v26, 16  ;;  %v3806_v46 = vrot.slane %v3805_v60, 4  ;;  %v3836_v27 = vshrl.u32 %v12329_v26, 16  ;;  %v3842_v15 = vshll.u32 %v12341_v41, 16  ;;  %v9509_v61 = vld [vmem:[%s16689_s0 + $0x28] sm:$0xf] }
  0xe1   :  { %10637 = vmatmul.mubr.msk.bf16.gmra.mxu1 %vm247_vm1, %v9243_v2  ;;  %v3816_v16 = vrot.slane %v3815_v8, 4  ;;  %v3825_v32 = vrot.slane %v3823_v1, 4  ;;  %v3828_v7 = vrot.slane %v3826_v11, 5  ;;  %v12371_v31 = vadd.f32 %v12151_v23, %v12355_v52  ;;  %v11148_v8 = vld [vmem:[%s16689_s0 + $0x24] sm:$0xff]  }
  0xe2   :  { %v12318_v35 = vpop.f32.mrf.mxu0  ;;  %v12322_v22 = vpop.f32.mrf.mxu1  ;;  %10708 = vmatprep.mubr.msk.bf16.mxu1 %vm247_vm1, %v11146_v62  ;;  %v3834_v38 = vrot.slane %v3832_v13, 5  ;;  %v3811_v39 = vsel %vm11430_vm7, %v3806_v46, %v3810_v50  ;;  %v3838_v55 = vrot.slane %v3836_v27, 4  ;;  %v9510_v62 = vld [vmem:[%s16689_s0 + $0x2c] sm:$0x1]  ;;  %v12388_v23 = vadd.f32 %v12163_v21, %v12355_v52  ;;  %v11210_v21 = vld [vmem:[%s16688_s1 + $0xa] sm:$0x3] }
  0xe3   :  { %16707 = vst [vmem:[#allocation5_spill] sm:$0xff] %v12371_v31  ;;  %v3821_v50 = vsel %vm11430_vm7, %v3816_v16, %v3820_v6  ;;  %v3829_v2 = vor.u32 %v3828_v7, %v3825_v32  ;;  %v3844_v46 = vrot.slane %v3842_v15, 5  ;;  %v5663_v16 = vsel %vm344_vm0, %v11210_v21, 0 }
  0xe4   :  { %v12331_v54 = vpop.f32.mrf.mxu0  ;;  %v12343_v49 = vpop.f32.mrf.mxu1  ;;  %16708 = vst [vmem:[#allocation6_spill] sm:$0xff] %v12388_v23  ;;  %v9599_v11 = vcombine.low %v3811_v39, %v3821_v50  ;;  %v3839_v13 = vor.u32 %v3838_v55, %v3834_v38  ;;  %v12405_v32 = vadd.f32 %v12355_v52, %v12165_v37  ;;  %v12409_v7 = vadd.f32 %v12355_v52, %v12168_v44  ;;  %v11211_v55 = vld [vmem:[%s16688_s1 + $0xc] sm:$0x3] }
  0xe5   :  { %v3830_v6 = vrot.slane %v3829_v2, 4  ;;  %v6342_v50 = vsel %vm344_vm0, %v11211_v55, 0  ;;  %v3847_v2 = vshrl.u32 %v9508_v28, 16  ;;  %v3850_v21 = vshll.u32 %v9508_v28, 16 }
  0xe6   :  { %v12345_v57 = vpop.f32.mrf.mxu0  ;;  %v12349_v33 = vpop.f32.mrf.mxu1  ;;  %16709 = vst [vmem:[#allocation7_spill] sm:$0xff] %v12405_v32  ;;  %16710 = vst [vmem:[#allocation8_spill] sm:$0xff] %v12409_v7  ;;  %10774 = vmatprep.mubr.msk.bf16.mxu0 %vm247_vm1, %v9599_v11  ;;  %v3840_v39 = vrot.slane %v3839_v13, 4  ;;  %v3856_v44 = vshll.u32 %v9509_v61, 16  ;;  %v3860_v60 = vshrl.u32 %v9509_v61, 16  ;;  %v3866_v7 = vshll.u32 %v9510_v62, 16 }
  0xe7   :  { %v3835_v37 = vsel %vm11430_vm7, %v3830_v6, %v3834_v38  ;;  %v9511_v11 = vld [vmem:[%s16689_s0 + $0x30] sm:$0xf]  ;;  %v12432_v28 = vadd.f32 %v12176_v48, %v12355_v52  ;;  %v3849_v41 = vrot.slane %v3847_v2, 4  ;;  %v3852_v38 = vrot.slane %v3850_v21, 5  ;;  %v9512_v61 = vld [vmem:[%s16689_s0 + $0x34] sm:$0xf] }
  0xe8   :  { %v12359_v29 = vpop.f32.mrf.mxu0  ;;  %v12365_v45 = vpop.f32.mrf.mxu1  ;;  %v3845_v55 = vsel %vm11430_vm7, %v3840_v39, %v3844_v46  ;;  %v12440_v62 = vld [vmem:[%s16689_s0 + $0x38] sm:$0x1]  ;;  %v12446_v46 = vadd.f32 %v12183_v53, %v12355_v52  ;;  %v3858_v48 = vrot.slane %v3856_v44, 5  ;;  %v3862_v39 = vrot.slane %v3860_v60, 4  ;;  %v11149_v53 = vld [vmem:[%s16689_s0 + $0x30] sm:$0xff]  }
  0xe9   :  { %10709 = vmatmul.mubr.msk.bf16.vlgmr.msra.gmra.mxu1 %vm247_vm1, %v11147_v51  ;;  %16711 = vst [vmem:[#allocation9_spill] sm:$0xff] %v12432_v28  ;;  %16712 = vst [vmem:[#allocation10_spill] sm:$0xff] %v12440_v62  ;;  %v9600_v51 = vcombine.low %v3835_v37, %v3845_v55  ;;  %v3853_v21 = vor.u32 %v3852_v38, %v3849_v41  ;;  %v3868_v26 = vrot.slane %v3866_v7, 5  ;;  %v3871_v23 = vshrl.u32 %v9511_v11, 16  ;;  %v11150_v41 = vld [vmem:[%s16689_s0 + $0x3c] sm:$0xff]  }
  0xea   :  { %v12382_v14 = vpop.f32.mrf.mxu0  ;;  %v12394_v1 = vpop.f32.mrf.mxu1  ;;  %10839 = vmatpush3.bf16.msra.mxu1 %v5663_v16  ;;  %16713 = vst [vmem:[#allocation11_spill] sm:$0xff] %v12446_v46  ;;  %10712 = vmatprep.mubr.msk.bf16.mxu1 %vm247_vm1, %v11148_v8  ;;  %v3874_v28 = vshll.u32 %v9511_v11, 16  ;;  %v3863_v37 = vor.u32 %v3862_v39, %v3858_v48  ;;  %v3880_v16 = vshll.u32 %v9512_v61, 16  ;;  %v3884_v55 = vshrl.u32 %v9512_v61, 16  ;;  %v9515_v61 = vld [vmem:[%s16689_s0 + $0x40] sm:$0xf] }
  0xeb   :  { %10775 = vmatmul.mubr.msk.bf16.vlgmr.msra.gmra.mxu0 %vm247_vm1, %v9600_v51  ;;  %v3890_v8 = vshll.u32 %v12440_v62, 16  ;;  %v3854_v7 = vrot.slane %v3853_v21, 4  ;;  %v3873_v44 = vrot.slane %v3871_v23, 4  ;;  %v9514_v51 = vld [vmem:[%s16689_s0 + $0x3c] sm:$0xf]  ;;  %v12483_v21 = vadd.f32 %v12355_v52, %v12195_v19 }
  0xec   :  { %v12397_v43 = vpop.f32.mrf.mxu0  ;;  %v12411_v15 = vpop.f32.mrf.mxu1  ;;  %10905 = vmatpush3.bf16.msra.mxu0 %v6342_v50  ;;  %v3876_v11 = vrot.slane %v3874_v28, 5  ;;  %v3864_v46 = vrot.slane %v3863_v37, 4  ;;  %v3882_v31 = vrot.slane %v3880_v16, 5  ;;  %v9516_v23 = vld [vmem:[%s16689_s0 + $0x44] sm:$0x1]  ;;  %v12479_v28 = vadd.f32 %v12355_v52, %v12191_v63 }
  0xed   :  { %16717 = vst [vmem:[#allocation15_spill] sm:$0xff] %v12483_v21  ;;  %v3859_v37 = vsel %vm11430_vm7, %v3854_v7, %v3858_v48  ;;  %v12493_v38 = vadd.f32 %v12197_v5, %v12355_v52  ;;  %v12497_v63 = vadd.f32 %v12204_v10, %v12355_v52  ;;  %v12504_v7 = vadd.f32 %v12355_v52, %v12212_v18  ;;  %v9517_v5 = vld [vmem:[%s16689_s0 + $0x48] sm:$0xf]  ;;  %v9518_v18 = vld [vmem:[%s16689_s0 + $0x4c] sm:$0xf] }
  0xee   :  { %v12418_v27 = vpop.f32.mrf.mxu0  ;;  %v12425_v13 = vpop.f32.mrf.mxu1  ;;  %16716 = vst [vmem:[#allocation14_spill] sm:$0xff] %v12479_v28  ;;  %v3877_v16 = vor.u32 %v3876_v11, %v3873_v44  ;;  %v3904_v44 = vshll.u32 %v9515_v61, 16  ;;  %v11151_v28 = vld [vmem:[%s16689_s0 + $0x48] sm:$0xff]  }
  0xef   :  { %16718 = vst [vmem:[#allocation16_spill] sm:$0xff] %v12493_v38  ;;  %16719 = vst [vmem:[#allocation17_spill] sm:$0xff] %v12497_v63  ;;  %v9521_v38 = vld [vmem:[%s16689_s0 + $0x58] sm:$0xf] }
  0xf0   :  { %v12442_v6 = vpop.f32.mrf.mxu0  ;;  %v12449_v2 = vpop.f32.mrf.mxu1  ;;  %v3878_v48 = vrot.slane %v3877_v16, 4  ;;  %16720 = vst [vmem:[#allocation18_spill] sm:$0xff] %v12504_v7  ;;  %v3906_v63 = vrot.slane %v3904_v44, 5  ;;  %v3928_v44 = vshll.u32 %v9518_v18, 16 }
  0xf1   :  { %10713 = vmatmul.mubr.msk.bf16.gmra.mxu1 %vm247_vm1, %v11149_v53  ;;  %v3898_v53 = vshll.u32 %v9514_v51, 16 }
  0xf2   :  { %v12451_v32 = vpop.f32.mrf.mxu0  ;;  %v12461_v60 = vpop.f32.mrf.mxu1  ;;  %10716 = vmatprep.mubr.msk.bf16.mxu1 %vm247_vm1, %v11150_v41  ;;  %v3914_v41 = vshll.u32 %v9516_v23, 16  ;;  %v3930_v7 = vrot.slane %v3928_v44, 5  ;;  %v12585_v44 = vadd.f32 %v12252_v3, %v12355_v52 }
  0xf3   :  { %16714 = vst [vmem:[#allocation12_spill] sm:$0xff] %v12451_v32  ;;  %16715 = vst [vmem:[#allocation13_spill] sm:$0xff] %v12461_v60  ;;  %v3886_v32 = vrot.slane %v3884_v55, 4  ;;  %v3892_v60 = vrot.slane %v3890_v8, 5  ;;  %v3869_v8 = vsel %vm11430_vm7, %v3864_v46, %v3868_v26  ;;  %v12508_v26 = vadd.f32 %v12355_v52, %v12214_v25 }
  0xf4   :  { %v12470_v39 = vpop.f32.mrf.mxu0  ;;  %v12475_v50 = vpop.f32.mrf.mxu1  ;;  %v9601_v21 = vcombine.low %v3859_v37, %v3869_v8  ;;  %v3895_v46 = vshrl.u32 %v9514_v51, 16  ;;  %v3883_v25 = vsel %vm11430_vm7, %v3878_v48, %v3882_v31  ;;  %v12526_v37 = vadd.f32 %v12223_v30, %v12355_v52  ;;  %v12531_v51 = vld [vmem:[%s16689_s0 + $0x50] sm:$0x1]  ;;  %16729 = vst [vmem:[#allocation27_spill] sm:$0xff] %v12585_v44 }
  0xf5   :  { %v3887_v62 = vor.u32 %v3886_v32, %v3882_v31  ;;  %16721 = vst [vmem:[#allocation19_spill] sm:$0xff] %v12508_v26  ;;  %16723 = vst [vmem:[#allocation21_spill] sm:$0xff] %v12531_v51  ;;  %v3900_v26 = vrot.slane %v3898_v53, 5  ;;  %v12541_v30 = vadd.f32 %v12235_v42, %v12355_v52  ;;  %v3922_v53 = vshll.u32 %v9517_v5, 16  ;;  %v11152_v42 = vld [vmem:[%s16689_s0 + $0x54] sm:$0xff]  }
  0xf6   :  { %v12487_v55 = vpop.f32.mrf.mxu0  ;;  %v12499_v19 = vpop.f32.mrf.mxu1  ;;  %10778 = vmatprep.mubr.msk.bf16.mxu0 %vm247_vm1, %v9601_v21  ;;  %16722 = vst [vmem:[#allocation20_spill] sm:$0xff] %v12526_v37  ;;  %v3897_v21 = vrot.slane %v3895_v46, 4  ;;  %v3919_v46 = vshrl.u32 %v9517_v5, 16 }
  0xf7   :  { %v3888_v32 = vrot.slane %v3887_v62, 4  ;;  %v3908_v62 = vshrl.u32 %v9515_v61, 16  ;;  %16724 = vst [vmem:[#allocation22_spill] sm:$0xff] %v12541_v30  ;;  %v12545_v61 = vadd.f32 %v12355_v52, %v12237_v36  ;;  %v3938_v30 = vshll.u32 %v12531_v51, 16 }
  0xf8   :  { %v12513_v10 = vpop.f32.mrf.mxu0  ;;  %v12519_v11 = vpop.f32.mrf.mxu1  ;;  %v3924_v37 = vrot.slane %v3922_v53, 5  ;;  %v12581_v53 = vadd.f32 %v12248_v9, %v12355_v52  ;;  %v9522_v9 = vld [vmem:[%s16689_s0 + $0x5c] sm:$0x1] }
  0xf9   :  { %v3893_v8 = vsel %vm11430_vm7, %v3888_v32, %v3892_v60  ;;  %16725 = vst [vmem:[#allocation23_spill] sm:$0xff] %v12545_v61  ;;  %v3910_v23 = vrot.slane %v3908_v62, 4  ;;  %v3901_v32 = vor.u32 %v3900_v26, %v3897_v21  ;;  %v3916_v62 = vrot.slane %v3914_v41, 5  ;;  %v9520_v26 = vld [vmem:[%s16689_s0 + $0x54] sm:$0xf]  ;;  %10717 = vmatmul.mubr.msk.bf16.gmra.mxu1 %vm247_vm1, %v11151_v28 }
  0xfa   :  { %v12533_v16 = vpop.f32.mrf.mxu0  ;;  %v12537_v31 = vpop.f32.mrf.mxu1  ;;  %v9602_v48 = vcombine.low %v3883_v25, %v3893_v8  ;;  %v3932_v8 = vshrl.u32 %v9518_v18, 16  ;;  %v3921_v61 = vrot.slane %v3919_v46, 4  ;;  %v12571_v18 = vadd.f32 %v12355_v52, %v12240_v24  ;;  %16728 = vst [vmem:[#allocation26_spill] sm:$0xff] %v12581_v53  ;;  %10720 = vmatprep.mubr.msk.bf16.mxu1 %vm247_vm1, %v11152_v42 }
  0xfb   :  { %v3911_v36 = vor.u32 %v3910_v23, %v3906_v63  ;;  %v3902_v5 = vrot.slane %v3901_v32, 4  ;;  %v12603_v42 = vadd.f32 %v12355_v52, %v12267_v17  ;;  %v3956_v17 = vshrl.u32 %v9521_v38, 16 }
  0xfc   :  { %v12550_v60 = vpop.f32.mrf.mxu0  ;;  %v12555_v25 = vpop.f32.mrf.mxu1  ;;  %10779 = vmatmul.mubr.msk.bf16.gmra.mxu0 %vm247_vm1, %v9602_v48  ;;  %16727 = vst [vmem:[#allocation25_spill] sm:$0xff] %v12571_v18  ;;  %v3934_v23 = vrot.slane %v3932_v8, 4  ;;  %v3925_v24 = vor.u32 %v3924_v37, %v3921_v61 }
  0xfd   :  { %v3912_v41 = vrot.slane %v3911_v36, 4  ;;  %v3907_v46 = vsel %vm11430_vm7, %v3902_v5, %v3906_v63  ;;  %v12594_v63 = vadd.f32 %v12355_v52, %v12260_v58  ;;  %16731 = vst [vmem:[#allocation29_spill] sm:$0xff] %v12603_v42  ;;  %v3943_v5 = vshrl.u32 %v9520_v26, 16  ;;  %v9523_v58 = vld [vmem:[%s16689_s0 + $0x60] sm:$0xf] }
  0xfe   :  { %v12562_v21 = vpop.f32.mrf.mxu0  ;;  %v12567_v48 = vpop.f32.mrf.mxu1  ;;  %v3935_v8 = vor.u32 %v3934_v23, %v3930_v7  ;;  %v3926_v61 = vrot.slane %v3925_v24, 4  ;;  %v3952_v24 = vshll.u32 %v9521_v38, 16  ;;  %v12626_v42 = vadd.f32 %v12269_v59, %v12355_v52 }
  0xff   :  { %16726 = vst [vmem:[#allocation24_spill] sm:$0xff] %v12562_v21  ;;  %v3917_v36 = vsel %vm11430_vm7, %v3912_v41, %v3916_v62  ;;  %v3940_v21 = vrot.slane %v3938_v30, 5  ;;  %16730 = vst [vmem:[#allocation28_spill] sm:$0xff] %v12594_v63  ;;  %v11153_v30 = vld [vmem:[%s16689_s0 + $0x60] sm:$0xff]   ;;  %v11154_v62 = vld [vmem:[%s16689_s0 + $0x6c] sm:$0xff]   ;;  %v3945_v44 = vrot.slane %v3943_v5, 4  ;;  %v12641_v59 = vadd.f32 %v12276_v34, %v12355_v52 }
 0x100   :  { %v12575_v32 = vpop.f32.mrf.mxu0  ;;  %v12588_v28 = vpop.f32.mrf.mxu1  ;;  %v9603_v37 = vcombine.low %v3907_v46, %v3917_v36  ;;  %v3936_v23 = vrot.slane %v3935_v8, 4  ;;  %v3946_v46 = vshll.u32 %v9520_v26, 16  ;;  %v9524_v36 = vld [vmem:[%s16689_s0 + $0x64] sm:$0xf]  ;;  %v3931_v18 = vsel %vm11430_vm7, %v3926_v61, %v3930_v7  ;;  %16734 = vst [vmem:[#allocation32_spill] sm:$0xff] %v12626_v42 }
 0x101   :  { %v3962_v8 = vshll.u32 %v9522_v9, 16  ;;  %v3954_v53 = vrot.slane %v3952_v24, 5  ;;  %16737 = vst [vmem:[#allocation35_spill] sm:$0xff] %v12641_v59  ;;  %v3967_v5 = vshrl.u32 %v9523_v58, 16  ;;  %10721 = vmatmul.mubr.msk.bf16.gmra.mxu1 %vm247_vm1, %v11153_v30  ;;  %v3976_v24 = vshll.u32 %v9524_v36, 16 }
 0x102   :  { %v12599_v3 = vpop.f32.mrf.mxu0  ;;  %v12614_v41 = vpop.f32.mrf.mxu1  ;;  %10782 = vmatprep.mubr.msk.bf16.mxu0 %vm247_vm1, %v9603_v37  ;;  %v3941_v38 = vsel %vm11430_vm7, %v3936_v23, %v3940_v21  ;;  %v3948_v63 = vrot.slane %v3946_v46, 5  ;;  %v12635_v37 = vld [vmem:[%s16689_s0 + $0x68] sm:$0x1]  ;;  %v3970_v46 = vshll.u32 %v9523_v58, 16  ;;  %10724 = vmatprep.mubr.msk.bf16.mxu1 %vm247_vm1, %v11154_v62  ;;  %v11155_v62 = vld [vmem:[%s16689_s0 + $0x78] sm:$0xff]  }
 0x103   :  { %16732 = vst [vmem:[#allocation30_spill] sm:$0xff] %v12614_v41  ;;  %v3958_v41 = vrot.slane %v3956_v17, 4  ;;  %16736 = vst [vmem:[#allocation34_spill] sm:$0xff] %v12635_v37  ;;  %v9604_v61 = vcombine.low %v3931_v18, %v3941_v38  ;;  %v3964_v9 = vrot.slane %v3962_v8, 5  ;;  %v12651_v18 = vadd.f32 %v12355_v52, %v12281_v47  ;;  %v9527_v47 = vld [vmem:[%s16689_s0 + $0x70] sm:$0xf] }
 0x104   :  { %v12619_v51 = vpop.f32.mrf.mxu0  ;;  %v12628_v26 = vpop.f32.mrf.mxu1  ;;  %v3949_v21 = vor.u32 %v3948_v63, %v3945_v44  ;;  %v3969_v34 = vrot.slane %v3967_v5, 4  ;;  %v3980_v38 = vshrl.u32 %v9524_v36, 16  ;;  %v3986_v8 = vshll.u32 %v12635_v37, 16  ;;  %v9526_v44 = vld [vmem:[%s16689_s0 + $0x6c] sm:$0xf] }
 0x105   :  { %16733 = vst [vmem:[#allocation31_spill] sm:$0xff] %v12619_v51  ;;  %16735 = vst [vmem:[#allocation33_spill] sm:$0xff] %v12628_v26  ;;  %v3959_v23 = vor.u32 %v3958_v41, %v3954_v53  ;;  %10783 = vmatmul.mubr.msk.bf16.gmra.mxu0 %vm247_vm1, %v9604_v61  ;;  %v3972_v41 = vrot.slane %v3970_v46, 5  ;;  %v3978_v61 = vrot.slane %v3976_v24, 5  ;;  %v9528_v36 = vld [vmem:[%s16689_s0 + $0x74] sm:$0x1]  ;;  %v12688_v51 = vadd.f32 %v12302_v4, %v12355_v52 }
 0x106   :  { %v12637_v7 = vpop.f32.mrf.mxu0  ;;  %v12643_v42 = vpop.f32.mrf.mxu1  ;;  %16738 = vst [vmem:[#allocation36_spill] sm:$0xff] %v12651_v18  ;;  %v3950_v30 = vrot.slane %v3949_v21, 4  ;;  %v12673_v21 = vadd.f32 %v12355_v52, %v12286_v40  ;;  %v3982_v46 = vrot.slane %v3980_v38, 4  ;;  %v3988_v38 = vrot.slane %v3986_v8, 5 }
 0x107   :  { %v3960_v58 = vrot.slane %v3959_v23, 4  ;;  %v12677_v23 = vadd.f32 %v12295_v0, %v12355_v52  ;;  %16741 = vst [vmem:[#allocation39_spill] sm:$0xff] %v12688_v51  ;;  %v3973_v40 = vor.u32 %v3972_v41, %v3969_v34  ;;  %v12694_v24 = vadd.f32 %v12355_v52, %v12307_v12  ;;  %v9530_v12 = vld [vmem:[%s16689_s0 + $0x7c] sm:$0xf] }
 0x108   :  { %v12646_v17 = vpop.f32.mrf.mxu0  ;;  %v12658_v63 = vpop.f32.mrf.mxu1  ;;  %16739 = vst [vmem:[#allocation37_spill] sm:$0xff] %v12673_v21  ;;  %v3955_v18 = vsel %vm11430_vm7, %v3950_v30, %v3954_v53  ;;  %v9529_v53 = vld [vmem:[%s16689_s0 + $0x78] sm:$0xf]  ;;  %v3994_v8 = vshll.u32 %v9526_v44, 16  ;;  %v4000_v41 = vshll.u32 %v9527_v47, 16  ;;  %v4010_v37 = vshll.u32 %v9528_v36, 16 }
 0x109   :  { %16740 = vst [vmem:[#allocation38_spill] sm:$0xff] %v12677_v23  ;;  %v3965_v26 = vsel %vm11430_vm7, %v3960_v58, %v3964_v9  ;;  %v3983_v23 = vor.u32 %v3982_v46, %v3978_v61  ;;  %16743 = vst [vmem:[#allocation41_spill] sm:$0xff] %v12694_v24  ;;  %v11156_v9 = vld [vmem:[%s16689_s0 + $0x84] sm:$0xff]   ;;  %v3974_v34 = vrot.slane %v3973_v40, 4  ;;  %v4004_v46 = vshrl.u32 %v9527_v47, 16  ;;  %10725 = vmatmul.mubr.msk.bf16.gmra.mxu1 %vm247_vm1, %v11155_v62 }
 0x10a   :  { %v12669_v5 = vpop.f32.mrf.mxu0  ;;  %v12680_v59 = vpop.f32.mrf.mxu1  ;;  %v9605_v0 = vcombine.low %v3955_v18, %v3965_v26  ;;  %v12706_v26 = vadd.f32 %v12355_v52, %v12310_v20  ;;  %v3991_v18 = vshrl.u32 %v9526_v44, 16  ;;  %v12720_v44 = vadd.f32 %v12318_v35, %v12355_v52  ;;  %v9531_v35 = vld [vmem:[%s16689_s0 + $0x80] sm:$0x1]  ;;  %10728 = vmatprep.mubr.msk.bf16.mxu1 %vm247_vm1, %v11156_v9  ;;  %v11157_v9 = vld [vmem:[%s16689_s0 + $0x90] sm:$0xff]  }
 0x10b   :  { %v3984_v58 = vrot.slane %v3983_v23, 4  ;;  %v3979_v20 = vsel %vm11430_vm7, %v3974_v34, %v3978_v61  ;;  %v12729_v47 = vadd.f32 %v12322_v22, %v12355_v52  ;;  %v4002_v36 = vrot.slane %v4000_v41, 5  ;;  %v9532_v41 = vld [vmem:[%s16689_s0 + $0x84] sm:$0xf] }
 0x10c   :  { %v12690_v21 = vpop.f32.mrf.mxu0  ;;  %v12702_v4 = vpop.f32.mrf.mxu1  ;;  %16745 = vst [vmem:[#allocation43_spill] sm:$0xff] %v12706_v26  ;;  %10786 = vmatprep.mubr.msk.bf16.mxu0 %vm247_vm1, %v9605_v0  ;;  %16746 = vst [vmem:[#allocation44_spill] sm:$0xff] %v12720_v44  ;;  %v3993_v40 = vrot.slane %v3991_v18, 4  ;;  %v3996_v26 = vrot.slane %v3994_v8, 5  ;;  %v4006_v0 = vrot.slane %v4004_v46, 4  ;;  %v4012_v18 = vrot.slane %v4010_v37, 5 }
 0x10d   :  { %16742 = vst [vmem:[#allocation40_spill] sm:$0xff] %v12690_v21  ;;  %16744 = vst [vmem:[#allocation42_spill] sm:$0xff] %v12702_v4  ;;  %v3989_v23 = vsel %vm11430_vm7, %v3984_v58, %v3988_v38  ;;  %v4015_v8 = vshrl.u32 %v9529_v53, 16  ;;  %v4018_v58 = vshll.u32 %v9529_v53, 16  ;;  %v4024_v22 = vshll.u32 %v9530_v12, 16 }
 0x10e   :  { %v12711_v30 = vpop.f32.mrf.mxu0  ;;  %v12714_v51 = vpop.f32.mrf.mxu1  ;;  %16747 = vst [vmem:[#allocation45_spill] sm:$0xff] %v12729_v47  ;;  %v9606_v62 = vcombine.low %v3979_v20, %v3989_v23  ;;  %v3997_v34 = vor.u32 %v3996_v26, %v3993_v40  ;;  %v4007_v38 = vor.u32 %v4006_v0, %v4002_v36  ;;  %v4028_v47 = vshrl.u32 %v9530_v12, 16  ;;  %v9533_v12 = vld [vmem:[%s16689_s0 + $0x88] sm:$0xf]  ;;  %v11158_v40 = vld [vmem:[%s16689_s0 + $0x9c] sm:$0xff]  }
 0x10f   :  { %v12750_v37 = vadd.f32 %v12355_v52, %v12331_v54  ;;  %v4017_v53 = vrot.slane %v4015_v8, 4  ;;  %v4034_v20 = vshll.u32 %v9531_v35, 16  ;;  %v4020_v21 = vrot.slane %v4018_v58, 5  ;;  %v9534_v54 = vld [vmem:[%s16689_s0 + $0x8c] sm:$0x1] }
 0x110   :  { %v12723_v24 = vpop.f32.mrf.mxu0  ;;  %v12735_v61 = vpop.f32.mrf.mxu1  ;;  %10787 = vmatmul.mubr.msk.bf16.gmra.mxu0 %vm247_vm1, %v9606_v62  ;;  %v3998_v26 = vrot.slane %v3997_v34, 4  ;;  %v4008_v0 = vrot.slane %v4007_v38, 4  ;;  %v4026_v62 = vrot.slane %v4024_v22, 5  ;;  %v4030_v4 = vrot.slane %v4028_v47, 4 }
 0x111   :  { %16748 = vst [vmem:[#allocation46_spill] sm:$0xff] %v12750_v37  ;;  %v12767_v35 = vadd.f32 %v12355_v52, %v12343_v49  ;;  %v12773_v37 = vadd.f32 %v12345_v57, %v12355_v52  ;;  %v4036_v38 = vrot.slane %v4034_v20, 5  ;;  %v12781_v22 = vadd.f32 %v12349_v33, %v12355_v52  ;;  %10729 = vmatmul.mubr.msk.bf16.gmra.mxu1 %vm247_vm1, %v11157_v9  ;;  %v9535_v33 = vld [vmem:[%s16689_s0 + $0x90] sm:$0xf] }
 0x112   :  { %v12737_v44 = vpop.f32.mrf.mxu0  ;;  %v12745_v46 = vpop.f32.mrf.mxu1  ;;  %v4003_v8 = vsel %vm11430_vm7, %v3998_v26, %v4002_v36  ;;  %v4013_v47 = vsel %vm11430_vm7, %v4008_v0, %v4012_v18  ;;  %v4031_v49 = vor.u32 %v4030_v4, %v4026_v62  ;;  %v12787_v36 = vadd.f32 %v12355_v52, %v12359_v29  ;;  %10732 = vmatprep.mubr.msk.bf16.mxu1 %vm247_vm1, %v11158_v40 }
 0x113   :  { %16751 = vst [vmem:[#allocation49_spill] sm:$0xff] %v12767_v35  ;;  %16752 = vst [vmem:[#allocation50_spill] sm:$0xff] %v12773_v37  ;;  %v12791_v57 = vadd.f32 %v12355_v52, %v12365_v45  ;;  %v4039_v26 = vshrl.u32 %v9532_v41, 16  ;;  %v4048_v20 = vshll.u32 %v9533_v12, 16  ;;  %v12808_v9 = vadd.f32 %v12382_v14, %v12355_v52  ;;  %v9537_v14 = vld [vmem:[%s16689_s0 + $0x98] sm:$0x1] }
 0x114   :  { %v12758_v23 = vpop.f32.mrf.mxu0  ;;  %v12763_v34 = vpop.f32.mrf.mxu1  ;;  %16753 = vst [vmem:[#allocation51_spill] sm:$0xff] %v12781_v22  ;;  %16754 = vst [vmem:[#allocation52_spill] sm:$0xff] %v12787_v36  ;;  %v4032_v29 = vrot.slane %v4031_v49, 4  ;;  %v4066_v22 = vshll.u32 %v9535_v33, 16 }
 0x115   :  { %16749 = vst [vmem:[#allocation47_spill] sm:$0xff] %v12758_v23  ;;  %16750 = vst [vmem:[#allocation48_spill] sm:$0xff] %v12763_v34  ;;  %v4021_v23 = vor.u32 %v4020_v21, %v4017_v53  ;;  %v9607_v34 = vcombine.low %v4003_v8, %v4013_v47  ;;  %v9536_v21 = vld [vmem:[%s16689_s0 + $0x94] sm:$0xf]  ;;  %v4042_v53 = vshll.u32 %v9532_v41, 16  ;;  %v4041_v0 = vrot.slane %v4039_v26, 4 }
 0x116   :  { %v12775_v58 = vpop.f32.mrf.mxu0  ;;  %v12783_v35 = vpop.f32.mrf.mxu1  ;;  %16755 = vst [vmem:[#allocation53_spill] sm:$0xff] %v12791_v57  ;;  %16756 = vst [vmem:[#allocation54_spill] sm:$0xff] %v12808_v9  ;;  %v4052_v8 = vshrl.u32 %v9533_v12, 16  ;;  %v4058_v47 = vshll.u32 %v9534_v54, 16  ;;  %v10017_v41 = vld [vmem:[%s16688_s1 + $0xe] sm:$0x3] }
 0x117   :  { %v4022_v18 = vrot.slane %v4021_v23, 4  ;;  %10790 = vmatprep.mubr.msk.bf16.mxu0 %vm247_vm1, %v9607_v34  ;;  %v4037_v23 = vsel %vm11430_vm7, %v4032_v29, %v4036_v38  ;;  %v4044_v34 = vrot.slane %v4042_v53, 5  ;;  %v4050_v49 = vrot.slane %v4048_v20, 5  ;;  %11112 = vmatprep.subr.msk.bf16.mxu1 %vm344_vm0, %v10017_v41  ;;  %v10146_v54 = vld [vmem:[%s16688_s1 + $0x10] sm:$0x3]  ;;  %v11159_v29 = vld [vmem:[%s16689_s0 + $0xa8] sm:$0xff]  }
 0x118   :  { %v12800_v4 = vpop.f32.mrf.mxu0  ;;  %v12803_v45 = vpop.f32.mrf.mxu1  ;;  %v4054_v38 = vrot.slane %v4052_v8, 4  ;;  %11113 = vmatprep.subr.msk.bf16.mxu0 %vm344_vm0, %v10146_v54  ;;  %v4063_v41 = vshrl.u32 %v9535_v33, 16  ;;  %v4072_v9 = vshll.u32 %v9536_v21, 16  ;;  %v12846_v8 = vadd.f32 %v12355_v52, %v12397_v43  ;;  %v9538_v33 = vld [vmem:[%s16689_s0 + $0x9c] sm:$0xf] }
 0x119   :  { %v4027_v40 = vsel %vm11430_vm7, %v4022_v18, %v4026_v62  ;;  %v12830_v62 = vadd.f32 %v12394_v1, %v12355_v52  ;;  %v4060_v18 = vrot.slane %v4058_v47, 5  ;;  %v4045_v20 = vor.u32 %v4044_v34, %v4041_v0  ;;  %10733 = vmatmul.mubr.msk.bf16.gmra.mxu1 %vm247_vm1, %v11159_v29 }
 0x11a   :  { %v12810_v57 = vpop.f32.mrf.mxu0  ;;  %v12822_v12 = vpop.f32.mrf.mxu1  ;;  %v9608_v26 = vcombine.low %v4027_v40, %v4037_v23  ;;  %v11160_v40 = vld [vmem:[%s16689_s0 + $0xb4] sm:$0xff]   ;;  %16760 = vst [vmem:[#allocation58_spill] sm:$0xff] %v12846_v8  ;;  %v4055_v47 = vor.u32 %v4054_v38, %v4050_v49  ;;  %v4076_v23 = vshrl.u32 %v9536_v21, 16  ;;  %v4065_v54 = vrot.slane %v4063_v41, 4 }
 0x11b   :  { %16757 = vst [vmem:[#allocation55_spill] sm:$0xff] %v12830_v62  ;;  %v4082_v62 = vshll.u32 %v9537_v14, 16  ;;  %v4046_v34 = vrot.slane %v4045_v20, 4  ;;  %v4074_v36 = vrot.slane %v4072_v9, 5  ;;  %v12860_v43 = vadd.f32 %v12355_v52, %v12411_v15  ;;  %10736 = vmatprep.mubr.msk.bf16.mxu1 %vm247_vm1, %v11160_v40 }
 0x11c   :  { %v12835_v53 = vpop.f32.mrf.mxu0  ;;  %v12841_v1 = vpop.f32.mrf.mxu1  ;;  %10791 = vmatmul.mubr.msk.bf16.gmra.mxu0 %vm247_vm1, %v9608_v26  ;;  %v9539_v26 = vld [vmem:[%s16689_s0 + $0xa0] sm:$0xf]  ;;  %v4056_v21 = vrot.slane %v4055_v47, 4  ;;  %v12864_v14 = vadd.f32 %v12418_v27, %v12355_v52  ;;  %v4078_v38 = vrot.slane %v4076_v23, 4  ;;  %v12876_v15 = vadd.f32 %v12425_v13, %v12355_v52  ;;  %v9541_v13 = vld [vmem:[%s16689_s0 + $0xa8] sm:$0xf] }
 0x11d   :  { %16758 = vst [vmem:[#allocation56_spill] sm:$0xff] %v12835_v53  ;;  %16759 = vst [vmem:[#allocation57_spill] sm:$0xff] %v12841_v1  ;;  %v4068_v53 = vrot.slane %v4066_v22, 5  ;;  %v9540_v22 = vld [vmem:[%s16689_s0 + $0xa4] sm:$0x1]  ;;  %v4051_v20 = vsel %vm11430_vm7, %v4046_v34, %v4050_v49  ;;  %v12880_v27 = vadd.f32 %v12355_v52, %v12442_v6  ;;  %v12889_v49 = vadd.f32 %v12355_v52, %v12449_v2 }
 0x11e   :  { %v12851_v0 = vpop.f32.mrf.mxu0  ;;  %v12856_v37 = vpop.f32.mrf.mxu1  ;;  %16761 = vst [vmem:[#allocation59_spill] sm:$0xff] %v12860_v43  ;;  %16762 = vst [vmem:[#allocation60_spill] sm:$0xff] %v12864_v14  ;;  %v4061_v29 = vsel %vm11430_vm7, %v4056_v21, %v4060_v18  ;;  %v4079_v23 = vor.u32 %v4078_v38, %v4074_v36  ;;  %v4084_v43 = vrot.slane %v4082_v62, 5  ;;  %v4087_v40 = vshrl.u32 %v9538_v33, 16  ;;  %v9542_v18 = vld [vmem:[%s16689_s0 + $0xac] sm:$0xf] }
 0x11f   :  { %16764 = vst [vmem:[#allocation62_spill] sm:$0xff] %v12876_v15  ;;  %v4069_v41 = vor.u32 %v4068_v53, %v4065_v54  ;;  %16765 = vst [vmem:[#allocation63_spill] sm:$0xff] %v12880_v27  ;;  %v9609_v6 = vcombine.low %v4051_v20, %v4061_v29  ;;  %v4090_v54 = vshll.u32 %v9538_v33, 16  ;;  %v4096_v38 = vshll.u32 %v9539_v26, 16  ;;  %v11161_v15 = vld [vmem:[%s16689_s0 + $0xc0] sm:$0xff]   ;;  %v16769_v29 = vld [vmem:[#allocation12_spill] sm:$0xff] }
 0x120   :  { %v12870_v9 = vpop.f32.mrf.mxu0  ;;  %v12883_v47 = vpop.f32.mrf.mxu1  ;;  %16766 = vst [vmem:[#allocation64_spill] sm:$0xff] %v12889_v49  ;;  %v4080_v62 = vrot.slane %v4079_v23, 4  ;;  %v4100_v2 = vshrl.u32 %v9539_v26, 16  ;;  %v4106_v49 = vshll.u32 %v9540_v22, 16  ;;  %v11162_v20 = vld [vmem:[%s16689_s0 + $0xe4] sm:$0xff]   ;;  %v12914_v23 = vadd.f32 %v16769_v29, %v12355_v52  ;;  %v16772_v14 = vld [vmem:[#allocation13_spill] sm:$0xff] }
 0x121   :  { %16763 = vst [vmem:[#allocation61_spill] sm:$0xff] %v12870_v9  ;;  %v4070_v34 = vrot.slane %v4069_v41, 4  ;;  %10794 = vmatprep.mubr.msk.bf16.mxu0 %vm247_vm1, %v9609_v6  ;;  %v4089_v26 = vrot.slane %v4087_v40, 4  ;;  %v4092_v22 = vrot.slane %v4090_v54, 5  ;;  %v12922_v1 = vadd.f32 %v16772_v14, %v12355_v52  ;;  %10737 = vmatmul.mubr.msk.bf16.gmra.mxu1 %vm247_vm1, %v11161_v15  ;;  %v9544_v15 = vld [vmem:[%s16689_s0 + $0xb4] sm:$0xf] }
 0x122   :  { %v12894_v53 = vpop.f32.mrf.mxu0  ;;  %v12899_v21 = vpop.f32.mrf.mxu1  ;;  %16770 = vst [vmem:[#allocation12_spill] sm:$0xff] %v12914_v23  ;;  %v4085_v27 = vsel %vm11430_vm7, %v4080_v62, %v4084_v43  ;;  %v4102_v6 = vrot.slane %v4100_v2, 4  ;;  %v4108_v54 = vrot.slane %v4106_v49, 5  ;;  %v4111_v23 = vshrl.u32 %v9541_v13, 16  ;;  %10740 = vmatprep.mubr.msk.bf16.mxu1 %vm247_vm1, %v11162_v20 }
 0x123   :  { %16767 = vst [vmem:[#allocation65_spill] sm:$0xff] %v12894_v53  ;;  %v4075_v33 = vsel %vm11430_vm7, %v4070_v34, %v4074_v36  ;;  %16773 = vst [vmem:[#allocation13_spill] sm:$0xff] %v12922_v1  ;;  %v9543_v36 = vld [vmem:[%s16689_s0 + $0xb0] sm:$0x1]  ;;  %v4093_v40 = vor.u32 %v4092_v22, %v4089_v26  ;;  %v4114_v43 = vshll.u32 %v9541_v13, 16  ;;  %v4120_v62 = vshll.u32 %v9542_v18, 16 }
 0x124   :  { %v12907_v41 = vpop.f32.mrf.mxu0  ;;  %v12916_v8 = vpop.f32.mrf.mxu1  ;;  %v9610_v29 = vcombine.low %v4075_v33, %v4085_v27  ;;  %v4124_v9 = vshrl.u32 %v9542_v18, 16  ;;  %v4113_v2 = vrot.slane %v4111_v23, 4  ;;  %v4130_v49 = vshll.u32 %v9543_v36, 16 }
 0x125   :  { %16768 = vst [vmem:[#allocation66_spill] sm:$0xff] %v12907_v41  ;;  %16771 = vst [vmem:[#allocation67_spill] sm:$0xff] %v12916_v8  ;;  %v4098_v41 = vrot.slane %v4096_v38, 5  ;;  %v12937_v38 = vadd.f32 %v12355_v52, %v12470_v39  ;;  %v4094_v27 = vrot.slane %v4093_v40, 4  ;;  %v4116_v26 = vrot.slane %v4114_v43, 5 }
 0x126   :  { %v12927_v34 = vpop.f32.mrf.mxu0  ;;  %v12929_v8 = vpop.f32.mrf.mxu1  ;;  %10795 = vmatmul.mubr.msk.bf16.gmra.mxu0 %vm247_vm1, %v9610_v29  ;;  %v4122_v18 = vrot.slane %v4120_v62, 5  ;;  %v4126_v22 = vrot.slane %v4124_v9, 4  ;;  %v12949_v39 = vadd.f32 %v12355_v52, %v12475_v50  ;;  %v12955_v20 = vadd.f32 %v12487_v55, %v12355_v52  ;;  %v9546_v50 = vld [vmem:[%s16689_s0 + $0xbc] sm:$0x1] }
 0x127   :  { %v4103_v53 = vor.u32 %v4102_v6, %v4098_v41  ;;  %16774 = vst [vmem:[#allocation68_spill] sm:$0xff] %v12937_v38  ;;  %v4099_v23 = vsel %vm11430_vm7, %v4094_v27, %v4098_v41  ;;  %v12959_v9 = vadd.f32 %v12499_v19, %v12355_v52  ;;  %v4117_v29 = vor.u32 %v4116_v26, %v4113_v2  ;;  %v11163_v19 = vld [vmem:[%s16689_s0 + $0xf0] sm:$0xff]  }
 0x128   :  { %v12932_v14 = vpop.f32.mrf.mxu0  ;;  %v12940_v33 = vpop.f32.mrf.mxu1  ;;  %16775 = vst [vmem:[#allocation69_spill] sm:$0xff] %v12949_v39  ;;  %v4127_v55 = vor.u32 %v4126_v22, %v4122_v18  ;;  %v4132_v40 = vrot.slane %v4130_v49, 5  ;;  %v12978_v27 = vadd.f32 %v12355_v52, %v12513_v10  ;;  %v4135_v39 = vshrl.u32 %v9544_v15, 16  ;;  %v9547_v10 = vld [vmem:[%s16689_s0 + $0xc0] sm:$0xf] }
 0x129   :  { %v4104_v13 = vrot.slane %v4103_v53, 4  ;;  %16776 = vst [vmem:[#allocation70_spill] sm:$0xff] %v12959_v9  ;;  %v9545_v53 = vld [vmem:[%s16689_s0 + $0xb8] sm:$0xf]  ;;  %v12982_v9 = vadd.f32 %v12355_v52, %v12519_v11  ;;  %v4118_v49 = vrot.slane %v4117_v29, 4  ;;  %v4138_v26 = vshll.u32 %v9544_v15, 16  ;;  %10741 = vmatmul.mubr.msk.bf16.gmra.mxu1 %vm247_vm1, %v11163_v19 }
 0x12a   :  { %v12945_v6 = vpop.f32.mrf.mxu0  ;;  %v12967_v36 = vpop.f32.mrf.mxu1  ;;  %16777 = vst [vmem:[#allocation71_spill] sm:$0xff] %v12978_v27  ;;  %v4144_v22 = vshll.u32 %v9545_v53, 16  ;;  %v12996_v52 = vld [vmem:[%s16690_s2] ss:$0 sm:$0xff]  ;;  %v4154_v29 = vshll.u32 %v9546_v50, 16 }
 0x12b   :  { %v4109_v41 = vsel %vm11430_vm7, %v4104_v13, %v4108_v54  ;;  %16778 = vst [vmem:[#allocation72_spill] sm:$0xff] %v12982_v9  ;;  %v11164_v54 = vld [vmem:[%s16689_s0 + $0xfc] sm:$0xff]   ;;  %v4128_v13 = vrot.slane %v4127_v55, 4  ;;  %v13000_v11 = vadd.f32 %v12996_v52, %v12533_v16  ;;  %v9548_v15 = vld [vmem:[%s16689_s0 + $0xc4] sm:$0xf]  ;;  %v4140_v1 = vrot.slane %v4138_v26, 5 }
 0x12c   :  { %v12974_v43 = vpop.f32.mrf.mxu0  ;;  %v9611_v62 = vcombine.low %v4099_v23, %v4109_v41  ;;  %v12987_v2 = vpop.f32.mrf.mxu1  ;;  %v4137_v23 = vrot.slane %v4135_v39, 4  ;;  %v4148_v41 = vshrl.u32 %v9545_v53, 16  ;;  %v4146_v38 = vrot.slane %v4144_v22, 5  ;;  %v9549_v16 = vld [vmem:[%s16689_s0 + $0xc8] sm:$0x1]  ;;  %10744 = vmatprep.mubr.msk.bf16.mxu1 %vm247_vm1, %v11164_v54 }
 0x12d   :  { %16779 = vst [vmem:[#allocation73_spill] sm:$0xff] %v13000_v11  ;;  %v4133_v9 = vsel %vm11430_vm7, %v4128_v13, %v4132_v40  ;;  %v13019_v50 = vadd.f32 %v12996_v52, %v12537_v31  ;;  %v4159_v26 = vshrl.u32 %v9547_v10, 16  ;;  %v4162_v22 = vshll.u32 %v9547_v10, 16 }
 0x12e   :  { %10798 = vmatprep.mubr.msk.bf16.mxu0 %vm247_vm1, %v9611_v62  ;;  %v13005_v55 = vpop.f32.mrf.mxu0  ;;  %v4123_v62 = vsel %vm11430_vm7, %v4118_v49, %v4122_v18  ;;  %v13015_v39 = vpop.f32.mrf.mxu1  ;;  %v13023_v18 = vadd.f32 %v12996_v52, %v12550_v60  ;;  %v4150_v40 = vrot.slane %v4148_v41, 4  ;;  %v4141_v13 = vor.u32 %v4140_v1, %v4137_v23  ;;  %v11165_v1 = vld [vmem:[%s16689_s0 + $0x108] sm:$0xff]  }
 0x12f   :  { %v9612_v53 = vcombine.low %v4123_v62, %v4133_v9  ;;  %16780 = vst [vmem:[#allocation74_spill] sm:$0xff] %v13019_v50  ;;  %v4168_v19 = vshll.u32 %v9548_v15, 16  ;;  %v4156_v31 = vrot.slane %v4154_v29, 5  ;;  %v4172_v62 = vshrl.u32 %v9548_v15, 16  ;;  %v16785_v29 = vld [vmem:[#allocation24_spill] sm:$0xff] }
 0x130   :  { %16781 = vst [vmem:[#allocation75_spill] sm:$0xff] %v13023_v18  ;;  %v13026_v49 = vpop.f32.mrf.mxu0  ;;  %v13028_v11 = vpop.f32.mrf.mxu1  ;;  %v4151_v9 = vor.u32 %v4150_v40, %v4146_v38  ;;  %v4178_v50 = vshll.u32 %v9549_v16, 16  ;;  %v4142_v60 = vrot.slane %v4141_v13, 4  ;;  %v4161_v41 = vrot.slane %v4159_v26, 4  ;;  %v9550_v40 = vld [vmem:[%s16689_s0 + $0xe4] sm:$0xf] }
 0x131   :  { %16782 = vst [vmem:[#allocation76_spill] sm:$0xff] %v13026_v49  ;;  %10799 = vmatmul.mubr.msk.bf16.gmra.mxu0 %vm247_vm1, %v9612_v53  ;;  %v4164_v18 = vrot.slane %v4162_v22, 5  ;;  %v4170_v54 = vrot.slane %v4168_v19, 5  ;;  %v13040_v23 = vadd.f32 %v12996_v52, %v12555_v25  ;;  %v13044_v15 = vadd.f32 %v12996_v52, %v16785_v29  ;;  %v11166_v13 = vld [vmem:[%s16689_s0 + $0x114] sm:$0xff]   ;;  %10745 = vmatmul.mubr.msk.bf16.gmra.mxu1 %vm247_vm1, %v11165_v1 }
 0x132   :  { %v13031_v27 = vpop.f32.mrf.mxu0  ;;  %v13036_v10 = vpop.f32.mrf.mxu1  ;;  %v4152_v53 = vrot.slane %v4151_v9, 4  ;;  %v4174_v16 = vrot.slane %v4172_v62, 4  ;;  %v4147_v26 = vsel %vm11430_vm7, %v4142_v60, %v4146_v38  ;;  %v13056_v25 = vadd.f32 %v12996_v52, %v12567_v48  ;;  %v9551_v9 = vld [vmem:[%s16689_s0 + $0xe8] sm:$0xf]  ;;  %v9552_v62 = vld [vmem:[%s16689_s0 + $0xec] sm:$0x1]  ;;  %10748 = vmatprep.mubr.msk.bf16.mxu1 %vm247_vm1, %v11166_v13 }
 0x133   :  { %16783 = vst [vmem:[#allocation77_spill] sm:$0xff] %v13031_v27  ;;  %16784 = vst [vmem:[#allocation78_spill] sm:$0xff] %v13040_v23  ;;  %v4165_v22 = vor.u32 %v4164_v18, %v4161_v41  ;;  %v13060_v19 = vadd.f32 %v12996_v52, %v12575_v32  ;;  %v4180_v29 = vrot.slane %v4178_v50, 5  ;;  %v13072_v48 = vadd.f32 %v12996_v52, %v12588_v28  ;;  %v9553_v50 = vld [vmem:[%s16689_s0 + $0xf0] sm:$0xf]  ;;  %v16791_v1 = vld [vmem:[#allocation5_spill] sm:$0xff] }
 0x134   :  { %16786 = vst [vmem:[#allocation24_spill] sm:$0xff] %v13044_v15  ;;  %16787 = vst [vmem:[#allocation79_spill] sm:$0xff] %v13056_v25  ;;  %v4157_v38 = vsel %vm11430_vm7, %v4152_v53, %v4156_v31  ;;  %v4175_v60 = vor.u32 %v4174_v16, %v4170_v54  ;;  %v13074_v18 = vpop.f32.mrf.mxu0  ;;  %v4183_v25 = vshrl.u32 %v9550_v40, 16  ;;  %v4186_v23 = vshll.u32 %v9550_v40, 16 }
 0x135   :  { %16788 = vst [vmem:[#allocation80_spill] sm:$0xff] %v13060_v19  ;;  %16789 = vst [vmem:[#allocation81_spill] sm:$0xff] %v13072_v48  ;;  %v9613_v32 = vcombine.low %v4147_v26, %v4157_v38  ;;  %v4166_v41 = vrot.slane %v4165_v22, 4  ;;  %v13077_v19 = vpop.f32.mrf.mxu1  ;;  %v4192_v27 = vshll.u32 %v9551_v9, 16  ;;  %v4196_v49 = vshrl.u32 %v9551_v9, 16 }
 0x136   :  { %16790 = vst [vmem:[#allocation82_spill] sm:$0xff] %v13074_v18  ;;  %v4176_v15 = vrot.slane %v4175_v60, 4  ;;  %v4202_v31 = vshll.u32 %v9552_v62, 16  ;;  %v4185_v53 = vrot.slane %v4183_v25, 4  ;;  %v4188_v16 = vrot.slane %v4186_v23, 5 }
 0x137   :  { %10802 = vmatprep.mubr.msk.bf16.mxu0 %vm247_vm1, %v9613_v32  ;;  %v4171_v28 = vsel %vm11430_vm7, %v4166_v41, %v4170_v54  ;;  %v2056_v40 = vadd.f32 %v12643_v42, %v16791_v1  ;;  %v9554_v26 = vld [vmem:[%s16689_s0 + $0xf4] sm:$0xf]  ;;  %v4194_v9 = vrot.slane %v4192_v27, 5  ;;  %v4198_v62 = vrot.slane %v4196_v49, 4  ;;  %v9555_v38 = vld [vmem:[%s16689_s0 + $0xf8] sm:$0x1]  ;;  %v13096_v54 = vpop.f32.mrf.mxu0 }
 0x138   :  { %v4181_v22 = vsel %vm11430_vm7, %v4176_v15, %v4180_v29  ;;  %v4204_v13 = vrot.slane %v4202_v31, 5  ;;  %v4189_v25 = vor.u32 %v4188_v16, %v4185_v53  ;;  %v4207_v60 = vshrl.u32 %v9553_v50, 16  ;;  %v11167_v32 = vld [vmem:[%s16689_s0 + $0x120] sm:$0xff]   ;;  %v13104_v15 = vpop.f32.mrf.mxu1  ;;  %v11168_v31 = vld [vmem:[%s16689_s0 + $0x12c] sm:$0xff]   ;;  %v9556_v48 = vld [vmem:[%s16689_s0 + $0xfc] sm:$0xf] }
 0x139   :  { %v9614_v23 = vcombine.low %v4171_v28, %v4181_v22  ;;  %v13099_v42 = vadd.f32 %v12637_v7, %v2056_v40  ;;  %v4199_v27 = vor.u32 %v4198_v62, %v4194_v9  ;;  %v4210_v49 = vshll.u32 %v9553_v50, 16  ;;  %v13109_v28 = vpop.f32.mrf.mxu0  ;;  %v16794_v1 = vld [vmem:[#allocation7_spill] sm:$0xff]  ;;  %10749 = vmatmul.mubr.msk.bf16.gmra.mxu1 %vm247_vm1, %v11167_v32 }
 0x13a   :  { %v4216_v29 = vshll.u32 %v9554_v26, 16  ;;  %v4220_v41 = vshrl.u32 %v9554_v26, 16  ;;  %16793 = vst [vmem:[#allocation83_spill] sm:$0xff] %v13109_v28  ;;  %v4190_v7 = vrot.slane %v4189_v25, 4  ;;  %v4209_v53 = vrot.slane %v4207_v60, 4  ;;  %v13114_v22 = vpop.f32.mrf.mxu1  ;;  %v16796_v25 = vld [vmem:[#allocation9_spill] sm:$0xff]  ;;  %10752 = vmatprep.mubr.msk.bf16.mxu1 %vm247_vm1, %v11168_v31 }
 0x13b   :  { %16792 = vst [vmem:[#allocation5_spill] sm:$0xff] %v13099_v42  ;;  %10803 = vmatmul.mubr.msk.bf16.gmra.mxu0 %vm247_vm1, %v9614_v23  ;;  %v4226_v16 = vshll.u32 %v9555_v38, 16  ;;  %v2054_v40 = vadd.f32 %v12658_v63, %v16794_v1  ;;  %v4200_v62 = vrot.slane %v4199_v27, 4  ;;  %v4212_v50 = vrot.slane %v4210_v49, 5  ;;  %v13119_v18 = vpop.f32.mrf.mxu0  ;;  %v9557_v27 = vld [vmem:[%s16689_s0 + $0x100] sm:$0xf] }
 0x13c   :  { %v4218_v42 = vrot.slane %v4216_v29, 5  ;;  %v4222_v26 = vrot.slane %v4220_v41, 4  ;;  %v13123_v23 = vadd.f32 %v12996_v52, %v12599_v3  ;;  %v4195_v38 = vsel %vm11430_vm7, %v4190_v7, %v4194_v9  ;;  %v13136_v49 = vpop.f32.mrf.mxu1  ;;  %v9560_v31 = vld [vmem:[%s16689_s0 + $0x10c] sm:$0xf] }
 0x13d   :  { %v13128_v63 = vadd.f32 %v12646_v17, %v2054_v40  ;;  %v2057_v60 = vadd.f32 %v12680_v59, %v16796_v25  ;;  %v4205_v3 = vsel %vm11430_vm7, %v4200_v62, %v4204_v13  ;;  %v4213_v29 = vor.u32 %v4212_v50, %v4209_v53  ;;  %v9558_v17 = vld [vmem:[%s16689_s0 + $0x104] sm:$0x1]  ;;  %v9559_v40 = vld [vmem:[%s16689_s0 + $0x108] sm:$0xf] }
 0x13e   :  { %v4223_v41 = vor.u32 %v4222_v26, %v4218_v42  ;;  %v4228_v9 = vrot.slane %v4226_v16, 5  ;;  %v9615_v59 = vcombine.low %v4195_v38, %v4205_v3  ;;  %v4231_v1 = vshrl.u32 %v9556_v48, 16  ;;  %v16798_v13 = vld [vmem:[#allocation30_spill] sm:$0xff]  ;;  %v13157_v26 = vpop.f32.mrf.mxu0  ;;  %v13163_v3 = vpop.f32.mrf.mxu1 }
 0x13f   :  { %16795 = vst [vmem:[#allocation7_spill] sm:$0xff] %v13128_v63  ;;  %v13145_v7 = vadd.f32 %v12669_v5, %v2057_v60  ;;  %v4234_v32 = vshll.u32 %v9556_v48, 16  ;;  %v13152_v53 = vadd.f32 %v12996_v52, %v16798_v13  ;;  %v4214_v16 = vrot.slane %v4213_v29, 4  ;;  %16800 = vst [vmem:[#allocation84_spill] sm:$0xff] %v13157_v26  ;;  %v11169_v60 = vld [vmem:[%s16689_s0 + $0x138] sm:$0xff]  }
 0x140   :  { %v4224_v62 = vrot.slane %v4223_v41, 4  ;;  %v4240_v50 = vshll.u32 %v9557_v27, 16  ;;  %10806 = vmatprep.mubr.msk.bf16.mxu0 %vm247_vm1, %v9615_v59  ;;  %v4233_v5 = vrot.slane %v4231_v1, 4  ;;  %v4244_v38 = vshrl.u32 %v9557_v27, 16  ;;  %v9561_v27 = vld [vmem:[%s16689_s0 + $0x110] sm:$0x1] }
 0x141   :  { %16797 = vst [vmem:[#allocation9_spill] sm:$0xff] %v13145_v7  ;;  %16799 = vst [vmem:[#allocation30_spill] sm:$0xff] %v13152_v53  ;;  %v4236_v48 = vrot.slane %v4234_v32, 5  ;;  %v4250_v25 = vshll.u32 %v9558_v17, 16  ;;  %v4219_v29 = vsel %vm11430_vm7, %v4214_v16, %v4218_v42  ;;  %v16801_v7 = vld [vmem:[#allocation16_spill] sm:$0xff]  ;;  %v11170_v17 = vld [vmem:[%s16689_s0 + $0x144] sm:$0xff]   ;;  %10753 = vmatmul.mubr.msk.bf16.gmra.mxu1 %vm247_vm1, %v11169_v60 }
 0x142   :  { %v4229_v41 = vsel %vm11430_vm7, %v4224_v62, %v4228_v9  ;;  %v4242_v13 = vrot.slane %v4240_v50, 5  ;;  %v2060_v59 = vadd.f32 %v12714_v51, %v16801_v7  ;;  %v4246_v63 = vrot.slane %v4244_v38, 4  ;;  %v13180_v50 = vpop.f32.mrf.mxu0  ;;  %10756 = vmatprep.mubr.msk.bf16.mxu1 %vm247_vm1, %v11170_v17 }
 0x143   :  { %v9616_v1 = vcombine.low %v4219_v29, %v4229_v41  ;;  %v4237_v32 = vor.u32 %v4236_v48, %v4233_v5  ;;  %v4252_v53 = vrot.slane %v4250_v25, 5  ;;  %v4255_v9 = vshrl.u32 %v9559_v40, 16  ;;  %v13184_v29 = vpop.f32.mrf.mxu1 }
 0x144   :  { %v13178_v42 = vadd.f32 %v12711_v30, %v2060_v59  ;;  %v4258_v16 = vshll.u32 %v9559_v40, 16  ;;  %v4264_v62 = vshll.u32 %v9560_v31, 16  ;;  %v4247_v7 = vor.u32 %v4246_v63, %v4242_v13  ;;  %v16803_v30 = vld [vmem:[#allocation18_spill] sm:$0xff]  ;;  %v9562_v40 = vld [vmem:[%s16689_s0 + $0x114] sm:$0xf]  ;;  %v13192_v41 = vpop.f32.mrf.mxu0  ;;  %v16804_v63 = vld [vmem:[#allocation31_spill] sm:$0xff] }
 0x145   :  { %10807 = vmatmul.mubr.msk.bf16.gmra.mxu0 %vm247_vm1, %v9616_v1  ;;  %v4238_v51 = vrot.slane %v4237_v32, 4  ;;  %v4268_v26 = vshrl.u32 %v9560_v31, 16  ;;  %v4274_v28 = vshll.u32 %v9561_v27, 16  ;;  %v4257_v5 = vrot.slane %v4255_v9, 4  ;;  %v13200_v1 = vpop.f32.mrf.mxu1 }
 0x146   :  { %16802 = vst [vmem:[#allocation16_spill] sm:$0xff] %v13178_v42  ;;  %v4260_v48 = vrot.slane %v4258_v16, 5  ;;  %v4266_v38 = vrot.slane %v4264_v62, 5  ;;  %v2058_v25 = vadd.f32 %v12735_v61, %v16803_v30  ;;  %v13196_v31 = vadd.f32 %v12996_v52, %v16804_v63  ;;  %v16806_v16 = vld [vmem:[#allocation20_spill] sm:$0xff]  ;;  %v9563_v62 = vld [vmem:[%s16689_s0 + $0x118] sm:$0xf]  ;;  %v13210_v30 = vpop.f32.mrf.mxu0 }
 0x147   :  { %v4243_v60 = vsel %vm11430_vm7, %v4238_v51, %v4242_v13  ;;  %v4248_v59 = vrot.slane %v4247_v7, 4  ;;  %v4270_v27 = vrot.slane %v4268_v26, 4  ;;  %v4276_v32 = vrot.slane %v4274_v28, 5  ;;  %v9564_v28 = vld [vmem:[%s16689_s0 + $0x11c] sm:$0x1]  ;;  %v13220_v7 = vpop.f32.mrf.mxu1 }
 0x148   :  { %v4261_v61 = vor.u32 %v4260_v48, %v4257_v5  ;;  %v13203_v9 = vadd.f32 %v12723_v24, %v2058_v25  ;;  %v2061_v17 = vadd.f32 %v12745_v46, %v16806_v16  ;;  %v4279_v51 = vshrl.u32 %v9562_v40, 16  ;;  %v11171_v46 = vld [vmem:[%s16689_s0 + $0x150] sm:$0xff]   ;;  %v16807_v5 = vld [vmem:[#allocation33_spill] sm:$0xff] }
 0x149   :  { %v4253_v13 = vsel %vm11430_vm7, %v4248_v59, %v4252_v53  ;;  %v4271_v26 = vor.u32 %v4270_v27, %v4266_v38  ;;  %v4282_v24 = vshll.u32 %v9562_v40, 16  ;;  %v13224_v48 = vadd.f32 %v12996_v52, %v16807_v5  ;;  %v9565_v59 = vld [vmem:[%s16689_s0 + $0x120] sm:$0xf]  ;;  %v13243_v5 = vpop.f32.mrf.mxu0  ;;  %10757 = vmatmul.mubr.msk.bf16.gmra.mxu1 %vm247_vm1, %v11171_v46  ;;  %v16814_v46 = vld [vmem:[#allocation28_spill] sm:$0xff] }
 0x14a   :  { %16805 = vst [vmem:[#allocation18_spill] sm:$0xff] %v13203_v9  ;;  %v9617_v25 = vcombine.low %v4243_v60, %v4253_v13  ;;  %v4262_v63 = vrot.slane %v4261_v61, 4  ;;  %v13227_v53 = vadd.f32 %v12737_v44, %v2061_v17  ;;  %v11172_v40 = vld [vmem:[%s16689_s0 + $0x15c] sm:$0xff]   ;;  %v4281_v16 = vrot.slane %v4279_v51, 4  ;;  %v9566_v13 = vld [vmem:[%s16689_s0 + $0x124] sm:$0xf] }
 0x14b   :  { %16808 = vst [vmem:[#allocation31_spill] sm:$0xff] %v13224_v48  ;;  %v4272_v27 = vrot.slane %v4271_v26, 4  ;;  %v4284_v9 = vrot.slane %v4282_v24, 5  ;;  %v4288_v42 = vshll.u32 %v9563_v62, 16  ;;  %v4292_v60 = vshrl.u32 %v9563_v62, 16  ;;  %v16810_v61 = vld [vmem:[#allocation26_spill] sm:$0xff]  ;;  %10760 = vmatprep.mubr.msk.bf16.mxu1 %vm247_vm1, %v11172_v40 }
 0x14c   :  { %16809 = vst [vmem:[#allocation20_spill] sm:$0xff] %v13227_v53  ;;  %10810 = vmatprep.mubr.msk.bf16.mxu0 %vm247_vm1, %v9617_v25  ;;  %v4267_v52 = vsel %vm11430_vm7, %v4262_v63, %v4266_v38  ;;  %v4298_v44 = vshll.u32 %v9564_v28, 16  ;;  %v2064_v17 = vadd.f32 %v12783_v35, %v16810_v61  ;;  %16811 = vst [vmem:[#allocation33_spill] sm:$0xff] %v13243_v5  ;;  %v9567_v38 = vld [vmem:[%s16689_s0 + $0x128] sm:$0x1]  ;;  %v4303_v62 = vshrl.u32 %v9565_v59, 16  ;;  %v13251_v28 = vpop.f32.mrf.mxu1 }
 0x14d   :  { %v4277_v26 = vsel %vm11430_vm7, %v4272_v27, %v4276_v32  ;;  %v4285_v51 = vor.u32 %v4284_v9, %v4281_v16  ;;  %v4290_v24 = vrot.slane %v4288_v42, 5  ;;  %16812 = vst [vmem:[#allocation26_spill] sm:$0xff] %v13251_v28  ;;  %v4294_v25 = vrot.slane %v4292_v60, 4  ;;  %v16815_v60 = vld [vmem:[#allocation14_spill] sm:$0xff] }
 0x14e   :  { %v9618_v35 = vcombine.low %v4267_v52, %v4277_v26  ;;  %v4300_v63 = vrot.slane %v4298_v44, 5  ;;  %v13254_v61 = vadd.f32 %v12775_v58, %v2064_v17  ;;  %v4305_v9 = vrot.slane %v4303_v62, 4  ;;  %v9568_v52 = vld [vmem:[%s16689_s0 + $0x12c] sm:$0xf]  ;;  %v13263_v58 = vpop.f32.mrf.mxu0  ;;  %v16816_v40 = vld [vmem:[#allocation42_spill] sm:$0xff]  ;;  %v16817_v26 = vld [vmem:[#allocation32_spill] sm:$0xff] }
 0x14f   :  { %v4286_v32 = vrot.slane %v4285_v51, 4  ;;  %v4306_v42 = vshll.u32 %v9565_v59, 16  ;;  %v4312_v27 = vshll.u32 %v9566_v13, 16  ;;  %v4295_v16 = vor.u32 %v4294_v25, %v4290_v24 }
 0x150   :  { %16813 = vst [vmem:[#allocation85_spill] sm:$0xff] %v13254_v61  ;;  %10811 = vmatmul.mubr.msk.bf16.gmra.mxu0 %vm247_vm1, %v9618_v35  ;;  %v4316_v53 = vshrl.u32 %v9566_v13, 16  ;;  %v4322_v48 = vshll.u32 %v9567_v38, 16  ;;  %v2062_v5 = vadd.f32 %v12803_v45, %v16814_v46  ;;  %v2055_v44 = vadd.f32 %v16816_v40, %v16815_v60  ;;  %v9569_v13 = vld [vmem:[%s16689_s0 + $0x130] sm:$0xf]  ;;  %v11173_v45 = vld [vmem:[%s16689_s0 + $0x168] sm:$0xff]   ;;  %v13275_v38 = vpop.f32.mrf.mxu1 }
 0x151   :  { %v4308_v17 = vrot.slane %v4306_v42, 5  ;;  %v4314_v59 = vrot.slane %v4312_v27, 5  ;;  %v2065_v51 = vadd.f32 %v12822_v12, %v16817_v26  ;;  %v4291_v62 = vsel %vm11430_vm7, %v4286_v32, %v4290_v24  ;;  %v11174_v12 = vld [vmem:[%s16689_s0 + $0x174] sm:$0xff]   ;;  %v13285_v27 = vpop.f32.mrf.mxu0  ;;  %10761 = vmatmul.mubr.msk.bf16.gmra.mxu1 %vm247_vm1, %v11173_v45  ;;  %v9572_v45 = vld [vmem:[%s16689_s0 + $0x13c] sm:$0xf] }
 0x152   :  { %v4296_v35 = vrot.slane %v4295_v16, 4  ;;  %v4318_v25 = vrot.slane %v4316_v53, 4  ;;  %v13280_v42 = vadd.f32 %v12800_v4, %v2062_v5  ;;  %v4324_v60 = vrot.slane %v4322_v48, 5  ;;  %v13290_v61 = vpop.f32.mrf.mxu1  ;;  %v9570_v4 = vld [vmem:[%s16689_s0 + $0x134] sm:$0x1]  ;;  %10764 = vmatprep.mubr.msk.bf16.mxu1 %vm247_vm1, %v11174_v12 }
 0x153   :  { %v4309_v46 = vor.u32 %v4308_v17, %v4305_v9  ;;  %v13288_v40 = vadd.f32 %v12810_v57, %v2065_v51  ;;  %v4327_v26 = vshrl.u32 %v9568_v52, 16  ;;  %v4330_v5 = vshll.u32 %v9568_v52, 16  ;;  %v9571_v48 = vld [vmem:[%s16689_s0 + $0x138] sm:$0xf]  ;;  %v13300_v9 = vpop.f32.mrf.mxu0  ;;  %v16820_v57 = vld [vmem:[#allocation40_spill] sm:$0xff] }
 0x154   :  { %16818 = vst [vmem:[#allocation28_spill] sm:$0xff] %v13280_v42  ;;  %v4301_v53 = vsel %vm11430_vm7, %v4296_v35, %v4300_v63  ;;  %v4319_v24 = vor.u32 %v4318_v25, %v4314_v59  ;;  %v4336_v32 = vshll.u32 %v9569_v13, 16  ;;  %v13303_v16 = vadd.f32 %v16820_v57, %v2055_v44  ;;  %v13306_v63 = vpop.f32.mrf.mxu1  ;;  %v16822_v57 = vld [vmem:[#allocation38_spill] sm:$0xff] }
 0x155   :  { %16819 = vst [vmem:[#allocation14_spill] sm:$0xff] %v13288_v40  ;;  %v9619_v17 = vcombine.low %v4291_v62, %v4301_v53  ;;  %v4310_v51 = vrot.slane %v4309_v46, 4  ;;  %v4329_v40 = vrot.slane %v4327_v26, 4  ;;  %v4332_v25 = vrot.slane %v4330_v5, 5  ;;  %v9573_v12 = vld [vmem:[%s16689_s0 + $0x140] sm:$0x1] }
 0x156   :  { %16821 = vst [vmem:[#allocation42_spill] sm:$0xff] %v13303_v16  ;;  %v4320_v35 = vrot.slane %v4319_v24, 4  ;;  %v4338_v52 = vrot.slane %v4336_v32, 5  ;;  %v4340_v42 = vshrl.u32 %v9569_v13, 16  ;;  %v4346_v44 = vshll.u32 %v9570_v4, 16  ;;  %v16833_v16 = vld [vmem:[#allocation65_spill] sm:$0xff] }
 0x157   :  { %10814 = vmatprep.mubr.msk.bf16.mxu0 %vm247_vm1, %v9619_v17  ;;  %v4315_v28 = vsel %vm11430_vm7, %v4310_v51, %v4314_v59  ;;  %v2068_v62 = vadd.f32 %v12856_v37, %v16822_v57  ;;  %v4351_v46 = vshrl.u32 %v9571_v48, 16  ;;  %v4333_v13 = vor.u32 %v4332_v25, %v4329_v40  ;;  %v13322_v59 = vpop.f32.mrf.mxu0  ;;  %v11175_v17 = vld [vmem:[%s16689_s0 + $0x180] sm:$0xff]   ;;  %v16826_v25 = vld [vmem:[#allocation41_spill] sm:$0xff]  ;;  %v16827_v57 = vld [vmem:[#allocation44_spill] sm:$0xff] }
 0x158   :  { %v4325_v26 = vsel %vm11430_vm7, %v4320_v35, %v4324_v60  ;;  %v4342_v53 = vrot.slane %v4340_v42, 4  ;;  %v4354_v24 = vshll.u32 %v9571_v48, 16  ;;  %16823 = vst [vmem:[#allocation32_spill] sm:$0xff] %v13322_v59  ;;  %v4348_v5 = vrot.slane %v4346_v44, 5  ;;  %v13330_v60 = vpop.f32.mrf.mxu1  ;;  %v11176_v48 = vld [vmem:[%s16689_s0 + $0x18c] sm:$0xff]  }
 0x159   :  { %v9620_v4 = vcombine.low %v4315_v28, %v4325_v26  ;;  %v13325_v37 = vadd.f32 %v12851_v0, %v2068_v62  ;;  %v4353_v32 = vrot.slane %v4351_v46, 4  ;;  %16825 = vst [vmem:[#allocation38_spill] sm:$0xff] %v13330_v60  ;;  %v4334_v42 = vrot.slane %v4333_v13, 4  ;;  %v9574_v46 = vld [vmem:[%s16689_s0 + $0x144] sm:$0xf]  ;;  %10765 = vmatmul.mubr.msk.bf16.gmra.mxu1 %vm247_vm1, %v11175_v17 }
 0x15a   :  { %v4343_v40 = vor.u32 %v4342_v53, %v4338_v52  ;;  %v4356_v51 = vrot.slane %v4354_v24, 5  ;;  %v4360_v35 = vshll.u32 %v9572_v45, 16  ;;  %v4364_v28 = vshrl.u32 %v9572_v45, 16  ;;  %v9575_v45 = vld [vmem:[%s16689_s0 + $0x148] sm:$0xf]  ;;  %10768 = vmatprep.mubr.msk.bf16.mxu1 %vm247_vm1, %v11176_v48 }
 0x15b   :  { %16824 = vst [vmem:[#allocation40_spill] sm:$0xff] %v13325_v37  ;;  %10815 = vmatmul.mubr.msk.bf16.gmra.mxu0 %vm247_vm1, %v9620_v4  ;;  %v4370_v0 = vshll.u32 %v9573_v12, 16  ;;  %v2066_v44 = vadd.f32 %v12883_v47, %v16826_v25  ;;  %v2069_v62 = vadd.f32 %v12899_v21, %v16827_v57  ;;  %v4339_v26 = vsel %vm11430_vm7, %v4334_v42, %v4338_v52  ;;  %v13348_v12 = vpop.f32.mrf.mxu0  ;;  %v16829_v47 = vld [vmem:[#allocation23_spill] sm:$0xff]  ;;  %v16830_v4 = vld [vmem:[#allocation48_spill] sm:$0xff]  ;;  %v16831_v57 = vld [vmem:[#allocation61_spill] sm:$0xff]  ;;  %v13359_v52 = vpop.f32.mrf.mxu1 }
 0x15c   :  { %v4344_v13 = vrot.slane %v4343_v40, 4  ;;  %v4357_v53 = vor.u32 %v4356_v51, %v4353_v32  ;;  %v4362_v24 = vrot.slane %v4360_v35, 5  ;;  %16828 = vst [vmem:[#allocation41_spill] sm:$0xff] %v13348_v12  ;;  %v2059_v25 = vadd.f32 %v16830_v4, %v16829_v47  ;;  %v9576_v51 = vld [vmem:[%s16689_s0 + $0x14c] sm:$0x1] }
 0x15d   :  { %v4366_v21 = vrot.slane %v4364_v28, 4  ;;  %v13353_v37 = vadd.f32 %v16831_v57, %v2066_v44  ;;  %v13356_v59 = vadd.f32 %v16833_v16, %v2069_v62  ;;  %v4372_v40 = vrot.slane %v4370_v0, 5  ;;  %v13367_v28 = vpop.f32.mrf.mxu0  ;;  %v9577_v47 = vld [vmem:[%s16689_s0 + $0x150] sm:$0xf] }
 0x15e   :  { %v4349_v32 = vsel %vm11430_vm7, %v4344_v13, %v4348_v5  ;;  %v4358_v42 = vrot.slane %v4357_v53, 4  ;;  %v4375_v35 = vshrl.u32 %v9574_v46, 16  ;;  %16835 = vst [vmem:[#allocation48_spill] sm:$0xff] %v13367_v28  ;;  %v4378_v62 = vshll.u32 %v9574_v46, 16  ;;  %v13372_v5 = vpop.f32.mrf.mxu1  ;;  %v16837_v0 = vld [vmem:[#allocation36_spill] sm:$0xff]  ;;  %v16838_v13 = vld [vmem:[#allocation57_spill] sm:$0xff] }
 0x15f   :  { %16832 = vst [vmem:[#allocation44_spill] sm:$0xff] %v13353_v37  ;;  %16834 = vst [vmem:[#allocation23_spill] sm:$0xff] %v13356_v59  ;;  %v9621_v16 = vcombine.low %v4339_v26, %v4349_v32  ;;  %v4367_v44 = vor.u32 %v4366_v21, %v4362_v24  ;;  %v4384_v17 = vshll.u32 %v9575_v45, 16  ;;  %v2063_v53 = vadd.f32 %v16838_v13, %v16837_v0  ;;  %v9578_v26 = vld [vmem:[%s16689_s0 + $0x154] sm:$0xf]  ;;  %v13381_v46 = vpop.f32.mrf.mxu0  ;;  %v11177_v0 = vld [vmem:[%s16689_s0 + $0x198] sm:$0xff]  }
 0x160   :  { %16836 = vst [vmem:[#allocation61_spill] sm:$0xff] %v13372_v5  ;;  %v4363_v4 = vsel %vm11430_vm7, %v4358_v42, %v4362_v24  ;;  %v4377_v57 = vrot.slane %v4375_v35, 4  ;;  %v4388_v48 = vshrl.u32 %v9575_v45, 16  ;;  %16839 = vst [vmem:[#allocation65_spill] sm:$0xff] %v13381_v46  ;;  %v4380_v32 = vrot.slane %v4378_v62, 5  ;;  %v13387_v13 = vpop.f32.mrf.mxu1  ;;  %v16841_v45 = vld [vmem:[#allocation50_spill] sm:$0xff] }
 0x161   :  { %10818 = vmatprep.mubr.msk.bf16.mxu0 %vm247_vm1, %v9621_v16  ;;  %v4368_v21 = vrot.slane %v4367_v44, 4  ;;  %v4386_v59 = vrot.slane %v4384_v17, 5  ;;  %v4394_v37 = vshll.u32 %v9576_v51, 16  ;;  %16840 = vst [vmem:[#allocation36_spill] sm:$0xff] %v13387_v13  ;;  %v2072_v42 = vadd.f32 %v12929_v8, %v16841_v45  ;;  %v9579_v51 = vld [vmem:[%s16689_s0 + $0x158] sm:$0x1]  ;;  %v13399_v5 = vpop.f32.mrf.mxu0  ;;  %10769 = vmatmul.mubr.msk.bf16.gmra.mxu1 %vm247_vm1, %v11177_v0 }
 0x162   :  { %v4390_v24 = vrot.slane %v4388_v48, 4  ;;  %v4399_v35 = vshrl.u32 %v9577_v47, 16  ;;  %v4402_v28 = vshll.u32 %v9577_v47, 16  ;;  %v4381_v16 = vor.u32 %v4380_v32, %v4377_v57  ;;  %16843 = vst [vmem:[#allocation50_spill] sm:$0xff] %v13399_v5  ;;  %v16846_v32 = vld [vmem:[#allocation47_spill] sm:$0xff] }
 0x163   :  { %v4373_v46 = vsel %vm11430_vm7, %v4368_v21, %v4372_v40  ;;  %v4396_v44 = vrot.slane %v4394_v37, 5  ;;  %v4408_v62 = vshll.u32 %v9578_v26, 16  ;;  %v13397_v13 = vadd.f32 %v12927_v34, %v2072_v42  ;;  %v13402_v37 = vpop.f32.mrf.mxu1  ;;  %v16845_v34 = vld [vmem:[#allocation54_spill] sm:$0xff]  ;;  %v16848_v42 = vld [vmem:[#allocation56_spill] sm:$0xff] }
 0x164   :  { %v9622_v17 = vcombine.low %v4363_v4, %v4373_v46  ;;  %v4391_v60 = vor.u32 %v4390_v24, %v4386_v59  ;;  %v4401_v48 = vrot.slane %v4399_v35, 4  ;;  %v4382_v8 = vrot.slane %v4381_v16, 4  ;;  %v16844_v4 = vld [vmem:[#allocation52_spill] sm:$0xff]  ;;  %v16851_v16 = vld [vmem:[#allocation67_spill] sm:$0xff] }
 0x165   :  { %16842 = vst [vmem:[#allocation57_spill] sm:$0xff] %v13397_v13  ;;  %v4404_v47 = vrot.slane %v4402_v28, 5  ;;  %v4410_v45 = vrot.slane %v4408_v62, 5  ;;  %v4412_v12 = vshrl.u32 %v9578_v26, 16  ;;  %v4418_v57 = vshll.u32 %v9579_v51, 16  ;;  %v13435_v62 = vpop.f32.mrf.mxu0 }
 0x166   :  { %10819 = vmatmul.mubr.msk.bf16.gmra.mxu0 %vm247_vm1, %v9622_v17  ;;  %v4392_v40 = vrot.slane %v4391_v60, 4  ;;  %v13407_v46 = vadd.f32 %v12940_v33, %v16844_v4  ;;  %v2073_v21 = vadd.f32 %v12967_v36, %v16845_v34  ;;  %v13412_v24 = vadd.f32 %v16846_v32, %v2059_v25  ;;  %v9580_v60 = vld [vmem:[%s16689_s0 + $0x15c] sm:$0xf]  ;;  %v9581_v33 = vld [vmem:[%s16689_s0 + $0x160] sm:$0xf] }
 0x167   :  { %v4387_v28 = vsel %vm11430_vm7, %v4382_v8, %v4386_v59  ;;  %v4405_v26 = vor.u32 %v4404_v47, %v4401_v48  ;;  %v4414_v0 = vrot.slane %v4412_v12, 4  ;;  %v13423_v35 = vadd.f32 %v16848_v42, %v2063_v53  ;;  %v16850_v36 = vld [vmem:[#allocation46_spill] sm:$0xff]  ;;  %v13437_v47 = vpop.f32.mrf.mxu1 }
 0x168   :  { %16847 = vst [vmem:[#allocation52_spill] sm:$0xff] %v13412_v24  ;;  %v2067_v25 = vadd.f32 %v16851_v16, %v16850_v36  ;;  %v4397_v51 = vsel %vm11430_vm7, %v4392_v40, %v4396_v44  ;;  %v13430_v59 = vadd.f32 %v12945_v6, %v2073_v21  ;;  %v9582_v12 = vld [vmem:[%s16689_s0 + $0x164] sm:$0x1]  ;;  %v4420_v53 = vrot.slane %v4418_v57, 5  ;;  %v9583_v6 = vld [vmem:[%s16689_s0 + $0x168] sm:$0xf]  ;;  %v13442_v44 = vpop.f32.mrf.mxu0 }
 0x169   :  { %16849 = vst [vmem:[#allocation54_spill] sm:$0xff] %v13423_v35  ;;  %v9623_v17 = vcombine.low %v4387_v28, %v4397_v51  ;;  %v4406_v48 = vrot.slane %v4405_v26, 4  ;;  %v4415_v8 = vor.u32 %v4414_v0, %v4410_v45  ;;  %v4423_v4 = vshrl.u32 %v9580_v60, 16  ;;  %v16853_v57 = vld [vmem:[#allocation60_spill] sm:$0xff]  ;;  %v9584_v0 = vld [vmem:[%s16689_s0 + $0x16c] sm:$0xf] }
 0x16a   :  { %16852 = vst [vmem:[#allocation47_spill] sm:$0xff] %v13430_v59  ;;  %v4426_v34 = vshll.u32 %v9580_v60, 16  ;;  %v4432_v32 = vshll.u32 %v9581_v33, 16  ;;  %v4436_v42 = vshrl.u32 %v9581_v33, 16  ;;  %v4442_v28 = vshll.u32 %v9582_v12, 16  ;;  %v13452_v60 = vpop.f32.mrf.mxu1 }
 0x16b   :  { %10822 = vmatprep.mubr.msk.bf16.mxu0 %vm247_vm1, %v9623_v17  ;;  %v4411_v40 = vsel %vm11430_vm7, %v4406_v48, %v4410_v45  ;;  %v4416_v21 = vrot.slane %v4415_v8, 4  ;;  %v2076_v26 = vadd.f32 %v13015_v39, %v16853_v57  ;;  %v4425_v33 = vrot.slane %v4423_v4, 4  ;;  %v9585_v17 = vld [vmem:[%s16689_s0 + $0x170] sm:$0x1]  ;;  %v13457_v45 = vpop.f32.mrf.mxu0 }
 0x16c   :  { %v4428_v36 = vrot.slane %v4426_v34, 5  ;;  %v4434_v16 = vrot.slane %v4432_v32, 5  ;;  %v4438_v51 = vrot.slane %v4436_v42, 4  ;;  %16854 = vst [vmem:[#allocation56_spill] sm:$0xff] %v13457_v45  ;;  %v4444_v39 = vrot.slane %v4442_v28, 5  ;;  %v13464_v57 = vpop.f32.mrf.mxu1 }
 0x16d   :  { %v4421_v12 = vsel %vm11430_vm7, %v4416_v21, %v4420_v53  ;;  %v13462_v48 = vadd.f32 %v13005_v55, %v2076_v26  ;;  %v4447_v8 = vshrl.u32 %v9583_v6, 16  ;;  %v4450_v42 = vshll.u32 %v9583_v6, 16  ;;  %v16856_v21 = vld [vmem:[#allocation63_spill] sm:$0xff]  ;;  %v13469_v28 = vpop.f32.mrf.mxu0  ;;  %v16857_v26 = vld [vmem:[#allocation58_spill] sm:$0xff]  ;;  %v16858_v6 = vld [vmem:[#allocation12_spill] sm:$0xff] }
 0x16e   :  { %v9624_v4 = vcombine.low %v4411_v40, %v4421_v12  ;;  %v4429_v34 = vor.u32 %v4428_v36, %v4425_v33  ;;  %v4439_v32 = vor.u32 %v4438_v51, %v4434_v16  ;;  %v4456_v13 = vshll.u32 %v9584_v0, 16  ;;  %v16859_v12 = vld [vmem:[#allocation66_spill] sm:$0xff] }
 0x16f   :  { %16855 = vst [vmem:[#allocation46_spill] sm:$0xff] %v13462_v48  ;;  %v4449_v59 = vrot.slane %v4447_v8, 4  ;;  %v4460_v35 = vshrl.u32 %v9584_v0, 16  ;;  %v4466_v24 = vshll.u32 %v9585_v17, 16  ;;  %v4452_v53 = vrot.slane %v4450_v42, 5  ;;  %v16871_v48 = vld [vmem:[#allocation80_spill] sm:$0xff] }
 0x170   :  { %10823 = vmatmul.mubr.msk.bf16.gmra.mxu0 %vm247_vm1, %v9624_v4  ;;  %v4430_v5 = vrot.slane %v4429_v34, 4  ;;  %v4440_v45 = vrot.slane %v4439_v32, 4  ;;  %v2074_v55 = vadd.f32 %v13028_v11, %v16856_v21  ;;  %v2071_v40 = vadd.f32 %v12987_v2, %v16857_v26  ;;  %v9586_v0 = vld [vmem:[%s16689_s0 + $0x174] sm:$0xf]  ;;  %v9587_v17 = vld [vmem:[%s16689_s0 + $0x178] sm:$0xf]  ;;  %v13483_v11 = vpop.f32.mrf.mxu1 }
 0x171   :  { %v4458_v33 = vrot.slane %v4456_v13, 5  ;;  %v4462_v36 = vrot.slane %v4460_v35, 4  ;;  %v13475_v51 = vadd.f32 %v13036_v10, %v16858_v6  ;;  %v13486_v8 = vadd.f32 %v16859_v12, %v2067_v25  ;;  %v9588_v35 = vld [vmem:[%s16689_s0 + $0x17c] sm:$0x1] }
 0x172   :  { %v4435_v2 = vsel %vm11430_vm7, %v4430_v5, %v4434_v16  ;;  %v4445_v10 = vsel %vm11430_vm7, %v4440_v45, %v4444_v39  ;;  %v4453_v13 = vor.u32 %v4452_v53, %v4449_v59  ;;  %v13497_v4 = vadd.f32 %v12932_v14, %v13407_v46  ;;  %v13499_v5 = vpop.f32.mrf.mxu0  ;;  %v9589_v14 = vld [vmem:[%s16689_s0 + $0x180] sm:$0xf]  ;;  %v13508_v46 = vpop.f32.mrf.mxu1 }
 0x173   :  { %v9625_v34 = vcombine.low %v4435_v2, %v4445_v10  ;;  %v4463_v32 = vor.u32 %v4462_v36, %v4458_v33  ;;  %v4468_v42 = vrot.slane %v4466_v24, 5  ;;  %v4471_v21 = vshrl.u32 %v9586_v0, 16 }
 0x174   :  { %v4454_v25 = vrot.slane %v4453_v13, 4  ;;  %v4474_v26 = vshll.u32 %v9586_v0, 16  ;;  %v4480_v6 = vshll.u32 %v9587_v17, 16  ;;  %v13502_v16 = vadd.f32 %v12974_v43, %v2071_v40  ;;  %v9590_v43 = vld [vmem:[%s16689_s0 + $0x184] sm:$0xf]  ;;  %v13515_v40 = vpop.f32.mrf.mxu0  ;;  %v13524_v13 = vpop.f32.mrf.mxu1 }
 0x175   :  { %10826 = vmatprep.mubr.msk.bf16.mxu0 %vm247_vm1, %v9625_v34  ;;  %v4464_v59 = vrot.slane %v4463_v32, 4  ;;  %v4484_v45 = vshrl.u32 %v9587_v17, 16  ;;  %v4490_v39 = vshll.u32 %v9588_v35, 16  ;;  %v4473_v53 = vrot.slane %v4471_v21, 4 }
 0x176   :  { %16860 = vst [vmem:[#allocation67_spill] sm:$0xff] %v13502_v16  ;;  %v4459_v24 = vsel %vm11430_vm7, %v4454_v25, %v4458_v33  ;;  %v4476_v36 = vrot.slane %v4474_v26, 5  ;;  %v4482_v0 = vrot.slane %v4480_v6, 5  ;;  %v2080_v10 = vadd.f32 %v13104_v15, %v12955_v20  ;;  %v9591_v33 = vld [vmem:[%s16689_s0 + $0x188] sm:$0x1]  ;;  %v13526_v21 = vpop.f32.mrf.mxu0 }
 0x177   :  { %v4469_v17 = vsel %vm11430_vm7, %v4464_v59, %v4468_v42  ;;  %v4486_v12 = vrot.slane %v4484_v45, 4  ;;  %v4492_v2 = vrot.slane %v4490_v39, 5  ;;  %v4495_v32 = vshrl.u32 %v9589_v14, 16  ;;  %v13531_v45 = vpop.f32.mrf.mxu1 }
 0x178   :  { %v9626_v35 = vcombine.low %v4459_v24, %v4469_v17  ;;  %v4477_v34 = vor.u32 %v4476_v36, %v4473_v53  ;;  %v4498_v25 = vshll.u32 %v9589_v14, 16  ;;  %v13529_v42 = vadd.f32 %v13096_v54, %v2080_v10  ;;  %v16862_v14 = vld [vmem:[#allocation71_spill] sm:$0xff] }
 0x179   :  { %v4487_v26 = vor.u32 %v4486_v12, %v4482_v0  ;;  %v4504_v6 = vshll.u32 %v9590_v43, 16  ;;  %v4508_v59 = vshrl.u32 %v9590_v43, 16  ;;  %v4497_v15 = vrot.slane %v4495_v32, 4  ;;  %v9592_v54 = vld [vmem:[%s16689_s0 + $0x18c] sm:$0xf]  ;;  %v16863_v43 = vld [vmem:[#allocation76_spill] sm:$0xff] }
 0x17a   :  { %16861 = vst [vmem:[#allocation60_spill] sm:$0xff] %v13529_v42  ;;  %10827 = vmatmul.mubr.msk.bf16.gmra.mxu0 %vm247_vm1, %v9626_v35  ;;  %v4478_v20 = vrot.slane %v4477_v34, 4  ;;  %v4500_v39 = vrot.slane %v4498_v25, 5  ;;  %v4514_v16 = vshll.u32 %v9591_v33, 16  ;;  %v13536_v17 = vadd.f32 %v13114_v22, %v16862_v14  ;;  %v16865_v34 = vld [vmem:[#allocation73_spill] sm:$0xff]  ;;  %v13551_v22 = vpop.f32.mrf.mxu0 }
 0x17b   :  { %v4488_v24 = vrot.slane %v4487_v26, 4  ;;  %v4506_v53 = vrot.slane %v4504_v6, 5  ;;  %v4510_v36 = vrot.slane %v4508_v59, 4  ;;  %v13542_v12 = vadd.f32 %v16863_v43, %v2074_v55  ;;  %v9593_v32 = vld [vmem:[%s16689_s0 + $0x190] sm:$0xf]  ;;  %v16866_v25 = vld [vmem:[#allocation77_spill] sm:$0xff] }
 0x17c   :  { %v4483_v10 = vsel %vm11430_vm7, %v4478_v20, %v4482_v0  ;;  %v4501_v35 = vor.u32 %v4500_v39, %v4497_v15  ;;  %v2081_v33 = vadd.f32 %v13136_v49, %v16865_v34  ;;  %v13555_v26 = vadd.f32 %v16866_v25, %v13475_v51  ;;  %v9594_v0 = vld [vmem:[%s16689_s0 + $0x194] sm:$0x1]  ;;  %v13562_v49 = vpop.f32.mrf.mxu1 }
 0x17d   :  { %16864 = vst [vmem:[#allocation63_spill] sm:$0xff] %v13542_v12  ;;  %v4493_v55 = vsel %vm11430_vm7, %v4488_v24, %v4492_v2  ;;  %v4511_v6 = vor.u32 %v4510_v36, %v4506_v53  ;;  %v4516_v59 = vrot.slane %v4514_v16, 5  ;;  %v4519_v14 = vshrl.u32 %v9592_v54, 16  ;;  %v16869_v43 = vld [vmem:[#allocation68_spill] sm:$0xff]  ;;  %v9595_v16 = vld [vmem:[%s16689_s0 + $0x198] sm:$0xf] }
 0x17e   :  { %16867 = vst [vmem:[#allocation58_spill] sm:$0xff] %v13555_v26  ;;  %v9627_v20 = vcombine.low %v4483_v10, %v4493_v55  ;;  %v4502_v15 = vrot.slane %v4501_v35, 4  ;;  %v13565_v39 = vadd.f32 %v13119_v18, %v2081_v33  ;;  %v2075_v51 = vadd.f32 %v13077_v19, %v16869_v43  ;;  %v9596_v35 = vld [vmem:[%s16689_s0 + $0x19c] sm:$0xf]  ;;  %v13578_v19 = vpop.f32.mrf.mxu0 }
 0x17f   :  { %v4512_v34 = vrot.slane %v4511_v6, 4  ;;  %v4522_v25 = vshll.u32 %v9592_v54, 16  ;;  %v4528_v2 = vshll.u32 %v9593_v32, 16  ;;  %v4521_v36 = vrot.slane %v4519_v14, 4  ;;  %v16870_v6 = vld [vmem:[#allocation24_spill] sm:$0xff] }
 0x180   :  { %16868 = vst [vmem:[#allocation12_spill] sm:$0xff] %v13565_v39  ;;  %10830 = vmatprep.mubr.msk.bf16.mxu0 %vm247_vm1, %v9627_v20  ;;  %v4507_v24 = vsel %vm11430_vm7, %v4502_v15, %v4506_v53  ;;  %v4532_v10 = vshrl.u32 %v9593_v32, 16  ;;  %v4538_v18 = vshll.u32 %v9594_v0, 16  ;;  %v2084_v20 = vadd.f32 %v13184_v29, %v16870_v6  ;;  %v9597_v53 = vld [vmem:[%s16689_s0 + $0x1a0] sm:$0x1]  ;;  %v13587_v32 = vpop.f32.mrf.mxu1  ;;  %v13589_v39 = vpop.f32.mrf.mxu0 }
 0x181   :  { %v4517_v54 = vsel %vm11430_vm7, %v4512_v34, %v4516_v59  ;;  %v4524_v33 = vrot.slane %v4522_v25, 5  ;;  %v4530_v55 = vrot.slane %v4528_v2, 5  ;;  %v4543_v43 = vshrl.u32 %v9595_v16, 16 }
 0x182   :  { %v9628_v0 = vcombine.low %v4507_v24, %v4517_v54  ;;  %v4534_v15 = vrot.slane %v4532_v10, 4  ;;  %v4540_v14 = vrot.slane %v4538_v18, 5  ;;  %v13592_v59 = vadd.f32 %v13180_v50, %v2084_v20  ;;  %v13594_v2 = vpop.f32.mrf.mxu1  ;;  %v13597_v24 = vpop.f32.mrf.mxu0  ;;  %v9663_v50 = vld [vmem:[%s16689_s0 + $0xc] sm:$0xe] }
 0x183   :  { %v4525_v42 = vor.u32 %v4524_v33, %v4521_v36  ;;  %v4546_v34 = vshll.u32 %v9595_v16, 16  ;;  %v4552_v25 = vshll.u32 %v9596_v35, 16  ;;  %v4545_v6 = vrot.slane %v4543_v43, 4  ;;  %v16872_v33 = vld [vmem:[#allocation82_spill] sm:$0xff] }
 0x184   :  { %10831 = vmatmul.mubr.msk.bf16.gmra.mxu0 %vm247_vm1, %v9628_v0  ;;  %v4535_v29 = vor.u32 %v4534_v15, %v4530_v55  ;;  %v4556_v26 = vshrl.u32 %v9596_v35, 16  ;;  %v4562_v12 = vshll.u32 %v9597_v53, 16  ;;  %v2082_v36 = vadd.f32 %v13200_v1, %v16871_v48  ;;  %v13604_v16 = vpop.f32.mrf.mxu1  ;;  %v9664_v48 = vld [vmem:[%s16689_s0 + $0x18] sm:$0xe] }
 0x185   :  { %v4526_v10 = vrot.slane %v4525_v42, 4  ;;  %v4548_v18 = vrot.slane %v4546_v34, 5  ;;  %v4554_v54 = vrot.slane %v4552_v25, 5  ;;  %v13607_v20 = vadd.f32 %v16872_v33, %v2075_v51 }
 0x186   :  { %v4536_v0 = vrot.slane %v4535_v29, 4  ;;  %v4558_v35 = vrot.slane %v4556_v26, 4  ;;  %v2085_v53 = vadd.f32 %v13220_v7, %v13123_v23  ;;  %v4564_v43 = vrot.slane %v4562_v12, 5  ;;  %v13624_v7 = vpop.f32.mrf.mxu0  ;;  %v11213_v29 = vld [vmem:[%s16689_s0 + $0x10] sm:$0xf] }
 0x187   :  { %v4531_v42 = vsel %vm11430_vm7, %v4526_v10, %v4530_v55  ;;  %v4549_v15 = vor.u32 %v4548_v18, %v4545_v6  ;;  %v13614_v1 = vadd.f32 %v13192_v41, %v2082_v36  ;;  %v9695_v23 = vrot.slane %v9663_v50, 9  ;;  %v16873_v55 = vld [vmem:[#allocation75_spill] sm:$0xff]  ;;  %v13631_v10 = vpop.f32.mrf.mxu1  ;;  %v16874_v36 = vld [vmem:[#allocation6_spill] sm:$0xff] }
 0x188   :  { %v4541_v51 = vsel %vm11430_vm7, %v4536_v0, %v4540_v14  ;;  %v4559_v34 = vor.u32 %v4558_v35, %v4554_v54  ;;  %v13622_v26 = vadd.f32 %v13210_v30, %v2085_v53  ;;  %v2079_v12 = vadd.f32 %v13163_v3, %v16873_v55  ;;  %v11214_v30 = vld [vmem:[%s16689_s0 + $0x14] sm:$0x1] }
 0x189   :  { %v9629_v25 = vcombine.low %v4531_v42, %v4541_v51  ;;  %v4550_v41 = vrot.slane %v4549_v15, 4  ;;  %v5246_v6 = vrot.slane %v11213_v29, 5  ;;  %v5249_v18 = vrot.slane %v11214_v30, 5  ;;  %v16876_v42 = vld [vmem:[#allocation3_spill] sm:$0xff]  ;;  %v16883_v30 = vld [vmem:[#allocation8_spill] sm:$0xff] }
 0x18a   :  { %v4560_v14 = vrot.slane %v4559_v34, 4  ;;  %v2088_v50 = vadd.f32 %v13275_v38, %v16874_v36  ;;  %v9696_v33 = vrot.slane %v9664_v48, 9  ;;  %v16877_v15 = vrot.slane %v16876_v42, 5  ;;  %v16878_v34 = vld [vmem:[#allocation83_spill] sm:$0xff]  ;;  %v11178_v48 = vld [vmem:[%s16689_s0 + $0x18] sm:$0xff]   ;;  %v16884_v42 = vld [vmem:[#allocation84_spill] sm:$0xff] }
 0x18b   :  { %10834 = vmatprep.mubr.msk.bf16.mxu0 %vm247_vm1, %v9629_v25  ;;  %v4555_v3 = vsel %vm11430_vm7, %v4550_v41, %v4554_v54  ;;  %v5247_v35 = vsel %vm11408_vm6, %v9695_v23, %v5246_v6  ;;  %v5248_v53 = vrot.slane %v5246_v6, 4  ;;  %v13647_v55 = vadd.f32 %v16878_v34, %v13536_v17  ;;  %v9665_v17 = vld [vmem:[%s16689_s0 + $0x24] sm:$0xe]  ;;  %v13664_v41 = vpop.f32.mrf.mxu0  ;;  %v16881_v6 = vld [vmem:[#allocation4_spill] sm:$0xff] }
 0x18c   :  { %v5255_v51 = vrot.slane %v16877_v15, 4  ;;  %v4565_v38 = vsel %vm11430_vm7, %v4560_v14, %v4564_v43  ;;  %v13655_v54 = vadd.f32 %v13263_v58, %v2088_v50  ;;  %v16880_v23 = vmov %v16877_v15  ;;  %v9666_v50 = vld [vmem:[%s16689_s0 + $0x30] sm:$0xe] }
 0x18d   :  { %v5254_v25 = vsel %vm11408_vm6, %v9696_v33, %v16880_v23  ;;  %v9630_v29 = vcombine.low %v4555_v3, %v4565_v38  ;;  %v5250_v43 = vsel %vm11408_vm6, %v5248_v53, %v5249_v18  ;;  %v16882_v14 = vrot.slane %v16881_v6, 5  ;;  %v13677_v33 = vpop.f32.mrf.mxu1  ;;  %v16885_v18 = vld [vmem:[#allocation11_spill] sm:$0xff]  ;;  %v13684_v38 = vpop.f32.mrf.mxu0 }
 0x18e   :  { %16879 = vst [vmem:[#allocation66_spill] sm:$0xff] %v13655_v54  ;;  %v2086_v36 = vadd.f32 %v13290_v61, %v16883_v30  ;;  %v13680_v15 = vadd.f32 %v16884_v42, %v2079_v12  ;;  %v9728_v3 = vcombine.low %v5247_v35, %v5250_v43  ;;  %v2089_v53 = vadd.f32 %v13306_v63, %v16885_v18  ;;  %v11215_v61 = vld [vmem:[%s16688_s1 + $0xe] sm:$0x3]  ;;  %v11216_v35 = vld [vmem:[%s16689_s0 + $0x28] sm:$0xf] }
 0x18f   :  { %v5257_v58 = vsel %vm11408_vm6, %v5255_v51, %v16882_v14  ;;  %10835 = vmatmul.mubr.msk.bf16.gmra.mxu0 %vm247_vm1, %v9630_v29  ;;  %v7756_v51 = vsel %vm344_vm0, %v11215_v61, 0  ;;  %v9697_v12 = vrot.slane %v9665_v17, 9  ;;  %v13697_v63 = vpop.f32.mrf.mxu1  ;;  %v16888_v17 = vld [vmem:[#allocation17_spill] sm:$0xff]  ;;  %v9698_v14 = vrot.slane %v9666_v50, 9  ;;  %v13712_v30 = vpop.f32.mrf.mxu0  ;;  %v11219_v18 = vld [vmem:[%s16688_s1 + $0x10] sm:$0x3] }
 0x190   :  { %v9729_v34 = vcombine.low %v5254_v25, %v5257_v58  ;;  %v13692_v23 = vadd.f32 %v13285_v27, %v2086_v36  ;;  %v5260_v25 = vrot.slane %v11216_v35, 5  ;;  %10840 = vmatprep.mubr.msk.bf16.mxu1 %vm247_vm1, %v9728_v3  ;;  %10906 = vmatprep.mubr.msk.bf16.mxu0 %vm247_vm1, %v11178_v48  ;;  %v13702_v29 = vadd.f32 %v13300_v9, %v2089_v53  ;;  %v11217_v27 = vld [vmem:[%s16689_s0 + $0x2c] sm:$0x1]  ;;  %v9667_v58 = vld [vmem:[%s16689_s0 + $0x3c] sm:$0xe]  ;;  %v16889_v48 = vld [vmem:[#allocation26_spill] sm:$0xff] }
 0x191   :  { %v5263_v43 = vrot.slane %v11217_v27, 5  ;;  %v2092_v6 = vadd.f32 %v13359_v52, %v16888_v17  ;;  %v2083_v36 = vadd.f32 %v16889_v48, %v13196_v31  ;;  %v11218_v52 = vld [vmem:[%s16689_s0 + $0x34] sm:$0xf]  ;;  %v13722_v3 = vpop.f32.mrf.mxu1  ;;  %v8658_v31 = vsel %vm344_vm0, %v11219_v18, 0  ;;  %v16890_v53 = vld [vmem:[#allocation41_spill] sm:$0xff]  ;;  %v16892_v61 = vld [vmem:[#allocation19_spill] sm:$0xff] }
 0x192   :  { %16886 = vst [vmem:[#allocation71_spill] sm:$0xff] %v13692_v23  ;;  %16887 = vst [vmem:[#allocation76_spill] sm:$0xff] %v13702_v29  ;;  %10841 = vmatmul.mubr.msk.bf16.vlgmr.msra.gmra.mxu1 %vm247_vm1, %v9729_v34  ;;  %v5261_v9 = vsel %vm11408_vm6, %v9697_v12, %v5260_v25  ;;  %v5262_v42 = vrot.slane %v5260_v25, 4  ;;  %v5267_v50 = vrot.slane %v11218_v52, 5  ;;  %v16893_v12 = vld [vmem:[#allocation61_spill] sm:$0xff]  ;;  %v16894_v25 = vld [vmem:[#allocation22_spill] sm:$0xff] }
 0x193   :  { %10971 = vmatpush3.bf16.msra.mxu1 %v7756_v51  ;;  %v13729_v34 = vadd.f32 %v16890_v53, %v2092_v6  ;;  %v2090_v35 = vadd.f32 %v16893_v12, %v16892_v61  ;;  %v16895_v27 = vld [vmem:[#allocation36_spill] sm:$0xff]  ;;  %v11179_v48 = vld [vmem:[%s16689_s0 + $0x24] sm:$0xff]   ;;  %v9699_v29 = vrot.slane %v9667_v58, 9 }
 0x194   :  { %v2093_v17 = vadd.f32 %v16895_v27, %v16894_v25  ;;  %v5264_v51 = vsel %vm11408_vm6, %v5262_v42, %v5263_v43  ;;  %v5268_v52 = vsel %vm11408_vm6, %v9698_v14, %v5267_v50  ;;  %v5269_v18 = vrot.slane %v5267_v50, 4  ;;  %v9668_v6 = vld [vmem:[%s16689_s0 + $0x48] sm:$0xe]  ;;  %v16897_v61 = vld [vmem:[#allocation38_spill] sm:$0xff]  ;;  %v11180_v27 = vld [vmem:[%s16689_s0 + $0x30] sm:$0xff]   ;;  %v13756_v14 = vpop.f32.mrf.mxu0 }
 0x195   :  { %16891 = vst [vmem:[#allocation73_spill] sm:$0xff] %v13729_v34  ;;  %v16896_v53 = vld [vmem:[#allocation15_spill] sm:$0xff]  ;;  %v9730_v25 = vcombine.low %v5261_v9, %v5264_v51  ;;  %v16898_v34 = vld [vmem:[#allocation48_spill] sm:$0xff]  ;;  %v16900_v43 = vld [vmem:[#allocation65_spill] sm:$0xff] }
 0x196   :  { %v2087_v12 = vadd.f32 %v16897_v61, %v16896_v53  ;;  %v13751_v23 = vadd.f32 %v16898_v34, %v2090_v35  ;;  %v13754_v42 = vadd.f32 %v16900_v43, %v2093_v17  ;;  %v16902_v58 = vld [vmem:[#allocation10_spill] sm:$0xff]  ;;  %v16904_v53 = vld [vmem:[#allocation27_spill] sm:$0xff]  ;;  %v13770_v61 = vpop.f32.mrf.mxu1 }
 0x197   :  { %v16903_v50 = vrot.slane %v16902_v58, 5  ;;  %v11220_v9 = vld [vmem:[%s16689_s0 + $0x40] sm:$0xf]  ;;  %v11221_v34 = vld [vmem:[%s16689_s0 + $0x44] sm:$0x1]  ;;  %v2096_v17 = vadd.f32 %v13437_v47, %v16904_v53  ;;  %10844 = vmatprep.mubr.msk.bf16.mxu1 %vm247_vm1, %v9730_v25  ;;  %v9700_v58 = vrot.slane %v9668_v6, 9  ;;  %10907 = vmatmul.mubr.msk.bf16.vlgmr.msra.gmra.mxu0 %vm247_vm1, %v11179_v48 }
 0x198   :  { %16899 = vst [vmem:[#allocation77_spill] sm:$0xff] %v13751_v23  ;;  %16901 = vst [vmem:[#allocation68_spill] sm:$0xff] %v13754_v42  ;;  %v5274_v51 = vrot.slane %v11220_v9, 5  ;;  %v5277_v35 = vrot.slane %v11221_v34, 5  ;;  %v16905_v9 = vld [vmem:[#allocation29_spill] sm:$0xff]  ;;  %11037 = vmatpush3.bf16.msra.mxu0 %v8658_v31  ;;  %10910 = vmatprep.mubr.msk.bf16.mxu0 %vm247_vm1, %v11180_v27 }
 0x199   :  { %v5271_v54 = vsel %vm11408_vm6, %v5269_v18, %v16903_v50  ;;  %v11222_v18 = vld [vmem:[%s16689_s0 + $0x4c] sm:$0xf]  ;;  %v2094_v42 = vadd.f32 %v13452_v60, %v16905_v9  ;;  %v9669_v34 = vld [vmem:[%s16689_s0 + $0x54] sm:$0xe]  ;;  %v16908_v53 = vld [vmem:[#allocation33_spill] sm:$0xff] }
 0x19a   :  { %v9731_v43 = vcombine.low %v5268_v52, %v5271_v54  ;;  %v5281_v50 = vrot.slane %v11222_v18, 5  ;;  %v5275_v47 = vsel %vm11408_vm6, %v9699_v29, %v5274_v51  ;;  %v5276_v25 = vrot.slane %v5274_v51, 4  ;;  %v16907_v52 = vld [vmem:[#allocation35_spill] sm:$0xff]  ;;  %v16909_v60 = vld [vmem:[#allocation25_spill] sm:$0xff]  ;;  %v13798_v29 = vpop.f32.mrf.mxu0  ;;  %v13809_v51 = vpop.f32.mrf.mxu1 }
 0x19b   :  { %v13785_v54 = vadd.f32 %v13435_v62, %v2096_v17  ;;  %v2097_v6 = vadd.f32 %v13464_v57, %v16907_v52  ;;  %v13790_v18 = vadd.f32 %v16908_v53, %v2083_v36  ;;  %v2091_v9 = vadd.f32 %v13402_v37, %v16909_v60  ;;  %v16911_v57 = vld [vmem:[#allocation56_spill] sm:$0xff]  ;;  %v11223_v27 = vld [vmem:[%s16689_s0 + $0x58] sm:$0xf]  ;;  %v9670_v52 = vld [vmem:[%s16689_s0 + $0x60] sm:$0xe] }
 0x19c   :  { %v5283_v48 = vrot.slane %v5281_v50, 4  ;;  %v13796_v23 = vadd.f32 %v13442_v44, %v2094_v42  ;;  %10845 = vmatmul.mubr.msk.bf16.gmra.mxu1 %vm247_vm1, %v9731_v43  ;;  %v5278_v62 = vsel %vm11408_vm6, %v5276_v25, %v5277_v35  ;;  %v9701_v31 = vrot.slane %v9669_v34, 9  ;;  %v16913_v17 = vld [vmem:[#allocation21_spill] sm:$0xff] }
 0x19d   :  { %16906 = vst [vmem:[#allocation24_spill] sm:$0xff] %v13785_v54  ;;  %v13804_v36 = vadd.f32 %v16911_v57, %v2097_v6  ;;  %v5288_v37 = vrot.slane %v11223_v27, 5  ;;  %v9732_v44 = vcombine.low %v5275_v47, %v5278_v62  ;;  %v5282_v42 = vsel %vm11408_vm6, %v9700_v58, %v5281_v50  ;;  %v11224_v34 = vld [vmem:[%s16689_s0 + $0x5c] sm:$0x1]  ;;  %v13823_v6 = vpop.f32.mrf.mxu0  ;;  %v16915_v47 = vld [vmem:[#allocation32_spill] sm:$0xff]  ;;  %v13835_v57 = vpop.f32.mrf.mxu1 }
 0x19e   :  { %16910 = vst [vmem:[#allocation80_spill] sm:$0xff] %v13796_v23  ;;  %v16914_v43 = vrot.slane %v16913_v17, 5  ;;  %v5291_v25 = vrot.slane %v11224_v34, 5  ;;  %v13826_v53 = vadd.f32 %v16915_v47, %v2087_v12  ;;  %v11181_v58 = vld [vmem:[%s16689_s0 + $0x3c] sm:$0xff]   ;;  %v11182_v12 = vld [vmem:[%s16689_s0 + $0x48] sm:$0xff]  }
 0x19f   :  { %16912 = vst [vmem:[#allocation82_spill] sm:$0xff] %v13804_v36  ;;  %v5289_v50 = vsel %vm11408_vm6, %v9701_v31, %v5288_v37  ;;  %v5290_v60 = vrot.slane %v5288_v37, 4  ;;  %10848 = vmatprep.mubr.msk.bf16.mxu1 %vm247_vm1, %v9732_v44  ;;  %v16917_v27 = vld [vmem:[#allocation37_spill] sm:$0xff]  ;;  %v16918_v37 = vld [vmem:[#allocation43_spill] sm:$0xff]  ;;  %10911 = vmatmul.mubr.msk.bf16.gmra.mxu0 %vm247_vm1, %v11181_v58 }
 0x1a0   :  { %v5285_v35 = vsel %vm11408_vm6, %v5283_v48, %v16914_v43  ;;  %v16916_v48 = vld [vmem:[#allocation39_spill] sm:$0xff]  ;;  %v2095_v17 = vadd.f32 %v13483_v11, %v16917_v27  ;;  %v11225_v43 = vld [vmem:[%s16689_s0 + $0x64] sm:$0xf]  ;;  %v2098_v34 = vadd.f32 %v13524_v13, %v16918_v37  ;;  %v9672_v13 = vld [vmem:[%s16689_s0 + $0x78] sm:$0xe]  ;;  %v13863_v37 = vpop.f32.mrf.mxu1  ;;  %10914 = vmatprep.mubr.msk.bf16.mxu0 %vm247_vm1, %v11182_v12 }
 0x1a1   :  { %v2100_v62 = vadd.f32 %v13508_v46, %v16916_v48  ;;  %v5295_v31 = vrot.slane %v11225_v43, 5  ;;  %v16919_v46 = vld [vmem:[#allocation45_spill] sm:$0xff]  ;;  %v9671_v44 = vld [vmem:[%s16689_s0 + $0x6c] sm:$0xe]  ;;  %v13853_v48 = vpop.f32.mrf.mxu0  ;;  %v9733_v36 = vcombine.low %v5282_v42, %v5285_v35  ;;  %v5292_v11 = vsel %vm11408_vm6, %v5290_v60, %v5291_v25  ;;  %v11226_v25 = vld [vmem:[%s16689_s0 + $0x70] sm:$0xf] }
 0x1a2   :  { %v2101_v47 = vadd.f32 %v13531_v45, %v16919_v46  ;;  %v9702_v43 = vrot.slane %v9670_v52, 9  ;;  %v16921_v45 = vld [vmem:[#allocation50_spill] sm:$0xff]  ;;  %v9734_v23 = vcombine.low %v5289_v50, %v5292_v11  ;;  %v13869_v42 = vadd.f32 %v13515_v40, %v2098_v34  ;;  %v16926_v58 = vld [vmem:[#allocation51_spill] sm:$0xff]  ;;  %v16927_v12 = vld [vmem:[#allocation49_spill] sm:$0xff] }
 0x1a3   :  { %v13858_v27 = vadd.f32 %v13499_v5, %v2100_v62  ;;  %v13866_v46 = vadd.f32 %v16921_v45, %v2091_v9  ;;  %v5297_v54 = vrot.slane %v5295_v31, 4  ;;  %v9703_v35 = vrot.slane %v9671_v44, 9  ;;  %v11227_v9 = vld [vmem:[%s16689_s0 + $0x74] sm:$0x1]  ;;  %v11228_v62 = vld [vmem:[%s16689_s0 + $0x7c] sm:$0xf]  ;;  %v13903_v45 = vpop.f32.mrf.mxu1 }
 0x1a4   :  { %16923 = vst [vmem:[#allocation2_spill] sm:$0xff] %v13869_v42  ;;  %v13873_v5 = vadd.f32 %v13526_v21, %v2101_v47  ;;  %v5302_v52 = vrot.slane %v11226_v25, 5  ;;  %v5305_v50 = vrot.slane %v11227_v9, 5  ;;  %v13883_v40 = vadd.f32 %v13469_v28, %v2095_v17  ;;  %v13890_v47 = vpop.f32.mrf.mxu0  ;;  %10849 = vmatmul.mubr.msk.bf16.gmra.mxu1 %vm247_vm1, %v9733_v36  ;;  %v16928_v36 = vld [vmem:[#allocation34_spill] sm:$0xff]  ;;  %v16931_v9 = vld [vmem:[#allocation53_spill] sm:$0xff] }
 0x1a5   :  { %16920 = vst [vmem:[#allocation75_spill] sm:$0xff] %v13858_v27  ;;  %16922 = vst [vmem:[#allocation6_spill] sm:$0xff] %v13866_v46  ;;  %v2104_v21 = vadd.f32 %v13587_v32, %v16926_v58  ;;  %v9704_v60 = vrot.slane %v9672_v13, 9  ;;  %v5309_v34 = vrot.slane %v11228_v62, 5  ;;  %v5296_v44 = vsel %vm11408_vm6, %v9702_v43, %v5295_v31  ;;  %v11229_v32 = vld [vmem:[%s16689_s0 + $0x80] sm:$0x1]  ;;  %10852 = vmatprep.mubr.msk.bf16.mxu1 %vm247_vm1, %v9734_v23 }
 0x1a6   :  { %16924 = vst [vmem:[#allocation3_spill] sm:$0xff] %v13873_v5  ;;  %16925 = vst [vmem:[#allocation83_spill] sm:$0xff] %v13883_v40  ;;  %v2099_v28 = vadd.f32 %v13562_v49, %v16927_v12  ;;  %v5304_v17 = vrot.slane %v5302_v52, 4  ;;  %v5312_v11 = vrot.slane %v11229_v32, 5  ;;  %v9673_v13 = vld [vmem:[%s16689_s0 + $0x84] sm:$0xe]  ;;  %v2102_v58 = vadd.f32 %v13594_v2, %v16931_v9 }
 0x1a7   :  { %v16929_v25 = vrot.slane %v16928_v36, 5  ;;  %v13911_v49 = vadd.f32 %v13578_v19, %v2104_v21  ;;  %v5311_v43 = vrot.slane %v5309_v34, 4  ;;  %v11183_v62 = vld [vmem:[%s16689_s0 + $0x54] sm:$0xff]   ;;  %v5303_v12 = vsel %vm11408_vm6, %v9703_v35, %v5302_v52  ;;  %v16932_v19 = vld [vmem:[#allocation55_spill] sm:$0xff]  ;;  %v11184_v2 = vld [vmem:[%s16689_s0 + $0x60] sm:$0xff]  }
 0x1a8   :  { %v5306_v23 = vsel %vm11408_vm6, %v5304_v17, %v5305_v50  ;;  %v2105_v21 = vadd.f32 %v13604_v16, %v16932_v19  ;;  %v13936_v35 = vadd.f32 %v13589_v39, %v2102_v58  ;;  %v9705_v52 = vrot.slane %v9673_v13, 9  ;;  %v11230_v50 = vld [vmem:[%s16689_s0 + $0x88] sm:$0xf]  ;;  %v11231_v39 = vld [vmem:[%s16689_s0 + $0x8c] sm:$0x1]  ;;  %10915 = vmatmul.mubr.msk.bf16.gmra.mxu0 %vm247_vm1, %v11183_v62 }
 0x1a9   :  { %v5299_v31 = vsel %vm11408_vm6, %v5297_v54, %v16929_v25  ;;  %16930 = vst [vmem:[#allocation4_spill] sm:$0xff] %v13911_v49  ;;  %v13924_v54 = vsel %vm11408_vm6, %v9704_v60, %v5309_v34  ;;  %v13933_v32 = vsel %vm11408_vm6, %v5311_v43, %v5312_v11  ;;  %v5316_v60 = vrot.slane %v11230_v50, 5  ;;  %v13941_v34 = vpop.f32.mrf.mxu0  ;;  %v9674_v13 = vld [vmem:[%s16689_s0 + $0x90] sm:$0xe]  ;;  %v13955_v25 = vpop.f32.mrf.mxu1  ;;  %v16936_v9 = vld [vmem:[#allocation59_spill] sm:$0xff]  ;;  %10918 = vmatprep.mubr.msk.bf16.mxu0 %vm247_vm1, %v11184_v2 }
 0x1aa   :  { %16933 = vst [vmem:[#allocation8_spill] sm:$0xff] %v13936_v35  ;;  %v9735_v16 = vcombine.low %v5296_v44, %v5299_v31  ;;  %v13944_v17 = vadd.f32 %v13551_v22, %v2099_v28  ;;  %v13947_v36 = vadd.f32 %v13597_v24, %v2105_v21  ;;  %v5319_v11 = vrot.slane %v11231_v39, 5  ;;  %v16937_v28 = vld [vmem:[#allocation62_spill] sm:$0xff]  ;;  %v11232_v19 = vld [vmem:[%s16689_s0 + $0x94] sm:$0xf] }
 0x1ab   :  { %v9736_v43 = vcombine.low %v5303_v12, %v5306_v23  ;;  %v2103_v44 = vadd.f32 %v13631_v10, %v16936_v9  ;;  %v5318_v22 = vrot.slane %v5316_v60, 4  ;;  %v2108_v24 = vadd.f32 %v13677_v33, %v16937_v28  ;;  %v13961_v31 = vpop.f32.mrf.mxu0  ;;  %v16938_v12 = vld [vmem:[#allocation64_spill] sm:$0xff]  ;;  %v16939_v10 = vld [vmem:[#allocation13_spill] sm:$0xff]  ;;  %v13976_v39 = vpop.f32.mrf.mxu1 }
 0x1ac   :  { %16934 = vst [vmem:[#allocation84_spill] sm:$0xff] %v13944_v17  ;;  %16935 = vst [vmem:[#allocation11_spill] sm:$0xff] %v13947_v36  ;;  %v5323_v21 = vrot.slane %v11232_v19, 5  ;;  %v2106_v23 = vadd.f32 %v13697_v63, %v16938_v12  ;;  %v2109_v50 = vadd.f32 %v13722_v3, %v16939_v10  ;;  %v9675_v33 = vld [vmem:[%s16689_s0 + $0x9c] sm:$0xe]  ;;  %v13981_v62 = vsel %vm11408_vm6, %v9705_v52, %v5316_v60  ;;  %v17008_v35 = vld [vmem:[#allocation60_spill] sm:$0xff] }
 0x1ad   :  { %v13984_v9 = vadd.f32 %v13664_v41, %v2108_v24  ;;  %v9706_v28 = vrot.slane %v9674_v13, 9  ;;  %v11233_v63 = vld [vmem:[%s16689_s0 + $0x98] sm:$0x1]  ;;  %v9676_v19 = vld [vmem:[%s16689_s0 + $0xa8] sm:$0xe]  ;;  %v13992_v12 = vpop.f32.mrf.mxu0  ;;  %10853 = vmatmul.mubr.msk.bf16.gmra.mxu1 %vm247_vm1, %v9735_v16  ;;  %v5320_v2 = vsel %vm11408_vm6, %v5318_v22, %v5319_v11  ;;  %v10639_v24 = vpop.f32.mrf.mxu1 }
 0x1ae   :  { %v5326_v3 = vrot.slane %v11233_v63, 5  ;;  %v5325_v52 = vrot.slane %v5323_v21, 4  ;;  %v13998_v41 = vadd.f32 %v13684_v38, %v2106_v23  ;;  %v16942_v60 = vld [vmem:[#allocation69_spill] sm:$0xff]  ;;  %10856 = vmatprep.mubr.msk.bf16.mxu1 %vm247_vm1, %v9736_v43  ;;  %v14004_v10 = vadd.f32 %v13712_v30, %v2109_v50  ;;  %v11234_v16 = vld [vmem:[%s16689_s0 + $0xa0] sm:$0xf] }
 0x1af   :  { %16940 = vst [vmem:[#allocation17_spill] sm:$0xff] %v13984_v9  ;;  %v2107_v13 = vadd.f32 %v13770_v61, %v16942_v60  ;;  %v9707_v63 = vrot.slane %v9675_v33, 9  ;;  %v5330_v58 = vrot.slane %v11234_v16, 5  ;;  %v11235_v38 = vld [vmem:[%s16689_s0 + $0xa4] sm:$0x1]  ;;  %v11185_v61 = vld [vmem:[%s16689_s0 + $0x6c] sm:$0xff]   ;;  %v14016_v43 = vadd.f32 %v13624_v7, %v2103_v44  ;;  %v2042_v60 = vpop.f32.mrf.mxu1 }
 0x1b0   :  { %16941 = vst [vmem:[#allocation26_spill] sm:$0xff] %v13998_v41  ;;  %16943 = vst [vmem:[#allocation41_spill] sm:$0xff] %v14004_v10  ;;  %v5333_v11 = vrot.slane %v11235_v38, 5  ;;  %v16945_v30 = vld [vmem:[#allocation70_spill] sm:$0xff]  ;;  %v9708_v23 = vrot.slane %v9676_v19, 9  ;;  %v11186_v16 = vld [vmem:[%s16689_s0 + $0x78] sm:$0xff]   ;;  %v14028_v38 = vsel %vm11408_vm6, %v9706_v28, %v5323_v21  ;;  %v14032_v7 = vsel %vm11408_vm6, %v5325_v52, %v5326_v3  ;;  %10919 = vmatmul.mubr.msk.bf16.gmra.mxu0 %vm247_vm1, %v11185_v61 }
 0x1b1   :  { %16944 = vst [vmem:[#allocation19_spill] sm:$0xff] %v14016_v43  ;;  %v2112_v22 = vadd.f32 %v13809_v51, %v16945_v30  ;;  %v11236_v50 = vld [vmem:[%s16689_s0 + $0xac] sm:$0xf]  ;;  %v5332_v51 = vrot.slane %v5330_v58, 4  ;;  %v11237_v44 = vld [vmem:[%s16689_s0 + $0xb0] sm:$0x1]  ;;  %v2947_v30 = vpop.f32.mrf.mxu0  ;;  %v10710_v3 = vpop.f32.mrf.mxu1  ;;  %v14047_v52 = vadd.f32 %v13756_v14, %v2107_v13  ;;  %10922 = vmatprep.mubr.msk.bf16.mxu0 %vm247_vm1, %v11186_v16 }
 0x1b2   :  { %v5337_v33 = vrot.slane %v11236_v50, 5  ;;  %v5340_v19 = vrot.slane %v11237_v44, 5  ;;  %v9738_v50 = vcombine.low %v13981_v62, %v5320_v2  ;;  %v16947_v10 = vld [vmem:[#allocation72_spill] sm:$0xff]  ;;  %v14051_v44 = vsel %vm11408_vm6, %v9707_v63, %v5330_v58  ;;  %v16949_v62 = vld [vmem:[#allocation74_spill] sm:$0xff]  ;;  %v11238_v58 = vld [vmem:[%s16689_s0 + $0xb8] sm:$0xf] }
 0x1b3   :  { %v14039_v43 = vadd.f32 %v13798_v29, %v2112_v22  ;;  %v2110_v21 = vadd.f32 %v13835_v57, %v16947_v10  ;;  %v9677_v28 = vld [vmem:[%s16689_s0 + $0xb4] sm:$0xe]  ;;  %16948 = vst [vmem:[#allocation22_spill] sm:$0xff] %v14047_v52  ;;  %v14055_v29 = vsel %vm11408_vm6, %v5332_v51, %v5333_v11  ;;  %v2113_v2 = vadd.f32 %v13863_v37, %v16949_v62  ;;  %v9678_v37 = vld [vmem:[%s16689_s0 + $0xc0] sm:$0xe]  ;;  %v3383_v63 = vpop.f32.mrf.mxu1 }
 0x1b4   :  { %v5339_v17 = vrot.slane %v5337_v33, 4  ;;  %v14064_v14 = vsel %vm11408_vm6, %v9708_v23, %v5337_v33  ;;  %v5344_v10 = vrot.slane %v11238_v58, 5  ;;  %v9709_v23 = vrot.slane %v9677_v28, 9  ;;  %v10776_v33 = vpop.f32.mrf.mxu0 }
 0x1b5   :  { %16946 = vst [vmem:[#allocation61_spill] sm:$0xff] %v14039_v43  ;;  %v14067_v13 = vadd.f32 %v13823_v6, %v2110_v21  ;;  %v14081_v61 = vadd.f32 %v13853_v48, %v2113_v2  ;;  %v16952_v6 = vld [vmem:[#allocation78_spill] sm:$0xff]  ;;  %v16953_v51 = vcombine.low %v13924_v54, %v13933_v32  ;;  %v9740_v16 = vcombine.low %v14051_v44, %v14055_v29  ;;  %v16955_v2 = vld [vmem:[#allocation81_spill] sm:$0xff] }
 0x1b6   :  { %v14078_v11 = vsel %vm11408_vm6, %v5339_v17, %v5340_v19  ;;  %v2111_v22 = vadd.f32 %v13903_v45, %v16952_v6  ;;  %v5346_v21 = vrot.slane %v5344_v10, 4  ;;  %v11239_v17 = vld [vmem:[%s16689_s0 + $0xbc] sm:$0x1]  ;;  %v16954_v19 = vld [vmem:[#allocation79_spill] sm:$0xff]  ;;  %v10711_v45 = vpop.f32.mrf.mxu1  ;;  %v9710_v28 = vrot.slane %v9678_v37, 9  ;;  %v16956_v29 = vld [vmem:[#allocation30_spill] sm:$0xff]  ;;  %v4797_v6 = vpop.f32.mrf.mxu0 }
 0x1b7   :  { %16950 = vst [vmem:[#allocation36_spill] sm:$0xff] %v14067_v13  ;;  %16951 = vst [vmem:[#allocation15_spill] sm:$0xff] %v14081_v61  ;;  %10857 = vmatmul.mubr.msk.bf16.gmra.mxu1 %vm247_vm1, %v16953_v51  ;;  %v5347_v48 = vrot.slane %v11239_v17, 5  ;;  %v2116_v62 = vadd.f32 %v13955_v25, %v16954_v19  ;;  %v11240_v54 = vld [vmem:[%s16689_s0 + $0xc4] sm:$0xf]  ;;  %v2114_v44 = vadd.f32 %v13976_v39, %v16955_v2  ;;  %v16958_v19 = vld [vmem:[#allocation31_spill] sm:$0xff] }
 0x1b8   :  { %10860 = vmatprep.mubr.msk.bf16.mxu1 %vm247_vm1, %v9738_v50  ;;  %v5351_v32 = vrot.slane %v11240_v54, 5  ;;  %v2117_v58 = vadd.f32 %v10639_v24, %v16956_v29  ;;  %v11187_v51 = vld [vmem:[%s16689_s0 + $0x84] sm:$0xff]   ;;  %v2115_v39 = vadd.f32 %v2042_v60, %v16958_v19  ;;  %v3386_v54 = vpop.f32.mrf.mxu1  ;;  %v11188_v2 = vld [vmem:[%s16689_s0 + $0x90] sm:$0xff]   ;;  %v14122_v29 = vadd.f32 %v13890_v47, %v2111_v22  ;;  %v10777_v19 = vpop.f32.mrf.mxu0 }
 0x1b9   :  { %v14109_v50 = vadd.f32 %v13941_v34, %v2116_v62  ;;  %v11241_v37 = vld [vmem:[%s16689_s0 + $0xc8] sm:$0x1]  ;;  %v9679_v24 = vld [vmem:[%s16689_s0 + $0xe4] sm:$0xe]  ;;  %v14126_v34 = vsel %vm11408_vm6, %v9709_v23, %v5344_v10  ;;  %v9680_v60 = vld [vmem:[%s16689_s0 + $0xf0] sm:$0xe]  ;;  %v14136_v25 = vsel %vm11408_vm6, %v5346_v21, %v5347_v48  ;;  %10923 = vmatmul.mubr.msk.bf16.gmra.mxu0 %vm247_vm1, %v11187_v51 }
 0x1ba   :  { %v5354_v17 = vrot.slane %v11241_v37, 5  ;;  %16959 = vst [vmem:[#allocation48_spill] sm:$0xff] %v14122_v29  ;;  %v5353_v62 = vrot.slane %v5351_v32, 4  ;;  %v14129_v37 = vadd.f32 %v13961_v31, %v2114_v44  ;;  %v14139_v47 = vadd.f32 %v13992_v12, %v2117_v58  ;;  %v11242_v10 = vld [vmem:[%s16689_s0 + $0xe8] sm:$0xf]  ;;  %v10714_v23 = vpop.f32.mrf.mxu1  ;;  %10926 = vmatprep.mubr.msk.bf16.mxu0 %vm247_vm1, %v11188_v2 }
 0x1bb   :  { %16957 = vst [vmem:[#allocation38_spill] sm:$0xff] %v14109_v50  ;;  %v14141_v22 = vadd.f32 %v2947_v30, %v2115_v39  ;;  %v5358_v31 = vrot.slane %v11242_v10, 5  ;;  %v14148_v44 = vsel %vm11408_vm6, %v9710_v28, %v5351_v32  ;;  %v9711_v57 = vrot.slane %v9679_v24, 9  ;;  %v11243_v12 = vld [vmem:[%s16689_s0 + $0xf4] sm:$0xf]  ;;  %v4800_v39 = vpop.f32.mrf.mxu0 }
 0x1bc   :  { %16960 = vst [vmem:[#allocation65_spill] sm:$0xff] %v14129_v37  ;;  %16961 = vst [vmem:[#allocation10_spill] sm:$0xff] %v14139_v47  ;;  %v16963_v37 = vld [vmem:[#allocation5_spill] sm:$0xff]  ;;  %v5365_v21 = vrot.slane %v11243_v12, 5  ;;  %v14160_v48 = vsel %vm11408_vm6, %v5353_v62, %v5354_v17  ;;  %v9712_v58 = vrot.slane %v9680_v60, 9  ;;  %v3399_v24 = vpop.f32.mrf.mxu1  ;;  %v16965_v62 = vld [vmem:[#allocation7_spill] sm:$0xff]  ;;  %v9742_v60 = vcombine.low %v14126_v34, %v14136_v25 }
 0x1bd   :  { %16962 = vst [vmem:[#allocation27_spill] sm:$0xff] %v14141_v22  ;;  %v3640_v50 = vadd.f32 %v10710_v3, %v16963_v37  ;;  %v9681_v30 = vld [vmem:[%s16689_s0 + $0xfc] sm:$0xe]  ;;  %v5360_v28 = vrot.slane %v5358_v31, 4  ;;  %v11244_v3 = vld [vmem:[%s16689_s0 + $0xec] sm:$0x1]  ;;  %v3638_v12 = vadd.f32 %v3383_v63, %v16965_v62  ;;  %v16966_v22 = vcombine.low %v14028_v38, %v14032_v7 }
 0x1be   :  { %v5361_v32 = vrot.slane %v11244_v3, 5  ;;  %v5367_v10 = vrot.slane %v5365_v21, 4  ;;  %v11245_v51 = vld [vmem:[%s16689_s0 + $0xf8] sm:$0x1]  ;;  %v10715_v47 = vpop.f32.mrf.mxu1  ;;  %v14185_v63 = vsel %vm11408_vm6, %v9711_v57, %v5358_v31  ;;  %v11246_v7 = vld [vmem:[%s16689_s0 + $0x100] sm:$0xf] }
 0x1bf   :  { %v14166_v37 = vadd.f32 %v10776_v33, %v3640_v50  ;;  %v5368_v17 = vrot.slane %v11245_v51, 5  ;;  %10861 = vmatmul.mubr.msk.bf16.gmra.mxu1 %vm247_vm1, %v16966_v22  ;;  %v16967_v3 = vld [vmem:[#allocation9_spill] sm:$0xff]  ;;  %v16968_v33 = vld [vmem:[#allocation42_spill] sm:$0xff]  ;;  %v14187_v38 = vadd.f32 %v4797_v6, %v3638_v12  ;;  %v10780_v22 = vpop.f32.mrf.mxu0  ;;  %v9682_v31 = vld [vmem:[%s16689_s0 + $0x108] sm:$0xe] }
 0x1c0   :  { %v3641_v2 = vadd.f32 %v10711_v45, %v16967_v3  ;;  %v3639_v50 = vadd.f32 %v3386_v54, %v16968_v33  ;;  %10864 = vmatprep.mubr.msk.bf16.mxu1 %vm247_vm1, %v9740_v16  ;;  %v5372_v45 = vrot.slane %v11246_v7, 5  ;;  %v11189_v25 = vld [vmem:[%s16689_s0 + $0x9c] sm:$0xff]   ;;  %v14197_v16 = vsel %vm11408_vm6, %v9712_v58, %v5365_v21  ;;  %v11247_v57 = vld [vmem:[%s16689_s0 + $0x104] sm:$0x1]  ;;  %v11190_v21 = vld [vmem:[%s16689_s0 + $0xa8] sm:$0xff]  }
 0x1c1   :  { %16964 = vst [vmem:[#allocation29_spill] sm:$0xff] %v14166_v37  ;;  %v9713_v37 = vrot.slane %v9681_v30, 9  ;;  %16969 = vst [vmem:[#allocation35_spill] sm:$0xff] %v14187_v38  ;;  %v5375_v6 = vrot.slane %v11247_v57, 5  ;;  %v3402_v30 = vpop.f32.mrf.mxu1  ;;  %v14218_v58 = vsel %vm11408_vm6, %v5367_v10, %v5368_v17  ;;  %v16972_v62 = vld [vmem:[#allocation16_spill] sm:$0xff]  ;;  %v16973_v33 = vld [vmem:[#allocation18_spill] sm:$0xff]  ;;  %v4813_v10 = vpop.f32.mrf.mxu0  ;;  %10927 = vmatmul.mubr.msk.bf16.gmra.mxu0 %vm247_vm1, %v11189_v25 }
 0x1c2   :  { %v14199_v54 = vadd.f32 %v10777_v19, %v3641_v2  ;;  %v14201_v34 = vadd.f32 %v4800_v39, %v3639_v50  ;;  %v14214_v19 = vsel %vm11408_vm6, %v5360_v28, %v5361_v32  ;;  %v5374_v39 = vrot.slane %v5372_v45, 4  ;;  %v9683_v3 = vld [vmem:[%s16689_s0 + $0x114] sm:$0xe]  ;;  %v11248_v28 = vld [vmem:[%s16689_s0 + $0x10c] sm:$0xf]  ;;  %10930 = vmatprep.mubr.msk.bf16.mxu0 %vm247_vm1, %v11190_v21 }
 0x1c3   :  { %v3644_v12 = vadd.f32 %v10714_v23, %v16972_v62  ;;  %v14226_v2 = vsel %vm11408_vm6, %v9713_v37, %v5372_v45  ;;  %v5379_v32 = vrot.slane %v11248_v28, 5  ;;  %v3642_v50 = vadd.f32 %v3399_v24, %v16973_v33  ;;  %v16974_v17 = vld [vmem:[#allocation20_spill] sm:$0xff]  ;;  %v10718_v57 = vpop.f32.mrf.mxu1  ;;  %v9684_v28 = vld [vmem:[%s16689_s0 + $0x120] sm:$0xe]  ;;  %v11251_v25 = vld [vmem:[%s16689_s0 + $0x11c] sm:$0x1] }
 0x1c4   :  { %16970 = vst [vmem:[#allocation33_spill] sm:$0xff] %v14199_v54  ;;  %16971 = vst [vmem:[#allocation25_spill] sm:$0xff] %v14201_v34  ;;  %v3645_v7 = vadd.f32 %v10715_v47, %v16974_v17  ;;  %v9714_v62 = vrot.slane %v9682_v31, 9  ;;  %v11249_v51 = vld [vmem:[%s16689_s0 + $0x110] sm:$0x1]  ;;  %v14245_v47 = vsel %vm11408_vm6, %v5374_v39, %v5375_v6  ;;  %v10781_v31 = vpop.f32.mrf.mxu0  ;;  %v5389_v6 = vrot.slane %v11251_v25, 5 }
 0x1c5   :  { %v14233_v23 = vadd.f32 %v10780_v22, %v3644_v12  ;;  %v5382_v37 = vrot.slane %v11249_v51, 5  ;;  %v16976_v45 = vld [vmem:[#allocation52_spill] sm:$0xff]  ;;  %v5381_v24 = vrot.slane %v5379_v32, 4  ;;  %v14247_v22 = vadd.f32 %v4813_v10, %v3642_v50  ;;  %v3415_v33 = vpop.f32.mrf.mxu1  ;;  %v16979_v39 = vld [vmem:[#allocation85_spill] sm:$0xff] }
 0x1c6   :  { %v3643_v34 = vadd.f32 %v3402_v30, %v16976_v45  ;;  %v9715_v12 = vrot.slane %v9683_v3, 9  ;;  %v14250_v51 = vadd.f32 %v10781_v31, %v3645_v7  ;;  %v11250_v30 = vld [vmem:[%s16689_s0 + $0x118] sm:$0xf]  ;;  %v3648_v50 = vadd.f32 %v10718_v57, %v16979_v39  ;;  %v4816_v7 = vpop.f32.mrf.mxu0  ;;  %v11252_v31 = vld [vmem:[%s16689_s0 + $0x124] sm:$0xf] }
 0x1c7   :  { %16975 = vst [vmem:[#allocation56_spill] sm:$0xff] %v14233_v23  ;;  %16977 = vst [vmem:[#allocation21_spill] sm:$0xff] %v14247_v22  ;;  %v5386_v17 = vrot.slane %v11250_v30, 5  ;;  %v16980_v3 = vcombine.low %v14064_v14, %v14078_v11  ;;  %v9744_v21 = vcombine.low %v14185_v63, %v14214_v19  ;;  %v9716_v45 = vrot.slane %v9684_v28, 9  ;;  %v10719_v25 = vpop.f32.mrf.mxu1  ;;  %v9685_v57 = vld [vmem:[%s16689_s0 + $0x12c] sm:$0xe] }
 0x1c8   :  { %16978 = vst [vmem:[#allocation32_spill] sm:$0xff] %v14250_v51  ;;  %v5393_v30 = vrot.slane %v11252_v31, 5  ;;  %v14273_v14 = vsel %vm11408_vm6, %v9714_v62, %v5379_v32  ;;  %v14277_v11 = vsel %vm11408_vm6, %v5381_v24, %v5382_v37  ;;  %v14279_v63 = vadd.f32 %v4816_v7, %v3643_v34  ;;  %v11191_v28 = vld [vmem:[%s16689_s0 + $0xb4] sm:$0xff]   ;;  %v11253_v32 = vld [vmem:[%s16689_s0 + $0x128] sm:$0x1]  ;;  %v16983_v24 = vld [vmem:[#allocation14_spill] sm:$0xff]  ;;  %v10784_v51 = vpop.f32.mrf.mxu0 }
 0x1c9   :  { %10865 = vmatmul.mubr.msk.bf16.gmra.mxu1 %vm247_vm1, %v16980_v3  ;;  %v5388_v19 = vrot.slane %v5386_v17, 4  ;;  %v5396_v62 = vrot.slane %v11253_v32, 5  ;;  %v16982_v37 = vld [vmem:[#allocation28_spill] sm:$0xff]  ;;  %v3649_v39 = vadd.f32 %v10719_v25, %v16983_v24  ;;  %v3418_v3 = vpop.f32.mrf.mxu1  ;;  %v9686_v7 = vld [vmem:[%s16689_s0 + $0x138] sm:$0xe]  ;;  %v11192_v31 = vld [vmem:[%s16689_s0 + $0xc0] sm:$0xff]   ;;  %10931 = vmatmul.mubr.msk.bf16.gmra.mxu0 %vm247_vm1, %v11191_v28 }
 0x1ca   :  { %10868 = vmatprep.mubr.msk.bf16.mxu1 %vm247_vm1, %v9742_v60  ;;  %16981 = vst [vmem:[#allocation39_spill] sm:$0xff] %v14279_v63  ;;  %v3646_v34 = vadd.f32 %v3415_v33, %v16982_v37  ;;  %v14302_v60 = vsel %vm11408_vm6, %v9715_v12, %v5386_v17  ;;  %v5395_v33 = vrot.slane %v5393_v30, 4  ;;  %v11254_v25 = vld [vmem:[%s16689_s0 + $0x130] sm:$0xf]  ;;  %v14315_v10 = vsel %vm11408_vm6, %v9716_v45, %v5393_v30  ;;  %v11255_v12 = vld [vmem:[%s16689_s0 + $0x134] sm:$0x1] }
 0x1cb   :  { %v14306_v32 = vsel %vm11408_vm6, %v5388_v19, %v5389_v6  ;;  %v5400_v37 = vrot.slane %v11254_v25, 5  ;;  %v9717_v63 = vrot.slane %v9685_v57, 9  ;;  %v5403_v17 = vrot.slane %v11255_v12, 5  ;;  %v10722_v6 = vpop.f32.mrf.mxu1  ;;  %v9687_v19 = vld [vmem:[%s16689_s0 + $0x144] sm:$0xe]  ;;  %v16985_v24 = vld [vmem:[#allocation40_spill] sm:$0xff]  ;;  %10934 = vmatprep.mubr.msk.bf16.mxu0 %vm247_vm1, %v11192_v31 }
 0x1cc   :  { %v16984_v25 = vld [vmem:[#allocation54_spill] sm:$0xff]  ;;  %v14325_v54 = vadd.f32 %v10722_v6, %v16985_v24  ;;  %v9718_v45 = vrot.slane %v9686_v7, 9  ;;  %v14330_v57 = vadd.f32 %v10784_v51, %v3648_v50  ;;  %v11256_v12 = vld [vmem:[%s16689_s0 + $0x13c] sm:$0xf]  ;;  %v14341_v28 = vsel %vm11408_vm6, %v5395_v33, %v5396_v62  ;;  %v4829_v7 = vpop.f32.mrf.mxu0  ;;  %v16987_v51 = vld [vmem:[#allocation44_spill] sm:$0xff] }
 0x1cd   :  { %v3647_v22 = vadd.f32 %v3418_v3, %v16984_v25  ;;  %v5402_v23 = vrot.slane %v5400_v37, 4  ;;  %v5407_v38 = vrot.slane %v11256_v12, 5  ;;  %v11257_v3 = vld [vmem:[%s16689_s0 + $0x140] sm:$0x1]  ;;  %v3431_v24 = vpop.f32.mrf.mxu1  ;;  %v9719_v6 = vrot.slane %v9687_v19, 9 }
 0x1ce   :  { %16986 = vst [vmem:[#allocation37_spill] sm:$0xff] %v14330_v57  ;;  %v5410_v25 = vrot.slane %v11257_v3, 5  ;;  %v14344_v50 = vadd.f32 %v3431_v24, %v16987_v51  ;;  %v11258_v12 = vld [vmem:[%s16689_s0 + $0x148] sm:$0xf]  ;;  %v9688_v3 = vld [vmem:[%s16689_s0 + $0x150] sm:$0xe]  ;;  %v16988_v31 = vcombine.low %v14148_v44, %v14160_v48  ;;  %v14356_v62 = vadd.f32 %v4829_v7, %v3646_v34 }
 0x1cf   :  { %v5414_v30 = vrot.slane %v11258_v12, 5  ;;  %v14360_v33 = vsel %vm11408_vm6, %v9717_v63, %v5400_v37  ;;  %v14364_v19 = vsel %vm11408_vm6, %v5402_v23, %v5403_v17  ;;  %v5409_v24 = vrot.slane %v5407_v38, 4  ;;  %v10723_v51 = vpop.f32.mrf.mxu1  ;;  %v10785_v12 = vpop.f32.mrf.mxu0  ;;  %v16990_v48 = vld [vmem:[#allocation23_spill] sm:$0xff]  ;;  %v9689_v23 = vld [vmem:[%s16689_s0 + $0x15c] sm:$0xe] }
 0x1d0   :  { %16989 = vst [vmem:[#allocation43_spill] sm:$0xff] %v14356_v62  ;;  %v14369_v44 = vsel %vm11408_vm6, %v9718_v45, %v5407_v38  ;;  %v14372_v34 = vadd.f32 %v10723_v51, %v16990_v48  ;;  %v11259_v63 = vld [vmem:[%s16689_s0 + $0x14c] sm:$0x1]  ;;  %v14383_v17 = vadd.f32 %v10785_v12, %v3649_v39  ;;  %v11260_v51 = vld [vmem:[%s16689_s0 + $0x154] sm:$0xf]  ;;  %v9721_v29 = vrot.slane %v9689_v23, 9 }
 0x1d1   :  { %10869 = vmatmul.mubr.msk.bf16.gmra.mxu1 %vm247_vm1, %v16988_v31  ;;  %v5416_v7 = vrot.slane %v5414_v30, 4  ;;  %v5417_v37 = vrot.slane %v11259_v63, 5  ;;  %v14387_v38 = vsel %vm11408_vm6, %v5409_v24, %v5410_v25  ;;  %v3434_v45 = vpop.f32.mrf.mxu1  ;;  %v9720_v31 = vrot.slane %v9688_v3, 9  ;;  %v11194_v63 = vld [vmem:[%s16689_s0 + $0xf0] sm:$0xff]   ;;  %v4832_v39 = vpop.f32.mrf.mxu0  ;;  %v11261_v3 = vld [vmem:[%s16689_s0 + $0x158] sm:$0x1] }
 0x1d2   :  { %10872 = vmatprep.mubr.msk.bf16.mxu1 %vm247_vm1, %v9744_v21  ;;  %v11193_v21 = vld [vmem:[%s16689_s0 + $0xcc] sm:$0xff]   ;;  %16991 = vst [vmem:[#allocation45_spill] sm:$0xff] %v14383_v17  ;;  %v5421_v48 = vrot.slane %v11260_v51, 5  ;;  %v14401_v25 = vsel %vm11408_vm6, %v9719_v6, %v5414_v30  ;;  %v5424_v24 = vrot.slane %v11261_v3, 5  ;;  %v9690_v51 = vld [vmem:[%s16689_s0 + $0x168] sm:$0xe]  ;;  %v14409_v17 = vadd.f32 %v4832_v39, %v3647_v22 }
 0x1d3   :  { %v10726_v57 = vpop.f32.mrf.mxu1  ;;  %v14414_v30 = vadd.f32 %v3434_v45, %v13486_v8  ;;  %v16993_v6 = vld [vmem:[#allocation57_spill] sm:$0xff]  ;;  %v11262_v3 = vld [vmem:[%s16689_s0 + $0x160] sm:$0xf]  ;;  %v11263_v22 = vld [vmem:[%s16689_s0 + $0x164] sm:$0x1]  ;;  %10935 = vmatmul.mubr.msk.bf16.gmra.mxu0 %vm247_vm1, %v11193_v21  ;;  %v14431_v8 = vsel %vm11408_vm6, %v5416_v7, %v5417_v37 }
 0x1d4   :  { %16992 = vst [vmem:[#allocation50_spill] sm:$0xff] %v14409_v17  ;;  %v5423_v12 = vrot.slane %v5421_v48, 4  ;;  %v14417_v61 = vadd.f32 %v10726_v57, %v16993_v6  ;;  %v5428_v13 = vrot.slane %v11262_v3, 5  ;;  %v5431_v39 = vrot.slane %v11263_v22, 5  ;;  %v9691_v23 = vld [vmem:[%s16689_s0 + $0x174] sm:$0xe]  ;;  %10938 = vmatprep.mubr.msk.bf16.mxu0 %vm247_vm1, %v11194_v63 }
 0x1d5   :  { %v14435_v57 = vsel %vm11408_vm6, %v9720_v31, %v5421_v48  ;;  %v3447_v45 = vpop.f32.mrf.mxu1  ;;  %v9722_v6 = vrot.slane %v9690_v51, 9  ;;  %v11264_v3 = vld [vmem:[%s16689_s0 + $0x16c] sm:$0xf]  ;;  %v11265_v31 = vld [vmem:[%s16689_s0 + $0x170] sm:$0x1]  ;;  %v16994_v63 = vcombine.low %v14197_v16, %v14218_v58  ;;  %v16995_v17 = vcombine.low %v14226_v2, %v14245_v47 }
 0x1d6   :  { %v5435_v22 = vrot.slane %v11264_v3, 5  ;;  %v14443_v21 = vsel %vm11408_vm6, %v5423_v12, %v5424_v24  ;;  %v14446_v7 = vadd.f32 %v3447_v45, %v13497_v4  ;;  %v5430_v37 = vrot.slane %v5428_v13, 4  ;;  %v9692_v51 = vld [vmem:[%s16689_s0 + $0x180] sm:$0xe]  ;;  %v10788_v12 = vpop.f32.mrf.mxu0  ;;  %v16997_v58 = vld [vmem:[#allocation47_spill] sm:$0xff] }
 0x1d7   :  { %v5438_v48 = vrot.slane %v11265_v31, 5  ;;  %v10727_v24 = vpop.f32.mrf.mxu1  ;;  %v14460_v4 = vsel %vm11408_vm6, %v9721_v29, %v5428_v13  ;;  %v9723_v3 = vrot.slane %v9691_v23, 9  ;;  %v11266_v31 = vld [vmem:[%s16689_s0 + $0x178] sm:$0xf]  ;;  %v14470_v16 = vadd.f32 %v10788_v12, %v14325_v54  ;;  %v11267_v29 = vld [vmem:[%s16689_s0 + $0x17c] sm:$0x1] }
 0x1d8   :  { %v5437_v45 = vrot.slane %v5435_v22, 4  ;;  %v5442_v62 = vrot.slane %v11266_v31, 5  ;;  %v14477_v13 = vsel %vm11408_vm6, %v5430_v37, %v5431_v39  ;;  %v5445_v23 = vrot.slane %v11267_v29, 5  ;;  %v9693_v2 = vld [vmem:[%s16689_s0 + $0x18c] sm:$0xe]  ;;  %v11195_v54 = vld [vmem:[%s16689_s0 + $0xfc] sm:$0xff]   ;;  %v4845_v47 = vpop.f32.mrf.mxu0 }
 0x1d9   :  { %10873 = vmatmul.mubr.msk.bf16.gmra.mxu1 %vm247_vm1, %v16994_v63  ;;  %16996 = vst [vmem:[#allocation51_spill] sm:$0xff] %v14470_v16  ;;  %v14473_v63 = vadd.f32 %v10727_v24, %v16997_v58  ;;  %v3450_v37 = vpop.f32.mrf.mxu1  ;;  %v9724_v24 = vrot.slane %v9692_v51, 9  ;;  %v11196_v31 = vld [vmem:[%s16689_s0 + $0x108] sm:$0xff]   ;;  %v14496_v58 = vadd.f32 %v4845_v47, %v14344_v50  ;;  %v14502_v16 = vsel %vm11408_vm6, %v9722_v6, %v5435_v22  ;;  %v11268_v39 = vld [vmem:[%s16689_s0 + $0x184] sm:$0xf] }
 0x1da   :  { %10876 = vmatprep.mubr.msk.bf16.mxu1 %vm247_vm1, %v16995_v17  ;;  %v5444_v12 = vrot.slane %v5442_v62, 4  ;;  %v5449_v17 = vrot.slane %v11268_v39, 5  ;;  %v10789_v51 = vpop.f32.mrf.mxu0  ;;  %v14509_v52 = vsel %vm11408_vm6, %v5437_v45, %v5438_v48  ;;  %v11269_v50 = vld [vmem:[%s16689_s0 + $0x188] sm:$0x1]  ;;  %v9725_v29 = vrot.slane %v9693_v2, 9  ;;  %v17000_v48 = vld [vmem:[#allocation46_spill] sm:$0xff] }
 0x1db   :  { %16998 = vst [vmem:[#allocation49_spill] sm:$0xff] %v14496_v58  ;;  %v10730_v43 = vpop.f32.mrf.mxu1  ;;  %v5452_v47 = vrot.slane %v11269_v50, 5  ;;  %v11270_v6 = vld [vmem:[%s16689_s0 + $0x190] sm:$0xf]  ;;  %v9694_v39 = vld [vmem:[%s16689_s0 + $0x198] sm:$0xe]  ;;  %v14521_v58 = vadd.f32 %v10789_v51, %v14372_v34  ;;  %v14528_v41 = vsel %vm11408_vm6, %v9723_v3, %v5442_v62  ;;  %10939 = vmatmul.mubr.msk.bf16.gmra.mxu0 %vm247_vm1, %v11195_v54 }
 0x1dc   :  { %v5456_v22 = vrot.slane %v11270_v6, 5  ;;  %v14524_v45 = vadd.f32 %v10730_v43, %v17000_v48  ;;  %v14532_v2 = vsel %vm11408_vm6, %v5444_v12, %v5445_v23  ;;  %v9921_v50 = vld [vmem:[%s16689_s0 + $0x18] sm:$0xf]  ;;  %v4848_v6 = vpop.f32.mrf.mxu0  ;;  %v14540_v43 = vsel %vm11408_vm6, %v9724_v24, %v5449_v17  ;;  %v11271_v62 = vld [vmem:[%s16689_s0 + $0x194] sm:$0x1]  ;;  %10942 = vmatprep.mubr.msk.bf16.mxu0 %vm247_vm1, %v11196_v31  ;;  %v17002_v12 = vld [vmem:[#allocation63_spill] sm:$0xff] }
 0x1dd   :  { %16999 = vst [vmem:[#allocation34_spill] sm:$0xff] %v14521_v58  ;;  %v3463_v34 = vpop.f32.mrf.mxu1  ;;  %v5451_v51 = vrot.slane %v5449_v17, 4  ;;  %v5459_v3 = vrot.slane %v11271_v62, 5  ;;  %v14547_v23 = vadd.f32 %v4848_v6, %v14414_v30  ;;  %v9726_v24 = vrot.slane %v9694_v39, 9  ;;  %v14559_v17 = vld [vmem:[%s16689_s0 + $0x1c] sm:$0xf] }
 0x1de   :  { %v5458_v48 = vrot.slane %v5456_v22, 4  ;;  %v14550_v54 = vadd.f32 %v3463_v34, %v17002_v12  ;;  %v14554_v58 = vsel %vm11408_vm6, %v9725_v29, %v5456_v22  ;;  %v17003_v62 = vcombine.low %v14273_v14, %v14277_v11  ;;  %v11272_v22 = vld [vmem:[%s16689_s0 + $0x19c] sm:$0xf]  ;;  %v11197_v14 = vld [vmem:[%s16689_s0 + $0x114] sm:$0xff]  }
 0x1df   :  { %17001 = vst [vmem:[#allocation53_spill] sm:$0xff] %v14547_v23  ;;  %v10731_v30 = vpop.f32.mrf.mxu1  ;;  %v14567_v31 = vsel %vm11408_vm6, %v5451_v51, %v5452_v47  ;;  %v5463_v39 = vrot.slane %v11272_v22, 5  ;;  %v6794_v6 = vshrl.u32 %v9921_v50, 16  ;;  %v17004_v11 = vcombine.low %v14302_v60, %v14306_v32  ;;  %v17005_v47 = vld [vmem:[#allocation67_spill] sm:$0xff]  ;;  %v11273_v23 = vld [vmem:[%s16689_s0 + $0x1a0] sm:$0x1] }
 0x1e0   :  { %v14571_v29 = vsel %vm11408_vm6, %v5458_v48, %v5459_v3  ;;  %v3655_v34 = vadd.f32 %v3450_v37, %v17005_v47  ;;  %v17006_v48 = vld [vmem:[#allocation58_spill] sm:$0xff]  ;;  %v5466_v60 = vrot.slane %v11273_v23, 5  ;;  %v6803_v47 = vshll.u32 %v14559_v17, 16 }
 0x1e1   :  { %10877 = vmatmul.mubr.msk.bf16.gmra.mxu1 %vm247_vm1, %v17003_v62  ;;  %v14587_v3 = vadd.f32 %v10731_v30, %v17006_v48  ;;  %v10792_v62 = vpop.f32.mrf.mxu0  ;;  %v3466_v22 = vpop.f32.mrf.mxu1  ;;  %v9923_v32 = vld [vmem:[%s16689_s0 + $0x20] sm:$0x1]  ;;  %v6796_v37 = vrot.slane %v6794_v6, 4  ;;  %v6807_v51 = vshrl.u32 %v14559_v17, 16  ;;  %v14614_v36 = vsel %vm11408_vm6, %v9726_v24, %v5463_v39  ;;  %v9924_v23 = vld [vmem:[%s16689_s0 + $0x24] sm:$0xf] }
 0x1e2   :  { %10880 = vmatprep.mubr.msk.bf16.mxu1 %vm247_vm1, %v17004_v11  ;;  %v6797_v11 = vshll.u32 %v9921_v50, 16  ;;  %v11198_v30 = vld [vmem:[%s16689_s0 + $0x120] sm:$0xff]   ;;  %v14602_v48 = vadd.f32 %v10792_v62, %v14417_v61  ;;  %v10082_v50 = vld [vmem:[%s16689_s0 + $0x18] sm:$0xe]  ;;  %v5465_v61 = vrot.slane %v5463_v39, 4  ;;  %v6813_v42 = vshll.u32 %v9923_v32, 16 }
 0x1e3   :  { %v4861_v6 = vpop.f32.mrf.mxu0  ;;  %v10734_v9 = vpop.f32.mrf.mxu1  ;;  %v6809_v5 = vrot.slane %v6807_v51, 4  ;;  %10943 = vmatmul.mubr.msk.bf16.gmra.mxu0 %vm247_vm1, %v11197_v14  ;;  %v8244_v40 = vrot.slane %v9923_v32, 5  ;;  %v6818_v14 = vshrl.u32 %v9924_v23, 16 }
 0x1e4   :  { %17007 = vst [vmem:[#allocation55_spill] sm:$0xff] %v14602_v48  ;;  %v6799_v62 = vrot.slane %v6797_v11, 5  ;;  %v14616_v48 = vrot.slane %v6803_v47, 5  ;;  %v14622_v12 = vadd.f32 %v4861_v6, %v14446_v7  ;;  %v14625_v49 = vadd.f32 %v10734_v9, %v17008_v35  ;;  %10946 = vmatprep.mubr.msk.bf16.mxu0 %vm247_vm1, %v11198_v30  ;;  %v14640_v9 = vld [vmem:[%s16689_s0 + $0x28] sm:$0xf] }
 0x1e5   :  { %v10793_v24 = vpop.f32.mrf.mxu0  ;;  %v3479_v27 = vpop.f32.mrf.mxu1  ;;  %v10114_v11 = vrot.slane %v10082_v50, 9  ;;  %v8241_v47 = vrot.slane %v14559_v17, 5  ;;  %v17009_v17 = vcombine.low %v14315_v10, %v14341_v28  ;;  %v17010_v30 = vcombine.low %v14360_v33, %v14364_v19  ;;  %v17011_v50 = vld [vmem:[#allocation12_spill] sm:$0xff]  ;;  %v11200_v19 = vld [vmem:[%s16689_s0 + $0x138] sm:$0xff]  }
 0x1e6   :  { %v6800_v39 = vor.u32 %v6799_v62, %v6796_v37  ;;  %v14631_v46 = vadd.f32 %v10793_v24, %v14473_v63  ;;  %v14634_v7 = vadd.f32 %v3479_v27, %v13647_v55  ;;  %v6810_v35 = vor.u32 %v6809_v5, %v14616_v48  ;;  %v11199_v37 = vld [vmem:[%s16689_s0 + $0x12c] sm:$0xff]  }
 0x1e7   :  { %v4864_v51 = vpop.f32.mrf.mxu0  ;;  %v10735_v32 = vpop.f32.mrf.mxu1  ;;  %v14648_v63 = vsel %vm11408_vm6, %v5465_v61, %v5466_v60  ;;  %v8243_v27 = vrot.slane %v8241_v47, 4  ;;  %v6821_v5 = vshll.u32 %v9924_v23, 16  ;;  %v14660_v28 = vadd.f32 %v3466_v22, %v13607_v20  ;;  %v9926_v24 = vld [vmem:[%s16689_s0 + $0x2c] sm:$0x1] }
 0x1e8   :  { %v6801_v55 = vrot.slane %v6800_v39, 4  ;;  %v14657_v10 = vadd.f32 %v4864_v51, %v3655_v34  ;;  %v14663_v60 = vadd.f32 %v10735_v32, %v17011_v50  ;;  %v6820_v6 = vrot.slane %v6818_v14, 4 }
 0x1e9   :  { %10881 = vmatmul.mubr.msk.bf16.gmra.mxu1 %vm247_vm1, %v17009_v17  ;;  %v3482_v61 = vpop.f32.mrf.mxu1  ;;  %v6811_v23 = vrot.slane %v6810_v35, 4  ;;  %v6815_v62 = vrot.slane %v6813_v42, 5  ;;  %v6823_v39 = vrot.slane %v6821_v5, 5  ;;  %v6827_v33 = vshll.u32 %v14640_v9, 16  ;;  %v10083_v35 = vld [vmem:[%s16689_s0 + $0x24] sm:$0xe]  ;;  %v10796_v32 = vpop.f32.mrf.mxu0 }
 0x1ea   :  { %10884 = vmatprep.mubr.msk.bf16.mxu1 %vm247_vm1, %v17010_v30  ;;  %v14676_v34 = vsel %vm11408_vm6, %v10114_v11, %v8241_v47  ;;  %v14680_v42 = vsel %vm11408_vm6, %v8243_v27, %v8244_v40  ;;  %v6831_v22 = vshrl.u32 %v14640_v9, 16  ;;  %v14687_v14 = vadd.f32 %v3482_v61, %v13680_v15  ;;  %v9927_v15 = vld [vmem:[%s16689_s0 + $0x30] sm:$0xf] }
 0x1eb   :  { %v10738_v17 = vpop.f32.mrf.mxu1  ;;  %v6806_v51 = vsel %vm11430_vm7, %v6801_v55, %v14616_v48  ;;  %v6824_v11 = vor.u32 %v6823_v39, %v6820_v6  ;;  %v14692_v47 = vrot.slane %v6827_v33, 5  ;;  %v6837_v5 = vshll.u32 %v9926_v24, 16  ;;  %10947 = vmatmul.mubr.msk.bf16.gmra.mxu0 %vm247_vm1, %v11199_v37  ;;  %v4877_v61 = vpop.f32.mrf.mxu0 }
 0x1ec   :  { %v14695_v40 = vadd.f32 %v10738_v17, %v13592_v59  ;;  %v6833_v27 = vrot.slane %v6831_v22, 4  ;;  %v8248_v30 = vrot.slane %v14640_v9, 5  ;;  %v14703_v50 = vadd.f32 %v10796_v32, %v14524_v45  ;;  %v14712_v9 = vld [vmem:[%s16689_s0 + $0x34] sm:$0xf]  ;;  %10950 = vmatprep.mubr.msk.bf16.mxu0 %vm247_vm1, %v11200_v19 }
 0x1ed   :  { %v3495_v48 = vpop.f32.mrf.mxu1  ;;  %v6816_v55 = vsel %vm11430_vm7, %v6811_v23, %v6815_v62  ;;  %v10115_v6 = vrot.slane %v10083_v35, 9  ;;  %v8251_v33 = vrot.slane %v9926_v24, 5  ;;  %v17012_v23 = vcombine.low %v14369_v44, %v14387_v38  ;;  %v10797_v32 = vpop.f32.mrf.mxu0 }
 0x1ee   :  { %v14716_v37 = vadd.f32 %v3495_v48, %v13614_v1  ;;  %v6834_v45 = vor.u32 %v6833_v27, %v14692_v47  ;;  %v8250_v39 = vrot.slane %v8248_v30, 4  ;;  %v14724_v62 = vadd.f32 %v4877_v61, %v14550_v54  ;;  %v9929_v54 = vld [vmem:[%s16689_s0 + $0x38] sm:$0x1]  ;;  %v11201_v27 = vld [vmem:[%s16689_s0 + $0x144] sm:$0xff]  }
 0x1ef   :  { %v10739_v22 = vpop.f32.mrf.mxu1  ;;  %v14726_v35 = vrot.slane %v6824_v11, 4  ;;  %v6842_v19 = vshrl.u32 %v9927_v15, 16  ;;  %v6845_v17 = vshll.u32 %v9927_v15, 16  ;;  %v17013_v1 = vcombine.low %v14401_v25, %v14431_v8 }
 0x1f0   :  { %v14733_v24 = vadd.f32 %v10739_v22, %v13622_v26  ;;  %v14735_v44 = vcombine.low %v6806_v51, %v6816_v55  ;;  %v6839_v38 = vrot.slane %v6837_v5, 5  ;;  %v6851_v11 = vshll.u32 %v14712_v9, 16  ;;  %v10084_v51 = vld [vmem:[%s16689_s0 + $0x30] sm:$0xe]  ;;  %v4880_v55 = vpop.f32.mrf.mxu0  ;;  %v9930_v22 = vld [vmem:[%s16689_s0 + $0x3c] sm:$0xf] }
 0x1f1   :  { %10885 = vmatmul.mubr.msk.bf16.gmra.mxu1 %vm247_vm1, %v17012_v23  ;;  %v14745_v25 = vadd.f32 %v10797_v32, %v14587_v3  ;;  %v3498_v8 = vpop.f32.mrf.mxu1  ;;  %v6835_v15 = vrot.slane %v6834_v45, 4  ;;  %v6844_v26 = vrot.slane %v6842_v19, 4  ;;  %v6847_v48 = vrot.slane %v6845_v17, 5  ;;  %v11202_v5 = vld [vmem:[%s16689_s0 + $0x150] sm:$0xff]  }
 0x1f2   :  { %10888 = vmatprep.mubr.msk.bf16.mxu1 %vm247_vm1, %v17013_v1  ;;  %v14755_v61 = vsel %vm11408_vm6, %v10115_v6, %v8248_v30  ;;  %v14759_v3 = vsel %vm11408_vm6, %v8250_v39, %v8251_v33  ;;  %v14761_v45 = vrot.slane %v6851_v11, 5  ;;  %v6855_v23 = vshrl.u32 %v14712_v9, 16  ;;  %v17015_v33 = vld [vmem:[#allocation66_spill] sm:$0xff] }
 0x1f3   :  { %v14768_v19 = vadd.f32 %v4880_v55, %v14660_v28  ;;  %v10742_v17 = vpop.f32.mrf.mxu1  ;;  %v6830_v30 = vsel %vm11430_vm7, %v14726_v35, %v14692_v47  ;;  %v6848_v6 = vor.u32 %v6847_v48, %v6844_v26  ;;  %v6861_v39 = vshll.u32 %v9929_v54, 16  ;;  %10951 = vmatmul.mubr.msk.bf16.gmra.mxu0 %vm247_vm1, %v11201_v27  ;;  %v14786_v47 = vld [vmem:[%s16689_s0 + $0x40] sm:$0xf]  ;;  %v10800_v26 = vpop.f32.mrf.mxu0 }
 0x1f4   :  { %v14775_v1 = vadd.f32 %v10742_v17, %v17015_v33  ;;  %v6857_v32 = vrot.slane %v6855_v23, 4  ;;  %v10116_v11 = vrot.slane %v10084_v51, 9  ;;  %v8255_v59 = vrot.slane %v14712_v9, 5  ;;  %10954 = vmatprep.mubr.msk.bf16.mxu0 %vm247_vm1, %v11202_v5  ;;  %v17016_v9 = vld [vmem:[#allocation71_spill] sm:$0xff] }
 0x1f5   :  { %17014 = vst [vmem:[#allocation59_spill] sm:$0xff] %v14768_v19  ;;  %v6840_v28 = vsel %vm11430_vm7, %v6835_v15, %v6839_v38  ;;  %v3511_v20 = vpop.f32.mrf.mxu1  ;;  %v8258_v19 = vrot.slane %v9929_v54, 5  ;;  %v6866_v35 = vshrl.u32 %v9930_v22, 16  ;;  %v14792_v27 = vrot.slane %v6848_v6, 4  ;;  %v4893_v6 = vpop.f32.mrf.mxu0 }
 0x1f6   :  { %v14790_v48 = vadd.f32 %v3511_v20, %v17016_v9  ;;  %v6858_v38 = vor.u32 %v6857_v32, %v14761_v45  ;;  %v8257_v15 = vrot.slane %v8255_v59, 4  ;;  %v17017_v54 = vcombine.low %v14435_v57, %v14443_v21  ;;  %v17019_v32 = vld [vmem:[#allocation76_spill] sm:$0xff] }
 0x1f7   :  { %v14800_v51 = vadd.f32 %v10800_v26, %v14625_v49  ;;  %v10743_v23 = vpop.f32.mrf.mxu1  ;;  %v6863_v17 = vrot.slane %v6861_v39, 5  ;;  %v6868_v5 = vrot.slane %v6866_v35, 4  ;;  %v6869_v33 = vshll.u32 %v9930_v22, 16  ;;  %v14816_v49 = vld [vmem:[%s16689_s0 + $0x44] sm:$0x1]  ;;  %v11204_v35 = vld [vmem:[%s16689_s0 + $0x168] sm:$0xff]   ;;  %v10801_v26 = vpop.f32.mrf.mxu0 }
 0x1f8   :  { %v17018_v20 = vcombine.low %v14460_v4, %v14477_v13  ;;  %v14807_v9 = vadd.f32 %v10743_v23, %v17019_v32  ;;  %v6859_v55 = vrot.slane %v6858_v38, 4  ;;  %v14811_v57 = vsel %vm11408_vm6, %v10116_v11, %v8255_v59  ;;  %v11203_v4 = vld [vmem:[%s16689_s0 + $0x15c] sm:$0xff]  }
 0x1f9   :  { %10889 = vmatmul.mubr.msk.bf16.gmra.mxu1 %vm247_vm1, %v17017_v54  ;;  %v6875_v21 = vshll.u32 %v14786_v47, 16  ;;  %v14823_v13 = vadd.f32 %v4893_v6, %v14634_v7  ;;  %v3514_v22 = vpop.f32.mrf.mxu1  ;;  %v14827_v39 = vsel %vm11408_vm6, %v8257_v15, %v8258_v19  ;;  %v6871_v59 = vrot.slane %v6869_v33, 5  ;;  %v10085_v15 = vld [vmem:[%s16689_s0 + $0x3c] sm:$0xe] }
 0x1fa   :  { %10892 = vmatprep.mubr.msk.bf16.mxu1 %vm247_vm1, %v17018_v20  ;;  %v6879_v11 = vshrl.u32 %v14786_v47, 16  ;;  %v14834_v38 = vadd.f32 %v3498_v8, %v13790_v18  ;;  %v14836_v54 = vcombine.low %v6830_v30, %v6840_v28  ;;  %v6854_v7 = vsel %vm11430_vm7, %v14792_v27, %v14761_v45  ;;  %v9933_v30 = vld [vmem:[%s16689_s0 + $0x48] sm:$0xf]  ;;  %v4896_v28 = vpop.f32.mrf.mxu0  ;;  %v17021_v6 = vld [vmem:[#allocation73_spill] sm:$0xff] }
 0x1fb   :  { %v14842_v19 = vrot.slane %v6875_v21, 5  ;;  %v14848_v23 = vadd.f32 %v10801_v26, %v14663_v60  ;;  %v10746_v33 = vpop.f32.mrf.mxu1  ;;  %v6872_v20 = vor.u32 %v6871_v59, %v6868_v5  ;;  %v6885_v8 = vshll.u32 %v14816_v49, 16  ;;  %v14865_v5 = vld [vmem:[%s16689_s0 + $0x4c] sm:$0xf]  ;;  %10955 = vmatmul.mubr.msk.bf16.gmra.mxu0 %vm247_vm1, %v11203_v4 }
 0x1fc   :  { %v6881_v18 = vrot.slane %v6879_v11, 4  ;;  %v6864_v45 = vsel %vm11430_vm7, %v6859_v55, %v6863_v17  ;;  %v14859_v32 = vadd.f32 %v10746_v33, %v17021_v6  ;;  %v8262_v60 = vrot.slane %v14786_v47, 5  ;;  %10958 = vmatprep.mubr.msk.bf16.mxu0 %vm247_vm1, %v11204_v35  ;;  %v17023_v33 = vld [vmem:[#allocation77_spill] sm:$0xff] }
 0x1fd   :  { %17020 = vst [vmem:[#allocation62_spill] sm:$0xff] %v14848_v23  ;;  %v14869_v21 = vadd.f32 %v4896_v28, %v14687_v14  ;;  %v6873_v59 = vrot.slane %v6872_v20, 4  ;;  %v10117_v17 = vrot.slane %v10085_v15, 9  ;;  %v3527_v11 = vpop.f32.mrf.mxu1  ;;  %v8265_v47 = vrot.slane %v14816_v49, 5 }
 0x1fe   :  { %v6882_v55 = vor.u32 %v6881_v18, %v14842_v19  ;;  %v8264_v26 = vrot.slane %v8262_v60, 4  ;;  %v14875_v6 = vadd.f32 %v3527_v11, %v17023_v33  ;;  %v6890_v27 = vshrl.u32 %v9933_v30, 16  ;;  %v17026_v11 = vld [vmem:[#allocation68_spill] sm:$0xff] }
 0x1ff   :  { %17022 = vst [vmem:[#allocation64_spill] sm:$0xff] %v14869_v21  ;;  %v17024_v4 = vcombine.low %v14502_v16, %v14509_v52  ;;  %v6887_v20 = vrot.slane %v6885_v8, 5  ;;  %v10747_v28 = vpop.f32.mrf.mxu1  ;;  %v6893_v18 = vshll.u32 %v9933_v30, 16  ;;  %v6899_v15 = vshll.u32 %v14865_v5, 16  ;;  %v9935_v52 = vld [vmem:[%s16689_s0 + $0x50] sm:$0x1] }
 0x200   :  { %v6883_v14 = vrot.slane %v6882_v55, 4  ;;  %v17025_v35 = vcombine.low %v14528_v41, %v14532_v2  ;;  %v14887_v49 = vadd.f32 %v3514_v22, %v13826_v53  ;;  %v14890_v33 = vadd.f32 %v10747_v28, %v17026_v11  ;;  %v11205_v30 = vld [vmem:[%s16689_s0 + $0x174] sm:$0xff]   ;;  %v10804_v41 = vpop.f32.mrf.mxu0  ;;  %v11206_v28 = vld [vmem:[%s16689_s0 + $0x180] sm:$0xff]  }
 0x201   :  { %10893 = vmatmul.mubr.msk.bf16.gmra.mxu1 %vm247_vm1, %v17024_v4  ;;  %v6892_v16 = vrot.slane %v6890_v27, 4  ;;  %v6903_v8 = vshrl.u32 %v14865_v5, 16  ;;  %v14899_v2 = vcombine.low %v6854_v7, %v6864_v45  ;;  %v14903_v53 = vsel %vm11408_vm6, %v10117_v17, %v8262_v60  ;;  %v14905_v22 = vpop.f32.mrf.mxu1  ;;  %v10086_v27 = vld [vmem:[%s16689_s0 + $0x48] sm:$0xe] }
 0x202   :  { %10896 = vmatprep.mubr.msk.bf16.mxu1 %vm247_vm1, %v17025_v35  ;;  %v6895_v55 = vrot.slane %v6893_v18, 5  ;;  %v14907_v4 = vrot.slane %v6899_v15, 5  ;;  %v14916_v7 = vadd.f32 %v10804_v41, %v14695_v40  ;;  %v6878_v45 = vsel %vm11430_vm7, %v6873_v59, %v14842_v19  ;;  %v4909_v18 = vpop.f32.mrf.mxu0  ;;  %v9936_v40 = vld [vmem:[%s16689_s0 + $0x54] sm:$0xf] }
 0x203   :  { %v14923_v60 = vsel %vm11408_vm6, %v8264_v26, %v8265_v47  ;;  %v6905_v17 = vrot.slane %v6903_v8, 4  ;;  %v6888_v15 = vsel %vm11430_vm7, %v6883_v14, %v6887_v20  ;;  %v6909_v11 = vshll.u32 %v9935_v52, 16  ;;  %v10750_v23 = vpop.f32.mrf.mxu1  ;;  %v17029_v47 = vld [vmem:[#allocation24_spill] sm:$0xff]  ;;  %v14941_v14 = vld [vmem:[%s16689_s0 + $0x58] sm:$0xf]  ;;  %10959 = vmatmul.mubr.msk.bf16.gmra.mxu0 %vm247_vm1, %v11205_v30 }
 0x204   :  { %17027 = vst [vmem:[#allocation13_spill] sm:$0xff] %v14916_v7  ;;  %v6896_v35 = vor.u32 %v6895_v55, %v6892_v16  ;;  %v8269_v21 = vrot.slane %v14865_v5, 5  ;;  %v14932_v19 = vadd.f32 %v4909_v18, %v14716_v37  ;;  %v10118_v26 = vrot.slane %v10086_v27, 9  ;;  %v10805_v5 = vpop.f32.mrf.mxu0  ;;  %10962 = vmatprep.mubr.msk.bf16.mxu0 %vm247_vm1, %v11206_v28  ;;  %v9938_v28 = vld [vmem:[%s16689_s0 + $0x5c] sm:$0x1] }
 0x205   :  { %v6906_v59 = vor.u32 %v6905_v17, %v14907_v4  ;;  %v14936_v8 = vadd.f32 %v10750_v23, %v17029_v47  ;;  %v6911_v16 = vrot.slane %v6909_v11, 5  ;;  %v8272_v55 = vrot.slane %v9935_v52, 5  ;;  %v3543_v37 = vpop.f32.mrf.mxu1  ;;  %v17035_v52 = vld [vmem:[#allocation82_spill] sm:$0xff] }
 0x206   :  { %17028 = vst [vmem:[#allocation69_spill] sm:$0xff] %v14932_v19  ;;  %v6897_v20 = vrot.slane %v6896_v35, 4  ;;  %v8271_v41 = vrot.slane %v8269_v21, 4  ;;  %v14946_v27 = vadd.f32 %v10805_v5, %v14733_v24  ;;  %v6914_v17 = vshrl.u32 %v9936_v40, 16  ;;  %v4912_v30 = vpop.f32.mrf.mxu0  ;;  %v11207_v5 = vld [vmem:[%s16689_s0 + $0x18c] sm:$0xff]  }
 0x207   :  { %v6907_v23 = vrot.slane %v6906_v59, 4  ;;  %v6917_v18 = vshll.u32 %v9936_v40, 16  ;;  %v17031_v47 = vcombine.low %v14540_v43, %v14567_v31  ;;  %v14952_v19 = vcombine.low %v6878_v45, %v6888_v15  ;;  %v10087_v43 = vld [vmem:[%s16689_s0 + $0x54] sm:$0xe]  ;;  %v10751_v31 = vpop.f32.mrf.mxu1 }
 0x208   :  { %17030 = vst [vmem:[#allocation70_spill] sm:$0xff] %v14946_v27  ;;  %v6923_v24 = vshll.u32 %v14941_v14, 16  ;;  %v6927_v35 = vshrl.u32 %v14941_v14, 16  ;;  %v17032_v45 = vcombine.low %v14554_v58, %v14571_v29  ;;  %v14969_v15 = vadd.f32 %v4912_v30, %v14834_v38 }
 0x209   :  { %10897 = vmatmul.mubr.msk.bf16.gmra.mxu1 %vm247_vm1, %v17031_v47  ;;  %v6902_v11 = vsel %vm11430_vm7, %v6897_v20, %v14907_v4  ;;  %v14976_v40 = vsel %vm11408_vm6, %v10118_v26, %v8269_v21  ;;  %v6916_v59 = vrot.slane %v6914_v17, 4  ;;  %v14983_v58 = vsel %vm11408_vm6, %v8271_v41, %v8272_v55  ;;  %v3546_v30 = vpop.f32.mrf.mxu1  ;;  %v11208_v4 = vld [vmem:[%s16689_s0 + $0x198] sm:$0xff]   ;;  %v9939_v41 = vld [vmem:[%s16689_s0 + $0x60] sm:$0xf]  ;;  %v10808_v55 = vpop.f32.mrf.mxu0 }
 0x20a   :  { %10900 = vmatprep.mubr.msk.bf16.mxu1 %vm247_vm1, %v17032_v45  ;;  %17033 = vst [vmem:[#allocation72_spill] sm:$0xff] %v14969_v15  ;;  %v6919_v29 = vrot.slane %v6917_v18, 5  ;;  %v14985_v38 = vrot.slane %v6923_v24, 5  ;;  %v6929_v47 = vrot.slane %v6927_v35, 4  ;;  %v6912_v21 = vsel %vm11430_vm7, %v6907_v23, %v6911_v16  ;;  %v17034_v35 = vld [vmem:[#allocation80_spill] sm:$0xff] }
 0x20b   :  { %v6933_v26 = vshll.u32 %v9938_v28, 16  ;;  %v10119_v20 = vrot.slane %v10087_v43, 9  ;;  %v8276_v17 = vrot.slane %v14941_v14, 5  ;;  %v14998_v45 = vadd.f32 %v3543_v37, %v17034_v35  ;;  %v15006_v16 = vld [vmem:[%s16689_s0 + $0x64] sm:$0xf]  ;;  %v10754_v14 = vpop.f32.mrf.mxu1  ;;  %10963 = vmatmul.mubr.msk.bf16.gmra.mxu0 %vm247_vm1, %v11207_v5  ;;  %v4925_v37 = vpop.f32.mrf.mxu0 }
 0x20c   :  { %v6920_v18 = vor.u32 %v6919_v29, %v6916_v59  ;;  %v6930_v24 = vor.u32 %v6929_v47, %v14985_v38  ;;  %v15001_v15 = vadd.f32 %v10751_v31, %v17035_v52  ;;  %v15009_v23 = vadd.f32 %v10808_v55, %v14775_v1  ;;  %v17037_v43 = vld [vmem:[#allocation6_spill] sm:$0xff]  ;;  %10966 = vmatprep.mubr.msk.bf16.mxu0 %vm247_vm1, %v11208_v4  ;;  %v17040_v4 = vld [vmem:[#allocation83_spill] sm:$0xff] }
 0x20d   :  { %v15013_v59 = vadd.f32 %v14905_v22, %v17037_v43  ;;  %v8278_v29 = vrot.slane %v8276_v17, 4  ;;  %v8279_v47 = vrot.slane %v9938_v28, 5  ;;  %v15016_v52 = vcombine.low %v6902_v11, %v6912_v21  ;;  %v15022_v7 = vpop.f32.mrf.mxu1  ;;  %v9941_v28 = vld [vmem:[%s16689_s0 + $0x68] sm:$0x1]  ;;  %v10809_v55 = vpop.f32.mrf.mxu0 }
 0x20e   :  { %17036 = vst [vmem:[#allocation74_spill] sm:$0xff] %v15009_v23  ;;  %v15020_v35 = vrot.slane %v6920_v18, 4  ;;  %v6938_v27 = vshrl.u32 %v9939_v41, 16  ;;  %v15026_v1 = vadd.f32 %v4925_v37, %v14790_v48  ;;  %v15028_v22 = vrot.slane %v6933_v26, 5  ;;  %v17043_v31 = vld [vmem:[#allocation75_spill] sm:$0xff] }
 0x20f   :  { %v6941_v11 = vshll.u32 %v9939_v41, 16  ;;  %v6947_v5 = vshll.u32 %v15006_v16, 16  ;;  %v17039_v21 = vcombine.low %v14614_v36, %v14648_v63  ;;  %v15038_v18 = vrot.slane %v6930_v24, 4  ;;  %v10088_v41 = vld [vmem:[%s16689_s0 + $0x60] sm:$0xe]  ;;  %v15050_v37 = vpop.f32.mrf.mxu1  ;;  %v11209_v36 = vld [vmem:[%s16689_s0 + $0x1a4] sm:$0xff]   ;;  %v4928_v24 = vpop.f32.mrf.mxu0 }
 0x210   :  { %17038 = vst [vmem:[#allocation78_spill] sm:$0xff] %v15026_v1  ;;  %v15042_v48 = vsel %vm11408_vm6, %v10119_v20, %v8276_v17  ;;  %v15045_v26 = vadd.f32 %v3546_v30, %v17040_v4  ;;  %v6940_v43 = vrot.slane %v6938_v27, 4  ;;  %v15058_v63 = vadd.f32 %v10809_v55, %v14807_v9  ;;  %v9942_v17 = vld [vmem:[%s16689_s0 + $0x6c] sm:$0xf]  ;;  %v15076_v4 = vld [vmem:[%s16689_s0 + $0x70] sm:$0xf] }
 0x211   :  { %10901 = vmatmul.mubr.msk.bf16.gmra.mxu1 %vm247_vm1, %v17039_v21  ;;  %v15066_v30 = vsel %vm11408_vm6, %v8278_v29, %v8279_v47  ;;  %v6943_v20 = vrot.slane %v6941_v11, 5  ;;  %v6949_v21 = vrot.slane %v6947_v5, 5  ;;  %v6957_v9 = vshll.u32 %v9941_v28, 16 }
 0x212   :  { %10972 = vmatprep.mubr.msk.bf16.mxu1 %vm247_vm1, %v14735_v44  ;;  %17041 = vst [vmem:[#allocation79_spill] sm:$0xff] %v15058_v63  ;;  %v6951_v44 = vshrl.u32 %v15006_v16, 16  ;;  %v8283_v55 = vrot.slane %v15006_v16, 5  ;;  %v15079_v29 = vadd.f32 %v4928_v24, %v14887_v49  ;;  %v10120_v11 = vrot.slane %v10088_v41, 9  ;;  %v15084_v63 = vpop.f32.mrf.mxu1  ;;  %v9944_v49 = vld [vmem:[%s16689_s0 + $0x74] sm:$0x1] }
 0x213   :  { %v6944_v47 = vor.u32 %v6943_v20, %v6940_v43  ;;  %v15082_v27 = vadd.f32 %v10754_v14, %v17043_v31  ;;  %v6936_v16 = vsel %vm11430_vm7, %v15038_v18, %v15028_v22  ;;  %v8286_v23 = vrot.slane %v9941_v28, 5  ;;  %10967 = vmatmul.mubr.msk.bf16.gmra.mxu0 %vm247_vm1, %v11209_v36  ;;  %v10812_v18 = vpop.f32.mrf.mxu0 }
 0x214   :  { %17042 = vst [vmem:[#allocation81_spill] sm:$0xff] %v15079_v29  ;;  %v6953_v5 = vrot.slane %v6951_v44, 4  ;;  %v8285_v1 = vrot.slane %v8283_v55, 4  ;;  %v6962_v43 = vshrl.u32 %v9942_v17, 16  ;;  %v6965_v41 = vshll.u32 %v9942_v17, 16 }
 0x215   :  { %v6945_v24 = vrot.slane %v6944_v47, 4  ;;  %v6971_v14 = vshll.u32 %v15076_v4, 16  ;;  %v6959_v29 = vrot.slane %v6957_v9, 5  ;;  %v6975_v22 = vshrl.u32 %v15076_v4, 16  ;;  %v10758_v9 = vpop.f32.mrf.mxu1 }
 0x216   :  { %v6954_v20 = vor.u32 %v6953_v5, %v6949_v21  ;;  %v17044_v28 = vcombine.low %v14676_v34, %v14680_v42  ;;  %v15104_v17 = vsel %vm11408_vm6, %v10120_v11, %v8283_v55  ;;  %v6964_v44 = vrot.slane %v6962_v43, 4  ;;  %v10089_v5 = vld [vmem:[%s16689_s0 + $0x6c] sm:$0xe]  ;;  %v4941_v55 = vpop.f32.mrf.mxu0 }
 0x217   :  { %v6967_v47 = vrot.slane %v6965_v41, 5  ;;  %v6981_v36 = vshll.u32 %v9944_v49, 16  ;;  %v15112_v34 = vadd.f32 %v10812_v18, %v14859_v32  ;;  %v6977_v31 = vrot.slane %v6975_v22, 4  ;;  %v15138_v18 = vpop.f32.mrf.mxu1 }
 0x218   :  { %11038 = vmatprep.mubr.msk.bf16.mxu0 %vm247_vm1, %v17044_v28  ;;  %v6955_v42 = vrot.slane %v6954_v20, 4  ;;  %v15114_v28 = vrot.slane %v6971_v14, 5  ;;  %v6950_v11 = vsel %vm11430_vm7, %v6945_v24, %v6949_v21  ;;  %v15122_v43 = vsel %vm11408_vm6, %v8285_v1, %v8286_v23  ;;  %v9945_v21 = vld [vmem:[%s16689_s0 + $0x78] sm:$0xf]  ;;  %v10813_v24 = vpop.f32.mrf.mxu0 }
 0x219   :  { %10973 = vmatmul.mubr.msk.bf16.vlgmr.msra.gmra.mxu1 %vm247_vm1, %v14836_v54  ;;  %17045 = vst [vmem:[#allocation30_spill] sm:$0xff] %v15112_v34  ;;  %v6968_v41 = vor.u32 %v6967_v47, %v6964_v44  ;;  %v8290_v54 = vrot.slane %v15076_v4, 5  ;;  %v15126_v32 = vadd.f32 %v4941_v55, %v14875_v6  ;;  %v15136_v23 = vrot.slane %v6981_v36, 5  ;;  %v17049_v47 = vld [vmem:[#allocation3_spill] sm:$0xff]  ;;  %v9946_v36 = vld [vmem:[%s16689_s0 + $0x7c] sm:$0xf] }
 0x21a   :  { %10976 = vmatprep.mubr.msk.bf16.mxu1 %vm247_vm1, %v14899_v2  ;;  %v6960_v14 = vsel %vm11430_vm7, %v6955_v42, %v6959_v29  ;;  %v6978_v20 = vor.u32 %v6977_v31, %v15114_v28  ;;  %v10121_v2 = vrot.slane %v10089_v5, 9  ;;  %v8293_v4 = vrot.slane %v9944_v49, 5  ;;  %v17048_v31 = vld [vmem:[#allocation2_spill] sm:$0xff]  ;;  %v4944_v49 = vpop.f32.mrf.mxu0 }
 0x21b   :  { %17046 = vst [vmem:[#allocation31_spill] sm:$0xff] %v15126_v32  ;;  %v15134_v22 = vrot.slane %v6968_v41, 4  ;;  %v8292_v1 = vrot.slane %v8290_v54, 4  ;;  %v15141_v6 = vadd.f32 %v10813_v24, %v14890_v33  ;;  %v15147_v44 = vadd.f32 %v15022_v7, %v17048_v31 }
 0x21c   :  { %v15143_v29 = vrot.slane %v6978_v20, 4  ;;  %v15151_v5 = vadd.f32 %v15050_v37, %v17049_v47  ;;  %v17050_v33 = vsel %vm11430_vm7, %v15020_v35, %v14985_v38  ;;  %v15161_v55 = vcombine.low %v6950_v11, %v6960_v14  ;;  %v9947_v37 = vld [vmem:[%s16689_s0 + $0x80] sm:$0x1]  ;;  %v10090_v11 = vld [vmem:[%s16689_s0 + $0x78] sm:$0xe]  ;;  %v15194_v47 = vpop.f32.mrf.mxu1 }
 0x21d   :  { %17047 = vst [vmem:[#allocation5_spill] sm:$0xff] %v15141_v6  ;;  %v10023_v42 = vcombine.low %v17050_v33, %v6936_v16  ;;  %v6986_v41 = vshrl.u32 %v9945_v21, 16  ;;  %v17051_v20 = vcombine.low %v14755_v61, %v14759_v3  ;;  %v15173_v24 = vadd.f32 %v4944_v49, %v15013_v59  ;;  %v17054_v33 = vld [vmem:[#allocation4_spill] sm:$0xff] }
 0x21e   :  { %v15181_v35 = vsel %vm11408_vm6, %v10121_v2, %v8290_v54  ;;  %v6989_v16 = vshll.u32 %v9945_v21, 16  ;;  %v17053_v61 = vcombine.low %v14811_v57, %v14827_v39  ;;  %v15192_v3 = vsel %vm11408_vm6, %v8292_v1, %v8293_v4  ;;  %v9948_v21 = vld [vmem:[%s16689_s0 + $0x84] sm:$0xf] }
 0x21f   :  { %11039 = vmatmul.mubr.msk.bf16.vlgmr.msra.gmra.mxu0 %vm247_vm1, %v17051_v20  ;;  %17052 = vst [vmem:[#allocation7_spill] sm:$0xff] %v15173_v24  ;;  %v6988_v59 = vrot.slane %v6986_v41, 4  ;;  %v6995_v14 = vshll.u32 %v9946_v36, 16  ;;  %v6999_v31 = vshrl.u32 %v9946_v36, 16  ;;  %v6984_v54 = vsel %vm11430_vm7, %v15143_v29, %v15136_v23  ;;  %v15213_v23 = vld [vmem:[%s16689_s0 + $0x88] sm:$0xf]  ;;  %v10816_v29 = vpop.f32.mrf.mxu0 }
 0x220   :  { %11042 = vmatprep.mubr.msk.bf16.mxu0 %vm247_vm1, %v17053_v61  ;;  %v6991_v57 = vrot.slane %v6989_v16, 5  ;;  %v7005_v39 = vshll.u32 %v9947_v37, 16  ;;  %v8297_v2 = vrot.slane %v9946_v36, 5  ;;  %v10122_v49 = vrot.slane %v10090_v11, 9  ;;  %v15218_v11 = vpop.f32.mrf.mxu1 }
 0x221   :  { %10977 = vmatmul.mubr.msk.bf16.gmra.mxu1 %vm247_vm1, %v14952_v19  ;;  %v6997_v1 = vrot.slane %v6995_v14, 5  ;;  %v7001_v4 = vrot.slane %v6999_v31, 4  ;;  %v15208_v19 = vadd.f32 %v10758_v9, %v17054_v33  ;;  %v8300_v16 = vrot.slane %v9947_v37, 5  ;;  %v4957_v9 = vpop.f32.mrf.mxu0 }
 0x222   :  { %10980 = vmatprep.mubr.msk.bf16.mxu1 %vm247_vm1, %v15016_v52  ;;  %v6992_v36 = vor.u32 %v6991_v57, %v6988_v59  ;;  %v7007_v41 = vrot.slane %v7005_v39, 5  ;;  %v8299_v20 = vrot.slane %v8297_v2, 4  ;;  %v15216_v61 = vadd.f32 %v10816_v29, %v14936_v8  ;;  %v9950_v59 = vld [vmem:[%s16689_s0 + $0x8c] sm:$0x1]  ;;  %v10091_v29 = vld [vmem:[%s16689_s0 + $0x84] sm:$0xe] }
 0x223   :  { %v7002_v52 = vor.u32 %v7001_v4, %v6997_v1  ;;  %v7010_v14 = vshrl.u32 %v9948_v21, 16  ;;  %v7013_v31 = vshll.u32 %v9948_v21, 16  ;;  %v7019_v57 = vshll.u32 %v15213_v23, 16  ;;  %v10817_v33 = vpop.f32.mrf.mxu0 }
 0x224   :  { %17055 = vst [vmem:[#allocation9_spill] sm:$0xff] %v15216_v61  ;;  %v6993_v7 = vrot.slane %v6992_v36, 4  ;;  %v7023_v37 = vshrl.u32 %v15213_v23, 16  ;;  %v15228_v8 = vadd.f32 %v4957_v9, %v14998_v45  ;;  %v15232_v21 = vsel %vm11408_vm6, %v10122_v49, %v8297_v2 }
 0x225   :  { %v7003_v39 = vrot.slane %v7002_v52, 4  ;;  %v7012_v4 = vrot.slane %v7010_v14, 4  ;;  %v17057_v36 = vcombine.low %v14903_v53, %v14923_v60  ;;  %v15243_v45 = vsel %vm11408_vm6, %v8299_v20, %v8300_v16  ;;  %v10762_v20 = vpop.f32.mrf.mxu1  ;;  %v4960_v16 = vpop.f32.mrf.mxu0 }
 0x226   :  { %17056 = vst [vmem:[#allocation42_spill] sm:$0xff] %v15228_v8  ;;  %v7015_v52 = vrot.slane %v7013_v31, 5  ;;  %v7021_v9 = vrot.slane %v7019_v57, 5  ;;  %v7025_v38 = vrot.slane %v7023_v37, 4  ;;  %v17058_v2 = vcombine.low %v14976_v40, %v14983_v58 }
 0x227   :  { %11043 = vmatmul.mubr.msk.bf16.gmra.mxu0 %vm247_vm1, %v17057_v36  ;;  %v15250_v49 = vadd.f32 %v10817_v33, %v15001_v15  ;;  %v6998_v53 = vsel %vm11430_vm7, %v6993_v7, %v6997_v1  ;;  %v7008_v60 = vsel %vm11430_vm7, %v7003_v39, %v7007_v41  ;;  %v7029_v14 = vshll.u32 %v9950_v59, 16  ;;  %v9951_v15 = vld [vmem:[%s16689_s0 + $0x90] sm:$0xf] }
 0x228   :  { %11046 = vmatprep.mubr.msk.bf16.mxu0 %vm247_vm1, %v17058_v2  ;;  %v7016_v31 = vor.u32 %v7015_v52, %v7012_v4  ;;  %v7026_v57 = vor.u32 %v7025_v38, %v7021_v9  ;;  %v10123_v37 = vrot.slane %v10091_v29, 9  ;;  %v8304_v40 = vrot.slane %v15213_v23, 5  ;;  %v17061_v41 = vld [vmem:[#allocation8_spill] sm:$0xff]  ;;  %v9953_v29 = vld [vmem:[%s16689_s0 + $0x98] sm:$0x1]  ;;  %v15287_v2 = vpop.f32.mrf.mxu1 }
 0x229   :  { %17059 = vst [vmem:[#allocation16_spill] sm:$0xff] %v15250_v49  ;;  %10981 = vmatmul.mubr.msk.bf16.gmra.mxu1 %vm247_vm1, %v10023_v42  ;;  %v15262_v58 = vadd.f32 %v4960_v16, %v15045_v26  ;;  %v7031_v7 = vrot.slane %v7029_v14, 5  ;;  %v8307_v1 = vrot.slane %v9950_v59, 5  ;;  %v15268_v42 = vadd.f32 %v15138_v18, %v17061_v41  ;;  %v9952_v38 = vld [vmem:[%s16689_s0 + $0x94] sm:$0xf]  ;;  %v17063_v59 = vld [vmem:[#allocation11_spill] sm:$0xff]  ;;  %v10820_v16 = vpop.f32.mrf.mxu0 }
 0x22a   :  { %10984 = vmatprep.mubr.msk.bf16.mxu1 %vm247_vm1, %v15161_v55  ;;  %v17062_v23 = vsel %vm11430_vm7, %v15134_v22, %v15114_v28  ;;  %v7017_v33 = vrot.slane %v7016_v31, 4  ;;  %v7027_v39 = vrot.slane %v7026_v57, 4  ;;  %v8306_v4 = vrot.slane %v8304_v40, 4 }
 0x22b   :  { %17060 = vst [vmem:[#allocation18_spill] sm:$0xff] %v15262_v58  ;;  %v10025_v26 = vcombine.low %v17062_v23, %v6984_v54  ;;  %v15282_v18 = vadd.f32 %v15194_v47, %v17063_v59  ;;  %v7034_v36 = vshrl.u32 %v9951_v15, 16  ;;  %v7037_v52 = vshll.u32 %v9951_v15, 16  ;;  %v10092_v47 = vld [vmem:[%s16689_s0 + $0x90] sm:$0xe] }
 0x22c   :  { %v10026_v28 = vcombine.low %v6998_v53, %v7008_v60  ;;  %v7022_v22 = vsel %vm11430_vm7, %v7017_v33, %v7021_v9  ;;  %v7032_v54 = vsel %vm11430_vm7, %v7027_v39, %v7031_v7  ;;  %v7043_v14 = vshll.u32 %v9952_v38, 16 }
 0x22d   :  { %v15298_v31 = vsel %vm11408_vm6, %v10123_v37, %v8304_v40  ;;  %v15302_v57 = vsel %vm11408_vm6, %v8306_v4, %v8307_v1  ;;  %v7036_v53 = vrot.slane %v7034_v36, 4  ;;  %v7039_v60 = vrot.slane %v7037_v52, 5  ;;  %v9954_v37 = vld [vmem:[%s16689_s0 + $0x9c] sm:$0xf]  ;;  %v4973_v1 = vpop.f32.mrf.mxu0  ;;  %v10763_v4 = vpop.f32.mrf.mxu1 }
 0x22e   :  { %v17064_v9 = vcombine.low %v15042_v48, %v15066_v30  ;;  %v15309_v15 = vadd.f32 %v10820_v16, %v15082_v27  ;;  %v7045_v7 = vrot.slane %v7043_v14, 5  ;;  %v7047_v41 = vshrl.u32 %v9952_v38, 16  ;;  %v9955_v27 = vld [vmem:[%s16689_s0 + $0xa0] sm:$0xf] }
 0x22f   :  { %v7053_v23 = vshll.u32 %v9953_v29, 16  ;;  %v17066_v40 = vcombine.low %v15104_v17, %v15122_v43  ;;  %v10027_v33 = vcombine.low %v7022_v22, %v7032_v54  ;;  %v7040_v48 = vor.u32 %v7039_v60, %v7036_v53  ;;  %v17068_v17 = vld [vmem:[#allocation17_spill] sm:$0xff]  ;;  %v10821_v14 = vpop.f32.mrf.mxu0 }
 0x230   :  { %11047 = vmatmul.mubr.msk.bf16.gmra.mxu0 %vm247_vm1, %v17064_v9  ;;  %17065 = vst [vmem:[#allocation20_spill] sm:$0xff] %v15309_v15  ;;  %v10124_v30 = vrot.slane %v10092_v47, 9  ;;  %v8311_v39 = vrot.slane %v9952_v38, 5  ;;  %v15323_v59 = vadd.f32 %v4973_v1, %v15147_v44  ;;  %v7049_v36 = vrot.slane %v7047_v41, 4  ;;  %v9956_v44 = vld [vmem:[%s16689_s0 + $0xa4] sm:$0x1] }
 0x231   :  { %11050 = vmatprep.mubr.msk.bf16.mxu0 %vm247_vm1, %v17066_v40  ;;  %10985 = vmatmul.mubr.msk.bf16.gmra.mxu1 %vm247_vm1, %v10025_v26  ;;  %v8314_v52 = vrot.slane %v9953_v29, 5  ;;  %v15326_v43 = vadd.f32 %v10762_v20, %v17068_v17  ;;  %v7041_v22 = vrot.slane %v7040_v48, 4  ;;  %v7055_v38 = vrot.slane %v7053_v23, 5  ;;  %v10093_v20 = vld [vmem:[%s16689_s0 + $0x9c] sm:$0xe]  ;;  %v15338_v60 = vpop.f32.mrf.mxu0  ;;  %v3594_v23 = vpop.f32.mrf.mxu1 }
 0x232   :  { %17067 = vst [vmem:[#allocation52_spill] sm:$0xff] %v15323_v59  ;;  %10988 = vmatprep.mubr.msk.bf16.mxu1 %vm247_vm1, %v10026_v28  ;;  %v8313_v54 = vrot.slane %v8311_v39, 4  ;;  %v7058_v47 = vshrl.u32 %v9954_v37, 16  ;;  %v15330_v16 = vadd.f32 %v10821_v14, %v15151_v5  ;;  %v7050_v53 = vor.u32 %v7049_v36, %v7045_v7 }
 0x233   :  { %v7061_v26 = vshll.u32 %v9954_v37, 16  ;;  %v7067_v29 = vshll.u32 %v9955_v27, 16  ;;  %v10156_v28 = vcombine.low %v15298_v31, %v15302_v57  ;;  %v15344_v5 = vsel %vm11408_vm6, %v10124_v30, %v8311_v39 }
 0x234   :  { %17069 = vst [vmem:[#allocation85_spill] sm:$0xff] %v15330_v16  ;;  %v7060_v9 = vrot.slane %v7058_v47, 4  ;;  %v7071_v41 = vshrl.u32 %v9955_v27, 16  ;;  %v7046_v37 = vsel %vm11430_vm7, %v7041_v22, %v7045_v7  ;;  %v7051_v40 = vrot.slane %v7050_v53, 4  ;;  %v17072_v53 = vld [vmem:[#allocation26_spill] sm:$0xff] }
 0x235   :  { %v8315_v1 = vsel %vm11408_vm6, %v8313_v54, %v8314_v52  ;;  %v7063_v48 = vrot.slane %v7061_v26, 5  ;;  %v7069_v36 = vrot.slane %v7067_v29, 5  ;;  %v7077_v14 = vshll.u32 %v9956_v44, 16  ;;  %v9957_v52 = vld [vmem:[%s16689_s0 + $0xa8] sm:$0xf]  ;;  %v10824_v54 = vpop.f32.mrf.mxu0 }
 0x236   :  { %v7073_v17 = vrot.slane %v7071_v41, 4  ;;  %v10125_v55 = vrot.slane %v10093_v20, 9  ;;  %v17070_v31 = vcombine.low %v15181_v35, %v15192_v3  ;;  %v7056_v57 = vsel %vm11430_vm7, %v7051_v40, %v7055_v38  ;;  %v10766_v38 = vpop.f32.mrf.mxu1  ;;  %v17076_v40 = vld [vmem:[#allocation22_spill] sm:$0xff] }
 0x237   :  { %v7064_v30 = vor.u32 %v7063_v48, %v7060_v9  ;;  %v8318_v39 = vrot.slane %v9955_v27, 5  ;;  %v8321_v7 = vrot.slane %v9956_v44, 5  ;;  %v17071_v22 = vcombine.low %v15232_v21, %v15243_v45  ;;  %v9958_v45 = vld [vmem:[%s16689_s0 + $0xac] sm:$0xf]  ;;  %v4989_v20 = vpop.f32.mrf.mxu0  ;;  %v9959_v48 = vld [vmem:[%s16689_s0 + $0xb0] sm:$0x1] }
 0x238   :  { %11051 = vmatmul.mubr.msk.bf16.gmra.mxu0 %vm247_vm1, %v17070_v31  ;;  %v10028_v47 = vcombine.low %v7046_v37, %v7056_v57  ;;  %v7074_v35 = vor.u32 %v7073_v17, %v7069_v36  ;;  %v7079_v3 = vrot.slane %v7077_v14, 5  ;;  %v15365_v26 = vadd.f32 %v15287_v2, %v17072_v53 }
 0x239   :  { %11054 = vmatprep.mubr.msk.bf16.mxu0 %vm247_vm1, %v17071_v22  ;;  %v15368_v27 = vadd.f32 %v10824_v54, %v15208_v19  ;;  %10989 = vmatmul.mubr.msk.bf16.gmra.mxu1 %vm247_vm1, %v10027_v33  ;;  %v10157_v44 = vcombine.low %v15344_v5, %v8315_v1  ;;  %v7065_v29 = vrot.slane %v7064_v30, 4  ;;  %v8320_v21 = vrot.slane %v8318_v39, 4  ;;  %v17074_v19 = vld [vmem:[#allocation41_spill] sm:$0xff] }
 0x23a   :  { %10992 = vmatprep.mubr.msk.bf16.mxu1 %vm247_vm1, %v10028_v47  ;;  %v7075_v9 = vrot.slane %v7074_v35, 4  ;;  %v15378_v2 = vsel %vm11408_vm6, %v10125_v55, %v8318_v39  ;;  %v15381_v41 = vadd.f32 %v10763_v4, %v17074_v19  ;;  %v7082_v33 = vshrl.u32 %v9957_v52, 16  ;;  %v10094_v55 = vld [vmem:[%s16689_s0 + $0xa8] sm:$0xe]  ;;  %v10825_v4 = vpop.f32.mrf.mxu0 }
 0x23b   :  { %17073 = vst [vmem:[#allocation28_spill] sm:$0xff] %v15368_v27  ;;  %v15384_v5 = vadd.f32 %v4989_v20, %v15268_v42  ;;  %v7070_v37 = vsel %vm11430_vm7, %v7065_v29, %v7069_v36  ;;  %v15389_v1 = vadd.f32 %v3594_v23, %v17076_v40  ;;  %v7085_v17 = vshll.u32 %v9957_v52, 16  ;;  %v3607_v23 = vpop.f32.mrf.mxu1  ;;  %v9961_v20 = vld [vmem:[%s16689_s0 + $0xb8] sm:$0xf] }
 0x23c   :  { %v7080_v42 = vsel %vm11430_vm7, %v7075_v9, %v7079_v3  ;;  %v8322_v14 = vsel %vm11408_vm6, %v8320_v21, %v8321_v7  ;;  %v7084_v36 = vrot.slane %v7082_v33, 4  ;;  %v7091_v31 = vshll.u32 %v9958_v45, 16  ;;  %v15404_v22 = vpop.f32.mrf.mxu0  ;;  %v9960_v3 = vld [vmem:[%s16689_s0 + $0xb4] sm:$0xf]  ;;  %v9962_v9 = vld [vmem:[%s16689_s0 + $0xbc] sm:$0x1] }
 0x23d   :  { %17075 = vst [vmem:[#allocation14_spill] sm:$0xff] %v15384_v5  ;;  %v15402_v57 = vadd.f32 %v10825_v4, %v15282_v18  ;;  %v10029_v30 = vcombine.low %v7070_v37, %v7080_v42  ;;  %v7087_v39 = vrot.slane %v7085_v17, 5  ;;  %v7095_v52 = vshrl.u32 %v9958_v45, 16  ;;  %v17078_v33 = vld [vmem:[#allocation61_spill] sm:$0xff]  ;;  %v10767_v37 = vpop.f32.mrf.mxu1 }
 0x23e   :  { %v7093_v54 = vrot.slane %v7091_v31, 5  ;;  %v7101_v47 = vshll.u32 %v9959_v48, 16  ;;  %v10126_v35 = vrot.slane %v10094_v55, 9  ;;  %v8325_v53 = vrot.slane %v9958_v45, 5  ;;  %v10828_v4 = vpop.f32.mrf.mxu0  ;;  %v10095_v31 = vld [vmem:[%s16689_s0 + $0xb4] sm:$0xe] }
 0x23f   :  { %17077 = vst [vmem:[#allocation54_spill] sm:$0xff] %v15402_v57  ;;  %v10158_v7 = vcombine.low %v15378_v2, %v8322_v14  ;;  %v7088_v29 = vor.u32 %v7087_v39, %v7084_v36  ;;  %v7097_v18 = vrot.slane %v7095_v52, 4  ;;  %v8328_v21 = vrot.slane %v9959_v48, 5 }
 0x240   :  { %11055 = vmatmul.mubr.msk.bf16.gmra.mxu0 %vm247_vm1, %v10156_v28  ;;  %v7103_v45 = vrot.slane %v7101_v47, 5  ;;  %v8326_v19 = vsel %vm11408_vm6, %v10126_v35, %v8325_v53  ;;  %v8327_v28 = vrot.slane %v8325_v53, 4  ;;  %v15421_v2 = vadd.f32 %v10766_v38, %v17078_v33  ;;  %v5005_v47 = vpop.f32.mrf.mxu0 }
 0x241   :  { %11058 = vmatprep.mubr.msk.bf16.mxu0 %vm247_vm1, %v10157_v44  ;;  %10993 = vmatmul.mubr.msk.bf16.gmra.mxu1 %vm247_vm1, %v10029_v30  ;;  %v7089_v40 = vrot.slane %v7088_v29, 4  ;;  %v7098_v48 = vor.u32 %v7097_v18, %v7093_v54  ;;  %v7106_v17 = vshrl.u32 %v9960_v3, 16  ;;  %v7109_v55 = vshll.u32 %v9960_v3, 16  ;;  %v3610_v18 = vpop.f32.mrf.mxu1 }
 0x242   :  { %v8329_v42 = vsel %vm11408_vm6, %v8327_v28, %v8328_v21  ;;  %v7115_v44 = vshll.u32 %v9961_v20, 16  ;;  %v7119_v14 = vshrl.u32 %v9961_v20, 16  ;;  %v7125_v36 = vshll.u32 %v9962_v9, 16 }
 0x243   :  { %v15430_v38 = vadd.f32 %v10828_v4, %v15326_v43  ;;  %v7094_v30 = vsel %vm11430_vm7, %v7089_v40, %v7093_v54  ;;  %v7099_v39 = vrot.slane %v7098_v48, 4  ;;  %v10159_v52 = vcombine.low %v8326_v19, %v8329_v42  ;;  %v10829_v4 = vpop.f32.mrf.mxu0  ;;  %v9963_v19 = vld [vmem:[%s16689_s0 + $0xc0] sm:$0xf] }
 0x244   :  { %v7108_v35 = vrot.slane %v7106_v17, 4  ;;  %v7111_v53 = vrot.slane %v7109_v55, 5  ;;  %v7117_v3 = vrot.slane %v7115_v44, 5  ;;  %v7121_v29 = vrot.slane %v7119_v14, 4  ;;  %v17082_v17 = vld [vmem:[#allocation36_spill] sm:$0xff] }
 0x245   :  { %17079 = vst [vmem:[#allocation40_spill] sm:$0xff] %v15430_v38  ;;  %v15435_v21 = vadd.f32 %v5005_v47, %v15365_v26  ;;  %v7104_v28 = vsel %vm11430_vm7, %v7099_v39, %v7103_v45  ;;  %v7127_v33 = vrot.slane %v7125_v36, 5  ;;  %v10127_v43 = vrot.slane %v10095_v31, 9  ;;  %v17083_v45 = vld [vmem:[#allocation15_spill] sm:$0xff]  ;;  %v9964_v44 = vld [vmem:[%s16689_s0 + $0xc4] sm:$0xf]  ;;  %v5008_v14 = vpop.f32.mrf.mxu0 }
 0x246   :  { %v10030_v38 = vcombine.low %v7094_v30, %v7104_v28  ;;  %v7112_v57 = vor.u32 %v7111_v53, %v7108_v35  ;;  %v7122_v54 = vor.u32 %v7121_v29, %v7117_v3  ;;  %v8332_v40 = vrot.slane %v9961_v20, 5  ;;  %v9965_v30 = vld [vmem:[%s16689_s0 + $0xc8] sm:$0x1] }
 0x247   :  { %17080 = vst [vmem:[#allocation44_spill] sm:$0xff] %v15435_v21  ;;  %v15444_v48 = vadd.f32 %v10829_v4, %v15381_v41  ;;  %v8335_v26 = vrot.slane %v9962_v9, 5  ;;  %v3694_v55 = vadd.f32 %v3607_v23, %v17082_v17  ;;  %v3697_v42 = vadd.f32 %v10767_v37, %v17083_v45  ;;  %v10770_v9 = vpop.f32.mrf.mxu1  ;;  %v17085_v37 = vld [vmem:[#allocation48_spill] sm:$0xff]  ;;  %v10832_v4 = vpop.f32.mrf.mxu0 }
 0x248   :  { %11059 = vmatmul.mubr.msk.bf16.gmra.mxu0 %vm247_vm1, %v10158_v7  ;;  %10996 = vmatprep.mubr.msk.bf16.mxu1 %vm247_vm1, %v10030_v38  ;;  %v7113_v20 = vrot.slane %v7112_v57, 4  ;;  %v7123_v36 = vrot.slane %v7122_v54, 4  ;;  %v8333_v41 = vsel %vm11408_vm6, %v10127_v43, %v8332_v40  ;;  %v8334_v7 = vrot.slane %v8332_v40, 4  ;;  %v10096_v57 = vld [vmem:[%s16689_s0 + $0xc0] sm:$0xe] }
 0x249   :  { %17081 = vst [vmem:[#allocation23_spill] sm:$0xff] %v15444_v48  ;;  %11062 = vmatprep.mubr.msk.bf16.mxu0 %vm247_vm1, %v10159_v52  ;;  %v15456_v23 = vadd.f32 %v5008_v14, %v15389_v1  ;;  %v3695_v31 = vadd.f32 %v3610_v18, %v17085_v37  ;;  %v7130_v39 = vshrl.u32 %v9963_v19, 16  ;;  %v7133_v38 = vshll.u32 %v9963_v19, 16  ;;  %v9966_v43 = vld [vmem:[%s16689_s0 + $0xcc] sm:$0xf]  ;;  %v3623_v17 = vpop.f32.mrf.mxu1  ;;  %v17087_v37 = vld [vmem:[#allocation38_spill] sm:$0xff] }
 0x24a   :  { %v7118_v52 = vsel %vm11430_vm7, %v7113_v20, %v7117_v3  ;;  %v7128_v47 = vsel %vm11430_vm7, %v7123_v36, %v7127_v33  ;;  %v8336_v1 = vsel %vm11408_vm6, %v8334_v7, %v8335_v26  ;;  %v7139_v35 = vshll.u32 %v9964_v44, 16  ;;  %v9967_v20 = vld [vmem:[%s16689_s0 + $0xd0] sm:$0xf]  ;;  %v5021_v36 = vpop.f32.mrf.mxu0 }
 0x24b   :  { %17084 = vst [vmem:[#allocation57_spill] sm:$0xff] %v15456_v23  ;;  %v10031_v53 = vcombine.low %v7118_v52, %v7128_v47  ;;  %v10160_v29 = vcombine.low %v8333_v41, %v8336_v1  ;;  %v7132_v18 = vrot.slane %v7130_v39, 4  ;;  %v7135_v28 = vrot.slane %v7133_v38, 5 }
 0x24c   :  { %v7141_v54 = vrot.slane %v7139_v35, 5  ;;  %v7143_v40 = vshrl.u32 %v9964_v44, 16  ;;  %v7149_v19 = vshll.u32 %v9965_v30, 16  ;;  %v10128_v3 = vrot.slane %v10096_v57, 9  ;;  %v10833_v47 = vpop.f32.mrf.mxu0 }
 0x24d   :  { %v15475_v33 = vadd.f32 %v10832_v4, %v15421_v2  ;;  %10997 = vmatmul.mubr.msk.bf16.gmra.mxu1 %vm247_vm1, %v10031_v53  ;;  %v7136_v26 = vor.u32 %v7135_v28, %v7132_v18  ;;  %v8339_v45 = vrot.slane %v9964_v44, 5  ;;  %v8342_v14 = vrot.slane %v9965_v30, 5  ;;  %v9968_v30 = vld [vmem:[%s16689_s0 + $0xd4] sm:$0x1] }
 0x24e   :  { %v7145_v41 = vrot.slane %v7143_v40, 4  ;;  %v7151_v7 = vrot.slane %v7149_v19, 5  ;;  %v3700_v39 = vadd.f32 %v10770_v9, %v17087_v37  ;;  %v7154_v38 = vshrl.u32 %v9966_v43, 16  ;;  %v10097_v9 = vld [vmem:[%s16689_s0 + $0xcc] sm:$0xe]  ;;  %v5024_v19 = vpop.f32.mrf.mxu0 }
 0x24f   :  { %17086 = vst [vmem:[#allocation47_spill] sm:$0xff] %v15475_v33  ;;  %v15483_v57 = vadd.f32 %v5021_v36, %v3694_v55  ;;  %v7137_v2 = vrot.slane %v7136_v26, 4  ;;  %v8340_v52 = vsel %vm11408_vm6, %v10128_v3, %v8339_v45  ;;  %v8341_v44 = vrot.slane %v8339_v45, 4  ;;  %v10771_v55 = vpop.f32.mrf.mxu1 }
 0x250   :  { %11063 = vmatmul.mubr.msk.bf16.gmra.mxu0 %vm247_vm1, %v10160_v29  ;;  %v7146_v1 = vor.u32 %v7145_v41, %v7141_v54  ;;  %v7156_v35 = vrot.slane %v7154_v38, 4  ;;  %v7157_v53 = vshll.u32 %v9966_v43, 16  ;;  %v7163_v18 = vshll.u32 %v9967_v20, 16 }
 0x251   :  { %17088 = vst [vmem:[#allocation46_spill] sm:$0xff] %v15483_v57  ;;  %v15493_v29 = vadd.f32 %v10833_v47, %v3697_v42  ;;  %v7142_v28 = vsel %vm11430_vm7, %v7137_v2, %v7141_v54  ;;  %v8343_v4 = vsel %vm11408_vm6, %v8341_v44, %v8342_v14  ;;  %v7167_v40 = vshrl.u32 %v9967_v20, 16  ;;  %v3626_v14 = vpop.f32.mrf.mxu1 }
 0x252   :  { %v7147_v3 = vrot.slane %v7146_v1, 4  ;;  %v10161_v26 = vcombine.low %v8340_v52, %v8343_v4  ;;  %v7159_v45 = vrot.slane %v7157_v53, 5  ;;  %v7165_v43 = vrot.slane %v7163_v18, 5  ;;  %v9969_v52 = vld [vmem:[%s16689_s0 + $0xf0] sm:$0xf]  ;;  %v17091_v53 = vld [vmem:[#allocation65_spill] sm:$0xff] }
 0x253   :  { %17089 = vst [vmem:[#allocation63_spill] sm:$0xff] %v15493_v29  ;;  %v15499_v36 = vadd.f32 %v5024_v19, %v3695_v31  ;;  %v7169_v41 = vrot.slane %v7167_v40, 4  ;;  %v7173_v37 = vshll.u32 %v9968_v30, 16  ;;  %v10129_v38 = vrot.slane %v10097_v9, 9  ;;  %v9970_v9 = vld [vmem:[%s16689_s0 + $0xf4] sm:$0xf]  ;;  %v10836_v40 = vpop.f32.mrf.mxu0 }
 0x254   :  { %v7152_v42 = vsel %vm11430_vm7, %v7147_v3, %v7151_v7  ;;  %11066 = vmatprep.mubr.msk.bf16.mxu0 %vm247_vm1, %v10161_v26  ;;  %v7160_v54 = vor.u32 %v7159_v45, %v7156_v35  ;;  %v8346_v2 = vrot.slane %v9967_v20, 5  ;;  %v8349_v47 = vrot.slane %v9968_v30, 5  ;;  %v17092_v30 = vld [vmem:[#allocation10_spill] sm:$0xff] }
 0x255   :  { %17090 = vst [vmem:[#allocation67_spill] sm:$0xff] %v15499_v36  ;;  %v10032_v44 = vcombine.low %v7142_v28, %v7152_v42  ;;  %v7170_v1 = vor.u32 %v7169_v41, %v7165_v43  ;;  %v7175_v31 = vrot.slane %v7173_v37, 5  ;;  %v3698_v18 = vadd.f32 %v3623_v17, %v17091_v53  ;;  %v17093_v28 = vld [vmem:[#allocation27_spill] sm:$0xff]  ;;  %v10098_v42 = vld [vmem:[%s16689_s0 + $0xf0] sm:$0xe] }
 0x256   :  { %v7161_v7 = vrot.slane %v7160_v54, 4  ;;  %v8347_v35 = vsel %vm11408_vm6, %v10129_v38, %v8346_v2  ;;  %v8348_v20 = vrot.slane %v8346_v2, 4  ;;  %v3701_v4 = vadd.f32 %v10771_v55, %v17092_v30  ;;  %v9971_v55 = vld [vmem:[%s16689_s0 + $0xf8] sm:$0x1]  ;;  %v5037_v2 = vpop.f32.mrf.mxu0 }
 0x257   :  { %11000 = vmatprep.mubr.msk.bf16.mxu1 %vm247_vm1, %v10032_v44  ;;  %v7171_v19 = vrot.slane %v7170_v1, 4  ;;  %v3699_v3 = vadd.f32 %v3626_v14, %v17093_v28  ;;  %v7178_v26 = vshrl.u32 %v9969_v52, 16  ;;  %v7181_v45 = vshll.u32 %v9969_v52, 16 }
 0x258   :  { %v15516_v17 = vadd.f32 %v10836_v40, %v3700_v39  ;;  %v7166_v41 = vsel %vm11430_vm7, %v7161_v7, %v7165_v43  ;;  %v8350_v37 = vsel %vm11408_vm6, %v8348_v20, %v8349_v47  ;;  %v7187_v38 = vshll.u32 %v9970_v9, 16  ;;  %v10842_v43 = vpop.f32.mrf.mxu1  ;;  %v10837_v7 = vpop.f32.mrf.mxu0 }
 0x259   :  { %v7176_v54 = vsel %vm11430_vm7, %v7171_v19, %v7175_v31  ;;  %v10162_v39 = vcombine.low %v8347_v35, %v8350_v37  ;;  %v7180_v14 = vrot.slane %v7178_v26, 4  ;;  %v7183_v52 = vrot.slane %v7181_v45, 5  ;;  %v9972_v31 = vld [vmem:[%s16689_s0 + $0xfc] sm:$0xf]  ;;  %v9973_v37 = vld [vmem:[%s16689_s0 + $0x100] sm:$0xf] }
 0x25a   :  { %17094 = vst [vmem:[#allocation58_spill] sm:$0xff] %v15516_v17  ;;  %v10033_v44 = vcombine.low %v7166_v41, %v7176_v54  ;;  %v15530_v1 = vadd.f32 %v5037_v2, %v3698_v18  ;;  %v7189_v47 = vrot.slane %v7187_v38, 5  ;;  %v7191_v53 = vshrl.u32 %v9970_v9, 16  ;;  %v5699_v35 = vpop.f32.mrf.mxu1  ;;  %v17097_v45 = vld [vmem:[#allocation29_spill] sm:$0xff]  ;;  %v5040_v38 = vpop.f32.mrf.mxu0 }
 0x25b   :  { %11067 = vmatmul.mubr.msk.bf16.gmra.mxu0 %vm247_vm1, %v10162_v39  ;;  %v7184_v20 = vor.u32 %v7183_v52, %v7180_v14  ;;  %v7197_v30 = vshll.u32 %v9971_v55, 16  ;;  %v10130_v40 = vrot.slane %v10098_v42, 9  ;;  %v8353_v28 = vrot.slane %v9970_v9, 5 }
 0x25c   :  { %17095 = vst [vmem:[#allocation60_spill] sm:$0xff] %v15530_v1  ;;  %11001 = vmatmul.mubr.msk.bf16.gmra.mxu1 %vm247_vm1, %v10033_v44  ;;  %v15537_v19 = vadd.f32 %v10837_v7, %v3701_v4  ;;  %v7193_v18 = vrot.slane %v7191_v53, 4  ;;  %v8356_v26 = vrot.slane %v9971_v55, 5  ;;  %v5956_v41 = vadd.f32 %v10842_v43, %v17097_v45  ;;  %v10843_v2 = vpop.f32.mrf.mxu1  ;;  %v9974_v55 = vld [vmem:[%s16689_s0 + $0x104] sm:$0x1]  ;;  %v10908_v7 = vpop.f32.mrf.mxu0 }
 0x25d   :  { %v7185_v42 = vrot.slane %v7184_v20, 4  ;;  %v7199_v9 = vrot.slane %v7197_v30, 5  ;;  %v8354_v54 = vsel %vm11408_vm6, %v10130_v40, %v8353_v28  ;;  %v8355_v39 = vrot.slane %v8353_v28, 4 }
 0x25e   :  { %17096 = vst [vmem:[#allocation12_spill] sm:$0xff] %v15537_v19  ;;  %v15545_v14 = vadd.f32 %v5040_v38, %v3699_v3  ;;  %v7194_v4 = vor.u32 %v7193_v18, %v7189_v47  ;;  %v7202_v52 = vshrl.u32 %v9972_v31, 16  ;;  %v7205_v43 = vshll.u32 %v9972_v31, 16  ;;  %v10099_v3 = vld [vmem:[%s16689_s0 + $0xfc] sm:$0xe]  ;;  %v5702_v40 = vpop.f32.mrf.mxu1 }
 0x25f   :  { %v7190_v44 = vsel %vm11430_vm7, %v7185_v42, %v7189_v47  ;;  %v8357_v53 = vsel %vm11408_vm6, %v8355_v39, %v8356_v26  ;;  %v7211_v20 = vshll.u32 %v9973_v37, 16  ;;  %v7215_v30 = vshrl.u32 %v9973_v37, 16  ;;  %v6378_v42 = vpop.f32.mrf.mxu0 }
 0x260   :  { %17098 = vst [vmem:[#allocation66_spill] sm:$0xff] %v15545_v14  ;;  %v7195_v28 = vrot.slane %v7194_v4, 4  ;;  %v10163_v18 = vcombine.low %v8354_v54, %v8357_v53  ;;  %v15557_v45 = vadd.f32 %v10908_v7, %v5956_v41  ;;  %v7204_v38 = vrot.slane %v7202_v52, 4  ;;  %v10846_v1 = vpop.f32.mrf.mxu1  ;;  %v9975_v41 = vld [vmem:[%s16689_s0 + $0x108] sm:$0xf] }
 0x261   :  { %v7207_v31 = vrot.slane %v7205_v43, 5  ;;  %v7213_v14 = vrot.slane %v7211_v20, 5  ;;  %v7217_v19 = vrot.slane %v7215_v30, 4  ;;  %v7221_v47 = vshll.u32 %v9974_v55, 16  ;;  %v10909_v53 = vpop.f32.mrf.mxu0  ;;  %v17100_v30 = vld [vmem:[#allocation35_spill] sm:$0xff] }
 0x262   :  { %17099 = vst [vmem:[#allocation71_spill] sm:$0xff] %v15557_v45  ;;  %v7200_v26 = vsel %vm11430_vm7, %v7195_v28, %v7199_v9  ;;  %11070 = vmatprep.mubr.msk.bf16.mxu0 %vm247_vm1, %v10163_v18  ;;  %v10131_v39 = vrot.slane %v10099_v3, 9  ;;  %v8360_v17 = vrot.slane %v9973_v37, 5  ;;  %v8363_v36 = vrot.slane %v9974_v55, 5  ;;  %v15565_v7 = vpop.f32.mrf.mxu1  ;;  %v17101_v3 = vld [vmem:[#allocation33_spill] sm:$0xff] }
 0x263   :  { %v10034_v54 = vcombine.low %v7190_v44, %v7200_v26  ;;  %v7208_v4 = vor.u32 %v7207_v31, %v7204_v38  ;;  %v7218_v52 = vor.u32 %v7217_v19, %v7213_v14  ;;  %v7223_v43 = vrot.slane %v7221_v47, 5  ;;  %v17102_v45 = vld [vmem:[#allocation25_spill] sm:$0xff]  ;;  %v6381_v38 = vpop.f32.mrf.mxu0  ;;  %v9976_v19 = vld [vmem:[%s16689_s0 + $0x10c] sm:$0xf]  ;;  %v9977_v26 = vld [vmem:[%s16689_s0 + $0x110] sm:$0x1] }
 0x264   :  { %v8361_v20 = vsel %vm11408_vm6, %v10131_v39, %v8360_v17  ;;  %v8362_v9 = vrot.slane %v8360_v17, 4  ;;  %v5954_v28 = vadd.f32 %v5699_v35, %v17100_v30  ;;  %v5957_v37 = vadd.f32 %v10843_v2, %v17101_v3  ;;  %v15576_v47 = vpop.f32.mrf.mxu1 }
 0x265   :  { %11004 = vmatprep.mubr.msk.bf16.mxu1 %vm247_vm1, %v10034_v54  ;;  %v7209_v55 = vrot.slane %v7208_v4, 4  ;;  %v7219_v18 = vrot.slane %v7218_v52, 4  ;;  %v5955_v44 = vadd.f32 %v5702_v40, %v17102_v45  ;;  %v7226_v31 = vshrl.u32 %v9975_v41, 16  ;;  %v10100_v45 = vld [vmem:[%s16689_s0 + $0x108] sm:$0xe]  ;;  %v10912_v4 = vpop.f32.mrf.mxu0 }
 0x266   :  { %v8364_v17 = vsel %vm11408_vm6, %v8362_v9, %v8363_v36  ;;  %v15580_v35 = vadd.f32 %v6378_v42, %v5954_v28  ;;  %v15582_v2 = vadd.f32 %v10909_v53, %v5957_v37  ;;  %v7229_v40 = vshll.u32 %v9975_v41, 16  ;;  %v15596_v52 = vpop.f32.mrf.mxu1 }
 0x267   :  { %v7214_v39 = vsel %vm11430_vm7, %v7209_v55, %v7213_v14  ;;  %v7224_v54 = vsel %vm11430_vm7, %v7219_v18, %v7223_v43  ;;  %v10164_v36 = vcombine.low %v8361_v20, %v8364_v17  ;;  %v15594_v42 = vadd.f32 %v6381_v38, %v5955_v44  ;;  %v9978_v14 = vld [vmem:[%s16689_s0 + $0x114] sm:$0xf]  ;;  %v6394_v43 = vpop.f32.mrf.mxu0  ;;  %v9979_v17 = vld [vmem:[%s16689_s0 + $0x118] sm:$0xf] }
 0x268   :  { %17103 = vst [vmem:[#allocation76_spill] sm:$0xff] %v15580_v35  ;;  %17104 = vst [vmem:[#allocation73_spill] sm:$0xff] %v15582_v2  ;;  %v10035_v53 = vcombine.low %v7214_v39, %v7224_v54  ;;  %v7228_v9 = vrot.slane %v7226_v31, 4  ;;  %v7231_v30 = vrot.slane %v7229_v40, 5  ;;  %v7235_v41 = vshll.u32 %v9976_v19, 16  ;;  %v15602_v20 = vpop.f32.mrf.mxu1  ;;  %v17106_v38 = vld [vmem:[#allocation56_spill] sm:$0xff] }
 0x269   :  { %17105 = vst [vmem:[#allocation77_spill] sm:$0xff] %v15594_v42  ;;  %11071 = vmatmul.mubr.msk.bf16.gmra.mxu0 %vm247_vm1, %v10164_v36  ;;  %v7239_v28 = vshrl.u32 %v9976_v19, 16  ;;  %v7245_v3 = vshll.u32 %v9977_v26, 16  ;;  %v10132_v37 = vrot.slane %v10100_v45, 9  ;;  %v8367_v2 = vrot.slane %v9976_v19, 5  ;;  %v10913_v54 = vpop.f32.mrf.mxu0 }
 0x26a   :  { %11005 = vmatmul.mubr.msk.bf16.gmra.mxu1 %vm247_vm1, %v10035_v53  ;;  %v7232_v55 = vor.u32 %v7231_v30, %v7228_v9  ;;  %v7237_v18 = vrot.slane %v7235_v41, 5  ;;  %v8370_v44 = vrot.slane %v9977_v26, 5  ;;  %v5960_v31 = vadd.f32 %v10846_v1, %v17106_v38  ;;  %v15611_v36 = vpop.f32.mrf.mxu1  ;;  %v9980_v1 = vld [vmem:[%s16689_s0 + $0x11c] sm:$0x1] }
 0x26b   :  { %v7241_v40 = vrot.slane %v7239_v28, 4  ;;  %v7247_v19 = vrot.slane %v7245_v3, 5  ;;  %v8368_v45 = vsel %vm11408_vm6, %v10132_v37, %v8367_v2  ;;  %v8369_v39 = vrot.slane %v8367_v2, 4  ;;  %v10101_v2 = vld [vmem:[%s16689_s0 + $0x114] sm:$0xe]  ;;  %v6397_v37 = vpop.f32.mrf.mxu0 }
 0x26c   :  { %v7233_v42 = vrot.slane %v7232_v55, 4  ;;  %v15613_v53 = vadd.f32 %v10912_v4, %v5960_v31  ;;  %v7250_v26 = vshrl.u32 %v9978_v14, 16  ;;  %v7253_v9 = vshll.u32 %v9978_v14, 16  ;;  %v15623_v55 = vpop.f32.mrf.mxu1 }
 0x26d   :  { %v7242_v30 = vor.u32 %v7241_v40, %v7237_v18  ;;  %v8371_v41 = vsel %vm11408_vm6, %v8369_v39, %v8370_v44  ;;  %v7259_v28 = vshll.u32 %v9979_v17, 16  ;;  %v7263_v3 = vshrl.u32 %v9979_v17, 16  ;;  %v15627_v44 = vpop.f32.mrf.mxu0 }
 0x26e   :  { %17107 = vst [vmem:[#allocation68_spill] sm:$0xff] %v15613_v53  ;;  %v7238_v4 = vsel %vm11430_vm7, %v7233_v42, %v7237_v18  ;;  %v10165_v38 = vcombine.low %v8368_v45, %v8371_v41  ;;  %v7252_v31 = vrot.slane %v7250_v26, 4  ;;  %v7255_v53 = vrot.slane %v7253_v9, 5  ;;  %v15629_v39 = vpop.f32.mrf.mxu1  ;;  %v17109_v26 = vld [vmem:[#allocation21_spill] sm:$0xff] }
 0x26f   :  { %v7243_v14 = vrot.slane %v7242_v30, 4  ;;  %v7261_v40 = vrot.slane %v7259_v28, 5  ;;  %v7265_v35 = vrot.slane %v7263_v3, 4  ;;  %v7269_v29 = vshll.u32 %v9980_v1, 16  ;;  %17108 = vst [vmem:[#allocation24_spill] sm:$0xff] %v15629_v39  ;;  %v15639_v41 = vpop.f32.mrf.mxu0 }
 0x270   :  { %11074 = vmatprep.mubr.msk.bf16.mxu0 %vm247_vm1, %v10165_v38  ;;  %v7256_v57 = vor.u32 %v7255_v53, %v7252_v31  ;;  %v10133_v33 = vrot.slane %v10101_v2, 9  ;;  %v8374_v23 = vrot.slane %v9979_v17, 5  ;;  %v8377_v48 = vrot.slane %v9980_v1, 5  ;;  %v9981_v30 = vld [vmem:[%s16689_s0 + $0x120] sm:$0xf]  ;;  %v15641_v28 = vpop.f32.mrf.mxu1  ;;  %v17112_v2 = vld [vmem:[#allocation39_spill] sm:$0xff] }
 0x271   :  { %v7248_v42 = vsel %vm11430_vm7, %v7243_v14, %v7247_v19  ;;  %v7266_v18 = vor.u32 %v7265_v35, %v7261_v40  ;;  %v7271_v45 = vrot.slane %v7269_v29, 5  ;;  %v5958_v9 = vadd.f32 %v15565_v7, %v17109_v26  ;;  %v17111_v29 = vld [vmem:[#allocation32_spill] sm:$0xff]  ;;  %v9982_v31 = vld [vmem:[%s16689_s0 + $0x124] sm:$0xf]  ;;  %v15654_v14 = vpop.f32.mrf.mxu0 }
 0x272   :  { %v10036_v53 = vcombine.low %v7238_v4, %v7248_v42  ;;  %v7257_v3 = vrot.slane %v7256_v57, 4  ;;  %v8375_v17 = vsel %vm11408_vm6, %v10133_v33, %v8374_v23  ;;  %v8376_v1 = vrot.slane %v8374_v23, 4  ;;  %v15656_v57 = vpop.f32.mrf.mxu1  ;;  %v10102_v4 = vld [vmem:[%s16689_s0 + $0x120] sm:$0xe] }
 0x273   :  { %v7267_v19 = vrot.slane %v7266_v18, 4  ;;  %v15645_v35 = vadd.f32 %v6394_v43, %v5958_v9  ;;  %v5961_v7 = vadd.f32 %v15576_v47, %v17111_v29  ;;  %v5959_v38 = vadd.f32 %v15596_v52, %v17112_v2  ;;  %v9983_v47 = vld [vmem:[%s16689_s0 + $0x128] sm:$0x1]  ;;  %v15675_v9 = vpop.f32.mrf.mxu0 }
 0x274   :  { %11008 = vmatprep.mubr.msk.bf16.mxu1 %vm247_vm1, %v10036_v53  ;;  %v7262_v23 = vsel %vm11430_vm7, %v7257_v3, %v7261_v40  ;;  %v8378_v33 = vsel %vm11408_vm6, %v8376_v1, %v8377_v48  ;;  %v7274_v52 = vshrl.u32 %v9981_v30, 16  ;;  %v7277_v43 = vshll.u32 %v9981_v30, 16  ;;  %17115 = vst [vmem:[#allocation83_spill] sm:$0xff] %v15675_v9  ;;  %v15677_v48 = vpop.f32.mrf.mxu1 }
 0x275   :  { %17110 = vst [vmem:[#allocation80_spill] sm:$0xff] %v15645_v35  ;;  %v7272_v42 = vsel %vm11430_vm7, %v7267_v19, %v7271_v45  ;;  %v10166_v18 = vcombine.low %v8375_v17, %v8378_v33  ;;  %v15671_v26 = vadd.f32 %v10913_v54, %v5961_v7  ;;  %v15673_v40 = vadd.f32 %v6397_v37, %v5959_v38  ;;  %v9984_v54 = vld [vmem:[%s16689_s0 + $0x12c] sm:$0xf]  ;;  %v15683_v37 = vpop.f32.mrf.mxu0  ;;  %v17117_v38 = vld [vmem:[#allocation37_spill] sm:$0xff] }
 0x276   :  { %v10037_v53 = vcombine.low %v7262_v23, %v7272_v42  ;;  %v7276_v3 = vrot.slane %v7274_v52, 4  ;;  %v7279_v1 = vrot.slane %v7277_v43, 5  ;;  %v7283_v30 = vshll.u32 %v9982_v31, 16  ;;  %v15685_v45 = vpop.f32.mrf.mxu1 }
 0x277   :  { %17113 = vst [vmem:[#allocation82_spill] sm:$0xff] %v15671_v26  ;;  %17114 = vst [vmem:[#allocation6_spill] sm:$0xff] %v15673_v40  ;;  %11075 = vmatmul.mubr.msk.bf16.gmra.mxu0 %vm247_vm1, %v10166_v18  ;;  %v7287_v29 = vshrl.u32 %v9982_v31, 16  ;;  %v7293_v2 = vshll.u32 %v9983_v47, 16  ;;  %v10134_v39 = vrot.slane %v10102_v4, 9  ;;  %v8381_v35 = vrot.slane %v9982_v31, 5  ;;  %v15695_v42 = vpop.f32.mrf.mxu0 }
 0x278   :  { %17116 = vst [vmem:[#allocation75_spill] sm:$0xff] %v15685_v45  ;;  %11009 = vmatmul.mubr.msk.bf16.gmra.mxu1 %vm247_vm1, %v10037_v53  ;;  %v7280_v17 = vor.u32 %v7279_v1, %v7276_v3  ;;  %v7285_v19 = vrot.slane %v7283_v30, 5  ;;  %v8384_v7 = vrot.slane %v9983_v47, 5  ;;  %v5964_v23 = vadd.f32 %v15602_v20, %v17117_v38  ;;  %v9985_v31 = vld [vmem:[%s16689_s0 + $0x130] sm:$0xf]  ;;  %v15697_v18 = vpop.f32.mrf.mxu1 }
 0x279   :  { %v7289_v33 = vrot.slane %v7287_v29, 4  ;;  %v7295_v52 = vrot.slane %v7293_v2, 5  ;;  %v8382_v43 = vsel %vm11408_vm6, %v10134_v39, %v8381_v35  ;;  %v8383_v4 = vrot.slane %v8381_v35, 4  ;;  %v9986_v20 = vld [vmem:[%s16689_s0 + $0x134] sm:$0x1] }
 0x27a   :  { %v7281_v53 = vrot.slane %v7280_v17, 4  ;;  %v15700_v47 = vadd.f32 %v15627_v44, %v5964_v23  ;;  %v7298_v3 = vshrl.u32 %v9984_v54, 16  ;;  %v7301_v1 = vshll.u32 %v9984_v54, 16  ;;  %v10103_v2 = vld [vmem:[%s16689_s0 + $0x12c] sm:$0xe]  ;;  %v15710_v17 = vpop.f32.mrf.mxu0  ;;  %v15712_v44 = vpop.f32.mrf.mxu1 }
 0x27b   :  { %v7290_v30 = vor.u32 %v7289_v33, %v7285_v19  ;;  %v8385_v29 = vsel %vm11408_vm6, %v8383_v4, %v8384_v7  ;;  %v7307_v39 = vshll.u32 %v9985_v31, 16  ;;  %v7311_v35 = vshrl.u32 %v9985_v31, 16 }
 0x27c   :  { %17118 = vst [vmem:[#allocation2_spill] sm:$0xff] %v15700_v47  ;;  %v7286_v38 = vsel %vm11430_vm7, %v7281_v53, %v7285_v19  ;;  %v10167_v23 = vcombine.low %v8382_v43, %v8385_v29  ;;  %v7300_v45 = vrot.slane %v7298_v3, 4  ;;  %v7303_v54 = vrot.slane %v7301_v1, 5  ;;  %v15716_v4 = vpop.f32.mrf.mxu0  ;;  %v15718_v40 = vpop.f32.mrf.mxu1  ;;  %v17120_v3 = vld [vmem:[#allocation43_spill] sm:$0xff] }
 0x27d   :  { %v7291_v33 = vrot.slane %v7290_v30, 4  ;;  %v7309_v9 = vrot.slane %v7307_v39, 5  ;;  %v7313_v47 = vrot.slane %v7311_v35, 4  ;;  %v7317_v7 = vshll.u32 %v9986_v20, 16  ;;  %17119 = vst [vmem:[#allocation3_spill] sm:$0xff] %v15716_v4 }
 0x27e   :  { %11078 = vmatprep.mubr.msk.bf16.mxu0 %vm247_vm1, %v10167_v23  ;;  %v7304_v26 = vor.u32 %v7303_v54, %v7300_v45  ;;  %v10135_v21 = vrot.slane %v10103_v2, 9  ;;  %v8388_v5 = vrot.slane %v9985_v31, 5  ;;  %v8391_v27 = vrot.slane %v9986_v20, 5  ;;  %v9987_v30 = vld [vmem:[%s16689_s0 + $0x138] sm:$0xf]  ;;  %v15728_v29 = vpop.f32.mrf.mxu0  ;;  %v15730_v39 = vpop.f32.mrf.mxu1 }
 0x27f   :  { %v7296_v19 = vsel %vm11430_vm7, %v7291_v33, %v7295_v52  ;;  %v7314_v43 = vor.u32 %v7313_v47, %v7309_v9  ;;  %v7319_v53 = vrot.slane %v7317_v7, 5  ;;  %v5962_v1 = vadd.f32 %v15611_v36, %v17120_v3  ;;  %v17121_v52 = vld [vmem:[#allocation84_spill] sm:$0xff]  ;;  %v17123_v23 = vld [vmem:[#allocation45_spill] sm:$0xff] }
 0x280   :  { %v10038_v45 = vcombine.low %v7286_v38, %v7296_v19  ;;  %v7305_v35 = vrot.slane %v7304_v26, 4  ;;  %v8389_v31 = vsel %vm11408_vm6, %v10135_v21, %v8388_v5  ;;  %v8390_v20 = vrot.slane %v8388_v5, 4  ;;  %v9988_v38 = vld [vmem:[%s16689_s0 + $0x13c] sm:$0xf]  ;;  %v15746_v26 = vpop.f32.mrf.mxu0  ;;  %v15748_v33 = vpop.f32.mrf.mxu1  ;;  %v9989_v21 = vld [vmem:[%s16689_s0 + $0x140] sm:$0x1] }
 0x281   :  { %v15736_v47 = vadd.f32 %v15084_v63, %v17121_v52  ;;  %v7315_v2 = vrot.slane %v7314_v43, 4  ;;  %v15739_v36 = vadd.f32 %v15639_v41, %v5962_v1  ;;  %v5965_v54 = vadd.f32 %v15623_v55, %v17123_v23  ;;  %v10104_v7 = vld [vmem:[%s16689_s0 + $0x138] sm:$0xe]  ;;  %v17124_v19 = vld [vmem:[#allocation19_spill] sm:$0xff] }
 0x282   :  { %11012 = vmatprep.mubr.msk.bf16.mxu1 %vm247_vm1, %v10038_v45  ;;  %v7310_v63 = vsel %vm11430_vm7, %v7305_v35, %v7309_v9  ;;  %v8392_v5 = vsel %vm11408_vm6, %v8390_v20, %v8391_v27  ;;  %v7322_v55 = vshrl.u32 %v9987_v30, 16  ;;  %v7325_v41 = vshll.u32 %v9987_v30, 16  ;;  %v15770_v1 = vpop.f32.mrf.mxu0  ;;  %v15772_v45 = vpop.f32.mrf.mxu1 }
 0x283   :  { %17122 = vst [vmem:[#allocation4_spill] sm:$0xff] %v15739_v36  ;;  %v15763_v43 = vadd.f32 %v15218_v11, %v17124_v19  ;;  %v7320_v9 = vsel %vm11430_vm7, %v7315_v2, %v7319_v53  ;;  %v10168_v3 = vcombine.low %v8389_v31, %v8392_v5  ;;  %v15768_v27 = vadd.f32 %v15654_v14, %v5965_v54  ;;  %v9990_v53 = vld [vmem:[%s16689_s0 + $0x144] sm:$0xf]  ;;  %v17126_v5 = vld [vmem:[#allocation51_spill] sm:$0xff] }
 0x284   :  { %v10039_v30 = vcombine.low %v7310_v63, %v7320_v9  ;;  %v7324_v35 = vrot.slane %v7322_v55, 4  ;;  %v7327_v20 = vrot.slane %v7325_v41, 5  ;;  %v7331_v52 = vshll.u32 %v9988_v38, 16  ;;  %v15778_v14 = vpop.f32.mrf.mxu0  ;;  %v15780_v31 = vpop.f32.mrf.mxu1 }
 0x285   :  { %17125 = vst [vmem:[#allocation8_spill] sm:$0xff] %v15768_v27  ;;  %11079 = vmatmul.mubr.msk.bf16.gmra.mxu0 %vm247_vm1, %v10168_v3  ;;  %v7335_v23 = vshrl.u32 %v9988_v38, 16  ;;  %v7341_v11 = vshll.u32 %v9989_v21, 16  ;;  %v10136_v19 = vrot.slane %v10104_v7, 9  ;;  %v8395_v4 = vrot.slane %v9988_v38, 5 }
 0x286   :  { %11013 = vmatmul.mubr.msk.bf16.gmra.mxu1 %vm247_vm1, %v10039_v30  ;;  %v7328_v2 = vor.u32 %v7327_v20, %v7324_v35  ;;  %v7333_v54 = vrot.slane %v7331_v52, 5  ;;  %v8398_v63 = vrot.slane %v9989_v21, 5  ;;  %v5968_v55 = vadd.f32 %v15641_v28, %v17126_v5  ;;  %v9991_v38 = vld [vmem:[%s16689_s0 + $0x148] sm:$0xf]  ;;  %v15790_v27 = vpop.f32.mrf.mxu0  ;;  %v15792_v36 = vpop.f32.mrf.mxu1  ;;  %v9992_v28 = vld [vmem:[%s16689_s0 + $0x14c] sm:$0x1] }
 0x287   :  { %v7337_v41 = vrot.slane %v7335_v23, 4  ;;  %v7343_v7 = vrot.slane %v7341_v11, 5  ;;  %v8396_v9 = vsel %vm11408_vm6, %v10136_v19, %v8395_v4  ;;  %v8397_v3 = vrot.slane %v8395_v4, 4  ;;  %v10105_v19 = vld [vmem:[%s16689_s0 + $0x144] sm:$0xe] }
 0x288   :  { %v7329_v30 = vrot.slane %v7328_v2, 4  ;;  %v15795_v21 = vadd.f32 %v15683_v37, %v5968_v55  ;;  %v7346_v35 = vshrl.u32 %v9990_v53, 16  ;;  %v7349_v20 = vshll.u32 %v9990_v53, 16  ;;  %v15805_v2 = vpop.f32.mrf.mxu0 }
 0x289   :  { %v7338_v52 = vor.u32 %v7337_v41, %v7333_v54  ;;  %v8399_v23 = vsel %vm11408_vm6, %v8397_v3, %v8398_v63  ;;  %v7355_v11 = vshll.u32 %v9991_v38, 16  ;;  %v7359_v4 = vshrl.u32 %v9991_v38, 16  ;;  %v15807_v37 = vpop.f32.mrf.mxu1 }
 0x28a   :  { %17127 = vst [vmem:[#allocation11_spill] sm:$0xff] %v15795_v21  ;;  %v7334_v5 = vsel %vm11430_vm7, %v7329_v30, %v7333_v54  ;;  %v10169_v55 = vcombine.low %v8396_v9, %v8399_v23  ;;  %v7348_v21 = vrot.slane %v7346_v35, 4  ;;  %v7351_v53 = vrot.slane %v7349_v20, 5  ;;  %v15811_v3 = vpop.f32.mrf.mxu0  ;;  %v17128_v35 = vld [vmem:[#allocation49_spill] sm:$0xff] }
 0x28b   :  { %v7339_v41 = vrot.slane %v7338_v52, 4  ;;  %v7357_v16 = vrot.slane %v7355_v11, 5  ;;  %v7361_v59 = vrot.slane %v7359_v4, 4  ;;  %v7365_v63 = vshll.u32 %v9992_v28, 16  ;;  %v15813_v15 = vpop.f32.mrf.mxu1  ;;  %v9993_v52 = vld [vmem:[%s16689_s0 + $0x150] sm:$0xf] }
 0x28c   :  { %11082 = vmatprep.mubr.msk.bf16.mxu0 %vm247_vm1, %v10169_v55  ;;  %v7352_v58 = vor.u32 %v7351_v53, %v7348_v21  ;;  %v10137_v49 = vrot.slane %v10105_v19, 9  ;;  %v8402_v8 = vrot.slane %v9991_v38, 5  ;;  %v8405_v61 = vrot.slane %v9992_v28, 5  ;;  %v15823_v23 = vpop.f32.mrf.mxu0  ;;  %v17131_v19 = vld [vmem:[#allocation34_spill] sm:$0xff] }
 0x28d   :  { %v7344_v54 = vsel %vm11430_vm7, %v7339_v41, %v7343_v7  ;;  %v7362_v9 = vor.u32 %v7361_v59, %v7357_v16  ;;  %v7367_v30 = vrot.slane %v7365_v63, 5  ;;  %v5966_v20 = vadd.f32 %v15656_v57, %v17128_v35  ;;  %v15825_v11 = vpop.f32.mrf.mxu1 }
 0x28e   :  { %v10040_v21 = vcombine.low %v7334_v5, %v7344_v54  ;;  %v7353_v4 = vrot.slane %v7352_v58, 4  ;;  %v8403_v38 = vsel %vm11408_vm6, %v10137_v49, %v8402_v8  ;;  %v8404_v28 = vrot.slane %v8402_v8, 4  ;;  %v9994_v5 = vld [vmem:[%s16689_s0 + $0x154] sm:$0xf]  ;;  %v15841_v58 = vpop.f32.mrf.mxu0 }
 0x28f   :  { %v15831_v59 = vadd.f32 %v15338_v60, %v15736_v47  ;;  %v7363_v7 = vrot.slane %v7362_v9, 4  ;;  %v15834_v57 = vadd.f32 %v15695_v42, %v5966_v20  ;;  %v5969_v55 = vadd.f32 %v15677_v48, %v17131_v19  ;;  %v15843_v53 = vpop.f32.mrf.mxu1  ;;  %v9995_v60 = vld [vmem:[%s16689_s0 + $0x158] sm:$0x1]  ;;  %v10106_v47 = vld [vmem:[%s16689_s0 + $0x150] sm:$0xe] }
 0x290   :  { %11016 = vmatprep.mubr.msk.bf16.mxu1 %vm247_vm1, %v10040_v21  ;;  %v7358_v8 = vsel %vm11430_vm7, %v7353_v4, %v7357_v16  ;;  %v8406_v49 = vsel %vm11408_vm6, %v8404_v28, %v8405_v61  ;;  %v7370_v48 = vshrl.u32 %v9993_v52, 16  ;;  %v7373_v42 = vshll.u32 %v9993_v52, 16  ;;  %v15865_v54 = vpop.f32.mrf.mxu0 }
 0x291   :  { %17129 = vst [vmem:[#allocation17_spill] sm:$0xff] %v15831_v59  ;;  %17130 = vst [vmem:[#allocation26_spill] sm:$0xff] %v15834_v57  ;;  %v15858_v41 = vadd.f32 %v15404_v22, %v15763_v43  ;;  %v7368_v16 = vsel %vm11430_vm7, %v7363_v7, %v7367_v30  ;;  %v10170_v63 = vcombine.low %v8403_v38, %v8406_v49  ;;  %v15867_v9 = vpop.f32.mrf.mxu1  ;;  %v7379_v21 = vshll.u32 %v9994_v5, 16  ;;  %v9996_v30 = vld [vmem:[%s16689_s0 + $0x15c] sm:$0xf] }
 0x292   :  { %v15863_v61 = vadd.f32 %v15710_v17, %v5969_v55  ;;  %v10041_v35 = vcombine.low %v7358_v8, %v7368_v16  ;;  %v7372_v20 = vrot.slane %v7370_v48, 4  ;;  %v7375_v52 = vrot.slane %v7373_v42, 5  ;;  %v15873_v17 = vpop.f32.mrf.mxu0  ;;  %v17134_v8 = vld [vmem:[#allocation55_spill] sm:$0xff] }
 0x293   :  { %17132 = vst [vmem:[#allocation41_spill] sm:$0xff] %v15858_v41  ;;  %11083 = vmatmul.mubr.msk.bf16.gmra.mxu0 %vm247_vm1, %v10170_v63  ;;  %v7383_v4 = vshrl.u32 %v9994_v5, 16  ;;  %v7389_v22 = vshll.u32 %v9995_v60, 16  ;;  %v10138_v43 = vrot.slane %v10106_v47, 9  ;;  %v8409_v28 = vrot.slane %v9994_v5, 5  ;;  %v15875_v38 = vpop.f32.mrf.mxu1 }
 0x294   :  { %17133 = vst [vmem:[#allocation22_spill] sm:$0xff] %v15863_v61  ;;  %11017 = vmatmul.mubr.msk.bf16.gmra.mxu1 %vm247_vm1, %v10041_v35  ;;  %v7376_v7 = vor.u32 %v7375_v52, %v7372_v20  ;;  %v7381_v19 = vrot.slane %v7379_v21, 5  ;;  %v8412_v55 = vrot.slane %v9995_v60, 5  ;;  %v5972_v49 = vadd.f32 %v15697_v18, %v17134_v8  ;;  %v9997_v5 = vld [vmem:[%s16689_s0 + $0x160] sm:$0xf]  ;;  %v15885_v63 = vpop.f32.mrf.mxu0 }
 0x295   :  { %v7385_v48 = vrot.slane %v7383_v4, 4  ;;  %v7391_v42 = vrot.slane %v7389_v22, 5  ;;  %v8410_v47 = vsel %vm11408_vm6, %v10138_v43, %v8409_v28  ;;  %v8411_v16 = vrot.slane %v8409_v28, 4  ;;  %v15887_v61 = vpop.f32.mrf.mxu1  ;;  %v9998_v18 = vld [vmem:[%s16689_s0 + $0x164] sm:$0x1] }
 0x296   :  { %v7377_v35 = vrot.slane %v7376_v7, 4  ;;  %v15890_v60 = vadd.f32 %v15728_v29, %v5972_v49  ;;  %v7394_v20 = vshrl.u32 %v9996_v30, 16  ;;  %v7397_v52 = vshll.u32 %v9996_v30, 16  ;;  %v10107_v28 = vld [vmem:[%s16689_s0 + $0x15c] sm:$0xe]  ;;  %v15900_v7 = vpop.f32.mrf.mxu0 }
 0x297   :  { %v7386_v21 = vor.u32 %v7385_v48, %v7381_v19  ;;  %v8413_v4 = vsel %vm11408_vm6, %v8411_v16, %v8412_v55  ;;  %v7403_v22 = vshll.u32 %v9997_v5, 16  ;;  %v7407_v43 = vshrl.u32 %v9997_v5, 16  ;;  %v15902_v29 = vpop.f32.mrf.mxu1 }
 0x298   :  { %17135 = vst [vmem:[#allocation61_spill] sm:$0xff] %v15890_v60  ;;  %v7382_v8 = vsel %vm11430_vm7, %v7377_v35, %v7381_v19  ;;  %v10171_v49 = vcombine.low %v8410_v47, %v8413_v4  ;;  %v7396_v60 = vrot.slane %v7394_v20, 4  ;;  %v7399_v30 = vrot.slane %v7397_v52, 5  ;;  %v15906_v16 = vpop.f32.mrf.mxu0  ;;  %v9999_v52 = vld [vmem:[%s16689_s0 + $0x168] sm:$0xf] }
 0x299   :  { %v7387_v48 = vrot.slane %v7386_v21, 4  ;;  %v7405_v57 = vrot.slane %v7403_v22, 5  ;;  %v7409_v41 = vrot.slane %v7407_v43, 4  ;;  %v7413_v55 = vshll.u32 %v9998_v18, 16  ;;  %v15908_v59 = vpop.f32.mrf.mxu1  ;;  %v10000_v43 = vld [vmem:[%s16689_s0 + $0x16c] sm:$0xf] }
 0x29a   :  { %11086 = vmatprep.mubr.msk.bf16.mxu0 %vm247_vm1, %v10171_v49  ;;  %v7400_v24 = vor.u32 %v7399_v30, %v7396_v60  ;;  %v10139_v6 = vrot.slane %v10107_v28, 9  ;;  %v8416_v32 = vrot.slane %v9997_v5, 5  ;;  %v8419_v34 = vrot.slane %v9998_v18, 5  ;;  %v15918_v21 = vpop.f32.mrf.mxu0 }
 0x29b   :  { %v7392_v19 = vsel %vm11430_vm7, %v7387_v48, %v7391_v42  ;;  %v7410_v47 = vor.u32 %v7409_v41, %v7405_v57  ;;  %v7415_v35 = vrot.slane %v7413_v55, 5  ;;  %v5970_v20 = vadd.f32 %v15712_v44, %v14622_v12  ;;  %v15920_v4 = vpop.f32.mrf.mxu1 }
 0x29c   :  { %v10042_v60 = vcombine.low %v7382_v8, %v7392_v19  ;;  %v7401_v22 = vrot.slane %v7400_v24, 4  ;;  %v8417_v5 = vsel %vm11408_vm6, %v10139_v6, %v8416_v32  ;;  %v8418_v18 = vrot.slane %v8416_v32, 4  ;;  %v15934_v28 = vpop.f32.mrf.mxu0 }
 0x29d   :  { %v7411_v42 = vrot.slane %v7410_v47, 4  ;;  %v15925_v41 = vadd.f32 %v15746_v26, %v5970_v20  ;;  %v5973_v12 = vadd.f32 %v15718_v40, %v14631_v46  ;;  %v5971_v44 = vadd.f32 %v15730_v39, %v14657_v10  ;;  %v15936_v24 = vpop.f32.mrf.mxu1  ;;  %v10001_v46 = vld [vmem:[%s16689_s0 + $0x170] sm:$0x1]  ;;  %v10108_v39 = vld [vmem:[%s16689_s0 + $0x168] sm:$0xe] }
 0x29e   :  { %11020 = vmatprep.mubr.msk.bf16.mxu1 %vm247_vm1, %v10042_v60  ;;  %v7406_v32 = vsel %vm11430_vm7, %v7401_v22, %v7405_v57  ;;  %v8420_v6 = vsel %vm11408_vm6, %v8418_v18, %v8419_v34  ;;  %v7418_v10 = vshrl.u32 %v9999_v52, 16  ;;  %v7421_v40 = vshll.u32 %v9999_v52, 16  ;;  %v15957_v34 = vpop.f32.mrf.mxu0 }
 0x29f   :  { %17136 = vst [vmem:[#allocation36_spill] sm:$0xff] %v15925_v41  ;;  %v7416_v26 = vsel %vm11430_vm7, %v7411_v42, %v7415_v35  ;;  %v10172_v8 = vcombine.low %v8417_v5, %v8420_v6  ;;  %v15952_v49 = vadd.f32 %v15770_v1, %v5973_v12  ;;  %v15955_v57 = vadd.f32 %v15778_v14, %v5971_v44  ;;  %v15959_v30 = vpop.f32.mrf.mxu1  ;;  %v10002_v1 = vld [vmem:[%s16689_s0 + $0x174] sm:$0xf]  ;;  %v10003_v44 = vld [vmem:[%s16689_s0 + $0x178] sm:$0xf] }
 0x2a0   :  { %v10043_v48 = vcombine.low %v7406_v32, %v7416_v26  ;;  %v7420_v55 = vrot.slane %v7418_v10, 4  ;;  %v7423_v19 = vrot.slane %v7421_v40, 5  ;;  %v7427_v47 = vshll.u32 %v10000_v43, 16  ;;  %v15965_v14 = vpop.f32.mrf.mxu0 }
 0x2a1   :  { %17137 = vst [vmem:[#allocation15_spill] sm:$0xff] %v15952_v49  ;;  %17138 = vst [vmem:[#allocation48_spill] sm:$0xff] %v15955_v57  ;;  %11087 = vmatmul.mubr.msk.bf16.gmra.mxu0 %vm247_vm1, %v10172_v8  ;;  %v7431_v20 = vshrl.u32 %v10000_v43, 16  ;;  %v7437_v52 = vshll.u32 %v10001_v46, 16  ;;  %v10140_v35 = vrot.slane %v10108_v39, 9  ;;  %v8423_v60 = vrot.slane %v10000_v43, 5  ;;  %v15967_v22 = vpop.f32.mrf.mxu1 }
 0x2a2   :  { %11021 = vmatmul.mubr.msk.bf16.gmra.mxu1 %vm247_vm1, %v10043_v48  ;;  %v7424_v5 = vor.u32 %v7423_v19, %v7420_v55  ;;  %v7429_v18 = vrot.slane %v7427_v47, 5  ;;  %v8426_v42 = vrot.slane %v10001_v46, 5  ;;  %v5976_v12 = vadd.f32 %v15748_v33, %v14703_v50  ;;  %v15977_v40 = vpop.f32.mrf.mxu0  ;;  %v10004_v50 = vld [vmem:[%s16689_s0 + $0x17c] sm:$0x1] }
 0x2a3   :  { %v7433_v43 = vrot.slane %v7431_v20, 4  ;;  %v7439_v32 = vrot.slane %v7437_v52, 5  ;;  %v8424_v6 = vsel %vm11408_vm6, %v10140_v35, %v8423_v60  ;;  %v8425_v10 = vrot.slane %v8423_v60, 4  ;;  %17139 = vst [vmem:[#allocation38_spill] sm:$0xff] %v15977_v40  ;;  %v15979_v39 = vpop.f32.mrf.mxu1  ;;  %v10109_v20 = vld [vmem:[%s16689_s0 + $0x174] sm:$0xe] }
 0x2a4   :  { %v7425_v26 = vrot.slane %v7424_v5, 4  ;;  %v15982_v46 = vadd.f32 %v15790_v27, %v5976_v12  ;;  %v7442_v33 = vshrl.u32 %v10002_v1, 16  ;;  %v7445_v8 = vshll.u32 %v10002_v1, 16  ;;  %v15992_v52 = vpop.f32.mrf.mxu0 }
 0x2a5   :  { %v7434_v48 = vor.u32 %v7433_v43, %v7429_v18  ;;  %v8427_v55 = vsel %vm11408_vm6, %v8425_v10, %v8426_v42  ;;  %v7451_v19 = vshll.u32 %v10003_v44, 16  ;;  %v7455_v47 = vshrl.u32 %v10003_v44, 16  ;;  %17141 = vst [vmem:[#allocation10_spill] sm:$0xff] %v15992_v52  ;;  %v15994_v27 = vpop.f32.mrf.mxu1 }
 0x2a6   :  { %17140 = vst [vmem:[#allocation65_spill] sm:$0xff] %v15982_v46  ;;  %v7430_v35 = vsel %vm11430_vm7, %v7425_v26, %v7429_v18  ;;  %v10173_v60 = vcombine.low %v8424_v6, %v8427_v55  ;;  %v7444_v5 = vrot.slane %v7442_v33, 4  ;;  %v7447_v1 = vrot.slane %v7445_v8, 5  ;;  %v15998_v10 = vpop.f32.mrf.mxu0  ;;  %v10005_v8 = vld [vmem:[%s16689_s0 + $0x180] sm:$0xf] }
 0x2a7   :  { %v7435_v12 = vrot.slane %v7434_v48, 4  ;;  %v7453_v43 = vrot.slane %v7451_v19, 5  ;;  %v7457_v46 = vrot.slane %v7455_v47, 4  ;;  %v7461_v42 = vshll.u32 %v10004_v50, 16  ;;  %v16000_v57 = vpop.f32.mrf.mxu1 }
 0x2a8   :  { %11090 = vmatprep.mubr.msk.bf16.mxu0 %vm247_vm1, %v10173_v60  ;;  %v7448_v49 = vor.u32 %v7447_v1, %v7444_v5  ;;  %v10141_v41 = vrot.slane %v10109_v20, 9  ;;  %v8430_v52 = vrot.slane %v10003_v44, 5  ;;  %v8433_v40 = vrot.slane %v10004_v50, 5  ;;  %v16010_v48 = vpop.f32.mrf.mxu0  ;;  %v10006_v60 = vld [vmem:[%s16689_s0 + $0x184] sm:$0xf] }
 0x2a9   :  { %v7440_v18 = vsel %vm11430_vm7, %v7435_v12, %v7439_v32  ;;  %v7458_v6 = vor.u32 %v7457_v46, %v7453_v43  ;;  %v7463_v26 = vrot.slane %v7461_v42, 5  ;;  %v5974_v33 = vadd.f32 %v15772_v45, %v14724_v62  ;;  %v16012_v55 = vpop.f32.mrf.mxu1  ;;  %v17143_v45 = vld [vmem:[#allocation59_spill] sm:$0xff] }
 0x2aa   :  { %v10044_v19 = vcombine.low %v7430_v35, %v7440_v18  ;;  %v7449_v47 = vrot.slane %v7448_v49, 4  ;;  %v8431_v44 = vsel %vm11408_vm6, %v10141_v41, %v8430_v52  ;;  %v8432_v50 = vrot.slane %v8430_v52, 4  ;;  %v16026_v35 = vpop.f32.mrf.mxu0  ;;  %v10110_v52 = vld [vmem:[%s16689_s0 + $0x180] sm:$0xe] }
 0x2ab   :  { %v7459_v32 = vrot.slane %v7458_v6, 4  ;;  %v16017_v46 = vadd.f32 %v15805_v2, %v5974_v33  ;;  %v5977_v62 = vadd.f32 %v15780_v31, %v14745_v25  ;;  %v5975_v20 = vadd.f32 %v15792_v36, %v17143_v45  ;;  %v16028_v49 = vpop.f32.mrf.mxu1  ;;  %v10007_v25 = vld [vmem:[%s16689_s0 + $0x188] sm:$0x1] }
 0x2ac   :  { %11024 = vmatprep.mubr.msk.bf16.mxu1 %vm247_vm1, %v10044_v19  ;;  %v7454_v2 = vsel %vm11430_vm7, %v7449_v47, %v7453_v43  ;;  %v8434_v41 = vsel %vm11408_vm6, %v8432_v50, %v8433_v40  ;;  %v7466_v36 = vshrl.u32 %v10005_v8, 16  ;;  %v7469_v31 = vshll.u32 %v10005_v8, 16  ;;  %v16049_v40 = vpop.f32.mrf.mxu0 }
 0x2ad   :  { %17142 = vst [vmem:[#allocation27_spill] sm:$0xff] %v16017_v46  ;;  %v7464_v5 = vsel %vm11430_vm7, %v7459_v32, %v7463_v26  ;;  %v10174_v1 = vcombine.low %v8431_v44, %v8434_v41  ;;  %v16044_v12 = vadd.f32 %v15811_v3, %v5977_v62  ;;  %v16047_v43 = vadd.f32 %v15823_v23, %v5975_v20  ;;  %v16051_v42 = vpop.f32.mrf.mxu1  ;;  %v10008_v3 = vld [vmem:[%s16689_s0 + $0x18c] sm:$0xf] }
 0x2ae   :  { %v10045_v18 = vcombine.low %v7454_v2, %v7464_v5  ;;  %v7468_v6 = vrot.slane %v7466_v36, 4  ;;  %v7471_v33 = vrot.slane %v7469_v31, 5  ;;  %v7475_v8 = vshll.u32 %v10006_v60, 16  ;;  %v16057_v23 = vpop.f32.mrf.mxu0 }
 0x2af   :  { %17144 = vst [vmem:[#allocation29_spill] sm:$0xff] %v16044_v12  ;;  %17145 = vst [vmem:[#allocation35_spill] sm:$0xff] %v16047_v43  ;;  %11091 = vmatmul.mubr.msk.bf16.gmra.mxu0 %vm247_vm1, %v10174_v1  ;;  %v7479_v19 = vshrl.u32 %v10006_v60, 16  ;;  %v7485_v47 = vshll.u32 %v10007_v25, 16  ;;  %v10142_v26 = vrot.slane %v10110_v52, 9  ;;  %v8437_v44 = vrot.slane %v10006_v60, 5  ;;  %v16059_v50 = vpop.f32.mrf.mxu1 }
 0x2b0   :  { %11025 = vmatmul.mubr.msk.bf16.gmra.mxu1 %vm247_vm1, %v10045_v18  ;;  %v7472_v32 = vor.u32 %v7471_v33, %v7468_v6  ;;  %v7477_v62 = vrot.slane %v7475_v8, 5  ;;  %v8440_v45 = vrot.slane %v10007_v25, 5  ;;  %v5980_v20 = vadd.f32 %v15807_v37, %v14800_v51  ;;  %v10009_v60 = vld [vmem:[%s16689_s0 + $0x190] sm:$0xf]  ;;  %v16069_v52 = vpop.f32.mrf.mxu0  ;;  %v10010_v51 = vld [vmem:[%s16689_s0 + $0x194] sm:$0x1] }
 0x2b1   :  { %v7481_v2 = vrot.slane %v7479_v19, 4  ;;  %v7487_v41 = vrot.slane %v7485_v47, 5  ;;  %v8438_v36 = vsel %vm11408_vm6, %v10142_v26, %v8437_v44  ;;  %v8439_v31 = vrot.slane %v8437_v44, 4  ;;  %v16071_v5 = vpop.f32.mrf.mxu1  ;;  %v10111_v47 = vld [vmem:[%s16689_s0 + $0x18c] sm:$0xe] }
 0x2b2   :  { %17146 = vst [vmem:[#allocation33_spill] sm:$0xff] %v16071_v5  ;;  %v7473_v1 = vrot.slane %v7472_v32, 4  ;;  %v16074_v25 = vadd.f32 %v15841_v58, %v5980_v20  ;;  %v7490_v37 = vshrl.u32 %v10008_v3, 16  ;;  %v7493_v18 = vshll.u32 %v10008_v3, 16  ;;  %v16084_v26 = vpop.f32.mrf.mxu0 }
 0x2b3   :  { %v7482_v6 = vor.u32 %v7481_v2, %v7477_v62  ;;  %v8441_v33 = vsel %vm11408_vm6, %v8439_v31, %v8440_v45  ;;  %v7499_v8 = vshll.u32 %v10009_v60, 16  ;;  %v7503_v19 = vshrl.u32 %v10009_v60, 16  ;;  %17148 = vst [vmem:[#allocation56_spill] sm:$0xff] %v16084_v26  ;;  %v16086_v58 = vpop.f32.mrf.mxu1 }
 0x2b4   :  { %17147 = vst [vmem:[#allocation25_spill] sm:$0xff] %v16074_v25  ;;  %17149 = vst [vmem:[#allocation21_spill] sm:$0xff] %v16086_v58  ;;  %v7478_v44 = vsel %vm11430_vm7, %v7473_v1, %v7477_v62  ;;  %v10175_v32 = vcombine.low %v8438_v36, %v8441_v33  ;;  %v7492_v20 = vrot.slane %v7490_v37, 4  ;;  %v7495_v3 = vrot.slane %v7493_v18, 5  ;;  %v16090_v31 = vpop.f32.mrf.mxu0  ;;  %v10011_v18 = vld [vmem:[%s16689_s0 + $0x198] sm:$0xf] }
 0x2b5   :  { %v7483_v2 = vrot.slane %v7482_v6, 4  ;;  %v7501_v25 = vrot.slane %v7499_v8, 5  ;;  %v7505_v43 = vrot.slane %v7503_v19, 4  ;;  %v7509_v45 = vshll.u32 %v10010_v51, 16  ;;  %v16092_v12 = vpop.f32.mrf.mxu1 }
 0x2b6   :  { %11094 = vmatprep.mubr.msk.bf16.mxu0 %vm247_vm1, %v10175_v32  ;;  %v7496_v46 = vor.u32 %v7495_v3, %v7492_v20  ;;  %v10143_v26 = vrot.slane %v10111_v47, 9  ;;  %v8444_v5 = vrot.slane %v10009_v60, 5  ;;  %v8447_v58 = vrot.slane %v10010_v51, 5  ;;  %v16102_v6 = vpop.f32.mrf.mxu0  ;;  %v17151_v47 = vld [vmem:[#allocation62_spill] sm:$0xff]  ;;  %v10012_v20 = vld [vmem:[%s16689_s0 + $0x19c] sm:$0xf] }
 0x2b7   :  { %v7488_v62 = vsel %vm11430_vm7, %v7483_v2, %v7487_v41  ;;  %v7506_v36 = vor.u32 %v7505_v43, %v7501_v25  ;;  %v7511_v1 = vrot.slane %v7509_v45, 5  ;;  %v5978_v37 = vadd.f32 %v15813_v15, %v14823_v13  ;;  %v16104_v33 = vpop.f32.mrf.mxu1  ;;  %v17152_v15 = vld [vmem:[#allocation64_spill] sm:$0xff]  ;;  %v10112_v3 = vld [vmem:[%s16689_s0 + $0x198] sm:$0xe] }
 0x2b8   :  { %v10046_v8 = vcombine.low %v7478_v44, %v7488_v62  ;;  %v7497_v19 = vrot.slane %v7496_v46, 4  ;;  %v8445_v60 = vsel %vm11408_vm6, %v10143_v26, %v8444_v5  ;;  %v8446_v51 = vrot.slane %v8444_v5, 4  ;;  %v16118_v44 = vpop.f32.mrf.mxu0 }
 0x2b9   :  { %v7507_v41 = vrot.slane %v7506_v36, 4  ;;  %v16109_v43 = vadd.f32 %v15865_v54, %v5978_v37  ;;  %v5981_v13 = vadd.f32 %v15825_v11, %v17151_v47  ;;  %v5979_v32 = vadd.f32 %v15843_v53, %v17152_v15  ;;  %v16120_v46 = vpop.f32.mrf.mxu1  ;;  %v10013_v11 = vld [vmem:[%s16689_s0 + $0x1a0] sm:$0x1] }
 0x2ba   :  { %11028 = vmatprep.mubr.msk.bf16.mxu1 %vm247_vm1, %v10046_v8  ;;  %v7502_v54 = vsel %vm11430_vm7, %v7497_v19, %v7501_v25  ;;  %v8448_v5 = vsel %vm11408_vm6, %v8446_v51, %v8447_v58  ;;  %v7514_v53 = vshrl.u32 %v10011_v18, 16  ;;  %v7517_v26 = vshll.u32 %v10011_v18, 16  ;;  %v16141_v58 = vpop.f32.mrf.mxu0 }
 0x2bb   :  { %17150 = vst [vmem:[#allocation32_spill] sm:$0xff] %v16109_v43  ;;  %v7512_v2 = vsel %vm11430_vm7, %v7507_v41, %v7511_v1  ;;  %v10176_v45 = vcombine.low %v8445_v60, %v8448_v5  ;;  %v16136_v62 = vadd.f32 %v15873_v17, %v5981_v13  ;;  %v16139_v25 = vadd.f32 %v15885_v63, %v5979_v32  ;;  %v16143_v36 = vpop.f32.mrf.mxu1  ;;  %v10014_v17 = vld [vmem:[%s16689_s0 + $0x1a4] sm:$0xf] }
 0x2bc   :  { %v10047_v37 = vcombine.low %v7502_v54, %v7512_v2  ;;  %v7516_v18 = vrot.slane %v7514_v53, 4  ;;  %v7519_v8 = vrot.slane %v7517_v26, 5  ;;  %v7523_v19 = vshll.u32 %v10012_v20, 16  ;;  %v16149_v63 = vpop.f32.mrf.mxu0  ;;  %v17156_v54 = vld [vmem:[#allocation13_spill] sm:$0xff] }
 0x2bd   :  { %17153 = vst [vmem:[#allocation39_spill] sm:$0xff] %v16136_v62  ;;  %17154 = vst [vmem:[#allocation37_spill] sm:$0xff] %v16139_v25  ;;  %11095 = vmatmul.mubr.msk.bf16.gmra.mxu0 %vm247_vm1, %v10176_v45  ;;  %v7527_v51 = vshrl.u32 %v10012_v20, 16  ;;  %v7533_v47 = vshll.u32 %v10013_v11, 16  ;;  %v10144_v1 = vrot.slane %v10112_v3, 9  ;;  %v8451_v60 = vrot.slane %v10012_v20, 5  ;;  %v16151_v41 = vpop.f32.mrf.mxu1 }
 0x2be   :  { %17155 = vst [vmem:[#allocation43_spill] sm:$0xff] %v16151_v41  ;;  %11029 = vmatmul.mubr.msk.bf16.gmra.mxu1 %vm247_vm1, %v10047_v37  ;;  %v7520_v13 = vor.u32 %v7519_v8, %v7516_v18  ;;  %v7525_v15 = vrot.slane %v7523_v19, 5  ;;  %v8454_v32 = vrot.slane %v10013_v11, 5  ;;  %v5984_v5 = vadd.f32 %v15867_v9, %v17156_v54  ;;  %v10015_v20 = vld [vmem:[%s16689_s0 + $0x1a8] sm:$0xf]  ;;  %v16161_v45 = vpop.f32.mrf.mxu0 }
 0x2bf   :  { %v7529_v53 = vrot.slane %v7527_v51, 4  ;;  %v7535_v26 = vrot.slane %v7533_v47, 5  ;;  %v8452_v3 = vsel %vm11408_vm6, %v10144_v1, %v8451_v60  ;;  %v8453_v2 = vrot.slane %v8451_v60, 4  ;;  %17157 = vst [vmem:[#allocation84_spill] sm:$0xff] %v16161_v45  ;;  %v16163_v25 = vpop.f32.mrf.mxu1  ;;  %v10016_v9 = vld [vmem:[%s16689_s0 + $0x1ac] sm:$0x1] }
 0x2c0   :  { %17158 = vst [vmem:[#allocation45_spill] sm:$0xff] %v16163_v25  ;;  %v7521_v37 = vrot.slane %v7520_v13, 4  ;;  %v16166_v11 = vadd.f32 %v15900_v7, %v5984_v5  ;;  %v7538_v18 = vshrl.u32 %v10014_v17, 16  ;;  %v7541_v8 = vshll.u32 %v10014_v17, 16  ;;  %v10113_v60 = vld [vmem:[%s16689_s0 + $0x1a4] sm:$0xe]  ;;  %v16176_v13 = vpop.f32.mrf.mxu0 }
 0x2c1   :  { %v7530_v19 = vor.u32 %v7529_v53, %v7525_v15  ;;  %v8455_v51 = vsel %vm11408_vm6, %v8453_v2, %v8454_v32  ;;  %v7547_v47 = vshll.u32 %v10015_v20, 16  ;;  %v7551_v1 = vshrl.u32 %v10015_v20, 16  ;;  %17160 = vst [vmem:[#allocation51_spill] sm:$0xff] %v16176_v13  ;;  %v16178_v7 = vpop.f32.mrf.mxu1 }
 0x2c2   :  { %17159 = vst [vmem:[#allocation19_spill] sm:$0xff] %v16166_v11  ;;  %17161 = vst [vmem:[#allocation49_spill] sm:$0xff] %v16178_v7  ;;  %v7526_v54 = vsel %vm11430_vm7, %v7521_v37, %v7525_v15  ;;  %v10177_v5 = vcombine.low %v8452_v3, %v8455_v51  ;;  %v7540_v11 = vrot.slane %v7538_v18, 4  ;;  %v7543_v17 = vrot.slane %v7541_v8, 5  ;;  %v16182_v2 = vpop.f32.mrf.mxu0  ;;  %v17162_v18 = vld [vmem:[#allocation69_spill] sm:$0xff] }
 0x2c3   :  { %v7531_v53 = vrot.slane %v7530_v19, 4  ;;  %v7549_v62 = vrot.slane %v7547_v47, 5  ;;  %v7553_v43 = vrot.slane %v7551_v1, 4  ;;  %v7557_v32 = vshll.u32 %v10016_v9, 16  ;;  %v16184_v25 = vpop.f32.mrf.mxu1 }
 0x2c4   :  { %11098 = vmatprep.mubr.msk.bf16.mxu0 %vm247_vm1, %v10177_v5  ;;  %v7544_v41 = vor.u32 %v7543_v17, %v7540_v11  ;;  %v10145_v13 = vrot.slane %v10113_v60, 9  ;;  %v8458_v45 = vrot.slane %v10015_v20, 5  ;;  %v8461_v7 = vrot.slane %v10016_v9, 5  ;;  %v16191_v19 = vpop.f32.mrf.mxu0  ;;  %v17164_v5 = vld [vmem:[#allocation72_spill] sm:$0xff] }
 0x2c5   :  { %v7536_v15 = vsel %vm11430_vm7, %v7531_v53, %v7535_v26  ;;  %v7554_v3 = vor.u32 %v7553_v43, %v7549_v62  ;;  %v7559_v37 = vrot.slane %v7557_v32, 5  ;;  %v5982_v8 = vadd.f32 %v15875_v38, %v17162_v18  ;;  %v16193_v51 = vpop.f32.mrf.mxu1  ;;  %v17163_v26 = vld [vmem:[#allocation70_spill] sm:$0xff] }
 0x2c6   :  { %v10048_v47 = vcombine.low %v7526_v54, %v7536_v15  ;;  %v7545_v1 = vrot.slane %v7544_v41, 4  ;;  %v8459_v11 = vsel %vm11408_vm6, %v10145_v13, %v8458_v45  ;;  %v8460_v60 = vrot.slane %v8458_v45, 4  ;;  %v16204_v17 = vpop.f32.mrf.mxu0  ;;  %v17166_v54 = vld [vmem:[#allocation78_spill] sm:$0xff] }
 0x2c7   :  { %v7555_v20 = vrot.slane %v7554_v3, 4  ;;  %v16198_v9 = vadd.f32 %v15906_v16, %v5982_v8  ;;  %v5985_v43 = vadd.f32 %v15887_v61, %v17163_v26  ;;  %v5983_v38 = vadd.f32 %v15902_v29, %v17164_v5  ;;  %v16206_v53 = vpop.f32.mrf.mxu1  ;;  %v17165_v16 = vld [vmem:[#allocation74_spill] sm:$0xff]  ;;  %v17173_v26 = vld [vmem:[#allocation7_spill] sm:$0xff] }
 0x2c8   :  { %11032 = vmatprep.mubr.msk.bf16.mxu1 %vm247_vm1, %v10048_v47  ;;  %v7550_v41 = vsel %vm11430_vm7, %v7545_v1, %v7549_v62  ;;  %v8462_v45 = vsel %vm11408_vm6, %v8460_v60, %v8461_v7  ;;  %v5988_v13 = vadd.f32 %v15908_v59, %v17165_v16  ;;  %v5986_v61 = vadd.f32 %v15920_v4, %v17166_v54  ;;  %v6586_v62 = vpop.f32.mrf.mxu0  ;;  %v17167_v4 = vld [vmem:[#allocation79_spill] sm:$0xff]  ;;  %v17169_v8 = vld [vmem:[#allocation30_spill] sm:$0xff] }
 0x2c9   :  { %v7560_v29 = vsel %vm11430_vm7, %v7555_v20, %v7559_v37  ;;  %v10178_v32 = vcombine.low %v8459_v11, %v8462_v45  ;;  %v16220_v15 = vadd.f32 %v15918_v21, %v5985_v43  ;;  %v16223_v3 = vadd.f32 %v15934_v28, %v5983_v38  ;;  %v10898_v18 = vpop.f32.mrf.mxu1  ;;  %v17168_v37 = vld [vmem:[#allocation81_spill] sm:$0xff]  ;;  %v17170_v47 = vld [vmem:[#allocation31_spill] sm:$0xff]  ;;  %v17172_v20 = vld [vmem:[#allocation38_spill] sm:$0xff] }
 0x2ca   :  { %v10049_v0 = vcombine.low %v7550_v41, %v7560_v29  ;;  %v16226_v7 = vadd.f32 %v15957_v34, %v5988_v13  ;;  %v16229_v59 = vadd.f32 %v15965_v14, %v5986_v61  ;;  %v5989_v56 = vadd.f32 %v15936_v24, %v17167_v4  ;;  %v17171_v11 = vld [vmem:[#allocation5_spill] sm:$0xff]  ;;  %v10961_v60 = vpop.f32.mrf.mxu0  ;;  %v17177_v61 = vld [vmem:[#allocation16_spill] sm:$0xff]  ;;  %v17178_v29 = vld [vmem:[#allocation18_spill] sm:$0xff] }
 0x2cb   :  { %11099 = vmatmul.mubr.msk.bf16.gmra.mxu0 %vm247_vm1, %v10178_v32  ;;  %v5987_v21 = vadd.f32 %v15959_v30, %v17168_v37  ;;  %v5992_v28 = vadd.f32 %v15967_v22, %v17169_v8  ;;  %v5990_v1 = vadd.f32 %v15979_v39, %v17170_v47  ;;  %v5993_v34 = vadd.f32 %v15994_v27, %v17171_v11  ;;  %v5923_v14 = vpop.f32.mrf.mxu1  ;;  %v17174_v30 = vld [vmem:[#allocation9_spill] sm:$0xff]  ;;  %v17175_v22 = vld [vmem:[#allocation42_spill] sm:$0xff]  ;;  %v17179_v32 = vld [vmem:[#allocation20_spill] sm:$0xff] }
 0x2cc   :  { %11033 = vmatmul.mubr.msk.bf16.gmra.mxu1 %vm247_vm1, %v10049_v0  ;;  %v16244_v24 = vadd.f32 %v17172_v20, %v5989_v56  ;;  %v5991_v43 = vadd.f32 %v16000_v57, %v17173_v26  ;;  %v5996_v5 = vadd.f32 %v16012_v55, %v17174_v30  ;;  %v5994_v38 = vadd.f32 %v16028_v49, %v17175_v22  ;;  %v17176_v39 = vld [vmem:[#allocation10_spill] sm:$0xff]  ;;  %v6589_v13 = vpop.f32.mrf.mxu0  ;;  %v17181_v4 = vld [vmem:[#allocation52_spill] sm:$0xff]  ;;  %v17182_v56 = vld [vmem:[#allocation21_spill] sm:$0xff] }
 0x2cd   :  { %v16253_v41 = vadd.f32 %v17176_v39, %v5987_v21  ;;  %v16256_v27 = vadd.f32 %v15998_v10, %v5992_v28  ;;  %v16259_v45 = vadd.f32 %v16010_v48, %v5990_v1  ;;  %v16262_v16 = vadd.f32 %v16026_v35, %v5993_v34  ;;  %v10899_v57 = vpop.f32.mrf.mxu1  ;;  %v17180_v35 = vld [vmem:[#allocation33_spill] sm:$0xff]  ;;  %v17184_v28 = vld [vmem:[#allocation56_spill] sm:$0xff]  ;;  %v17187_v11 = vld [vmem:[#allocation14_spill] sm:$0xff] }
 0x2ce   :  { %v16265_v54 = vadd.f32 %v16049_v40, %v5991_v43  ;;  %v16268_v55 = vadd.f32 %v16057_v23, %v5996_v5  ;;  %v16271_v49 = vadd.f32 %v16069_v52, %v5994_v38  ;;  %v5997_v10 = vadd.f32 %v16051_v42, %v17177_v61  ;;  %v17183_v40 = vld [vmem:[#allocation85_spill] sm:$0xff]  ;;  %v10964_v23 = vpop.f32.mrf.mxu0  ;;  %v17186_v1 = vld [vmem:[#allocation28_spill] sm:$0xff]  ;;  %v17190_v38 = vld [vmem:[#allocation54_spill] sm:$0xff] }
 0x2cf   :  { %v5995_v48 = vadd.f32 %v16059_v50, %v17178_v29  ;;  %v6000_v0 = vadd.f32 %v17180_v35, %v17179_v32  ;;  %v5998_v37 = vadd.f32 %v17182_v56, %v17181_v4  ;;  %v6001_v21 = vadd.f32 %v16092_v12, %v17183_v40  ;;  %v5926_v8 = vpop.f32.mrf.mxu1  ;;  %v17185_v47 = vld [vmem:[#allocation17_spill] sm:$0xff]  ;;  %v17194_v29 = vld [vmem:[#allocation40_spill] sm:$0xff] }
 0x2d0   :  { %v16284_v52 = vadd.f32 %v17184_v28, %v5997_v10  ;;  %v5999_v42 = vadd.f32 %v16104_v33, %v17185_v47  ;;  %v6004_v50 = vadd.f32 %v16120_v46, %v17186_v1  ;;  %v6002_v34 = vadd.f32 %v16143_v36, %v17187_v11  ;;  %v6602_v30 = vpop.f32.mrf.mxu0  ;;  %v17188_v46 = vld [vmem:[#allocation84_spill] sm:$0xff]  ;;  %v17189_v36 = vld [vmem:[#allocation51_spill] sm:$0xff]  ;;  %v17192_v61 = vld [vmem:[#allocation41_spill] sm:$0xff] }
 0x2d1   :  { %v16293_v20 = vadd.f32 %v16090_v31, %v5995_v48  ;;  %v16296_v26 = vadd.f32 %v16102_v6, %v6000_v0  ;;  %v16299_v12 = vadd.f32 %v16118_v44, %v5998_v37  ;;  %v16302_v43 = vadd.f32 %v16141_v58, %v6001_v21  ;;  %v10902_v33 = vpop.f32.mrf.mxu1  ;;  %v17191_v6 = vld [vmem:[#allocation43_spill] sm:$0xff]  ;;  %v17193_v44 = vld [vmem:[#allocation45_spill] sm:$0xff]  ;;  %v17196_v32 = vld [vmem:[#allocation44_spill] sm:$0xff] }
 0x2d2   :  { %v16305_v5 = vadd.f32 %v16149_v63, %v5999_v42  ;;  %v16308_v22 = vadd.f32 %v17188_v46, %v6004_v50  ;;  %v16311_v31 = vadd.f32 %v17189_v36, %v6002_v34  ;;  %v6005_v39 = vadd.f32 %v17191_v6, %v17190_v38  ;;  %v17195_v58 = vld [vmem:[#allocation49_spill] sm:$0xff]  ;;  %v17197_v63 = vld [vmem:[#allocation23_spill] sm:$0xff]  ;;  %v10965_v4 = vpop.f32.mrf.mxu0  ;;  %v17200_v42 = vld [vmem:[#allocation46_spill] sm:$0xff] }
 0x2d3   :  { %v6003_v10 = vadd.f32 %v17193_v44, %v17192_v61  ;;  %v6008_v48 = vadd.f32 %v17195_v58, %v17194_v29  ;;  %v6006_v35 = vadd.f32 %v16184_v25, %v17196_v32  ;;  %v6009_v0 = vadd.f32 %v16193_v51, %v17197_v63  ;;  %v5939_v56 = vpop.f32.mrf.mxu1  ;;  %v17198_v40 = vld [vmem:[#allocation57_spill] sm:$0xff]  ;;  %v17199_v28 = vld [vmem:[#allocation47_spill] sm:$0xff]  ;;  %v17203_v6 = vld [vmem:[#allocation58_spill] sm:$0xff] }
 0x2d4   :  { %v16324_v37 = vadd.f32 %v16182_v2, %v6005_v39  ;;  %v6007_v21 = vadd.f32 %v16206_v53, %v17198_v40  ;;  %v6012_v47 = vadd.f32 %v10898_v18, %v17199_v28  ;;  %v6010_v1 = vadd.f32 %v5923_v14, %v17200_v42  ;;  %v6605_v34 = vpop.f32.mrf.mxu0  ;;  %v17201_v18 = vld [vmem:[#allocation63_spill] sm:$0xff]  ;;  %v17204_v61 = vld [vmem:[#allocation60_spill] sm:$0xff] }
 0x2d5   :  { %v16331_v50 = vadd.f32 %v16191_v19, %v6003_v10  ;;  %v16334_v25 = vadd.f32 %v16204_v17, %v6008_v48  ;;  %v16336_v11 = vadd.f32 %v6586_v62, %v6006_v35  ;;  %v16338_v51 = vadd.f32 %v10961_v60, %v6009_v0  ;;  %v10903_v2 = vpop.f32.mrf.mxu1  ;;  %v17202_v38 = vld [vmem:[#allocation67_spill] sm:$0xff]  ;;  %v17205_v44 = vld [vmem:[#allocation12_spill] sm:$0xff] }
 0x2d6   :  { %v16340_v46 = vadd.f32 %v6589_v13, %v6007_v21  ;;  %v16342_v36 = vadd.f32 %v10964_v23, %v6012_v47  ;;  %v16344_v53 = vadd.f32 %v6602_v30, %v6010_v1  ;;  %v6013_v14 = vadd.f32 %v10899_v57, %v17201_v18  ;;  %v10968_v17 = vpop.f32.mrf.mxu0  ;;  %v17206_v13 = vld [vmem:[#allocation66_spill] sm:$0xff]  ;;  %v17207_v63 = vld [vmem:[#allocation71_spill] sm:$0xff]  ;;  %v17208_v21 = vld [vmem:[#allocation76_spill] sm:$0xff] }
 0x2d7   :  { %v6011_v19 = vadd.f32 %v5926_v8, %v17202_v38  ;;  %v6016_v39 = vadd.f32 %v10902_v33, %v17203_v6  ;;  %v6014_v62 = vadd.f32 %v5939_v56, %v17204_v61  ;;  %v6017_v60 = vadd.f32 %v10903_v2, %v17205_v44  ;;  %v5942_v10 = vpop.f32.mrf.mxu1  ;;  %v17210_v6 = vld [vmem:[#allocation77_spill] sm:$0xff] }
 0x2d8   :  { %v16351_v29 = vadd.f32 %v10965_v4, %v6013_v14  ;;  %v6015_v58 = vadd.f32 %v5942_v10, %v17206_v13  ;;  %v6618_v48 = vpop.f32.mrf.mxu0 }
 0x2d9   :  { %v16354_v23 = vadd.f32 %v6605_v34, %v6011_v19  ;;  %v16356_v30 = vadd.f32 %v10968_v17, %v6016_v39  ;;  %v10974_v57 = vpop.f32.mrf.mxu1  ;;  %v16358_v32 = vadd.f32 %v6618_v48, %v6014_v62  ;;  %v17209_v34 = vld [vmem:[#allocation73_spill] sm:$0xff] }
 0x2da   :  { %v10969_v8 = vpop.f32.mrf.mxu0  ;;  %v8049_v0 = vadd.f32 %v10974_v57, %v17207_v63 }
 0x2db   :  { %v7792_v33 = vpop.f32.mrf.mxu1  ;;  %v16360_v35 = vadd.f32 %v10969_v8, %v6017_v60  ;;  %v17211_v60 = vld [vmem:[#allocation68_spill] sm:$0xff] }
 0x2dc   :  { %v6621_v56 = vpop.f32.mrf.mxu0  ;;  %v8047_v28 = vadd.f32 %v7792_v33, %v17208_v21  ;;  %v17212_v8 = vld [vmem:[#allocation80_spill] sm:$0xff]  ;;  %v17213_v21 = vld [vmem:[#allocation82_spill] sm:$0xff] }
 0x2dd   :  { %v10975_v40 = vpop.f32.mrf.mxu1  ;;  %v16363_v4 = vadd.f32 %v6621_v56, %v6015_v58 }
 0x2de   :  { %v8050_v2 = vadd.f32 %v10975_v40, %v17209_v34 }
 0x2df   :  { %v11040_v47 = vpop.f32.mrf.mxu0  ;;  %v7795_v42 = vpop.f32.mrf.mxu1 }
 0x2e0   :  { %v8951_v1 = vadd.f32 %v11040_v47, %v8049_v0  ;;  %v8048_v39 = vadd.f32 %v7795_v42, %v17210_v6  ;;  %v17216_v6 = vld [vmem:[#allocation24_spill] sm:$0xff] }
 0x2e1   :  { %v8694_v18 = vpop.f32.mrf.mxu0  ;;  %v10978_v14 = vpop.f32.mrf.mxu1 }
 0x2e2   :  { %v9015_v38 = vmax.f32 %v8951_v1, 0.0  ;;  %v8949_v19 = vadd.f32 %v8694_v18, %v8047_v28  ;;  %v8053_v10 = vadd.f32 %v10978_v14, %v17211_v60 }
 0x2e3   :  { %v11041_v17 = vpop.f32.mrf.mxu0  ;;  %v7808_v61 = vpop.f32.mrf.mxu1 }
 0x2e4   :  { %9080 = vst.msk [vmem:[%s16691_s3 + $0x10] sm:$0xff] %vm9077_vm8, %v9015_v38  ;;  %v9013_v62 = vmax.f32 %v8949_v19, 0.0  ;;  %v8952_v44 = vadd.f32 %v11041_v17, %v8050_v2  ;;  %v8051_v33 = vadd.f32 %v7808_v61, %v17212_v8  ;;  %v17214_v2 = vld [vmem:[#allocation6_spill] sm:$0xff] }
 0x2e5   :  { %v8697_v13 = vpop.f32.mrf.mxu0  ;;  %v10979_v58 = vpop.f32.mrf.mxu1  ;;  %v17215_v19 = vld [vmem:[#allocation50_spill] sm:$0xff] }
 0x2e6   :  { %9078 = vst.msk [vmem:[%s16691_s3] sm:$0xff] %vm9077_vm8, %v9013_v62  ;;  %v9016_v48 = vmax.f32 %v8952_v44, 0.0  ;;  %v8950_v57 = vadd.f32 %v8697_v13, %v8048_v39  ;;  %v8054_v28 = vadd.f32 %v10979_v58, %v17213_v21  ;;  %v5963_v39 = vadd.f32 %v17216_v6, %v17215_v19  ;;  %v17217_v62 = vld [vmem:[#allocation2_spill] sm:$0xff]  ;;  %v17220_v21 = vld [vmem:[#allocation8_spill] sm:$0xff]  ;;  %v17222_v19 = vld [vmem:[#allocation75_spill] sm:$0xff] }
 0x2e7   :  { %v11044_v63 = vpop.f32.mrf.mxu0  ;;  %v7811_v0 = vpop.f32.mrf.mxu1 }
 0x2e8   :  { %9081 = vst.msk [vmem:[%s16691_s3 + $0x18] sm:$0xff] %vm9077_vm8, %v9016_v48  ;;  %v9014_v56 = vmax.f32 %v8950_v57, 0.0  ;;  %v8955_v40 = vadd.f32 %v11044_v63, %v8053_v10  ;;  %v8052_v18 = vadd.f32 %v7811_v0, %v17214_v2  ;;  %v17218_v48 = vld [vmem:[#allocation4_spill] sm:$0xff]  ;;  %v17219_v63 = vld [vmem:[#allocation83_spill] sm:$0xff] }
 0x2e9   :  { %v8710_v47 = vpop.f32.mrf.mxu0  ;;  %v10982_v42 = vpop.f32.mrf.mxu1  ;;  %v6642_v0 = vadd.f32 %v17219_v63, %v5963_v39 }
 0x2ea   :  { %9079 = vst.msk [vmem:[%s16691_s3 + $0x8] sm:$0xff] %vm9077_vm8, %v9014_v56  ;;  %v9019_v1 = vmax.f32 %v8955_v40, 0.0  ;;  %v8953_v34 = vadd.f32 %v8710_v47, %v8051_v33  ;;  %v8057_v44 = vadd.f32 %v10982_v42, %v17217_v62 }
 0x2eb   :  { %v11045_v14 = vpop.f32.mrf.mxu0  ;;  %v7824_v38 = vpop.f32.mrf.mxu1 }
 0x2ec   :  { %9084 = vst.msk [vmem:[%s16691_s3 + $0x30] sm:$0xff] %vm9077_vm8, %v9019_v1  ;;  %v9017_v17 = vmax.f32 %v8953_v34, 0.0  ;;  %v8956_v61 = vadd.f32 %v11045_v14, %v8054_v28  ;;  %v8055_v57 = vadd.f32 %v7824_v38, %v17218_v48  ;;  %v17221_v38 = vld [vmem:[#allocation53_spill] sm:$0xff] }
 0x2ed   :  { %v8713_v60 = vpop.f32.mrf.mxu0  ;;  %v10983_v10 = vpop.f32.mrf.mxu1  ;;  %v5967_v6 = vadd.f32 %v17222_v19, %v17221_v38  ;;  %v17227_v19 = vld [vmem:[#allocation61_spill] sm:$0xff] }
 0x2ee   :  { %9082 = vst.msk [vmem:[%s16691_s3 + $0x20] sm:$0xff] %vm9077_vm8, %v9017_v17  ;;  %v9020_v13 = vmax.f32 %v8956_v61, 0.0  ;;  %v8954_v58 = vadd.f32 %v8713_v60, %v8052_v18  ;;  %v8058_v28 = vadd.f32 %v10983_v10, %v17220_v21  ;;  %v17223_v61 = vld [vmem:[#allocation11_spill] sm:$0xff] }
 0x2ef   :  { %v7827_v33 = vpop.f32.mrf.mxu1 }
 0x2f0   :  { %v11048_v8 = vpop.f32.mrf.mxu0  ;;  %9085 = vst.msk [vmem:[%s16691_s3 + $0x38] sm:$0xff] %vm9077_vm8, %v9020_v13  ;;  %v9018_v56 = vmax.f32 %v8954_v58, 0.0  ;;  %v8056_v2 = vadd.f32 %v7827_v33, %v6642_v0  ;;  %v17224_v58 = vld [vmem:[#allocation26_spill] sm:$0xff]  ;;  %v17225_v33 = vld [vmem:[#allocation3_spill] sm:$0xff] }
 0x2f1   :  { %v8959_v40 = vadd.f32 %v11048_v8, %v8057_v44  ;;  %v10986_v42 = vpop.f32.mrf.mxu1  ;;  %v6646_v63 = vadd.f32 %v17225_v33, %v5967_v6 }
 0x2f2   :  { %v8726_v47 = vpop.f32.mrf.mxu0  ;;  %9083 = vst.msk [vmem:[%s16691_s3 + $0x28] sm:$0xff] %vm9077_vm8, %v9018_v56  ;;  %v8061_v62 = vadd.f32 %v10986_v42, %v17223_v61 }
 0x2f3   :  { %v9023_v1 = vmax.f32 %v8959_v40, 0.0  ;;  %v8957_v34 = vadd.f32 %v8726_v47, %v8055_v57  ;;  %v7840_v14 = vpop.f32.mrf.mxu1  ;;  %v17226_v40 = vld [vmem:[#allocation22_spill] sm:$0xff] }
 0x2f4   :  { %v11049_v18 = vpop.f32.mrf.mxu0  ;;  %v8059_v48 = vadd.f32 %v7840_v14, %v17224_v58 }
 0x2f5   :  { %9088 = vst.msk [vmem:[%s16691_s3 + $0x50] sm:$0xff] %vm9077_vm8, %v9023_v1  ;;  %v9021_v39 = vmax.f32 %v8957_v34, 0.0  ;;  %v8960_v17 = vadd.f32 %v11049_v18, %v8058_v28  ;;  %v10987_v60 = vpop.f32.mrf.mxu1 }
 0x2f6   :  { %v8729_v44 = vpop.f32.mrf.mxu0  ;;  %v8062_v21 = vadd.f32 %v10987_v60, %v17226_v40  ;;  %v17230_v40 = vld [vmem:[#allocation48_spill] sm:$0xff] }
 0x2f7   :  { %9086 = vst.msk [vmem:[%s16691_s3 + $0x40] sm:$0xff] %vm9077_vm8, %v9021_v39  ;;  %v9024_v10 = vmax.f32 %v8960_v17, 0.0  ;;  %v8958_v13 = vadd.f32 %v8729_v44, %v8056_v2  ;;  %v7843_v8 = vpop.f32.mrf.mxu1  ;;  %v17228_v44 = vld [vmem:[#allocation36_spill] sm:$0xff] }
 0x2f8   :  { %v11052_v57 = vpop.f32.mrf.mxu0  ;;  %v8060_v34 = vadd.f32 %v7843_v8, %v6646_v63 }
 0x2f9   :  { %9089 = vst.msk [vmem:[%s16691_s3 + $0x58] sm:$0xff] %vm9077_vm8, %v9024_v10  ;;  %v9022_v0 = vmax.f32 %v8958_v13, 0.0  ;;  %v8963_v56 = vadd.f32 %v11052_v57, %v8061_v62  ;;  %v10990_v47 = vpop.f32.mrf.mxu1  ;;  %v17229_v57 = vld [vmem:[#allocation15_spill] sm:$0xff] }
 0x2fa   :  { %v8742_v28 = vpop.f32.mrf.mxu0  ;;  %v8065_v6 = vadd.f32 %v10990_v47, %v17227_v19 }
 0x2fb   :  { %9087 = vst.msk [vmem:[%s16691_s3 + $0x48] sm:$0xff] %vm9077_vm8, %v9022_v0  ;;  %v9027_v42 = vmax.f32 %v8963_v56, 0.0  ;;  %v8961_v1 = vadd.f32 %v8742_v28, %v8059_v48  ;;  %v7856_v18 = vpop.f32.mrf.mxu1 }
 0x2fc   :  { %v11053_v2 = vpop.f32.mrf.mxu0  ;;  %v8063_v60 = vadd.f32 %v7856_v18, %v17228_v44 }
 0x2fd   :  { %9092 = vst.msk [vmem:[%s16691_s3 + $0x70] sm:$0xff] %vm9077_vm8, %v9027_v42  ;;  %v9025_v14 = vmax.f32 %v8961_v1, 0.0  ;;  %v8964_v38 = vadd.f32 %v11053_v2, %v8062_v21  ;;  %v10991_v17 = vpop.f32.mrf.mxu1 }
 0x2fe   :  { %v8745_v39 = vpop.f32.mrf.mxu0  ;;  %v8066_v8 = vadd.f32 %v10991_v17, %v17229_v57  ;;  %v17234_v57 = vld [vmem:[#allocation35_spill] sm:$0xff] }
 0x2ff   :  { %9090 = vst.msk [vmem:[%s16691_s3 + $0x60] sm:$0xff] %vm9077_vm8, %v9025_v14  ;;  %v9028_v61 = vmax.f32 %v8964_v38, 0.0  ;;  %v8962_v62 = vadd.f32 %v8745_v39, %v8060_v34  ;;  %v7859_v13 = vpop.f32.mrf.mxu1  ;;  %v17231_v34 = vld [vmem:[#allocation65_spill] sm:$0xff] }
 0x300   :  { %v11056_v10 = vpop.f32.mrf.mxu0  ;;  %v8064_v21 = vadd.f32 %v7859_v13, %v17230_v40 }
 0x301   :  { %9093 = vst.msk [vmem:[%s16691_s3 + $0x78] sm:$0xff] %vm9077_vm8, %v9028_v61  ;;  %v9026_v58 = vmax.f32 %v8962_v62, 0.0  ;;  %v8967_v48 = vadd.f32 %v11056_v10, %v8065_v6  ;;  %v10994_v63 = vpop.f32.mrf.mxu1  ;;  %v17232_v6 = vld [vmem:[#allocation27_spill] sm:$0xff] }
 0x302   :  { %v8758_v33 = vpop.f32.mrf.mxu0  ;;  %v8069_v2 = vadd.f32 %v10994_v63, %v17231_v34 }
 0x303   :  { %9091 = vst.msk [vmem:[%s16691_s3 + $0x68] sm:$0xff] %vm9077_vm8, %v9026_v58  ;;  %v9031_v0 = vmax.f32 %v8967_v48, 0.0  ;;  %v8965_v56 = vadd.f32 %v8758_v33, %v8063_v60  ;;  %v7872_v47 = vpop.f32.mrf.mxu1  ;;  %v17233_v60 = vld [vmem:[#allocation29_spill] sm:$0xff] }
 0x304   :  { %v11057_v28 = vpop.f32.mrf.mxu0  ;;  %v8067_v39 = vadd.f32 %v7872_v47, %v17232_v6  ;;  %v17235_v47 = vld [vmem:[#allocation25_spill] sm:$0xff] }
 0x305   :  { %9096 = vst.msk [vmem:[%s16691_s3 + $0x90] sm:$0xff] %vm9077_vm8, %v9031_v0  ;;  %v9029_v42 = vmax.f32 %v8965_v56, 0.0  ;;  %v8968_v1 = vadd.f32 %v11057_v28, %v8066_v8  ;;  %v10995_v14 = vpop.f32.mrf.mxu1 }
 0x306   :  { %v8761_v18 = vpop.f32.mrf.mxu0  ;;  %v8070_v10 = vadd.f32 %v10995_v14, %v17233_v60  ;;  %v17236_v14 = vld [vmem:[#allocation32_spill] sm:$0xff] }
 0x307   :  { %9094 = vst.msk [vmem:[%s16691_s3 + $0x80] sm:$0xff] %vm9077_vm8, %v9029_v42  ;;  %v9032_v38 = vmax.f32 %v8968_v1, 0.0  ;;  %v8966_v19 = vadd.f32 %v8761_v18, %v8064_v21  ;;  %v7875_v61 = vpop.f32.mrf.mxu1 }
 0x308   :  { %v11060_v17 = vpop.f32.mrf.mxu0  ;;  %v8068_v8 = vadd.f32 %v7875_v61, %v17234_v57  ;;  %v17237_v61 = vld [vmem:[#allocation39_spill] sm:$0xff] }
 0x309   :  { %9097 = vst.msk [vmem:[%s16691_s3 + $0x98] sm:$0xff] %vm9077_vm8, %v9032_v38  ;;  %v9030_v62 = vmax.f32 %v8966_v19, 0.0  ;;  %v8971_v44 = vadd.f32 %v11060_v17, %v8069_v2 }
 0x30a   :  { %v8774_v13 = vpop.f32.mrf.mxu0 }
 0x30b   :  { %9095 = vst.msk [vmem:[%s16691_s3 + $0x88] sm:$0xff] %vm9077_vm8, %v9030_v62  ;;  %v9035_v58 = vmax.f32 %v8971_v44, 0.0  ;;  %v8969_v48 = vadd.f32 %v8774_v13, %v8067_v39 }
 0x30c   :  { %v11061_v33 = vpop.f32.mrf.mxu0 }
 0x30d   :  { %9100 = vst.msk [vmem:[%s16691_s3 + $0xb0] sm:$0xff] %vm9077_vm8, %v9035_v58  ;;  %v9033_v63 = vmax.f32 %v8969_v48, 0.0  ;;  %v8972_v0 = vadd.f32 %v11061_v33, %v8070_v10  ;;  %v10998_v40 = vpop.f32.mrf.mxu1  ;;  %v17238_v58 = vld [vmem:[#allocation37_spill] sm:$0xff] }
 0x30e   :  { %v8777_v56 = vpop.f32.mrf.mxu0  ;;  %v8073_v42 = vadd.f32 %v10998_v40, %v17235_v47  ;;  %v17239_v40 = vld [vmem:[#allocation19_spill] sm:$0xff] }
 0x30f   :  { %9098 = vst.msk [vmem:[%s16691_s3 + $0xa0] sm:$0xff] %vm9077_vm8, %v9033_v63  ;;  %v9036_v21 = vmax.f32 %v8972_v0, 0.0  ;;  %v8970_v28 = vadd.f32 %v8777_v56, %v8068_v8  ;;  %v7888_v34 = vpop.f32.mrf.mxu1 }
 0x310   :  { %v11064_v1 = vpop.f32.mrf.mxu0  ;;  %v8071_v38 = vadd.f32 %v7888_v34, %v17236_v14 }
 0x311   :  { %9101 = vst.msk [vmem:[%s16691_s3 + $0xb8] sm:$0xff] %vm9077_vm8, %v9036_v21  ;;  %v9034_v2 = vmax.f32 %v8970_v28, 0.0  ;;  %v8975_v18 = vadd.f32 %v11064_v1, %v8073_v42  ;;  %v10999_v6 = vpop.f32.mrf.mxu1 }
 0x312   :  { %v8790_v19 = vpop.f32.mrf.mxu0  ;;  %v8074_v62 = vadd.f32 %v10999_v6, %v17237_v61 }
 0x313   :  { %9099 = vst.msk [vmem:[%s16691_s3 + $0xa8] sm:$0xff] %vm9077_vm8, %v9034_v2  ;;  %v9039_v39 = vmax.f32 %v8975_v18, 0.0  ;;  %v8973_v17 = vadd.f32 %v8790_v19, %v8071_v38  ;;  %v7891_v60 = vpop.f32.mrf.mxu1 }
 0x314   :  { %v11065_v44 = vpop.f32.mrf.mxu0  ;;  %v8072_v48 = vadd.f32 %v7891_v60, %v17238_v58 }
 0x315   :  { %9104 = vst.msk [vmem:[%s16691_s3 + $0xd0] sm:$0xff] %vm9077_vm8, %v9039_v39  ;;  %v9037_v10 = vmax.f32 %v8973_v17, 0.0  ;;  %v8976_v13 = vadd.f32 %v11065_v44, %v8074_v62 }
 0x316   :  { %v8793_v57 = vpop.f32.mrf.mxu0 }
 0x317   :  { %9102 = vst.msk [vmem:[%s16691_s3 + $0xc0] sm:$0xff] %vm9077_vm8, %v9037_v10  ;;  %v9040_v8 = vmax.f32 %v8976_v13, 0.0  ;;  %v8974_v33 = vadd.f32 %v8793_v57, %v8072_v48 }
 0x319   :  { %9105 = vst.msk [vmem:[%s16691_s3 + $0xd8] sm:$0xff] %vm9077_vm8, %v9040_v8  ;;  %v9038_v63 = vmax.f32 %v8974_v33, 0.0 }
 0x31b   :  { %9103 = vst.msk [vmem:[%s16691_s3 + $0xc8] sm:$0xff] %vm9077_vm8, %v9038_v63  ;;  %v11068_v0 = vpop.f32.mrf.mxu0 }
 0x31c   :  { %v11002_v56 = vpop.f32.mrf.mxu1 }
 0x31d   :  { %v8077_v21 = vadd.f32 %v11002_v56, %v17239_v40  ;;  %v8806_v28 = vpop.f32.mrf.mxu0 }
 0x31e   :  { %v7904_v47 = vpop.f32.mrf.mxu1 }
 0x31f   :  { %v8979_v42 = vadd.f32 %v11068_v0, %v8077_v21  ;;  %v8075_v1 = vadd.f32 %v7904_v47, %v16198_v9  ;;  %v11069_v2 = vpop.f32.mrf.mxu0 }
 0x320   :  { %v11003_v34 = vpop.f32.mrf.mxu1 }
 0x321   :  { %v9043_v18 = vmax.f32 %v8979_v42, 0.0  ;;  %v8977_v14 = vadd.f32 %v8806_v28, %v8075_v1  ;;  %v8078_v38 = vadd.f32 %v11003_v34, %v16220_v15  ;;  %v8809_v61 = vpop.f32.mrf.mxu0 }
 0x322   :  { %v7907_v19 = vpop.f32.mrf.mxu1 }
 0x323   :  { %9108 = vst.msk [vmem:[%s16691_s3 + $0xf0] sm:$0xff] %vm9077_vm8, %v9043_v18  ;;  %v9041_v6 = vmax.f32 %v8977_v14, 0.0  ;;  %v8980_v39 = vadd.f32 %v11069_v2, %v8078_v38  ;;  %v8076_v17 = vadd.f32 %v7907_v19, %v16223_v3 }
 0x325   :  { %9106 = vst.msk [vmem:[%s16691_s3 + $0xe0] sm:$0xff] %vm9077_vm8, %v9041_v6  ;;  %v9044_v9 = vmax.f32 %v8980_v39, 0.0  ;;  %v8978_v62 = vadd.f32 %v8809_v61, %v8076_v17 }
 0x327   :  { %9109 = vst.msk [vmem:[%s16691_s3 + $0xf8] sm:$0xff] %vm9077_vm8, %v9044_v9  ;;  %v9042_v15 = vmax.f32 %v8978_v62, 0.0 }
 0x329   :  { %9107 = vst.msk [vmem:[%s16691_s3 + $0xe8] sm:$0xff] %vm9077_vm8, %v9042_v15  ;;  %v11072_v3 = vpop.f32.mrf.mxu0 }
 0x32a   :  { %v11006_v44 = vpop.f32.mrf.mxu1 }
 0x32b   :  { %v8081_v60 = vadd.f32 %v11006_v44, %v16226_v7  ;;  %v8822_v10 = vpop.f32.mrf.mxu0 }
 0x32c   :  { %v7920_v13 = vpop.f32.mrf.mxu1 }
 0x32d   :  { %v8983_v58 = vadd.f32 %v11072_v3, %v8081_v60  ;;  %v8079_v48 = vadd.f32 %v7920_v13, %v16229_v59  ;;  %v11073_v8 = vpop.f32.mrf.mxu0 }
 0x32e   :  { %v11007_v57 = vpop.f32.mrf.mxu1 }
 0x32f   :  { %v9047_v33 = vmax.f32 %v8983_v58, 0.0  ;;  %v8981_v63 = vadd.f32 %v8822_v10, %v8079_v48  ;;  %v8082_v0 = vadd.f32 %v11007_v57, %v16244_v24  ;;  %v8825_v28 = vpop.f32.mrf.mxu0 }
 0x330   :  { %v7923_v56 = vpop.f32.mrf.mxu1 }
 0x331   :  { %9112 = vst.msk [vmem:[%s16691_s3 + $0x110] sm:$0xff] %vm9077_vm8, %v9047_v33  ;;  %v9045_v40 = vmax.f32 %v8981_v63, 0.0  ;;  %v8984_v21 = vadd.f32 %v11073_v8, %v8082_v0  ;;  %v8080_v7 = vadd.f32 %v7923_v56, %v16253_v41 }
 0x333   :  { %9110 = vst.msk [vmem:[%s16691_s3 + $0x100] sm:$0xff] %vm9077_vm8, %v9045_v40  ;;  %v9048_v59 = vmax.f32 %v8984_v21, 0.0  ;;  %v8982_v47 = vadd.f32 %v8825_v28, %v8080_v7 }
 0x335   :  { %9113 = vst.msk [vmem:[%s16691_s3 + $0x118] sm:$0xff] %vm9077_vm8, %v9048_v59  ;;  %v9046_v24 = vmax.f32 %v8982_v47, 0.0 }
 0x337   :  { %9111 = vst.msk [vmem:[%s16691_s3 + $0x108] sm:$0xff] %vm9077_vm8, %v9046_v24  ;;  %v11076_v41 = vpop.f32.mrf.mxu0 }
 0x338   :  { %v11010_v42 = vpop.f32.mrf.mxu1 }
 0x339   :  { %v8085_v1 = vadd.f32 %v11010_v42, %v16256_v27  ;;  %v8838_v34 = vpop.f32.mrf.mxu0 }
 0x33a   :  { %v7936_v2 = vpop.f32.mrf.mxu1 }
 0x33b   :  { %v8987_v18 = vadd.f32 %v11076_v41, %v8085_v1  ;;  %v8083_v14 = vadd.f32 %v7936_v2, %v16259_v45  ;;  %v11077_v19 = vpop.f32.mrf.mxu0 }
 0x33c   :  { %v11011_v38 = vpop.f32.mrf.mxu1 }
 0x33d   :  { %v9051_v6 = vmax.f32 %v8987_v18, 0.0  ;;  %v8985_v39 = vadd.f32 %v8838_v34, %v8083_v14  ;;  %v8086_v17 = vadd.f32 %v11011_v38, %v16262_v16  ;;  %v8841_v15 = vpop.f32.mrf.mxu0 }
 0x33e   :  { %v7939_v61 = vpop.f32.mrf.mxu1 }
 0x33f   :  { %9116 = vst.msk [vmem:[%s16691_s3 + $0x130] sm:$0xff] %vm9077_vm8, %v9051_v6  ;;  %v9049_v9 = vmax.f32 %v8985_v39, 0.0  ;;  %v8988_v62 = vadd.f32 %v11077_v19, %v8086_v17  ;;  %v8084_v27 = vadd.f32 %v7939_v61, %v16265_v54 }
 0x341   :  { %9114 = vst.msk [vmem:[%s16691_s3 + $0x120] sm:$0xff] %vm9077_vm8, %v9049_v9  ;;  %v9052_v45 = vmax.f32 %v8988_v62, 0.0  ;;  %v8986_v3 = vadd.f32 %v8841_v15, %v8084_v27 }
 0x343   :  { %9117 = vst.msk [vmem:[%s16691_s3 + $0x138] sm:$0xff] %vm9077_vm8, %v9052_v45  ;;  %v9050_v16 = vmax.f32 %v8986_v3, 0.0 }
 0x345   :  { %9115 = vst.msk [vmem:[%s16691_s3 + $0x128] sm:$0xff] %vm9077_vm8, %v9050_v16  ;;  %v11080_v54 = vpop.f32.mrf.mxu0 }
 0x346   :  { %v11014_v44 = vpop.f32.mrf.mxu1 }
 0x347   :  { %v8089_v60 = vadd.f32 %v11014_v44, %v16268_v55  ;;  %v8854_v10 = vpop.f32.mrf.mxu0 }
 0x348   :  { %v7952_v13 = vpop.f32.mrf.mxu1 }
 0x349   :  { %v8991_v58 = vadd.f32 %v11080_v54, %v8089_v60  ;;  %v8087_v48 = vadd.f32 %v7952_v13, %v16271_v49  ;;  %v11081_v8 = vpop.f32.mrf.mxu0 }
 0x34a   :  { %v11015_v57 = vpop.f32.mrf.mxu1 }
 0x34b   :  { %v9055_v33 = vmax.f32 %v8991_v58, 0.0  ;;  %v8989_v63 = vadd.f32 %v8854_v10, %v8087_v48  ;;  %v8090_v0 = vadd.f32 %v11015_v57, %v16284_v52  ;;  %v8857_v7 = vpop.f32.mrf.mxu0 }
 0x34c   :  { %v7955_v56 = vpop.f32.mrf.mxu1 }
 0x34d   :  { %9120 = vst.msk [vmem:[%s16691_s3 + $0x150] sm:$0xff] %vm9077_vm8, %v9055_v33  ;;  %v9053_v40 = vmax.f32 %v8989_v63, 0.0  ;;  %v8992_v21 = vadd.f32 %v11081_v8, %v8090_v0  ;;  %v8088_v55 = vadd.f32 %v7955_v56, %v16293_v20 }
 0x34f   :  { %9118 = vst.msk [vmem:[%s16691_s3 + $0x140] sm:$0xff] %vm9077_vm8, %v9053_v40  ;;  %v9056_v49 = vmax.f32 %v8992_v21, 0.0  ;;  %v8990_v28 = vadd.f32 %v8857_v7, %v8088_v55 }
 0x351   :  { %9121 = vst.msk [vmem:[%s16691_s3 + $0x158] sm:$0xff] %vm9077_vm8, %v9056_v49  ;;  %v9054_v52 = vmax.f32 %v8990_v28, 0.0 }
 0x353   :  { %9119 = vst.msk [vmem:[%s16691_s3 + $0x148] sm:$0xff] %vm9077_vm8, %v9054_v52  ;;  %v11084_v20 = vpop.f32.mrf.mxu0 }
 0x354   :  { %v11018_v59 = vpop.f32.mrf.mxu1 }
 0x355   :  { %v8093_v47 = vadd.f32 %v11018_v59, %v16296_v26  ;;  %v8870_v24 = vpop.f32.mrf.mxu0 }
 0x356   :  { %v7968_v41 = vpop.f32.mrf.mxu1 }
 0x357   :  { %v8995_v42 = vadd.f32 %v11084_v20, %v8093_v47  ;;  %v8091_v1 = vadd.f32 %v7968_v41, %v16299_v12  ;;  %v11085_v2 = vpop.f32.mrf.mxu0 }
 0x358   :  { %v11019_v34 = vpop.f32.mrf.mxu1 }
 0x359   :  { %v9059_v18 = vmax.f32 %v8995_v42, 0.0  ;;  %v8993_v14 = vadd.f32 %v8870_v24, %v8091_v1  ;;  %v8094_v38 = vadd.f32 %v11019_v34, %v16302_v43  ;;  %v8873_v17 = vpop.f32.mrf.mxu0 }
 0x35a   :  { %v7971_v19 = vpop.f32.mrf.mxu1 }
 0x35b   :  { %9124 = vst.msk [vmem:[%s16691_s3 + $0x170] sm:$0xff] %vm9077_vm8, %v9059_v18  ;;  %v9057_v6 = vmax.f32 %v8993_v14, 0.0  ;;  %v8996_v39 = vadd.f32 %v11085_v2, %v8094_v38  ;;  %v8092_v26 = vadd.f32 %v7971_v19, %v16305_v5 }
 0x35d   :  { %9122 = vst.msk [vmem:[%s16691_s3 + $0x160] sm:$0xff] %vm9077_vm8, %v9057_v6  ;;  %v9060_v12 = vmax.f32 %v8996_v39, 0.0  ;;  %v8994_v61 = vadd.f32 %v8873_v17, %v8092_v26 }
 0x35f   :  { %9125 = vst.msk [vmem:[%s16691_s3 + $0x178] sm:$0xff] %vm9077_vm8, %v9060_v12  ;;  %v9058_v43 = vmax.f32 %v8994_v61, 0.0 }
 0x361   :  { %9123 = vst.msk [vmem:[%s16691_s3 + $0x168] sm:$0xff] %vm9077_vm8, %v9058_v43  ;;  %v11088_v5 = vpop.f32.mrf.mxu0 }
 0x362   :  { %v11022_v9 = vpop.f32.mrf.mxu1 }
 0x363   :  { %v8097_v62 = vadd.f32 %v11022_v9, %v16308_v22  ;;  %v8886_v27 = vpop.f32.mrf.mxu0 }
 0x364   :  { %v7984_v15 = vpop.f32.mrf.mxu1 }
 0x365   :  { %v8999_v45 = vadd.f32 %v11088_v5, %v8097_v62  ;;  %v8095_v3 = vadd.f32 %v7984_v15, %v16311_v31  ;;  %v11089_v54 = vpop.f32.mrf.mxu0 }
 0x366   :  { %v11023_v16 = vpop.f32.mrf.mxu1 }
 0x367   :  { %v9063_v44 = vmax.f32 %v8999_v45, 0.0  ;;  %v8997_v60 = vadd.f32 %v8886_v27, %v8095_v3  ;;  %v8098_v10 = vadd.f32 %v11023_v16, %v16324_v37  ;;  %v8889_v57 = vpop.f32.mrf.mxu0 }
 0x368   :  { %v7987_v13 = vpop.f32.mrf.mxu1 }
 0x369   :  { %9128 = vst.msk [vmem:[%s16691_s3 + $0x190] sm:$0xff] %vm9077_vm8, %v9063_v44  ;;  %v9061_v58 = vmax.f32 %v8997_v60, 0.0  ;;  %v9000_v48 = vadd.f32 %v11089_v54, %v8098_v10  ;;  %v8096_v22 = vadd.f32 %v7987_v13, %v16331_v50 }
 0x36b   :  { %9126 = vst.msk [vmem:[%s16691_s3 + $0x180] sm:$0xff] %vm9077_vm8, %v9061_v58  ;;  %v9064_v31 = vmax.f32 %v9000_v48, 0.0  ;;  %v8998_v8 = vadd.f32 %v8889_v57, %v8096_v22 }
 0x36d   :  { %9129 = vst.msk [vmem:[%s16691_s3 + $0x198] sm:$0xff] %vm9077_vm8, %v9064_v31  ;;  %v9062_v37 = vmax.f32 %v8998_v8, 0.0 }
 0x36f   :  { %9127 = vst.msk [vmem:[%s16691_s3 + $0x188] sm:$0xff] %vm9077_vm8, %v9062_v37  ;;  %v11092_v50 = vpop.f32.mrf.mxu0 }
 0x370   :  { %v11026_v33 = vpop.f32.mrf.mxu1 }
 0x371   :  { %v8101_v63 = vadd.f32 %v11026_v33, %v16334_v25  ;;  %v8902_v0 = vpop.f32.mrf.mxu0 }
 0x372   :  { %v8000_v56 = vpop.f32.mrf.mxu1 }
 0x373   :  { %v9003_v40 = vadd.f32 %v11092_v50, %v8101_v63  ;;  %v8099_v21 = vadd.f32 %v8000_v56, %v16336_v11  ;;  %v11093_v7 = vpop.f32.mrf.mxu0 }
 0x374   :  { %v11027_v55 = vpop.f32.mrf.mxu1 }
 0x375   :  { %v9067_v49 = vmax.f32 %v9003_v40, 0.0  ;;  %v9001_v28 = vadd.f32 %v8902_v0, %v8099_v21  ;;  %v8102_v52 = vadd.f32 %v11027_v55, %v16338_v51  ;;  %v8905_v24 = vpop.f32.mrf.mxu0 }
 0x376   :  { %v8003_v20 = vpop.f32.mrf.mxu1 }
 0x377   :  { %9132 = vst.msk [vmem:[%s16691_s3 + $0x1b0] sm:$0xff] %vm9077_vm8, %v9067_v49  ;;  %v9065_v59 = vmax.f32 %v9001_v28, 0.0  ;;  %v9004_v47 = vadd.f32 %v11093_v7, %v8102_v52  ;;  %v8100_v25 = vadd.f32 %v8003_v20, %v16340_v46 }
 0x379   :  { %9130 = vst.msk [vmem:[%s16691_s3 + $0x1a0] sm:$0xff] %vm9077_vm8, %v9065_v59  ;;  %v9068_v11 = vmax.f32 %v9004_v47, 0.0  ;;  %v9002_v41 = vadd.f32 %v8905_v24, %v8100_v25 }
 0x37b   :  { %9133 = vst.msk [vmem:[%s16691_s3 + $0x1b8] sm:$0xff] %vm9077_vm8, %v9068_v11  ;;  %v9066_v51 = vmax.f32 %v9002_v41, 0.0 }
 0x37d   :  { %9131 = vst.msk [vmem:[%s16691_s3 + $0x1a8] sm:$0xff] %vm9077_vm8, %v9066_v51  ;;  %v11096_v46 = vpop.f32.mrf.mxu0 }
 0x37e   :  { %v11030_v42 = vpop.f32.mrf.mxu1 }
 0x37f   :  { %v8105_v1 = vadd.f32 %v11030_v42, %v16342_v36  ;;  %v8918_v34 = vpop.f32.mrf.mxu0 }
 0x380   :  { %v8016_v2 = vpop.f32.mrf.mxu1 }
 0x381   :  { %v9007_v18 = vadd.f32 %v11096_v46, %v8105_v1  ;;  %v8103_v14 = vadd.f32 %v8016_v2, %v16344_v53  ;;  %v11097_v19 = vpop.f32.mrf.mxu0 }
 0x382   :  { %v11031_v38 = vpop.f32.mrf.mxu1 }
 0x383   :  { %v9071_v6 = vmax.f32 %v9007_v18, 0.0  ;;  %v9005_v39 = vadd.f32 %v8918_v34, %v8103_v14  ;;  %v8106_v26 = vadd.f32 %v11031_v38, %v16351_v29  ;;  %v8921_v43 = vpop.f32.mrf.mxu0 }
 0x384   :  { %v8019_v17 = vpop.f32.mrf.mxu1 }
 0x385   :  { %9136 = vst.msk [vmem:[%s16691_s3 + $0x1d0] sm:$0xff] %vm9077_vm8, %v9071_v6  ;;  %v9069_v12 = vmax.f32 %v9005_v39, 0.0  ;;  %v9008_v61 = vadd.f32 %v11097_v19, %v8106_v26  ;;  %v8104_v36 = vadd.f32 %v8019_v17, %v16354_v23 }
 0x387   :  { %9134 = vst.msk [vmem:[%s16691_s3 + $0x1c0] sm:$0xff] %vm9077_vm8, %v9069_v12  ;;  %v9072_v53 = vmax.f32 %v9008_v61, 0.0  ;;  %v9006_v5 = vadd.f32 %v8921_v43, %v8104_v36 }
 0x389   :  { %9137 = vst.msk [vmem:[%s16691_s3 + $0x1d8] sm:$0xff] %vm9077_vm8, %v9072_v53  ;;  %v9070_v29 = vmax.f32 %v9006_v5, 0.0 }
 0x38b   :  { %9135 = vst.msk [vmem:[%s16691_s3 + $0x1c8] sm:$0xff] %vm9077_vm8, %v9070_v29  ;;  %v11100_v23 = vpop.f32.mrf.mxu0 }
 0x38c   :  { %v11034_v9 = vpop.f32.mrf.mxu1 }
 0x38d   :  { %v8109_v62 = vadd.f32 %v11034_v9, %v16356_v30  ;;  %v8934_v27 = vpop.f32.mrf.mxu0 }
 0x38e   :  { %v8032_v15 = vpop.f32.mrf.mxu1 }
 0x38f   :  { %v9011_v45 = vadd.f32 %v11100_v23, %v8109_v62  ;;  %v8107_v3 = vadd.f32 %v8032_v15, %v16358_v32  ;;  %v11101_v54 = vpop.f32.mrf.mxu0 }
 0x390   :  { %v11035_v16 = vpop.f32.mrf.mxu1 }
 0x391   :  { %v9075_v44 = vmax.f32 %v9011_v45, 0.0  ;;  %v9009_v60 = vadd.f32 %v8934_v27, %v8107_v3  ;;  %v8110_v10 = vadd.f32 %v11035_v16, %v16360_v35  ;;  %v8937_v22 = vpop.f32.mrf.mxu0 }
 0x392   :  { %v8035_v13 = vpop.f32.mrf.mxu1 }
 0x393   :  { %9140 = vst.msk [vmem:[%s16691_s3 + $0x1f0] sm:$0xff] %vm9077_vm8, %v9075_v44  ;;  %v9073_v58 = vmax.f32 %v9009_v60, 0.0  ;;  %v9012_v48 = vadd.f32 %v11101_v54, %v8110_v10  ;;  %v8108_v30 = vadd.f32 %v8035_v13, %v16363_v4 }
 0x395   :  { %9138 = vst.msk [vmem:[%s16691_s3 + $0x1e0] sm:$0xff] %vm9077_vm8, %v9073_v58  ;;  %v9076_v32 = vmax.f32 %v9012_v48, 0.0  ;;  %v9010_v57 = vadd.f32 %v8937_v22, %v8108_v30 }
 0x397   :  { %9141 = vst.msk [vmem:[%s16691_s3 + $0x1f8] sm:$0xff] %vm9077_vm8, %v9076_v32  ;;  %v9074_v35 = vmax.f32 %v9010_v57, 0.0 }
 0x399   :  { %9139 = vst.msk [vmem:[%s16691_s3 + $0x1e8] sm:$0xff] %vm9077_vm8, %v9074_v35 }

</bundles_post_ra>
